<compile_context>
chip_gen: v7x
topology: tpu7x:2x2x1
jax: 0.10.0
libtpu: 0.0.40
codegen_flags: <defaults>
</compile_context>

<pallas_src>
import functools

import jax
import jax.numpy as jnp
from jax.experimental import pallas as pl
from jax.experimental.pallas import tpu as pltpu


def _round_up(x, m):
    return ((x + m - 1) // m) * m


# ----------------------------------------------------------------------------
# Pallas kernel: batched tiled matmul with fused bias add (+ optional tanh)
# A: (G, M, K) bf16, B: (G, K, N) bf16, bias broadcast over rows or columns.
# ----------------------------------------------------------------------------
def _bmm_kernel(a_ref, b_ref, bias_ref, o_ref, acc_ref, *, activation):
    k = pl.program_id(3)

    @pl.when(k == 0)
    def _():
        acc_ref[...] = jnp.zeros_like(acc_ref)

    acc_ref[...] += jnp.dot(a_ref[...], b_ref[...],
                            preferred_element_type=jnp.float32)

    @pl.when(k == pl.num_programs(3) - 1)
    def _():
        out = acc_ref[...] + bias_ref[...]        # (1,tn) or (tm,1) broadcast
        if activation == "tanh":
            out = jnp.tanh(out)
        o_ref[...] = out.astype(o_ref.dtype)


def pallas_bmm_bias(a, b, bias, *, bias_axis="col", activation=None):
    """Batched matmul with fused bias (+ optional tanh epilogue).

    a: (G, M, K), b: (G, K, N); bias: (N,) if bias_axis=="col" else (M,).
    Operands are cast to bf16 (MXU-native); accumulation is f32 in VMEM.
    Returns (G, M, N) float32.
    """
    G, M, K = a.shape
    G2, K2, N = b.shape
    assert G == G2 and K == K2

    # ---- tile selection (v5e/v6e/v7x safe) ----------------------------------
    Mp = _round_up(M, 8)
    tm = Mp if Mp <= 256 else 256
    Mp = _round_up(Mp, tm)

    Np = _round_up(N, 128)
    tn = 256 if (Np % 256 == 0 and Np >= 256) else 128
    Np = _round_up(Np, tn)

    tk = min(4096, _round_up(K, 128))
    Kp = _round_up(K, tk)

    a_p = jnp.pad(a.astype(jnp.bfloat16), ((0, 0), (0, Mp - M), (0, Kp - K)))
    b_p = jnp.pad(b.astype(jnp.bfloat16), ((0, 0), (0, Kp - K), (0, Np - N)))

    if bias_axis == "col":
        bias_p = jnp.pad(bias.astype(jnp.float32).reshape(1, N),
                         ((0, 0), (0, Np - N)))
        bias_spec = pl.BlockSpec((1, tn), lambda g, i, j, k: (0, j))
    else:  # per-row bias (used by the transposed small-Cout final layer)
        bias_p = jnp.pad(bias.astype(jnp.float32).reshape(M, 1),
                         ((0, Mp - M), (0, 0)))
        bias_spec = pl.BlockSpec((tm, 1), lambda g, i, j, k: (i, 0))

    grid = (G, Mp // tm, Np // tn, Kp // tk)

    flops = 2 * G * Mp * Np * Kp
    transcendentals = G * Mp * Np if activation == "tanh" else 0
    bytes_accessed = (a_p.size * 2 + b_p.size * 2 + bias_p.size * 4
                      + G * Mp * Np * 4)

    out = pl.pallas_call(
        functools.partial(_bmm_kernel, activation=activation),
        out_shape=jax.ShapeDtypeStruct((G, Mp, Np), jnp.float32),
        grid_spec=pltpu.PrefetchScalarGridSpec(
            num_scalar_prefetch=0,
            grid=grid,
            in_specs=[
                pl.BlockSpec((None, tm, tk), lambda g, i, j, k: (g, i, k)),
                pl.BlockSpec((None, tk, tn), lambda g, i, j, k: (g, k, j)),
                bias_spec,
            ],
            out_specs=pl.BlockSpec((None, tm, tn), lambda g, i, j, k: (g, i, j)),
            scratch_shapes=[pltpu.VMEM((tm, tn), jnp.float32)],
        ),
        compiler_params=pltpu.CompilerParams(
            dimension_semantics=("parallel", "parallel", "parallel",
                                 "arbitrary")),
        cost_estimate=pl.CostEstimate(flops=flops,
                                      transcendentals=transcendentals,
                                      bytes_accessed=bytes_accessed),
    )(a_p, b_p, bias_p)
    return out[:, :M, :N]


# ----------------------------------------------------------------------------
# Pallas kernel: BatchNorm2d (batch stats, biased variance) + ReLU on the
# lane-dense (M = N*H*W, C) view.  Statistics reduce over rows per channel.
# ----------------------------------------------------------------------------
def _bn_relu_kernel(x_ref, g_ref, b_ref, o_ref, *, eps):
    x = x_ref[...]                                    # (M, cb) f32
    mean = jnp.mean(x, axis=0, keepdims=True)
    xc = x - mean
    var = jnp.mean(xc * xc, axis=0, keepdims=True)    # biased (PyTorch training)
    inv = jax.lax.rsqrt(var + eps)
    y = xc * inv * g_ref[...] + b_ref[...]
    o_ref[...] = jnp.maximum(y, 0.0)


def pallas_bn_relu_mc(x_mc, gamma, beta, eps=1e-5):
    """x_mc: (M, C) f32 view of an NHWC activation; per-channel BN + ReLU."""
    M, C = x_mc.shape
    cb = 128
    assert C % cb == 0

    flops = 10 * M * C
    bytes_accessed = 2 * M * C * 4 + 2 * C * 4
    out = pl.pallas_call(
        functools.partial(_bn_relu_kernel, eps=eps),
        out_shape=jax.ShapeDtypeStruct((M, C), jnp.float32),
        grid_spec=pltpu.PrefetchScalarGridSpec(
            num_scalar_prefetch=0,
            grid=(C // cb,),
            in_specs=[
                pl.BlockSpec((M, cb), lambda i: (0, i)),
                pl.BlockSpec((1, cb), lambda i: (0, i)),
                pl.BlockSpec((1, cb), lambda i: (0, i)),
            ],
            out_specs=pl.BlockSpec((M, cb), lambda i: (0, i)),
        ),
        compiler_params=pltpu.CompilerParams(dimension_semantics=("parallel",)),
        cost_estimate=pl.CostEstimate(flops=flops, transcendentals=C,
                                      bytes_accessed=bytes_accessed),
    )(x_mc.astype(jnp.float32),
      gamma.reshape(1, C).astype(jnp.float32),
      beta.reshape(1, C).astype(jnp.float32))
    return out


# ----------------------------------------------------------------------------
# Sub-pixel (phase-decomposed) ConvTranspose2d glue.
#   o[n, co, oy, ox] = b[co] + sum_{ci,ky,kx} x[n,ci,iy,ix] * w[ci,co,ky,kx]
#   with oy = iy*s - p + ky.  For each output phase (oy%s, ox%s) only a
#   (K/s x K/s) subset of taps contributes -> 4 dense GEMMs, no zero rows.
# ----------------------------------------------------------------------------
def _phase_taps(K, s, p, phase):
    d_list, k_list = [], []
    for kk in range(K):
        if (kk - phase - p) % s == 0:
            d_list.append((kk - phase - p) // s)
            k_list.append(kk)
    return d_list, k_list


def _phase_patches_and_weights(x_nhwc, w, *, stride, padding):
    """Build per-phase im2col patches A (G, M_ph, K) and weights B (G, K, Cout)."""
    Nb, H, W, Cin = x_nhwc.shape
    _, Cout, KH, KW = w.shape
    s, p = stride, padding
    Ho = (H - 1) * s - 2 * p + KH
    Wo = (W - 1) * s - 2 * p + KW
    assert Ho % s == 0 and Wo % s == 0
    Ho_ph, Wo_ph = Ho // s, Wo // s

    phases = [(py, px) for py in range(s) for px in range(s)]
    tap_info = []
    pad_amt = 0
    for (py, px) in phases:
        dys, kys = _phase_taps(KH, s, p, py)
        dxs, kxs = _phase_taps(KW, s, p, px)
        tap_info.append((dys, kys, dxs, kxs))
        pad_amt = max(pad_amt, max(dys), max(dxs),
                      Ho_ph - min(dys) - H, Wo_ph - min(dxs) - W)
    pa = max(pad_amt, 0)

    x_pad = jnp.pad(x_nhwc, ((0, 0), (pa, pa), (pa, pa), (0, 0)))

    A_list, B_list = [], []
    for (py, px), (dys, kys, dxs, kxs) in zip(phases, tap_info):
        cols = []
        for dy in dys:
            for dx in dxs:
                cols.append(x_pad[:, pa - dy: pa - dy + Ho_ph,
                                  pa - dx: pa - dx + Wo_ph, :])
        patches = jnp.concatenate(cols, axis=-1)       # (Nb, Ho_ph, Wo_ph, T*Cin)
        A_list.append(patches.reshape(Nb * Ho_ph * Wo_ph, -1))
        # B[(dy, dx, ci), co] = w[ci, co, ky(dy), kx(dx)]
        w_ph = w[:, :, jnp.array(kys), :][:, :, :, jnp.array(kxs)]
        B_list.append(w_ph.transpose(2, 3, 0, 1).reshape(-1, Cout))

    A = jnp.stack(A_list, axis=0)                      # (G, M_ph, T*T*Cin)
    B = jnp.stack(B_list, axis=0)                      # (G, T*T*Cin, Cout)
    return A, B, phases, (Ho, Wo, Ho_ph, Wo_ph)


# ----------------------------------------------------------------------------
# Layer builders
# ----------------------------------------------------------------------------
def convt_bn_relu_first(z, w, b, gamma, beta):
    """ConvT(k4, s1, p0) on a 1x1 spatial input + BN + ReLU -> NHWC (Nb,4,4,Cout)."""
    Nb, Cin = z.shape[0], z.shape[1]
    _, Cout, KH, KW = w.shape
    a = z.reshape(Nb, Cin).astype(jnp.float32)[None]                 # (1, Nb, Cin)
    bmat = w.transpose(0, 2, 3, 1).reshape(Cin, KH * KW * Cout)[None]
    bias_full = jnp.tile(b, KH * KW)                                 # (oy,ox,co) order
    y = pallas_bmm_bias(a, bmat, bias_full, bias_axis="col")         # (1, Nb, 16*Cout)
    y = pallas_bn_relu_mc(y.reshape(Nb * KH * KW, Cout), gamma, beta)
    return y.reshape(Nb, KH, KW, Cout)


def convt_bn_relu_layer(x_nhwc, w, b, gamma, beta, *, stride, padding):
    """stride-2 ConvT + BN + ReLU; NHWC in, NHWC out."""
    Nb = x_nhwc.shape[0]
    Cout = w.shape[1]
    A, Bm, phases, (Ho, Wo, Ho_ph, Wo_ph) = _phase_patches_and_weights(
        x_nhwc, w, stride=stride, padding=padding)
    G, M_ph, _ = A.shape
    y = pallas_bmm_bias(A, Bm, b, bias_axis="col")                   # (G, M_ph, Cout)
    y = pallas_bn_relu_mc(y.reshape(G * M_ph, Cout), gamma, beta)
    y = y.reshape(G, Nb, Ho_ph, Wo_ph, Cout)
    out = jnp.zeros((Nb, Ho, Wo, Cout), jnp.float32)
    for gi, (py, px) in enumerate(phases):
        out = out.at[:, py::stride, px::stride, :].set(y[gi])
    return out


def convt_tanh_final(x_nhwc, w, b, *, stride, padding):
    """Final stride-2 ConvT + tanh.  Cout is tiny, so run the GEMM transposed
    (Cout x K) @ (K x M) and put the long spatial axis on the lane axis.
    Returns NCHW."""
    Nb = x_nhwc.shape[0]
    Cout = w.shape[1]
    A, Bm, phases, (Ho, Wo, Ho_ph, Wo_ph) = _phase_patches_and_weights(
        x_nhwc, w, stride=stride, padding=padding)
    G = A.shape[0]
    At = jnp.swapaxes(A, 1, 2)                                       # (G, K, M_ph)
    Bt = jnp.swapaxes(Bm, 1, 2)                                      # (G, Cout, K)
    y = pallas_bmm_bias(Bt, At, b, bias_axis="row", activation="tanh")  # (G, Cout, M_ph)
    y = y.reshape(G, Cout, Nb, Ho_ph, Wo_ph)
    out = jnp.zeros((Nb, Cout, Ho, Wo), jnp.float32)
    for gi, (py, px) in enumerate(phases):
        out = out.at[:, :, py::stride, px::stride].set(
            jnp.transpose(y[gi], (1, 0, 2, 3)))
    return out


# ----------------------------------------------------------------------------
# Generator_28 forward
# ----------------------------------------------------------------------------
def init_params(key, num_input, num_output):
    ks = jax.random.split(key, 12)
    f = 0.05
    p = {
        "w1": jax.random.normal(ks[0], (num_input, 1024, 4, 4), jnp.float32) * f,
        "b1": jax.random.normal(ks[1], (1024,), jnp.float32) * f,
        "g1": 1.0 + jax.random.normal(ks[2], (1024,), jnp.float32) * f,
        "be1": jax.random.normal(ks[3], (1024,), jnp.float32) * f,
        "w2": jax.random.normal(ks[4], (1024, 512, 4, 4), jnp.float32) * f,
        "b2": jax.random.normal(ks[5], (512,), jnp.float32) * f,
        "g2": 1.0 + jax.random.normal(ks[6], (512,), jnp.float32) * f,
        "be2": jax.random.normal(ks[7], (512,), jnp.float32) * f,
        "w3": jax.random.normal(ks[8], (512, 256, 4, 4), jnp.float32) * f,
        "b3": jax.random.normal(ks[9], (256,), jnp.float32) * f,
        "g3": 1.0 + jax.random.normal(ks[10], (256,), jnp.float32) * f,
        "be3": jax.random.normal(ks[11], (256,), jnp.float32) * f,
        "w4": jax.random.normal(jax.random.fold_in(key, 99),
                                (256, num_output, 4, 4), jnp.float32) * f,
        "b4": jax.random.normal(jax.random.fold_in(key, 100),
                                (num_output,), jnp.float32) * f,
    }
    return p


def generator_28_forward(params, z):
    """z: (N, num_input, 1, 1) -> (N, num_output, 28, 28) (NCHW, tanh range)."""
    # ConvT(num_input -> 1024, k4, s1, p0) + BN + ReLU   : 1x1  -> 4x4
    x = convt_bn_relu_first(z, params["w1"], params["b1"],
                            params["g1"], params["be1"])
    # ConvT(1024 -> 512, k4, s2, p1) + BN + ReLU         : 4x4  -> 8x8
    x = convt_bn_relu_layer(x, params["w2"], params["b2"],
                            params["g2"], params["be2"], stride=2, padding=1)
    # ConvT(512 -> 256, k4, s2, p2) + BN + ReLU          : 8x8  -> 14x14
    x = convt_bn_relu_layer(x, params["w3"], params["b3"],
                            params["g3"], params["be3"], stride=2, padding=2)
    # ConvT(256 -> num_output, k4, s2, p1) + Tanh        : 14x14 -> 28x28
    x = convt_tanh_final(x, params["w4"], params["b4"], stride=2, padding=1)
    return x


if __name__ == "__main__":
    num_input, num_output, batch = 32, 1, 2
    key = jax.random.PRNGKey(0)
    pkey, zkey = jax.random.split(key)
    params = init_params(pkey, num_input, num_output)
    z = jax.random.normal(zkey, (batch, num_input, 1, 1), jnp.float32)

    fwd = jax.jit(generator_28_forward)
    out = jax.block_until_ready(fwd(params, z))

    assert out.shape == (batch, num_output, 28, 28), out.shape
    assert bool(jnp.all(jnp.isfinite(out)))
    assert bool(jnp.all(jnp.abs(out) <= 1.0))   # tanh range
    print("KERNEL_OK")
</pallas_src>

<mosaic_0001>
module attributes {stable_mosaic.version = 11 : i64} {
  func.func @_bmm_kernel(%arg0: i32, %arg1: i32, %arg2: i32, %arg3: i32, %arg4: memref<1x8x128xbf16, #tpu.memory_space<vmem>>, %arg5: memref<1x128x256xbf16, #tpu.memory_space<vmem>>, %arg6: memref<1x256xf32, #tpu.memory_space<vmem>>, %arg7: memref<1x8x256xf32, #tpu.memory_space<vmem>>, %arg8: memref<8x256xf32, #tpu.memory_space<vmem>>) attributes {dimension_semantics = [#tpu.dimension_semantics<parallel>, #tpu.dimension_semantics<parallel>, #tpu.dimension_semantics<parallel>, #tpu.dimension_semantics<arbitrary>], iteration_bounds = array<i64: 1, 1, 64, 1>, scalar_prefetch = 0 : i64, scratch_operands = 1 : i64, tpu.core_type = #tpu.core_type<tc>, window_params = [{transform_indices = @transform_0, window_bounds = array<i64: 1, 8, 128>}, {transform_indices = @transform_1, window_bounds = array<i64: 1, 128, 256>}, {transform_indices = @transform_2, window_bounds = array<i64: 1, 256>}, {transform_indices = @transform_3, window_bounds = array<i64: 1, 8, 256>}]} {
    %c0_i32 = arith.constant 0 : i32
    %0 = arith.cmpi eq, %arg3, %c0_i32 : i32
    %1 = arith.extui %0 : i1 to i32
    %c0_i32_0 = arith.constant 0 : i32
    %2 = arith.cmpi ne, %1, %c0_i32_0 : i32
    scf.if %2 {
      %cst_12 = arith.constant 0.000000e+00 : f32
      %14 = vector.broadcast %cst_12 : f32 to vector<8x256xf32>
      %c0_13 = arith.constant 0 : index
      %c0_14 = arith.constant 0 : index
      %15 = vector.load %arg8[%c0_13, %c0_14] : memref<8x256xf32, #tpu.memory_space<vmem>>, vector<8x256xf32>
      tpu.vector_store %arg8[%c0_13, %c0_14], %14 {strides = array<i32>} : memref<8x256xf32, #tpu.memory_space<vmem>>, vector<8x256xf32>,
    } else {
    }
    %c0 = arith.constant 0 : index
    %c0_1 = arith.constant 0 : index
    %3 = vector.load %arg8[%c0, %c0_1] : memref<8x256xf32, #tpu.memory_space<vmem>>, vector<8x256xf32>
    %c0_2 = arith.constant 0 : index
    %c0_3 = arith.constant 0 : index
    %c0_4 = arith.constant 0 : index
    %4 = vector.load %arg4[%c0_2, %c0_3, %c0_4] : memref<1x8x128xbf16, #tpu.memory_space<vmem>>, vector<1x8x128xbf16>
    %5 = vector.shape_cast %4 : vector<1x8x128xbf16> to vector<8x128xbf16>
    %c0_5 = arith.constant 0 : index
    %c0_6 = arith.constant 0 : index
    %c0_7 = arith.constant 0 : index
    %6 = vector.load %arg5[%c0_5, %c0_6, %c0_7] : memref<1x128x256xbf16, #tpu.memory_space<vmem>>, vector<1x128x256xbf16>
    %7 = vector.shape_cast %6 : vector<1x128x256xbf16> to vector<128x256xbf16>
    %cst = arith.constant dense<0.000000e+00> : vector<8x256xf32>
    %8 = tpu.matmul %5, %7, %cst {dimension_numbers = #tpu.dot_dimension_numbers<[1], [0], [0], [1], [0, 0, 1, 1], [], []>} : vector<8x128xbf16>, vector<128x256xbf16>, vector<8x256xf32> -> vector<8x256xf32>
    %9 = arith.addf %3, %8 : vector<8x256xf32>
    %c0_8 = arith.constant 0 : index
    %c0_9 = arith.constant 0 : index
    %10 = vector.load %arg8[%c0_8, %c0_9] : memref<8x256xf32, #tpu.memory_space<vmem>>, vector<8x256xf32>
    tpu.vector_store %arg8[%c0_8, %c0_9], %9 {strides = array<i32>} : memref<8x256xf32, #tpu.memory_space<vmem>>, vector<8x256xf32>,
    %c0_i32_10 = arith.constant 0 : i32
    %11 = arith.cmpi eq, %arg3, %c0_i32_10 : i32
    %12 = arith.extui %11 : i1 to i32
    %c0_i32_11 = arith.constant 0 : i32
    %13 = arith.cmpi ne, %12, %c0_i32_11 : i32
    scf.if %13 {
      %c0_12 = arith.constant 0 : index
      %c0_13 = arith.constant 0 : index
      %14 = vector.load %arg8[%c0_12, %c0_13] : memref<8x256xf32, #tpu.memory_space<vmem>>, vector<8x256xf32>
      %c0_14 = arith.constant 0 : index
      %c0_15 = arith.constant 0 : index
      %15 = vector.load %arg6[%c0_14, %c0_15] : memref<1x256xf32, #tpu.memory_space<vmem>>, vector<1x256xf32>
      %16 = vector.broadcast %15 : vector<1x256xf32> to vector<8x256xf32>
      %17 = arith.addf %14, %16 : vector<8x256xf32>
      %c0_16 = arith.constant 0 : index
      %c0_17 = arith.constant 0 : index
      %c0_18 = arith.constant 0 : index
      %18 = vector.load %arg7[%c0_16, %c0_17, %c0_18] : memref<1x8x256xf32, #tpu.memory_space<vmem>>, vector<1x8x256xf32>
      %19 = vector.shape_cast %18 : vector<1x8x256xf32> to vector<8x256xf32>
      %20 = vector.shape_cast %17 : vector<8x256xf32> to vector<1x8x256xf32>
      tpu.vector_store %arg7[%c0_16, %c0_17, %c0_18], %20 {strides = array<i32>} : memref<1x8x256xf32, #tpu.memory_space<vmem>>, vector<1x8x256xf32>,
    } else {
    }
    return
  }
  func.func @transform_0(%arg0: i32, %arg1: i32, %arg2: i32, %arg3: i32) -> (i32, i32, i32) {
    %c0_i32 = arith.constant 0 : i32
    return %arg0, %arg1, %arg3 : i32, i32, i32
  }
  func.func @transform_1(%arg0: i32, %arg1: i32, %arg2: i32, %arg3: i32) -> (i32, i32, i32) {
    %c0_i32 = arith.constant 0 : i32
    return %arg0, %arg3, %arg2 : i32, i32, i32
  }
  func.func @transform_2(%arg0: i32, %arg1: i32, %arg2: i32, %arg3: i32) -> (i32, i32) {
    %c0_i32 = arith.constant 0 : i32
    %c0_i32_0 = arith.constant 0 : i32
    return %c0_i32, %arg2 : i32, i32
  }
  func.func @transform_3(%arg0: i32, %arg1: i32, %arg2: i32, %arg3: i32) -> (i32, i32, i32) {
    %c0_i32 = arith.constant 0 : i32
    return %arg0, %arg1, %arg2 : i32, i32, i32
  }
}

module attributes {stable_mosaic.version = 11 : i64} {
  func.func @_bn_relu_kernel(%arg0: i32, %arg1: memref<32x128xf32, #tpu.memory_space<vmem>>, %arg2: memref<1x128xf32, #tpu.memory_space<vmem>>, %arg3: memref<1x128xf32, #tpu.memory_space<vmem>>, %arg4: memref<32x128xf32, #tpu.memory_space<vmem>>) attributes {dimension_semantics = [#tpu.dimension_semantics<parallel>], iteration_bounds = array<i64: 8>, scalar_prefetch = 0 : i64, scratch_operands = 0 : i64, tpu.core_type = #tpu.core_type<tc>, window_params = [{transform_indices = @transform_0, window_bounds = array<i64: 32, 128>}, {transform_indices = @transform_1, window_bounds = array<i64: 1, 128>}, {transform_indices = @transform_2, window_bounds = array<i64: 1, 128>}, {transform_indices = @transform_3, window_bounds = array<i64: 32, 128>}]} {
    %c0 = arith.constant 0 : index
    %c0_0 = arith.constant 0 : index
    %0 = vector.load %arg1[%c0, %c0_0] : memref<32x128xf32, #tpu.memory_space<vmem>>, vector<32x128xf32>
    %cst = arith.constant dense<0.000000e+00> : vector<128xf32>
    %1 = vector.multi_reduction <add>, %0, %cst [0] : vector<32x128xf32> to vector<128xf32>
    %2 = vector.shape_cast %1 : vector<128xf32> to vector<1x128xf32>
    %cst_1 = arith.constant 3.200000e+01 : f32
    %3 = vector.broadcast %cst_1 : f32 to vector<1x128xf32>
    %4 = arith.divf %2, %3 : vector<1x128xf32>
    %5 = vector.broadcast %4 : vector<1x128xf32> to vector<32x128xf32>
    %6 = arith.subf %0, %5 : vector<32x128xf32>
    %7 = arith.mulf %6, %6 : vector<32x128xf32>
    %cst_2 = arith.constant dense<0.000000e+00> : vector<128xf32>
    %8 = vector.multi_reduction <add>, %7, %cst_2 [0] : vector<32x128xf32> to vector<128xf32>
    %9 = vector.shape_cast %8 : vector<128xf32> to vector<1x128xf32>
    %cst_3 = arith.constant 3.200000e+01 : f32
    %10 = vector.broadcast %cst_3 : f32 to vector<1x128xf32>
    %11 = arith.divf %9, %10 : vector<1x128xf32>
    %cst_4 = arith.constant 9.99999974E-6 : f32
    %12 = vector.broadcast %cst_4 : f32 to vector<1x128xf32>
    %13 = arith.addf %11, %12 : vector<1x128xf32>
    %14 = math.rsqrt %13 : vector<1x128xf32>
    %15 = vector.broadcast %14 : vector<1x128xf32> to vector<32x128xf32>
    %16 = arith.mulf %6, %15 : vector<32x128xf32>
    %c0_5 = arith.constant 0 : index
    %c0_6 = arith.constant 0 : index
    %17 = vector.load %arg2[%c0_5, %c0_6] : memref<1x128xf32, #tpu.memory_space<vmem>>, vector<1x128xf32>
    %18 = vector.broadcast %17 : vector<1x128xf32> to vector<32x128xf32>
    %19 = arith.mulf %16, %18 : vector<32x128xf32>
    %c0_7 = arith.constant 0 : index
    %c0_8 = arith.constant 0 : index
    %20 = vector.load %arg3[%c0_7, %c0_8] : memref<1x128xf32, #tpu.memory_space<vmem>>, vector<1x128xf32>
    %21 = vector.broadcast %20 : vector<1x128xf32> to vector<32x128xf32>
    %22 = arith.addf %19, %21 : vector<32x128xf32>
    %cst_9 = arith.constant 0.000000e+00 : f32
    %23 = vector.broadcast %cst_9 : f32 to vector<32x128xf32>
    %24 = arith.maximumf %22, %23 : vector<32x128xf32>
    %c0_10 = arith.constant 0 : index
    %c0_11 = arith.constant 0 : index
    %25 = vector.load %arg4[%c0_10, %c0_11] : memref<32x128xf32, #tpu.memory_space<vmem>>, vector<32x128xf32>
    tpu.vector_store %arg4[%c0_10, %c0_11], %24 {strides = array<i32>} : memref<32x128xf32, #tpu.memory_space<vmem>>, vector<32x128xf32>,
    return
  }
  func.func @transform_0(%arg0: i32) -> (i32, i32) {
    %c0_i32 = arith.constant 0 : i32
    %c0_i32_0 = arith.constant 0 : i32
    return %c0_i32, %arg0 : i32, i32
  }
  func.func @transform_1(%arg0: i32) -> (i32, i32) {
    %c0_i32 = arith.constant 0 : i32
    %c0_i32_0 = arith.constant 0 : i32
    return %c0_i32, %arg0 : i32, i32
  }
  func.func @transform_2(%arg0: i32) -> (i32, i32) {
    %c0_i32 = arith.constant 0 : i32
    %c0_i32_0 = arith.constant 0 : i32
    return %c0_i32, %arg0 : i32, i32
  }
  func.func @transform_3(%arg0: i32) -> (i32, i32) {
    %c0_i32 = arith.constant 0 : i32
    %c0_i32_0 = arith.constant 0 : i32
    return %c0_i32, %arg0 : i32, i32
  }
}

module attributes {stable_mosaic.version = 11 : i64} {
  func.func @_bmm_kernel(%arg0: i32, %arg1: i32, %arg2: i32, %arg3: i32, %arg4: memref<1x32x4096xbf16, #tpu.memory_space<vmem>>, %arg5: memref<1x4096x256xbf16, #tpu.memory_space<vmem>>, %arg6: memref<1x256xf32, #tpu.memory_space<vmem>>, %arg7: memref<1x32x256xf32, #tpu.memory_space<vmem>>, %arg8: memref<32x256xf32, #tpu.memory_space<vmem>>) attributes {dimension_semantics = [#tpu.dimension_semantics<parallel>, #tpu.dimension_semantics<parallel>, #tpu.dimension_semantics<parallel>, #tpu.dimension_semantics<arbitrary>], iteration_bounds = array<i64: 4, 1, 2, 1>, scalar_prefetch = 0 : i64, scratch_operands = 1 : i64, tpu.core_type = #tpu.core_type<tc>, window_params = [{transform_indices = @transform_0, window_bounds = array<i64: 1, 32, 4096>}, {transform_indices = @transform_1, window_bounds = array<i64: 1, 4096, 256>}, {transform_indices = @transform_2, window_bounds = array<i64: 1, 256>}, {transform_indices = @transform_3, window_bounds = array<i64: 1, 32, 256>}]} {
    %c0_i32 = arith.constant 0 : i32
    %0 = arith.cmpi eq, %arg3, %c0_i32 : i32
    %1 = arith.extui %0 : i1 to i32
    %c0_i32_0 = arith.constant 0 : i32
    %2 = arith.cmpi ne, %1, %c0_i32_0 : i32
    scf.if %2 {
      %cst_12 = arith.constant 0.000000e+00 : f32
      %14 = vector.broadcast %cst_12 : f32 to vector<32x256xf32>
      %c0_13 = arith.constant 0 : index
      %c0_14 = arith.constant 0 : index
      %15 = vector.load %arg8[%c0_13, %c0_14] : memref<32x256xf32, #tpu.memory_space<vmem>>, vector<32x256xf32>
      tpu.vector_store %arg8[%c0_13, %c0_14], %14 {strides = array<i32>} : memref<32x256xf32, #tpu.memory_space<vmem>>, vector<32x256xf32>,
    } else {
    }
    %c0 = arith.constant 0 : index
    %c0_1 = arith.constant 0 : index
    %3 = vector.load %arg8[%c0, %c0_1] : memref<32x256xf32, #tpu.memory_space<vmem>>, vector<32x256xf32>
    %c0_2 = arith.constant 0 : index
    %c0_3 = arith.constant 0 : index
    %c0_4 = arith.constant 0 : index
    %4 = vector.load %arg4[%c0_2, %c0_3, %c0_4] : memref<1x32x4096xbf16, #tpu.memory_space<vmem>>, vector<1x32x4096xbf16>
    %5 = vector.shape_cast %4 : vector<1x32x4096xbf16> to vector<32x4096xbf16>
    %c0_5 = arith.constant 0 : index
    %c0_6 = arith.constant 0 : index
    %c0_7 = arith.constant 0 : index
    %6 = vector.load %arg5[%c0_5, %c0_6, %c0_7] : memref<1x4096x256xbf16, #tpu.memory_space<vmem>>, vector<1x4096x256xbf16>
    %7 = vector.shape_cast %6 : vector<1x4096x256xbf16> to vector<4096x256xbf16>
    %cst = arith.constant dense<0.000000e+00> : vector<32x256xf32>
    %8 = tpu.matmul %5, %7, %cst {dimension_numbers = #tpu.dot_dimension_numbers<[1], [0], [0], [1], [0, 0, 1, 1], [], []>} : vector<32x4096xbf16>, vector<4096x256xbf16>, vector<32x256xf32> -> vector<32x256xf32>
    %9 = arith.addf %3, %8 : vector<32x256xf32>
    %c0_8 = arith.constant 0 : index
    %c0_9 = arith.constant 0 : index
    %10 = vector.load %arg8[%c0_8, %c0_9] : memref<32x256xf32, #tpu.memory_space<vmem>>, vector<32x256xf32>
    tpu.vector_store %arg8[%c0_8, %c0_9], %9 {strides = array<i32>} : memref<32x256xf32, #tpu.memory_space<vmem>>, vector<32x256xf32>,
    %c0_i32_10 = arith.constant 0 : i32
    %11 = arith.cmpi eq, %arg3, %c0_i32_10 : i32
    %12 = arith.extui %11 : i1 to i32
    %c0_i32_11 = arith.constant 0 : i32
    %13 = arith.cmpi ne, %12, %c0_i32_11 : i32
    scf.if %13 {
      %c0_12 = arith.constant 0 : index
      %c0_13 = arith.constant 0 : index
      %14 = vector.load %arg8[%c0_12, %c0_13] : memref<32x256xf32, #tpu.memory_space<vmem>>, vector<32x256xf32>
      %c0_14 = arith.constant 0 : index
      %c0_15 = arith.constant 0 : index
      %15 = vector.load %arg6[%c0_14, %c0_15] : memref<1x256xf32, #tpu.memory_space<vmem>>, vector<1x256xf32>
      %16 = vector.broadcast %15 : vector<1x256xf32> to vector<32x256xf32>
      %17 = arith.addf %14, %16 : vector<32x256xf32>
      %c0_16 = arith.constant 0 : index
      %c0_17 = arith.constant 0 : index
      %c0_18 = arith.constant 0 : index
      %18 = vector.load %arg7[%c0_16, %c0_17, %c0_18] : memref<1x32x256xf32, #tpu.memory_space<vmem>>, vector<1x32x256xf32>
      %19 = vector.shape_cast %18 : vector<1x32x256xf32> to vector<32x256xf32>
      %20 = vector.shape_cast %17 : vector<32x256xf32> to vector<1x32x256xf32>
      tpu.vector_store %arg7[%c0_16, %c0_17, %c0_18], %20 {strides = array<i32>} : memref<1x32x256xf32, #tpu.memory_space<vmem>>, vector<1x32x256xf32>,
    } else {
    }
    return
  }
  func.func @transform_0(%arg0: i32, %arg1: i32, %arg2: i32, %arg3: i32) -> (i32, i32, i32) {
    %c0_i32 = arith.constant 0 : i32
    return %arg0, %arg1, %arg3 : i32, i32, i32
  }
  func.func @transform_1(%arg0: i32, %arg1: i32, %arg2: i32, %arg3: i32) -> (i32, i32, i32) {
    %c0_i32 = arith.constant 0 : i32
    return %arg0, %arg3, %arg2 : i32, i32, i32
  }
  func.func @transform_2(%arg0: i32, %arg1: i32, %arg2: i32, %arg3: i32) -> (i32, i32) {
    %c0_i32 = arith.constant 0 : i32
    %c0_i32_0 = arith.constant 0 : i32
    return %c0_i32, %arg2 : i32, i32
  }
  func.func @transform_3(%arg0: i32, %arg1: i32, %arg2: i32, %arg3: i32) -> (i32, i32, i32) {
    %c0_i32 = arith.constant 0 : i32
    return %arg0, %arg1, %arg2 : i32, i32, i32
  }
}

module attributes {stable_mosaic.version = 11 : i64} {
  func.func @_bn_relu_kernel(%arg0: i32, %arg1: memref<128x128xf32, #tpu.memory_space<vmem>>, %arg2: memref<1x128xf32, #tpu.memory_space<vmem>>, %arg3: memref<1x128xf32, #tpu.memory_space<vmem>>, %arg4: memref<128x128xf32, #tpu.memory_space<vmem>>) attributes {dimension_semantics = [#tpu.dimension_semantics<parallel>], iteration_bounds = array<i64: 4>, scalar_prefetch = 0 : i64, scratch_operands = 0 : i64, tpu.core_type = #tpu.core_type<tc>, window_params = [{transform_indices = @transform_0, window_bounds = array<i64: 128, 128>}, {transform_indices = @transform_1, window_bounds = array<i64: 1, 128>}, {transform_indices = @transform_2, window_bounds = array<i64: 1, 128>}, {transform_indices = @transform_3, window_bounds = array<i64: 128, 128>}]} {
    %c0 = arith.constant 0 : index
    %c0_0 = arith.constant 0 : index
    %0 = vector.load %arg1[%c0, %c0_0] : memref<128x128xf32, #tpu.memory_space<vmem>>, vector<128x128xf32>
    %cst = arith.constant dense<0.000000e+00> : vector<128xf32>
    %1 = vector.multi_reduction <add>, %0, %cst [0] : vector<128x128xf32> to vector<128xf32>
    %2 = vector.shape_cast %1 : vector<128xf32> to vector<1x128xf32>
    %cst_1 = arith.constant 1.280000e+02 : f32
    %3 = vector.broadcast %cst_1 : f32 to vector<1x128xf32>
    %4 = arith.divf %2, %3 : vector<1x128xf32>
    %5 = vector.broadcast %4 : vector<1x128xf32> to vector<128x128xf32>
    %6 = arith.subf %0, %5 : vector<128x128xf32>
    %7 = arith.mulf %6, %6 : vector<128x128xf32>
    %cst_2 = arith.constant dense<0.000000e+00> : vector<128xf32>
    %8 = vector.multi_reduction <add>, %7, %cst_2 [0] : vector<128x128xf32> to vector<128xf32>
    %9 = vector.shape_cast %8 : vector<128xf32> to vector<1x128xf32>
    %cst_3 = arith.constant 1.280000e+02 : f32
    %10 = vector.broadcast %cst_3 : f32 to vector<1x128xf32>
    %11 = arith.divf %9, %10 : vector<1x128xf32>
    %cst_4 = arith.constant 9.99999974E-6 : f32
    %12 = vector.broadcast %cst_4 : f32 to vector<1x128xf32>
    %13 = arith.addf %11, %12 : vector<1x128xf32>
    %14 = math.rsqrt %13 : vector<1x128xf32>
    %15 = vector.broadcast %14 : vector<1x128xf32> to vector<128x128xf32>
    %16 = arith.mulf %6, %15 : vector<128x128xf32>
    %c0_5 = arith.constant 0 : index
    %c0_6 = arith.constant 0 : index
    %17 = vector.load %arg2[%c0_5, %c0_6] : memref<1x128xf32, #tpu.memory_space<vmem>>, vector<1x128xf32>
    %18 = vector.broadcast %17 : vector<1x128xf32> to vector<128x128xf32>
    %19 = arith.mulf %16, %18 : vector<128x128xf32>
    %c0_7 = arith.constant 0 : index
    %c0_8 = arith.constant 0 : index
    %20 = vector.load %arg3[%c0_7, %c0_8] : memref<1x128xf32, #tpu.memory_space<vmem>>, vector<1x128xf32>
    %21 = vector.broadcast %20 : vector<1x128xf32> to vector<128x128xf32>
    %22 = arith.addf %19, %21 : vector<128x128xf32>
    %cst_9 = arith.constant 0.000000e+00 : f32
    %23 = vector.broadcast %cst_9 : f32 to vector<128x128xf32>
    %24 = arith.maximumf %22, %23 : vector<128x128xf32>
    %c0_10 = arith.constant 0 : index
    %c0_11 = arith.constant 0 : index
    %25 = vector.load %arg4[%c0_10, %c0_11] : memref<128x128xf32, #tpu.memory_space<vmem>>, vector<128x128xf32>
    tpu.vector_store %arg4[%c0_10, %c0_11], %24 {strides = array<i32>} : memref<128x128xf32, #tpu.memory_space<vmem>>, vector<128x128xf32>,
    return
  }
  func.func @transform_0(%arg0: i32) -> (i32, i32) {
    %c0_i32 = arith.constant 0 : i32
    %c0_i32_0 = arith.constant 0 : i32
    return %c0_i32, %arg0 : i32, i32
  }
  func.func @transform_1(%arg0: i32) -> (i32, i32) {
    %c0_i32 = arith.constant 0 : i32
    %c0_i32_0 = arith.constant 0 : i32
    return %c0_i32, %arg0 : i32, i32
  }
  func.func @transform_2(%arg0: i32) -> (i32, i32) {
    %c0_i32 = arith.constant 0 : i32
    %c0_i32_0 = arith.constant 0 : i32
    return %c0_i32, %arg0 : i32, i32
  }
  func.func @transform_3(%arg0: i32) -> (i32, i32) {
    %c0_i32 = arith.constant 0 : i32
    %c0_i32_0 = arith.constant 0 : i32
    return %c0_i32, %arg0 : i32, i32
  }
}

module attributes {stable_mosaic.version = 11 : i64} {
  func.func @_bmm_kernel(%arg0: i32, %arg1: i32, %arg2: i32, %arg3: i32, %arg4: memref<1x104x2048xbf16, #tpu.memory_space<vmem>>, %arg5: memref<1x2048x256xbf16, #tpu.memory_space<vmem>>, %arg6: memref<1x256xf32, #tpu.memory_space<vmem>>, %arg7: memref<1x104x256xf32, #tpu.memory_space<vmem>>, %arg8: memref<104x256xf32, #tpu.memory_space<vmem>>) attributes {dimension_semantics = [#tpu.dimension_semantics<parallel>, #tpu.dimension_semantics<parallel>, #tpu.dimension_semantics<parallel>, #tpu.dimension_semantics<arbitrary>], iteration_bounds = array<i64: 4, 1, 1, 1>, scalar_prefetch = 0 : i64, scratch_operands = 1 : i64, tpu.core_type = #tpu.core_type<tc>, window_params = [{transform_indices = @transform_0, window_bounds = array<i64: 1, 104, 2048>}, {transform_indices = @transform_1, window_bounds = array<i64: 1, 2048, 256>}, {transform_indices = @transform_2, window_bounds = array<i64: 1, 256>}, {transform_indices = @transform_3, window_bounds = array<i64: 1, 104, 256>}]} {
    %c0_i32 = arith.constant 0 : i32
    %0 = arith.cmpi eq, %arg3, %c0_i32 : i32
    %1 = arith.extui %0 : i1 to i32
    %c0_i32_0 = arith.constant 0 : i32
    %2 = arith.cmpi ne, %1, %c0_i32_0 : i32
    scf.if %2 {
      %cst_12 = arith.constant 0.000000e+00 : f32
      %14 = vector.broadcast %cst_12 : f32 to vector<104x256xf32>
      %c0_13 = arith.constant 0 : index
      %c0_14 = arith.constant 0 : index
      %15 = vector.load %arg8[%c0_13, %c0_14] : memref<104x256xf32, #tpu.memory_space<vmem>>, vector<104x256xf32>
      tpu.vector_store %arg8[%c0_13, %c0_14], %14 {strides = array<i32>} : memref<104x256xf32, #tpu.memory_space<vmem>>, vector<104x256xf32>,
    } else {
    }
    %c0 = arith.constant 0 : index
    %c0_1 = arith.constant 0 : index
    %3 = vector.load %arg8[%c0, %c0_1] : memref<104x256xf32, #tpu.memory_space<vmem>>, vector<104x256xf32>
    %c0_2 = arith.constant 0 : index
    %c0_3 = arith.constant 0 : index
    %c0_4 = arith.constant 0 : index
    %4 = vector.load %arg4[%c0_2, %c0_3, %c0_4] : memref<1x104x2048xbf16, #tpu.memory_space<vmem>>, vector<1x104x2048xbf16>
    %5 = vector.shape_cast %4 : vector<1x104x2048xbf16> to vector<104x2048xbf16>
    %c0_5 = arith.constant 0 : index
    %c0_6 = arith.constant 0 : index
    %c0_7 = arith.constant 0 : index
    %6 = vector.load %arg5[%c0_5, %c0_6, %c0_7] : memref<1x2048x256xbf16, #tpu.memory_space<vmem>>, vector<1x2048x256xbf16>
    %7 = vector.shape_cast %6 : vector<1x2048x256xbf16> to vector<2048x256xbf16>
    %cst = arith.constant dense<0.000000e+00> : vector<104x256xf32>
    %8 = tpu.matmul %5, %7, %cst {dimension_numbers = #tpu.dot_dimension_numbers<[1], [0], [0], [1], [0, 0, 1, 1], [], []>} : vector<104x2048xbf16>, vector<2048x256xbf16>, vector<104x256xf32> -> vector<104x256xf32>
    %9 = arith.addf %3, %8 : vector<104x256xf32>
    %c0_8 = arith.constant 0 : index
    %c0_9 = arith.constant 0 : index
    %10 = vector.load %arg8[%c0_8, %c0_9] : memref<104x256xf32, #tpu.memory_space<vmem>>, vector<104x256xf32>
    tpu.vector_store %arg8[%c0_8, %c0_9], %9 {strides = array<i32>} : memref<104x256xf32, #tpu.memory_space<vmem>>, vector<104x256xf32>,
    %c0_i32_10 = arith.constant 0 : i32
    %11 = arith.cmpi eq, %arg3, %c0_i32_10 : i32
    %12 = arith.extui %11 : i1 to i32
    %c0_i32_11 = arith.constant 0 : i32
    %13 = arith.cmpi ne, %12, %c0_i32_11 : i32
    scf.if %13 {
      %c0_12 = arith.constant 0 : index
      %c0_13 = arith.constant 0 : index
      %14 = vector.load %arg8[%c0_12, %c0_13] : memref<104x256xf32, #tpu.memory_space<vmem>>, vector<104x256xf32>
      %c0_14 = arith.constant 0 : index
      %c0_15 = arith.constant 0 : index
      %15 = vector.load %arg6[%c0_14, %c0_15] : memref<1x256xf32, #tpu.memory_space<vmem>>, vector<1x256xf32>
      %16 = vector.broadcast %15 : vector<1x256xf32> to vector<104x256xf32>
      %17 = arith.addf %14, %16 : vector<104x256xf32>
      %c0_16 = arith.constant 0 : index
      %c0_17 = arith.constant 0 : index
      %c0_18 = arith.constant 0 : index
      %18 = vector.load %arg7[%c0_16, %c0_17, %c0_18] : memref<1x104x256xf32, #tpu.memory_space<vmem>>, vector<1x104x256xf32>
      %19 = vector.shape_cast %18 : vector<1x104x256xf32> to vector<104x256xf32>
      %20 = vector.shape_cast %17 : vector<104x256xf32> to vector<1x104x256xf32>
      tpu.vector_store %arg7[%c0_16, %c0_17, %c0_18], %20 {strides = array<i32>} : memref<1x104x256xf32, #tpu.memory_space<vmem>>, vector<1x104x256xf32>,
    } else {
    }
    return
  }
  func.func @transform_0(%arg0: i32, %arg1: i32, %arg2: i32, %arg3: i32) -> (i32, i32, i32) {
    %c0_i32 = arith.constant 0 : i32
    return %arg0, %arg1, %arg3 : i32, i32, i32
  }
  func.func @transform_1(%arg0: i32, %arg1: i32, %arg2: i32, %arg3: i32) -> (i32, i32, i32) {
    %c0_i32 = arith.constant 0 : i32
    return %arg0, %arg3, %arg2 : i32, i32, i32
  }
  func.func @transform_2(%arg0: i32, %arg1: i32, %arg2: i32, %arg3: i32) -> (i32, i32) {
    %c0_i32 = arith.constant 0 : i32
    %c0_i32_0 = arith.constant 0 : i32
    return %c0_i32, %arg2 : i32, i32
  }
  func.func @transform_3(%arg0: i32, %arg1: i32, %arg2: i32, %arg3: i32) -> (i32, i32, i32) {
    %c0_i32 = arith.constant 0 : i32
    return %arg0, %arg1, %arg2 : i32, i32, i32
  }
}

module attributes {stable_mosaic.version = 11 : i64} {
  func.func @_bn_relu_kernel(%arg0: i32, %arg1: memref<392x128xf32, #tpu.memory_space<vmem>>, %arg2: memref<1x128xf32, #tpu.memory_space<vmem>>, %arg3: memref<1x128xf32, #tpu.memory_space<vmem>>, %arg4: memref<392x128xf32, #tpu.memory_space<vmem>>) attributes {dimension_semantics = [#tpu.dimension_semantics<parallel>], iteration_bounds = array<i64: 2>, scalar_prefetch = 0 : i64, scratch_operands = 0 : i64, tpu.core_type = #tpu.core_type<tc>, window_params = [{transform_indices = @transform_0, window_bounds = array<i64: 392, 128>}, {transform_indices = @transform_1, window_bounds = array<i64: 1, 128>}, {transform_indices = @transform_2, window_bounds = array<i64: 1, 128>}, {transform_indices = @transform_3, window_bounds = array<i64: 392, 128>}]} {
    %c0 = arith.constant 0 : index
    %c0_0 = arith.constant 0 : index
    %0 = vector.load %arg1[%c0, %c0_0] : memref<392x128xf32, #tpu.memory_space<vmem>>, vector<392x128xf32>
    %cst = arith.constant dense<0.000000e+00> : vector<128xf32>
    %1 = vector.multi_reduction <add>, %0, %cst [0] : vector<392x128xf32> to vector<128xf32>
    %2 = vector.shape_cast %1 : vector<128xf32> to vector<1x128xf32>
    %cst_1 = arith.constant 3.920000e+02 : f32
    %3 = vector.broadcast %cst_1 : f32 to vector<1x128xf32>
    %4 = arith.divf %2, %3 : vector<1x128xf32>
    %5 = vector.broadcast %4 : vector<1x128xf32> to vector<392x128xf32>
    %6 = arith.subf %0, %5 : vector<392x128xf32>
    %7 = arith.mulf %6, %6 : vector<392x128xf32>
    %cst_2 = arith.constant dense<0.000000e+00> : vector<128xf32>
    %8 = vector.multi_reduction <add>, %7, %cst_2 [0] : vector<392x128xf32> to vector<128xf32>
    %9 = vector.shape_cast %8 : vector<128xf32> to vector<1x128xf32>
    %cst_3 = arith.constant 3.920000e+02 : f32
    %10 = vector.broadcast %cst_3 : f32 to vector<1x128xf32>
    %11 = arith.divf %9, %10 : vector<1x128xf32>
    %cst_4 = arith.constant 9.99999974E-6 : f32
    %12 = vector.broadcast %cst_4 : f32 to vector<1x128xf32>
    %13 = arith.addf %11, %12 : vector<1x128xf32>
    %14 = math.rsqrt %13 : vector<1x128xf32>
    %15 = vector.broadcast %14 : vector<1x128xf32> to vector<392x128xf32>
    %16 = arith.mulf %6, %15 : vector<392x128xf32>
    %c0_5 = arith.constant 0 : index
    %c0_6 = arith.constant 0 : index
    %17 = vector.load %arg2[%c0_5, %c0_6] : memref<1x128xf32, #tpu.memory_space<vmem>>, vector<1x128xf32>
    %18 = vector.broadcast %17 : vector<1x128xf32> to vector<392x128xf32>
    %19 = arith.mulf %16, %18 : vector<392x128xf32>
    %c0_7 = arith.constant 0 : index
    %c0_8 = arith.constant 0 : index
    %20 = vector.load %arg3[%c0_7, %c0_8] : memref<1x128xf32, #tpu.memory_space<vmem>>, vector<1x128xf32>
    %21 = vector.broadcast %20 : vector<1x128xf32> to vector<392x128xf32>
    %22 = arith.addf %19, %21 : vector<392x128xf32>
    %cst_9 = arith.constant 0.000000e+00 : f32
    %23 = vector.broadcast %cst_9 : f32 to vector<392x128xf32>
    %24 = arith.maximumf %22, %23 : vector<392x128xf32>
    %c0_10 = arith.constant 0 : index
    %c0_11 = arith.constant 0 : index
    %25 = vector.load %arg4[%c0_10, %c0_11] : memref<392x128xf32, #tpu.memory_space<vmem>>, vector<392x128xf32>
    tpu.vector_store %arg4[%c0_10, %c0_11], %24 {strides = array<i32>} : memref<392x128xf32, #tpu.memory_space<vmem>>, vector<392x128xf32>,
    return
  }
  func.func @transform_0(%arg0: i32) -> (i32, i32) {
    %c0_i32 = arith.constant 0 : i32
    %c0_i32_0 = arith.constant 0 : i32
    return %c0_i32, %arg0 : i32, i32
  }
  func.func @transform_1(%arg0: i32) -> (i32, i32) {
    %c0_i32 = arith.constant 0 : i32
    %c0_i32_0 = arith.constant 0 : i32
    return %c0_i32, %arg0 : i32, i32
  }
  func.func @transform_2(%arg0: i32) -> (i32, i32) {
    %c0_i32 = arith.constant 0 : i32
    %c0_i32_0 = arith.constant 0 : i32
    return %c0_i32, %arg0 : i32, i32
  }
  func.func @transform_3(%arg0: i32) -> (i32, i32) {
    %c0_i32 = arith.constant 0 : i32
    %c0_i32_0 = arith.constant 0 : i32
    return %c0_i32, %arg0 : i32, i32
  }
}

module attributes {stable_mosaic.version = 11 : i64} {
  func.func @_bmm_kernel(%arg0: i32, %arg1: i32, %arg2: i32, %arg3: i32, %arg4: memref<1x8x1024xbf16, #tpu.memory_space<vmem>>, %arg5: memref<1x1024x256xbf16, #tpu.memory_space<vmem>>, %arg6: memref<8x1xf32, #tpu.memory_space<vmem>>, %arg7: memref<1x8x256xf32, #tpu.memory_space<vmem>>, %arg8: memref<8x256xf32, #tpu.memory_space<vmem>>) attributes {dimension_semantics = [#tpu.dimension_semantics<parallel>, #tpu.dimension_semantics<parallel>, #tpu.dimension_semantics<parallel>, #tpu.dimension_semantics<arbitrary>], iteration_bounds = array<i64: 4, 1, 2, 1>, scalar_prefetch = 0 : i64, scratch_operands = 1 : i64, tpu.core_type = #tpu.core_type<tc>, window_params = [{transform_indices = @transform_0, window_bounds = array<i64: 1, 8, 1024>}, {transform_indices = @transform_1, window_bounds = array<i64: 1, 1024, 256>}, {transform_indices = @transform_2, window_bounds = array<i64: 8, 1>}, {transform_indices = @transform_3, window_bounds = array<i64: 1, 8, 256>}]} {
    %c0_i32 = arith.constant 0 : i32
    %0 = arith.cmpi eq, %arg3, %c0_i32 : i32
    %1 = arith.extui %0 : i1 to i32
    %c0_i32_0 = arith.constant 0 : i32
    %2 = arith.cmpi ne, %1, %c0_i32_0 : i32
    scf.if %2 {
      %cst_12 = arith.constant 0.000000e+00 : f32
      %14 = vector.broadcast %cst_12 : f32 to vector<8x256xf32>
      %c0_13 = arith.constant 0 : index
      %c0_14 = arith.constant 0 : index
      %15 = vector.load %arg8[%c0_13, %c0_14] : memref<8x256xf32, #tpu.memory_space<vmem>>, vector<8x256xf32>
      tpu.vector_store %arg8[%c0_13, %c0_14], %14 {strides = array<i32>} : memref<8x256xf32, #tpu.memory_space<vmem>>, vector<8x256xf32>,
    } else {
    }
    %c0 = arith.constant 0 : index
    %c0_1 = arith.constant 0 : index
    %3 = vector.load %arg8[%c0, %c0_1] : memref<8x256xf32, #tpu.memory_space<vmem>>, vector<8x256xf32>
    %c0_2 = arith.constant 0 : index
    %c0_3 = arith.constant 0 : index
    %c0_4 = arith.constant 0 : index
    %4 = vector.load %arg4[%c0_2, %c0_3, %c0_4] : memref<1x8x1024xbf16, #tpu.memory_space<vmem>>, vector<1x8x1024xbf16>
    %5 = vector.shape_cast %4 : vector<1x8x1024xbf16> to vector<8x1024xbf16>
    %c0_5 = arith.constant 0 : index
    %c0_6 = arith.constant 0 : index
    %c0_7 = arith.constant 0 : index
    %6 = vector.load %arg5[%c0_5, %c0_6, %c0_7] : memref<1x1024x256xbf16, #tpu.memory_space<vmem>>, vector<1x1024x256xbf16>
    %7 = vector.shape_cast %6 : vector<1x1024x256xbf16> to vector<1024x256xbf16>
    %cst = arith.constant dense<0.000000e+00> : vector<8x256xf32>
    %8 = tpu.matmul %5, %7, %cst {dimension_numbers = #tpu.dot_dimension_numbers<[1], [0], [0], [1], [0, 0, 1, 1], [], []>} : vector<8x1024xbf16>, vector<1024x256xbf16>, vector<8x256xf32> -> vector<8x256xf32>
    %9 = arith.addf %3, %8 : vector<8x256xf32>
    %c0_8 = arith.constant 0 : index
    %c0_9 = arith.constant 0 : index
    %10 = vector.load %arg8[%c0_8, %c0_9] : memref<8x256xf32, #tpu.memory_space<vmem>>, vector<8x256xf32>
    tpu.vector_store %arg8[%c0_8, %c0_9], %9 {strides = array<i32>} : memref<8x256xf32, #tpu.memory_space<vmem>>, vector<8x256xf32>,
    %c0_i32_10 = arith.constant 0 : i32
    %11 = arith.cmpi eq, %arg3, %c0_i32_10 : i32
    %12 = arith.extui %11 : i1 to i32
    %c0_i32_11 = arith.constant 0 : i32
    %13 = arith.cmpi ne, %12, %c0_i32_11 : i32
    scf.if %13 {
      %c0_12 = arith.constant 0 : index
      %c0_13 = arith.constant 0 : index
      %14 = vector.load %arg8[%c0_12, %c0_13] : memref<8x256xf32, #tpu.memory_space<vmem>>, vector<8x256xf32>
      %c0_14 = arith.constant 0 : index
      %c0_15 = arith.constant 0 : index
      %15 = vector.load %arg6[%c0_14, %c0_15] : memref<8x1xf32, #tpu.memory_space<vmem>>, vector<8x1xf32>
      %16 = vector.broadcast %15 : vector<8x1xf32> to vector<8x256xf32>
      %17 = arith.addf %14, %16 : vector<8x256xf32>
      %18 = math.tanh %17 : vector<8x256xf32>
      %c0_16 = arith.constant 0 : index
      %c0_17 = arith.constant 0 : index
      %c0_18 = arith.constant 0 : index
      %19 = vector.load %arg7[%c0_16, %c0_17, %c0_18] : memref<1x8x256xf32, #tpu.memory_space<vmem>>, vector<1x8x256xf32>
      %20 = vector.shape_cast %19 : vector<1x8x256xf32> to vector<8x256xf32>
      %21 = vector.shape_cast %18 : vector<8x256xf32> to vector<1x8x256xf32>
      tpu.vector_store %arg7[%c0_16, %c0_17, %c0_18], %21 {strides = array<i32>} : memref<1x8x256xf32, #tpu.memory_space<vmem>>, vector<1x8x256xf32>,
    } else {
    }
    return
  }
  func.func @transform_0(%arg0: i32, %arg1: i32, %arg2: i32, %arg3: i32) -> (i32, i32, i32) {
    %c0_i32 = arith.constant 0 : i32
    return %arg0, %arg1, %arg3 : i32, i32, i32
  }
  func.func @transform_1(%arg0: i32, %arg1: i32, %arg2: i32, %arg3: i32) -> (i32, i32, i32) {
    %c0_i32 = arith.constant 0 : i32
    return %arg0, %arg3, %arg2 : i32, i32, i32
  }
  func.func @transform_2(%arg0: i32, %arg1: i32, %arg2: i32, %arg3: i32) -> (i32, i32) {
    %c0_i32 = arith.constant 0 : i32
    %c0_i32_0 = arith.constant 0 : i32
    return %arg1, %c0_i32 : i32, i32
  }
  func.func @transform_3(%arg0: i32, %arg1: i32, %arg2: i32, %arg3: i32) -> (i32, i32, i32) {
    %c0_i32 = arith.constant 0 : i32
    return %arg0, %arg1, %arg2 : i32, i32, i32
  }
}

</mosaic_0001>

<bundles_post_ra>
// kernel: generator_28_forward.7
= control target key start
LH: loop header
LB: loop body
LE: loop exit
PB: predicated region body
PF: predicated region fallthrough
CT: control target
= control target key end

     0   :  { %s856_s12 = smov 0   ;;  %s858_s13 = smov 0   ;;  %s945_s0 = inlined_call_operand.vmem [shape: bf16[1,8,128], index: 0, kind: input, shape index: {}]   ;;  %s946_s1 = inlined_call_operand.vmem [shape: bf16[1,128,16384], index: 1, kind: input, shape index: {}]   ;;  %s947_s2 = inlined_call_operand.vmem [shape: f32[1,16384], index: 2, kind: input, shape index: {}]   ;;  %s948_s3 = inlined_call_operand.vmem [shape: f32[1,8,16384], index: 3, kind: output, shape index: {}]  }
   0x1   :  { %s860_s14 = smov 0   ;;  %s862_s15 = smov 0  }
   0x2   :  { %s864_s16 = smov 0  }
   0x3 LB: > { %s31_s17 = sadd.s32 1, %s829_s15  ;;  %p87_p1 = scmp.ne.s32.totalorder %s821_s13, %s817_s12  ;;  %s833_s16 = sphi %s864_s16, %s13_s16   ;;  %s829_s15 = sphi %s862_s15, %s952_s15   ;;  %s825_s14 = sphi %s860_s14, %s951_s14   ;;  %s821_s13 = sphi %s858_s13, %s950_s13   ;;  %s817_s12 = sphi %s856_s12, %s949_s12  }
   0x4   : > { %p33_p0 = scmp.ge.s32.totalorder %s31_s17, 64  ;;  %p88_p2 = scmp.eq.s32.totalorder %s833_s16, 0 }
   0x5   : > { %s80_s19 = sadd.s32 1, %s821_s13  ;;  %p702_p5 = scmp.ge.s32.totalorder %s833_s16, 64 }
   0x6   : > { %s954_s17 = smov (%p33_p0, %s31_s17), 0  ;;  %p89_p3 = por %p88_p2, %p87_p1 }
   0x7   : > { %s76_s18 = ssub.s32 %s829_s15, %s954_s17  ;;  %182 = sbr.rel (%p702_p5) target bundleno = 34 (0x22), region = 20 }
   0x8   : > { %p78_p4 = scmp.eq.s32.totalorder %s76_s18, 0 }
   0xa   : > { %s891_s20 = scalar_select %p78_p4, %s821_s13, %s80_s19  }
   0xe   : > { %185 = sbr.rel (!%p89_p3) target bundleno = 34 (0x22), region = 24  ;;  %s187_s21 = sand.u32 (%p89_p3), 1, %s821_s13  }
   0xf   : > { %s729_s22 = sshll.u32 (%p89_p3), %s829_s15, 3  ;;  %s703_s23 = sshll.u32 (%p89_p3), %s187_s21, 7 }
  0x10   : > { %s899_s26 = scalar_lea.vmem (%p89_p3), %s946_s1, %s729_s22  ;;  %s189_s27 = scalar_lea.vmem (%p89_p3), [#allocation3], %s703_s23 }
  0x11   : > { %v255_v0 = vld [vmem:[%s899_s26] sm:$0xff] (%p89_p3) }
  0x12   : > { %v257_v1 = vld [vmem:[%s899_s26 + $0x200] sm:$0xff] (%p89_p3)  ;;  %256 = vst [vmem:[%s189_s27] sm:$0xff] (%p89_p3), %v255_v0 }
  0x13   : > { %v259_v2 = vld [vmem:[%s899_s26 + $0x400] sm:$0xff] (%p89_p3)  ;;  %258 = vst [vmem:[%s189_s27 + $0x8] sm:$0xff] (%p89_p3), %v257_v1 }
  0x14   : > { %260 = vst [vmem:[%s189_s27 + $0x10] sm:$0xff] (%p89_p3), %v259_v2  ;;  %v261_v3 = vld [vmem:[%s899_s26 + $0x600] sm:$0xff] (%p89_p3) }
  0x15   : > { %v263_v4 = vld [vmem:[%s899_s26 + $0x800] sm:$0xff]  ;;  %262 = vst [vmem:[%s189_s27 + $0x18] sm:$0xff] %v261_v3 }
  0x16   : > { %v265_v5 = vld [vmem:[%s899_s26 + $0xa00] sm:$0xff]  ;;  %264 = vst [vmem:[%s189_s27 + $0x20] sm:$0xff] %v263_v4 }
  0x17   : > { %266 = vst [vmem:[%s189_s27 + $0x28] sm:$0xff] %v265_v5  ;;  %v267_v6 = vld [vmem:[%s899_s26 + $0xc00] sm:$0xff] }
  0x18   : > { %v269_v7 = vld [vmem:[%s899_s26 + $0xe00] sm:$0xff]  ;;  %268 = vst [vmem:[%s189_s27 + $0x30] sm:$0xff] %v267_v6 }
  0x19   : > { %v271_v8 = vld [vmem:[%s899_s26 + $0x1000] sm:$0xff]  ;;  %270 = vst [vmem:[%s189_s27 + $0x38] sm:$0xff] %v269_v7 }
  0x1a   : > { %272 = vst [vmem:[%s189_s27 + $0x40] sm:$0xff] %v271_v8  ;;  %v273_v9 = vld [vmem:[%s899_s26 + $0x1200] sm:$0xff] }
  0x1b   : > { %v275_v10 = vld [vmem:[%s899_s26 + $0x1400] sm:$0xff]  ;;  %274 = vst [vmem:[%s189_s27 + $0x48] sm:$0xff] %v273_v9 }
  0x1c   : > { %v277_v11 = vld [vmem:[%s899_s26 + $0x1600] sm:$0xff]  ;;  %276 = vst [vmem:[%s189_s27 + $0x50] sm:$0xff] %v275_v10 }
  0x1d   : > { %278 = vst [vmem:[%s189_s27 + $0x58] sm:$0xff] %v277_v11  ;;  %v279_v12 = vld [vmem:[%s899_s26 + $0x1800] sm:$0xff] }
  0x1e   : > { %v281_v13 = vld [vmem:[%s899_s26 + $0x1a00] sm:$0xff]  ;;  %280 = vst [vmem:[%s189_s27 + $0x60] sm:$0xff] %v279_v12 }
  0x1f   : > { %v283_v14 = vld [vmem:[%s899_s26 + $0x1c00] sm:$0xff]  ;;  %282 = vst [vmem:[%s189_s27 + $0x68] sm:$0xff] %v281_v13 }
  0x20   : > { %284 = vst [vmem:[%s189_s27 + $0x70] sm:$0xff] %v283_v14  ;;  %v285_v15 = vld [vmem:[%s899_s26 + $0x1e00] sm:$0xff] }
  0x21   : > { %286 = vst [vmem:[%s189_s27 + $0x78] sm:$0xff] %v285_v15 }
  0x22 PF: > { %p706_p6 = scmp.ge.s32.totalorder %s833_s16, 1  ;;  %p299_p7 = scmp.lt.s32.totalorder %s833_s16, 65 }
  0x24   : > { %p300_p8 = pnand %p706_p6, %p299_p7 }
  0x25   : > { %s306_s28 = sand.u32 (!%p300_p8), 1, %s817_s12   ;;  %v835_v16 = vmov (!%p300_p8), 0   ;;  %v391_v33 = vld [vmem:[%s945_s0] sm:$0xf] (!%p300_p8)  ;;  %s708_s6 = sshll.u32 (!%p300_p8), %s825_s14, 1  ;;  %v540_v34 = vlaneseq (!%p300_p8) }
  0x26   : > { %303 = sbr.rel (%p300_p8) target bundleno = 289 (0x121), region = 66  ;;  %s707_s29 = sshll.u32 (!%p300_p8), %s306_s28, 7  ;;  %520 = vmatprep.mubr.bf16.mxu0 (!%p300_p8), %v835_v16 }
  0x27   : > { %s308_s30 = scalar_lea.vmem (!%p300_p8), [#allocation3], %s707_s29  ;;  %p364_p9 = scmp.lt.s32.totalorder (!%p300_p8), %s708_s6, 127  ;;  %v541_v35 = vshrl.u32 (!%p300_p8), %v540_v34, 7 }
  0x28   : > { %v771_v17 = vld [vmem:[%s308_s30 + $0x4] ss:$8 sps:$4 sm:$0xff] (!%p300_p8)   ;;  %v773_v18 = vld [vmem:[%s308_s30] ss:$8 sps:$4 sm:$0xff] (!%p300_p8)   ;;  %v774_v19 = vld [vmem:[%s308_s30 + $0x14] ss:$8 sps:$4 sm:$0xff] (!%p300_p8)  }
  0x29   : > { %488 = vmatprep.subr.bf16.mxu0 (!%p300_p8), %v771_v17  ;;  %v776_v20 = vld [vmem:[%s308_s30 + $0x10] ss:$8 sps:$4 sm:$0xff] (!%p300_p8)   ;;  %v777_v21 = vld [vmem:[%s308_s30 + $0x24] ss:$8 sps:$4 sm:$0xff] (!%p300_p8)   ;;  %v779_v22 = vld [vmem:[%s308_s30 + $0x20] ss:$8 sps:$4 sm:$0xff] (!%p300_p8)  }
  0x2a   : > { %489 = vmatpush1.bf16.msra.mxu0 (!%p300_p8), %v773_v18  ;;  %v780_v23 = vld [vmem:[%s308_s30 + $0x34] ss:$8 sps:$4 sm:$0xff] (!%p300_p8)   ;;  %v782_v24 = vld [vmem:[%s308_s30 + $0x30] ss:$8 sps:$4 sm:$0xff] (!%p300_p8)   ;;  %v783_v25 = vld [vmem:[%s308_s30 + $0x44] ss:$8 sps:$4 sm:$0xff] (!%p300_p8)  }
  0x2b   : > { %490 = vmatprep.subr.bf16.mxu0 (!%p300_p8), %v774_v19  ;;  %v785_v26 = vld [vmem:[%s308_s30 + $0x40] ss:$8 sps:$4 sm:$0xff] (!%p300_p8)   ;;  %v786_v27 = vld [vmem:[%s308_s30 + $0x54] ss:$8 sps:$4 sm:$0xff] (!%p300_p8)   ;;  %v788_v28 = vld [vmem:[%s308_s30 + $0x50] ss:$8 sps:$4 sm:$0xff] (!%p300_p8)  }
  0x2c   : > { %v789_v29 = vld [vmem:[%s308_s30 + $0x64] ss:$8 sps:$4 sm:$0xff] (!%p300_p8)   ;;  %v791_v30 = vld [vmem:[%s308_s30 + $0x60] ss:$8 sps:$4 sm:$0xff] (!%p300_p8)   ;;  %v792_v31 = vld [vmem:[%s308_s30 + $0x74] ss:$8 sps:$4 sm:$0xff] (!%p300_p8)  }
  0x2d   : > { %v794_v32 = vld [vmem:[%s308_s30 + $0x70] ss:$8 sps:$4 sm:$0xff]   ;;  %s956_s6 = smov (!%p364_p9, %s708_s6), 127  ;;  %v542_v36 = vsub.s32 0, %v541_v35  ;;  %v546_v38 = vsub.s32 1, %v541_v35 }
  0x2e   : > { %491 = vmatpush1.bf16.msra.mxu0 %v776_v20  ;;  %s366_s9 = scalar_lea.vmem %s947_s2, %s956_s6  ;;  %s710_s10 = sshll.u32 %s956_s6, 3 }
  0x2f   : > { %492 = vmatprep.subr.bf16.mxu0 %v777_v21  ;;  %v538_v37 = vld [vmem:[%s366_s9] sm:$0x3]  ;;  %s380_s18 = scalar_lea.vmem %s948_s3, %s710_s10 }
  0x30   : > { %v543_v39 = vrot.slane %v538_v37, %v542_v36  ;;  %v547_v40 = vrot.slane %v538_v37, %v546_v38 }
  0x32   : > { %493 = vmatpush1.bf16.msra.mxu0 %v779_v22 }
  0x33   : > { %494 = vmatprep.subr.bf16.mxu0 %v780_v23 }
  0x36   : > { %495 = vmatpush1.bf16.msra.mxu0 %v782_v24 }
  0x37   : > { %496 = vmatprep.subr.bf16.mxu0 %v783_v25 }
  0x3a   : > { %497 = vmatpush1.bf16.msra.mxu0 %v785_v26 }
  0x3b   : > { %498 = vmatprep.subr.bf16.mxu0 %v786_v27 }
  0x3e   : > { %499 = vmatpush1.bf16.msra.mxu0 %v788_v28 }
  0x3f   : > { %500 = vmatprep.subr.bf16.mxu0 %v789_v29 }
  0x42   : > { %501 = vmatpush1.bf16.msra.mxu0 %v791_v30 }
  0x43   : > { %502 = vmatprep.subr.bf16.mxu0 %v792_v31 }
  0x46   : > { %503 = vmatpush1.bf16.msra.mxu0 %v794_v32 }
  0x49   : > { %521 = vmatmul.mubr.bf16.vlgmr.msra.gmra.mrb[0].mxu0 %v391_v33 }
 0x11c   : > { %v522_v41 = vpop.f32.mrb[0].mxu0 }
 0x11d   : > { %v550_v42 = vadd.f32 %v543_v39, %v522_v41  ;;  %v524_v43 = vpop.f32.mrb[1].mxu0 }
 0x11e   : > { %v551_v44 = vadd.f32 %v547_v40, %v524_v43  ;;  %v526_v45 = vpop.f32.mrb[2].mxu0 }
 0x11f   : > { %552 = vst [vmem:[%s380_s18] sm:$0xff] %v550_v42  ;;  %v527_v46 = vpop.f32.mrb[3].mxu0 }
 0x120   : > { %553 = vst [vmem:[%s380_s18 + $0x8] sm:$0xff] %v551_v44 }
 0x121 PF: > { %s13_s16 = sadd.s32 1, %s833_s16   ;;  %s949_s12 = smov %s821_s13 }
 0x122   : > { %p10_p10 = scmp.ge.s32.totalorder %s13_s16, 66   ;;  %s950_s13 = smov %s891_s20 }
 0x123   : > { %s951_s14 = smov %s829_s15  ;;  %s952_s15 = smov %s954_s17 }
 0x124   :  { %12 = sbr.rel (!%p10_p10) target bundleno = 3 (0x3), region = 119 }

// kernel: generator_28_forward.8
= control target key start
LH: loop header
LB: loop body
LE: loop exit
PB: predicated region body
PF: predicated region fallthrough
CT: control target
= control target key end

     0   :  { %s520_s12 = smov 0   ;;  %s522_s13 = smov 0   ;;  %s592_s0 = inlined_call_operand.vmem [shape: f32[32,1024], index: 0, kind: input, shape index: {}]   ;;  %s593_s1 = inlined_call_operand.vmem [shape: f32[1,1024], index: 1, kind: input, shape index: {}]   ;;  %s594_s2 = inlined_call_operand.vmem [shape: f32[1,1024], index: 2, kind: input, shape index: {}]   ;;  %s595_s3 = inlined_call_operand.vmem [shape: f32[32,1024], index: 3, kind: output, shape index: {}]  }
   0x1   :  { %s524_s14 = smov 0  }
   0x2 LB: > { %s536_s15 = sadd.s32 4294967295, %s498_s14   ;;  %s539_s16 = sadd.s32 1, %s498_s14   ;;  %s498_s14 = sphi %s524_s14, %s599_s14   ;;  %s494_s13 = sphi %s522_s13, %s598_s13   ;;  %s490_s12 = sphi %s520_s12, %s597_s12  }
   0x3   : > { %s17_s17 = ssub.s32 %s498_s14, %s539_s16  ;;  %s20_s18 = sadd.s32 1, %s494_s13 }
   0x4   : > { %p18_p0 = scmp.eq.s32.totalorder %s17_s17, 0  ;;  %p27_p1 = scmp.ne.s32.totalorder %s494_s13, %s490_s12 }
   0x5   : > { %p28_p2 = scmp.eq.s32.totalorder %s498_s14, 0  ;;  %p109_p3 = scmp.eq.s32.totalorder %s536_s15, 7 }
   0x6   : > { %s549_s19 = scalar_select %p18_p0, %s494_s13, %s20_s18  }
   0x7   : > { %p29_p4 = por %p28_p2, %p27_p1  ;;  %p551_p5 = por %p109_p3, %p27_p1 }
   0x8   : > { %p438_p6 = scmp.ge.s32.totalorder %s498_s14, 8 }
   0xa   : > { %131 = sbr.rel (%p438_p6) target bundleno = 25 (0x19), region = 16 }
  0x11   : > { %134 = sbr.rel (!%p29_p4) target bundleno = 25 (0x19), region = 20  ;;  %s136_s21 = sand.u32 (%p29_p4), 1, %s494_s13  }
  0x12   : > { %s440_s22 = sshll.u32 (%p29_p4), %s498_s14, 3  ;;  %s439_s23 = sshll.u32 (%p29_p4), %s136_s21, 5 }
  0x13   : > { %s140_s26 = scalar_lea.vmem (%p29_p4), %s592_s0, %s440_s22  ;;  %s138_s27 = scalar_lea.vmem (%p29_p4), [#allocation2], %s439_s23 }
  0x14   : > { %v174_v0 = vld [vmem:[%s140_s26] sm:$0xff] (%p29_p4) }
  0x15   : > { %v176_v1 = vld [vmem:[%s140_s26 + $0x40] sm:$0xff] (%p29_p4)  ;;  %175 = vst [vmem:[%s138_s27] sm:$0xff] (%p29_p4), %v174_v0 }
  0x16   : > { %v178_v2 = vld [vmem:[%s140_s26 + $0x80] sm:$0xff] (%p29_p4)  ;;  %177 = vst [vmem:[%s138_s27 + $0x8] sm:$0xff] (%p29_p4), %v176_v1 }
  0x17   : > { %179 = vst [vmem:[%s138_s27 + $0x10] sm:$0xff] (%p29_p4), %v178_v2  ;;  %v180_v3 = vld [vmem:[%s140_s26 + $0xc0] sm:$0xff] (%p29_p4) }
  0x18   : > { %181 = vst [vmem:[%s138_s27 + $0x18] sm:$0xff] %v180_v3 }
  0x19 PF: > { %p441_p7 = scmp.ge.s32.totalorder %s498_s14, 1  ;;  %p198_p8 = scmp.lt.s32.totalorder %s498_s14, 9 }
  0x1b   : > { %p199_p9 = pnand %p441_p7, %p198_p8 }
  0x1c   : > { %s205_s28 = sand.u32 (!%p199_p9), 1, %s490_s12   ;;  %p233_p10 = scmp.lt.s32.totalorder (!%p199_p9), %s536_s15, 7 }
  0x1d   : > { %202 = sbr.rel (%p199_p9) target bundleno = 107 (0x6b), region = 66  ;;  %s564_s29 = sshll.u32 (!%p199_p9), %s205_s28, 5 }
  0x1e   : > { %s207_s30 = scalar_lea.vmem (!%p199_p9), [#allocation2], %s564_s29  ;;  %s232_s11 = scalar_lea.vmem (!%p199_p9), [#allocation3], %s564_s29 }
  0x1f   : > { %v239_v4 = vld [vmem:[%s207_s30] sm:$0xff] (!%p199_p9)  ;;  %v240_v5 = vld [vmem:[%s207_s30 + $0x8] sm:$0xff] (!%p199_p9)  ;;  %v241_v6 = vld [vmem:[%s207_s30 + $0x10] sm:$0xff] (!%p199_p9) }
  0x20   : > { %v243_v7 = vadd.f32 (!%p199_p9), %v240_v5, %v239_v4  ;;  %v242_v8 = vld [vmem:[%s207_s30 + $0x18] sm:$0xff] (!%p199_p9) }
  0x22   : > { %v244_v9 = vadd.f32 (!%p199_p9), %v243_v7, %v241_v6 }
  0x24   : > { %v245_v10 = vadd.f32 %v244_v9, %v242_v8  ;;  %s234_s4 = scalar_select %p233_p10, %s536_s15, 7 }
  0x25   : > { %s447_s12 = sshll.u32 (%p551_p5), %s536_s15, 3 }
  0x26   : > { %v246_v11 = vrot.slane %v245_v10, 4  ;;  %s235_s7 = scalar_lea.vmem %s593_s1, %s234_s4  ;;  %s238_s10 = scalar_lea.vmem %s594_s2, %s234_s4 }
  0x27   : > { %v444_v38 = vld [vmem:[%s235_s7] ss:$0 sm:$0xff]  ;;  %s316_s18 = scalar_lea.vmem (%p551_p5), %s595_s3, %s447_s12 }
  0x28   : > { %v247_v12 = vadd.f32 %v246_v11, %v245_v10  ;;  %v445_v43 = vld [vmem:[%s238_s10] ss:$0 sm:$0xff] }
  0x2a   : > { %v248_v13 = vrot.slane %v247_v12, 2 }
  0x2c   : > { %v249_v14 = vadd.f32 %v248_v13, %v247_v12 }
  0x2e   : > { %v250_v15 = vrot.slane %v249_v14, 1 }
  0x30   : > { %v251_v16 = vadd.f32 %v250_v15, %v249_v14 }
  0x32   : > { %v253_v17 = vmul.f32 0.03125, %v251_v16 }
  0x34   : > { %v254_v18 = vsub.f32 %v239_v4, %v253_v17  ;;  %v255_v19 = vsub.f32 %v240_v5, %v253_v17  ;;  %v256_v20 = vsub.f32 %v241_v6, %v253_v17  ;;  %v257_v21 = vsub.f32 %v242_v8, %v253_v17 }
  0x36   : > { %v258_v22 = vmul.f32 %v254_v18, %v254_v18  ;;  %v259_v23 = vmul.f32 %v255_v19, %v255_v19  ;;  %v260_v24 = vmul.f32 %v256_v20, %v256_v20  ;;  %v261_v25 = vmul.f32 %v257_v21, %v257_v21 }
  0x38   : > { %v262_v26 = vadd.f32 %v259_v23, %v258_v22 }
  0x3a   : > { %v263_v27 = vadd.f32 %v262_v26, %v260_v24 }
  0x3c   : > { %v264_v28 = vadd.f32 %v263_v27, %v261_v25 }
  0x3e   : > { %v265_v29 = vrot.slane %v264_v28, 4 }
  0x40   : > { %v266_v30 = vadd.f32 %v265_v29, %v264_v28 }
  0x42   : > { %v267_v31 = vrot.slane %v266_v30, 2 }
  0x44   : > { %v268_v32 = vadd.f32 %v267_v31, %v266_v30 }
  0x46   : > { %v269_v33 = vrot.slane %v268_v32, 1 }
  0x48   : > { %v270_v34 = vadd.f32 %v269_v33, %v268_v32 }
  0x4a   : > { %v271_v35 = vmul.f32 0.03125, %v270_v34 }
  0x4c   : > { %v272_v36 = vadd.f32 1e-05, %v271_v35 }
  0x4e   : > { %474 = vrsqrt.f32 %v272_v36 }
  0x58   : > { %v475_v37 = vpop.eup %474 }
  0x59   : > { %v274_v39 = vmul.f32 %v475_v37, %v254_v18  ;;  %v275_v40 = vmul.f32 %v475_v37, %v255_v19  ;;  %v276_v41 = vmul.f32 %v475_v37, %v256_v20  ;;  %v277_v42 = vmul.f32 %v475_v37, %v257_v21 }
  0x5b   : > { %v285_v44 = vmul.f32 %v444_v38, %v274_v39  ;;  %v286_v45 = vmul.f32 %v444_v38, %v275_v40  ;;  %v287_v46 = vmul.f32 %v444_v38, %v276_v41  ;;  %v288_v47 = vmul.f32 %v444_v38, %v277_v42 }
  0x5c   : > { %314 = sbr.rel (!%p551_p5) target bundleno = 107 (0x6b), region = 74 }
  0x5d   : > { %v296_v48 = vadd.f32 %v445_v43, %v285_v44  ;;  %v297_v49 = vadd.f32 %v445_v43, %v286_v45  ;;  %v298_v50 = vadd.f32 %v445_v43, %v287_v46  ;;  %v299_v51 = vadd.f32 %v445_v43, %v288_v47 }
  0x5f   : > { %v300_v52 = vmax.f32 %v296_v48, 0.0  ;;  %v301_v53 = vmax.f32 %v297_v49, 0.0  ;;  %v302_v54 = vmax.f32 %v298_v50, 0.0  ;;  %v303_v55 = vmax.f32 %v299_v51, 0.0 }
  0x61   : > { %304 = vst [vmem:[%s232_s11] sm:$0xff] %v300_v52  ;;  %305 = vst [vmem:[%s232_s11 + $0x8] sm:$0xff] %v301_v53 }
  0x62   : > { %306 = vst [vmem:[%s232_s11 + $0x10] sm:$0xff] %v302_v54  ;;  %307 = vst [vmem:[%s232_s11 + $0x18] sm:$0xff] %v303_v55 }
  0x68   : > { %v350_v56 = vld [vmem:[%s232_s11] sm:$0xff]  ;;  %v352_v57 = vld [vmem:[%s232_s11 + $0x8] sm:$0xff] }
  0x69   : > { %v354_v58 = vld [vmem:[%s232_s11 + $0x10] sm:$0xff]  ;;  %v356_v59 = vld [vmem:[%s232_s11 + $0x18] sm:$0xff]  ;;  %351 = vst [vmem:[%s316_s18] sm:$0xff] %v350_v56  ;;  %353 = vst [vmem:[%s316_s18 + $0x40] sm:$0xff] %v352_v57 }
  0x6a   : > { %355 = vst [vmem:[%s316_s18 + $0x80] sm:$0xff] %v354_v58  ;;  %357 = vst [vmem:[%s316_s18 + $0xc0] sm:$0xff] %v356_v59 }
  0x6b PF: > { %p10_p11 = scmp.ge.s32.totalorder %s539_s16, 10   ;;  %s597_s12 = smov %s494_s13 }
  0x6c   : > { %s598_s13 = smov %s549_s19  ;;  %s599_s14 = smov %s539_s16 }
  0x6d   :  { %12 = sbr.rel (!%p10_p11) target bundleno = 2 (0x2), region = 149 }

// kernel: generator_28_forward.9
= control target key start
LH: loop header
LB: loop body
LE: loop exit
PB: predicated region body
PF: predicated region fallthrough
CT: control target
= control target key end

     0   :  { %s10616_s12 = smov 0   ;;  %s10618_s13 = smov 0   ;;  %s12467_s0 = inlined_call_operand.vmem [shape: bf16[4,32,4096], index: 0, kind: input, shape index: {}]   ;;  %s12468_s1 = inlined_call_operand.vmem [shape: bf16[4,4096,512], index: 1, kind: input, shape index: {}]   ;;  %s12469_s2 = inlined_call_operand.vmem [shape: f32[1,512], index: 2, kind: input, shape index: {}]   ;;  %s12470_s3 = inlined_call_operand.vmem [shape: f32[4,32,512], index: 3, kind: output, shape index: {}]  }
   0x1   :  { %s10620_s14 = smov 0   ;;  %s10622_s15 = smov 0  }
   0x2   :  { %s10624_s16 = smov 0   ;;  %s10626_s17 = smov 0  }
   0x3   :  { %s10628_s18 = smov 0  }
   0x4 LB: > { %s31_s19 = sadd.s32 1, %s10586_s16  ;;  %s39_s20 = sadd.s32 1, %s10590_s17  ;;  %s10594_s18 = sphi %s10628_s18, %s13_s18   ;;  %s10590_s17 = sphi %s10626_s17, %s12477_s17   ;;  %s10586_s16 = sphi %s10624_s16, %s12476_s16   ;;  %s10582_s15 = sphi %s10622_s15, %s12475_s15   ;;  %s10578_s14 = sphi %s10620_s14, %s12474_s14   ;;  %s10574_s13 = sphi %s10618_s13, %s12473_s13   ;;  %s10570_s12 = sphi %s10616_s12, %s12472_s12  }
   0x5   : > { %p33_p0 = scmp.ge.s32.totalorder %s31_s19, 2  ;;  %s8999_s21 = sadd.s32 4294967295, %s10594_s18  }
   0x6   : > { %p87_p1 = scmp.ne.s32.totalorder %s10574_s13, %s10570_s12  ;;  %p88_p2 = scmp.eq.s32.totalorder %s10594_s18, 0 }
   0x7   : > { %s12479_s19 = smov (%p33_p0, %s31_s19), 0  ;;  %s12481_s20 = smov (!%p33_p0, %s39_s20), %s10590_s17 }
   0x8   : > { %p41_p3 = scmp.ge.s32.totalorder %s12481_s20, 4  ;;  %p147_p4 = scmp.eq.s32.totalorder %s8999_s21, 7 }
   0x9   : > { %s76_s22 = ssub.s32 %s10586_s16, %s12479_s19  ;;  %p89_p5 = por %p88_p2, %p87_p1 }
   0xa   : > { %s12483_s20 = smov (%p41_p3, %s12481_s20), 0  ;;  %p10664_p6 = por %p147_p4, %p87_p1 }
   0xb   : > { %s73_s24 = ssub.s32 %s10590_s17, %s12483_s20  ;;  %s80_s26 = sadd.s32 1, %s10574_s13 }
   0xc   : > { %s77_s25 = sor.u32 %s76_s22, %s73_s24  ;;  %p9002_p8 = scmp.ge.s32.totalorder %s10594_s18, 8 }
   0xd   : > { %p78_p7 = scmp.eq.s32.totalorder %s77_s25, 0 }
   0xe   : > { %169 = sbr.rel (%p9002_p8) target bundleno = 284 (0x11c), region = 16 }
   0xf   : > { %s10672_s27 = scalar_select %p78_p7, %s10574_s13, %s80_s26  }
  0x15   : > { %191 = sbr.rel (!%p89_p5) target bundleno = 284 (0x11c), region = 24  ;;  %s193_s28 = sand.u32 (%p89_p5), 1, %s10574_s13  }
  0x16   : > { %s9004_s29 = sshll.u32 (%p89_p5), %s10586_s16, 1  ;;  %s9003_s30 = sshll.u32 (%p89_p5), %s193_s28, 12 }
  0x17   : > { %s9005_s4 = sshll.u32 (%p89_p5), %s10590_s17, 11  ;;  %s10686_s10 = scalar_lea.vmem (%p89_p5), [#allocation3], %s9003_s30 }
  0x18   : > { %s201_s5 = sadd.s32 (%p89_p5), %s9005_s4, %s9004_s29 }
  0x19   : > { %s9006_s6 = sshll.u32 (%p89_p5), %s201_s5, 2 }
  0x1a   : > { %s10681_s9 = scalar_lea.vmem (%p89_p5), %s12468_s1, %s9006_s6 }
  0x1b   : > { %v1256_v0 = vld [vmem:[%s10681_s9] sm:$0xff] (%p89_p5)  ;;  %v1258_v1 = vld [vmem:[%s10681_s9 + $0x10] sm:$0xff] (%p89_p5) }
  0x1c   : > { %v1260_v2 = vld [vmem:[%s10681_s9 + $0x20] sm:$0xff]  ;;  %1257 = vst [vmem:[%s10686_s10] sm:$0xff] %v1256_v0  ;;  %1259 = vst [vmem:[%s10686_s10 + $0x8] sm:$0xff] %v1258_v1  ;;  %v1262_v3 = vld [vmem:[%s10681_s9 + $0x30] sm:$0xff] }
  0x1d   : > { %1261 = vst [vmem:[%s10686_s10 + $0x10] sm:$0xff] %v1260_v2  ;;  %v1264_v4 = vld [vmem:[%s10681_s9 + $0x40] sm:$0xff]  ;;  %v1266_v5 = vld [vmem:[%s10681_s9 + $0x50] sm:$0xff]  ;;  %1263 = vst [vmem:[%s10686_s10 + $0x18] sm:$0xff] %v1262_v3 }
  0x1e   : > { %1265 = vst [vmem:[%s10686_s10 + $0x20] sm:$0xff] %v1264_v4  ;;  %1267 = vst [vmem:[%s10686_s10 + $0x28] sm:$0xff] %v1266_v5  ;;  %v1268_v6 = vld [vmem:[%s10681_s9 + $0x60] sm:$0xff]  ;;  %v1270_v7 = vld [vmem:[%s10681_s9 + $0x70] sm:$0xff] }
  0x1f   : > { %v1272_v8 = vld [vmem:[%s10681_s9 + $0x80] sm:$0xff]  ;;  %1269 = vst [vmem:[%s10686_s10 + $0x30] sm:$0xff] %v1268_v6  ;;  %1271 = vst [vmem:[%s10686_s10 + $0x38] sm:$0xff] %v1270_v7  ;;  %v1274_v9 = vld [vmem:[%s10681_s9 + $0x90] sm:$0xff] }
  0x20   : > { %1273 = vst [vmem:[%s10686_s10 + $0x40] sm:$0xff] %v1272_v8  ;;  %v1276_v10 = vld [vmem:[%s10681_s9 + $0xa0] sm:$0xff]  ;;  %v1278_v11 = vld [vmem:[%s10681_s9 + $0xb0] sm:$0xff]  ;;  %1275 = vst [vmem:[%s10686_s10 + $0x48] sm:$0xff] %v1274_v9 }
  0x21   : > { %1277 = vst [vmem:[%s10686_s10 + $0x50] sm:$0xff] %v1276_v10  ;;  %1279 = vst [vmem:[%s10686_s10 + $0x58] sm:$0xff] %v1278_v11  ;;  %v1280_v12 = vld [vmem:[%s10681_s9 + $0xc0] sm:$0xff]  ;;  %v1282_v13 = vld [vmem:[%s10681_s9 + $0xd0] sm:$0xff] }
  0x22   : > { %v1284_v14 = vld [vmem:[%s10681_s9 + $0xe0] sm:$0xff]  ;;  %1281 = vst [vmem:[%s10686_s10 + $0x60] sm:$0xff] %v1280_v12  ;;  %1283 = vst [vmem:[%s10686_s10 + $0x68] sm:$0xff] %v1282_v13  ;;  %v1286_v15 = vld [vmem:[%s10681_s9 + $0xf0] sm:$0xff] }
  0x23   : > { %1285 = vst [vmem:[%s10686_s10 + $0x70] sm:$0xff] %v1284_v14  ;;  %v1288_v16 = vld [vmem:[%s10681_s9 + $0x100] sm:$0xff]  ;;  %v1290_v17 = vld [vmem:[%s10681_s9 + $0x110] sm:$0xff]  ;;  %1287 = vst [vmem:[%s10686_s10 + $0x78] sm:$0xff] %v1286_v15 }
  0x24   : > { %1289 = vst [vmem:[%s10686_s10 + $0x80] sm:$0xff] %v1288_v16  ;;  %1291 = vst [vmem:[%s10686_s10 + $0x88] sm:$0xff] %v1290_v17  ;;  %v1292_v18 = vld [vmem:[%s10681_s9 + $0x120] sm:$0xff]  ;;  %v1294_v19 = vld [vmem:[%s10681_s9 + $0x130] sm:$0xff] }
  0x25   : > { %v1296_v20 = vld [vmem:[%s10681_s9 + $0x140] sm:$0xff]  ;;  %1293 = vst [vmem:[%s10686_s10 + $0x90] sm:$0xff] %v1292_v18  ;;  %1295 = vst [vmem:[%s10686_s10 + $0x98] sm:$0xff] %v1294_v19  ;;  %v1298_v21 = vld [vmem:[%s10681_s9 + $0x150] sm:$0xff] }
  0x26   : > { %1297 = vst [vmem:[%s10686_s10 + $0xa0] sm:$0xff] %v1296_v20  ;;  %v1300_v22 = vld [vmem:[%s10681_s9 + $0x160] sm:$0xff]  ;;  %v1302_v23 = vld [vmem:[%s10681_s9 + $0x170] sm:$0xff]  ;;  %1299 = vst [vmem:[%s10686_s10 + $0xa8] sm:$0xff] %v1298_v21 }
  0x27   : > { %1301 = vst [vmem:[%s10686_s10 + $0xb0] sm:$0xff] %v1300_v22  ;;  %1303 = vst [vmem:[%s10686_s10 + $0xb8] sm:$0xff] %v1302_v23  ;;  %v1304_v24 = vld [vmem:[%s10681_s9 + $0x180] sm:$0xff]  ;;  %v1306_v25 = vld [vmem:[%s10681_s9 + $0x190] sm:$0xff] }
  0x28   : > { %v1308_v26 = vld [vmem:[%s10681_s9 + $0x1a0] sm:$0xff]  ;;  %1305 = vst [vmem:[%s10686_s10 + $0xc0] sm:$0xff] %v1304_v24  ;;  %1307 = vst [vmem:[%s10686_s10 + $0xc8] sm:$0xff] %v1306_v25  ;;  %v1310_v27 = vld [vmem:[%s10681_s9 + $0x1b0] sm:$0xff] }
  0x29   : > { %1309 = vst [vmem:[%s10686_s10 + $0xd0] sm:$0xff] %v1308_v26  ;;  %v1312_v28 = vld [vmem:[%s10681_s9 + $0x1c0] sm:$0xff]  ;;  %v1314_v29 = vld [vmem:[%s10681_s9 + $0x1d0] sm:$0xff]  ;;  %1311 = vst [vmem:[%s10686_s10 + $0xd8] sm:$0xff] %v1310_v27 }
  0x2a   : > { %1313 = vst [vmem:[%s10686_s10 + $0xe0] sm:$0xff] %v1312_v28  ;;  %1315 = vst [vmem:[%s10686_s10 + $0xe8] sm:$0xff] %v1314_v29  ;;  %v1316_v30 = vld [vmem:[%s10681_s9 + $0x1e0] sm:$0xff]  ;;  %v1318_v31 = vld [vmem:[%s10681_s9 + $0x1f0] sm:$0xff] }
  0x2b   : > { %v1320_v32 = vld [vmem:[%s10681_s9 + $0x200] sm:$0xff]  ;;  %1317 = vst [vmem:[%s10686_s10 + $0xf0] sm:$0xff] %v1316_v30  ;;  %1319 = vst [vmem:[%s10686_s10 + $0xf8] sm:$0xff] %v1318_v31  ;;  %v1322_v33 = vld [vmem:[%s10681_s9 + $0x210] sm:$0xff] }
  0x2c   : > { %1321 = vst [vmem:[%s10686_s10 + $0x100] sm:$0xff] %v1320_v32  ;;  %v1324_v34 = vld [vmem:[%s10681_s9 + $0x220] sm:$0xff]  ;;  %v1326_v35 = vld [vmem:[%s10681_s9 + $0x230] sm:$0xff]  ;;  %1323 = vst [vmem:[%s10686_s10 + $0x108] sm:$0xff] %v1322_v33 }
  0x2d   : > { %1325 = vst [vmem:[%s10686_s10 + $0x110] sm:$0xff] %v1324_v34  ;;  %1327 = vst [vmem:[%s10686_s10 + $0x118] sm:$0xff] %v1326_v35  ;;  %v1328_v36 = vld [vmem:[%s10681_s9 + $0x240] sm:$0xff]  ;;  %v1330_v37 = vld [vmem:[%s10681_s9 + $0x250] sm:$0xff] }
  0x2e   : > { %v1332_v38 = vld [vmem:[%s10681_s9 + $0x260] sm:$0xff]  ;;  %1329 = vst [vmem:[%s10686_s10 + $0x120] sm:$0xff] %v1328_v36  ;;  %1331 = vst [vmem:[%s10686_s10 + $0x128] sm:$0xff] %v1330_v37  ;;  %v1334_v39 = vld [vmem:[%s10681_s9 + $0x270] sm:$0xff] }
  0x2f   : > { %1333 = vst [vmem:[%s10686_s10 + $0x130] sm:$0xff] %v1332_v38  ;;  %v1336_v40 = vld [vmem:[%s10681_s9 + $0x280] sm:$0xff]  ;;  %v1338_v41 = vld [vmem:[%s10681_s9 + $0x290] sm:$0xff]  ;;  %1335 = vst [vmem:[%s10686_s10 + $0x138] sm:$0xff] %v1334_v39 }
  0x30   : > { %1337 = vst [vmem:[%s10686_s10 + $0x140] sm:$0xff] %v1336_v40  ;;  %1339 = vst [vmem:[%s10686_s10 + $0x148] sm:$0xff] %v1338_v41  ;;  %v1340_v42 = vld [vmem:[%s10681_s9 + $0x2a0] sm:$0xff]  ;;  %v1342_v43 = vld [vmem:[%s10681_s9 + $0x2b0] sm:$0xff] }
  0x31   : > { %v1344_v44 = vld [vmem:[%s10681_s9 + $0x2c0] sm:$0xff]  ;;  %1341 = vst [vmem:[%s10686_s10 + $0x150] sm:$0xff] %v1340_v42  ;;  %1343 = vst [vmem:[%s10686_s10 + $0x158] sm:$0xff] %v1342_v43  ;;  %v1346_v45 = vld [vmem:[%s10681_s9 + $0x2d0] sm:$0xff] }
  0x32   : > { %1345 = vst [vmem:[%s10686_s10 + $0x160] sm:$0xff] %v1344_v44  ;;  %v1348_v46 = vld [vmem:[%s10681_s9 + $0x2e0] sm:$0xff]  ;;  %v1350_v47 = vld [vmem:[%s10681_s9 + $0x2f0] sm:$0xff]  ;;  %1347 = vst [vmem:[%s10686_s10 + $0x168] sm:$0xff] %v1346_v45 }
  0x33   : > { %1349 = vst [vmem:[%s10686_s10 + $0x170] sm:$0xff] %v1348_v46  ;;  %1351 = vst [vmem:[%s10686_s10 + $0x178] sm:$0xff] %v1350_v47  ;;  %v1352_v48 = vld [vmem:[%s10681_s9 + $0x300] sm:$0xff]  ;;  %v1354_v49 = vld [vmem:[%s10681_s9 + $0x310] sm:$0xff] }
  0x34   : > { %v1356_v50 = vld [vmem:[%s10681_s9 + $0x320] sm:$0xff]  ;;  %1353 = vst [vmem:[%s10686_s10 + $0x180] sm:$0xff] %v1352_v48  ;;  %1355 = vst [vmem:[%s10686_s10 + $0x188] sm:$0xff] %v1354_v49  ;;  %v1358_v51 = vld [vmem:[%s10681_s9 + $0x330] sm:$0xff] }
  0x35   : > { %1357 = vst [vmem:[%s10686_s10 + $0x190] sm:$0xff] %v1356_v50  ;;  %v1360_v52 = vld [vmem:[%s10681_s9 + $0x340] sm:$0xff]  ;;  %v1362_v53 = vld [vmem:[%s10681_s9 + $0x350] sm:$0xff]  ;;  %1359 = vst [vmem:[%s10686_s10 + $0x198] sm:$0xff] %v1358_v51 }
  0x36   : > { %1361 = vst [vmem:[%s10686_s10 + $0x1a0] sm:$0xff] %v1360_v52  ;;  %1363 = vst [vmem:[%s10686_s10 + $0x1a8] sm:$0xff] %v1362_v53  ;;  %v1364_v54 = vld [vmem:[%s10681_s9 + $0x360] sm:$0xff]  ;;  %v1366_v55 = vld [vmem:[%s10681_s9 + $0x370] sm:$0xff] }
  0x37   : > { %v1368_v56 = vld [vmem:[%s10681_s9 + $0x380] sm:$0xff]  ;;  %1365 = vst [vmem:[%s10686_s10 + $0x1b0] sm:$0xff] %v1364_v54  ;;  %1367 = vst [vmem:[%s10686_s10 + $0x1b8] sm:$0xff] %v1366_v55  ;;  %v1370_v57 = vld [vmem:[%s10681_s9 + $0x390] sm:$0xff] }
  0x38   : > { %1369 = vst [vmem:[%s10686_s10 + $0x1c0] sm:$0xff] %v1368_v56  ;;  %v1372_v58 = vld [vmem:[%s10681_s9 + $0x3a0] sm:$0xff]  ;;  %v1374_v59 = vld [vmem:[%s10681_s9 + $0x3b0] sm:$0xff]  ;;  %1371 = vst [vmem:[%s10686_s10 + $0x1c8] sm:$0xff] %v1370_v57 }
  0x39   : > { %1373 = vst [vmem:[%s10686_s10 + $0x1d0] sm:$0xff] %v1372_v58  ;;  %1375 = vst [vmem:[%s10686_s10 + $0x1d8] sm:$0xff] %v1374_v59  ;;  %v1376_v60 = vld [vmem:[%s10681_s9 + $0x3c0] sm:$0xff]  ;;  %v1378_v61 = vld [vmem:[%s10681_s9 + $0x3d0] sm:$0xff] }
  0x3a   : > { %v1380_v62 = vld [vmem:[%s10681_s9 + $0x3e0] sm:$0xff]  ;;  %1377 = vst [vmem:[%s10686_s10 + $0x1e0] sm:$0xff] %v1376_v60  ;;  %1379 = vst [vmem:[%s10686_s10 + $0x1e8] sm:$0xff] %v1378_v61  ;;  %v1382_v63 = vld [vmem:[%s10681_s9 + $0x3f0] sm:$0xff] }
  0x3b   : > { %1381 = vst [vmem:[%s10686_s10 + $0x1f0] sm:$0xff] %v1380_v62  ;;  %v1384_v0 = vld [vmem:[%s10681_s9 + $0x400] sm:$0xff]  ;;  %v1386_v1 = vld [vmem:[%s10681_s9 + $0x410] sm:$0xff]  ;;  %1383 = vst [vmem:[%s10686_s10 + $0x1f8] sm:$0xff] %v1382_v63 }
  0x3c   : > { %1385 = vst [vmem:[%s10686_s10 + $0x200] sm:$0xff] %v1384_v0  ;;  %1387 = vst [vmem:[%s10686_s10 + $0x208] sm:$0xff] %v1386_v1  ;;  %v1388_v2 = vld [vmem:[%s10681_s9 + $0x420] sm:$0xff]  ;;  %v1390_v3 = vld [vmem:[%s10681_s9 + $0x430] sm:$0xff] }
  0x3d   : > { %v1392_v4 = vld [vmem:[%s10681_s9 + $0x440] sm:$0xff]  ;;  %1389 = vst [vmem:[%s10686_s10 + $0x210] sm:$0xff] %v1388_v2  ;;  %1391 = vst [vmem:[%s10686_s10 + $0x218] sm:$0xff] %v1390_v3  ;;  %v1394_v5 = vld [vmem:[%s10681_s9 + $0x450] sm:$0xff] }
  0x3e   : > { %1393 = vst [vmem:[%s10686_s10 + $0x220] sm:$0xff] %v1392_v4  ;;  %v1396_v6 = vld [vmem:[%s10681_s9 + $0x460] sm:$0xff]  ;;  %v1398_v7 = vld [vmem:[%s10681_s9 + $0x470] sm:$0xff]  ;;  %1395 = vst [vmem:[%s10686_s10 + $0x228] sm:$0xff] %v1394_v5 }
  0x3f   : > { %1397 = vst [vmem:[%s10686_s10 + $0x230] sm:$0xff] %v1396_v6  ;;  %1399 = vst [vmem:[%s10686_s10 + $0x238] sm:$0xff] %v1398_v7  ;;  %v1400_v8 = vld [vmem:[%s10681_s9 + $0x480] sm:$0xff]  ;;  %v1402_v9 = vld [vmem:[%s10681_s9 + $0x490] sm:$0xff] }
  0x40   : > { %v1404_v10 = vld [vmem:[%s10681_s9 + $0x4a0] sm:$0xff]  ;;  %1401 = vst [vmem:[%s10686_s10 + $0x240] sm:$0xff] %v1400_v8  ;;  %1403 = vst [vmem:[%s10686_s10 + $0x248] sm:$0xff] %v1402_v9  ;;  %v1406_v11 = vld [vmem:[%s10681_s9 + $0x4b0] sm:$0xff] }
  0x41   : > { %1405 = vst [vmem:[%s10686_s10 + $0x250] sm:$0xff] %v1404_v10  ;;  %v1408_v12 = vld [vmem:[%s10681_s9 + $0x4c0] sm:$0xff]  ;;  %v1410_v13 = vld [vmem:[%s10681_s9 + $0x4d0] sm:$0xff]  ;;  %1407 = vst [vmem:[%s10686_s10 + $0x258] sm:$0xff] %v1406_v11 }
  0x42   : > { %1409 = vst [vmem:[%s10686_s10 + $0x260] sm:$0xff] %v1408_v12  ;;  %1411 = vst [vmem:[%s10686_s10 + $0x268] sm:$0xff] %v1410_v13  ;;  %v1412_v14 = vld [vmem:[%s10681_s9 + $0x4e0] sm:$0xff]  ;;  %v1414_v15 = vld [vmem:[%s10681_s9 + $0x4f0] sm:$0xff] }
  0x43   : > { %v1416_v16 = vld [vmem:[%s10681_s9 + $0x500] sm:$0xff]  ;;  %1413 = vst [vmem:[%s10686_s10 + $0x270] sm:$0xff] %v1412_v14  ;;  %1415 = vst [vmem:[%s10686_s10 + $0x278] sm:$0xff] %v1414_v15  ;;  %v1418_v17 = vld [vmem:[%s10681_s9 + $0x510] sm:$0xff] }
  0x44   : > { %1417 = vst [vmem:[%s10686_s10 + $0x280] sm:$0xff] %v1416_v16  ;;  %v1420_v18 = vld [vmem:[%s10681_s9 + $0x520] sm:$0xff]  ;;  %v1422_v19 = vld [vmem:[%s10681_s9 + $0x530] sm:$0xff]  ;;  %1419 = vst [vmem:[%s10686_s10 + $0x288] sm:$0xff] %v1418_v17 }
  0x45   : > { %1421 = vst [vmem:[%s10686_s10 + $0x290] sm:$0xff] %v1420_v18  ;;  %1423 = vst [vmem:[%s10686_s10 + $0x298] sm:$0xff] %v1422_v19  ;;  %v1424_v20 = vld [vmem:[%s10681_s9 + $0x540] sm:$0xff]  ;;  %v1426_v21 = vld [vmem:[%s10681_s9 + $0x550] sm:$0xff] }
  0x46   : > { %v1428_v22 = vld [vmem:[%s10681_s9 + $0x560] sm:$0xff]  ;;  %1425 = vst [vmem:[%s10686_s10 + $0x2a0] sm:$0xff] %v1424_v20  ;;  %1427 = vst [vmem:[%s10686_s10 + $0x2a8] sm:$0xff] %v1426_v21  ;;  %v1430_v23 = vld [vmem:[%s10681_s9 + $0x570] sm:$0xff] }
  0x47   : > { %1429 = vst [vmem:[%s10686_s10 + $0x2b0] sm:$0xff] %v1428_v22  ;;  %v1432_v24 = vld [vmem:[%s10681_s9 + $0x580] sm:$0xff]  ;;  %v1434_v25 = vld [vmem:[%s10681_s9 + $0x590] sm:$0xff]  ;;  %1431 = vst [vmem:[%s10686_s10 + $0x2b8] sm:$0xff] %v1430_v23 }
  0x48   : > { %1433 = vst [vmem:[%s10686_s10 + $0x2c0] sm:$0xff] %v1432_v24  ;;  %1435 = vst [vmem:[%s10686_s10 + $0x2c8] sm:$0xff] %v1434_v25  ;;  %v1436_v26 = vld [vmem:[%s10681_s9 + $0x5a0] sm:$0xff]  ;;  %v1438_v27 = vld [vmem:[%s10681_s9 + $0x5b0] sm:$0xff] }
  0x49   : > { %v1440_v28 = vld [vmem:[%s10681_s9 + $0x5c0] sm:$0xff]  ;;  %1437 = vst [vmem:[%s10686_s10 + $0x2d0] sm:$0xff] %v1436_v26  ;;  %1439 = vst [vmem:[%s10686_s10 + $0x2d8] sm:$0xff] %v1438_v27  ;;  %v1442_v29 = vld [vmem:[%s10681_s9 + $0x5d0] sm:$0xff] }
  0x4a   : > { %1441 = vst [vmem:[%s10686_s10 + $0x2e0] sm:$0xff] %v1440_v28  ;;  %v1444_v30 = vld [vmem:[%s10681_s9 + $0x5e0] sm:$0xff]  ;;  %v1446_v31 = vld [vmem:[%s10681_s9 + $0x5f0] sm:$0xff]  ;;  %1443 = vst [vmem:[%s10686_s10 + $0x2e8] sm:$0xff] %v1442_v29 }
  0x4b   : > { %1445 = vst [vmem:[%s10686_s10 + $0x2f0] sm:$0xff] %v1444_v30  ;;  %1447 = vst [vmem:[%s10686_s10 + $0x2f8] sm:$0xff] %v1446_v31  ;;  %v1448_v32 = vld [vmem:[%s10681_s9 + $0x600] sm:$0xff]  ;;  %v1450_v33 = vld [vmem:[%s10681_s9 + $0x610] sm:$0xff] }
  0x4c   : > { %v1452_v34 = vld [vmem:[%s10681_s9 + $0x620] sm:$0xff]  ;;  %1449 = vst [vmem:[%s10686_s10 + $0x300] sm:$0xff] %v1448_v32  ;;  %1451 = vst [vmem:[%s10686_s10 + $0x308] sm:$0xff] %v1450_v33  ;;  %v1454_v35 = vld [vmem:[%s10681_s9 + $0x630] sm:$0xff] }
  0x4d   : > { %1453 = vst [vmem:[%s10686_s10 + $0x310] sm:$0xff] %v1452_v34  ;;  %v1456_v36 = vld [vmem:[%s10681_s9 + $0x640] sm:$0xff]  ;;  %v1458_v37 = vld [vmem:[%s10681_s9 + $0x650] sm:$0xff]  ;;  %1455 = vst [vmem:[%s10686_s10 + $0x318] sm:$0xff] %v1454_v35 }
  0x4e   : > { %1457 = vst [vmem:[%s10686_s10 + $0x320] sm:$0xff] %v1456_v36  ;;  %1459 = vst [vmem:[%s10686_s10 + $0x328] sm:$0xff] %v1458_v37  ;;  %v1460_v38 = vld [vmem:[%s10681_s9 + $0x660] sm:$0xff]  ;;  %v1462_v39 = vld [vmem:[%s10681_s9 + $0x670] sm:$0xff] }
  0x4f   : > { %v1464_v40 = vld [vmem:[%s10681_s9 + $0x680] sm:$0xff]  ;;  %1461 = vst [vmem:[%s10686_s10 + $0x330] sm:$0xff] %v1460_v38  ;;  %1463 = vst [vmem:[%s10686_s10 + $0x338] sm:$0xff] %v1462_v39  ;;  %v1466_v41 = vld [vmem:[%s10681_s9 + $0x690] sm:$0xff] }
  0x50   : > { %1465 = vst [vmem:[%s10686_s10 + $0x340] sm:$0xff] %v1464_v40  ;;  %v1468_v42 = vld [vmem:[%s10681_s9 + $0x6a0] sm:$0xff]  ;;  %v1470_v43 = vld [vmem:[%s10681_s9 + $0x6b0] sm:$0xff]  ;;  %1467 = vst [vmem:[%s10686_s10 + $0x348] sm:$0xff] %v1466_v41 }
  0x51   : > { %1469 = vst [vmem:[%s10686_s10 + $0x350] sm:$0xff] %v1468_v42  ;;  %1471 = vst [vmem:[%s10686_s10 + $0x358] sm:$0xff] %v1470_v43  ;;  %v1472_v44 = vld [vmem:[%s10681_s9 + $0x6c0] sm:$0xff]  ;;  %v1474_v45 = vld [vmem:[%s10681_s9 + $0x6d0] sm:$0xff] }
  0x52   : > { %v1476_v46 = vld [vmem:[%s10681_s9 + $0x6e0] sm:$0xff]  ;;  %1473 = vst [vmem:[%s10686_s10 + $0x360] sm:$0xff] %v1472_v44  ;;  %1475 = vst [vmem:[%s10686_s10 + $0x368] sm:$0xff] %v1474_v45  ;;  %v1478_v47 = vld [vmem:[%s10681_s9 + $0x6f0] sm:$0xff] }
  0x53   : > { %1477 = vst [vmem:[%s10686_s10 + $0x370] sm:$0xff] %v1476_v46  ;;  %v1480_v48 = vld [vmem:[%s10681_s9 + $0x700] sm:$0xff]  ;;  %v1482_v49 = vld [vmem:[%s10681_s9 + $0x710] sm:$0xff]  ;;  %1479 = vst [vmem:[%s10686_s10 + $0x378] sm:$0xff] %v1478_v47 }
  0x54   : > { %1481 = vst [vmem:[%s10686_s10 + $0x380] sm:$0xff] %v1480_v48  ;;  %1483 = vst [vmem:[%s10686_s10 + $0x388] sm:$0xff] %v1482_v49  ;;  %v1484_v50 = vld [vmem:[%s10681_s9 + $0x720] sm:$0xff]  ;;  %v1486_v51 = vld [vmem:[%s10681_s9 + $0x730] sm:$0xff] }
  0x55   : > { %v1488_v52 = vld [vmem:[%s10681_s9 + $0x740] sm:$0xff]  ;;  %1485 = vst [vmem:[%s10686_s10 + $0x390] sm:$0xff] %v1484_v50  ;;  %1487 = vst [vmem:[%s10686_s10 + $0x398] sm:$0xff] %v1486_v51  ;;  %v1490_v53 = vld [vmem:[%s10681_s9 + $0x750] sm:$0xff] }
  0x56   : > { %1489 = vst [vmem:[%s10686_s10 + $0x3a0] sm:$0xff] %v1488_v52  ;;  %v1492_v54 = vld [vmem:[%s10681_s9 + $0x760] sm:$0xff]  ;;  %v1494_v55 = vld [vmem:[%s10681_s9 + $0x770] sm:$0xff]  ;;  %1491 = vst [vmem:[%s10686_s10 + $0x3a8] sm:$0xff] %v1490_v53 }
  0x57   : > { %1493 = vst [vmem:[%s10686_s10 + $0x3b0] sm:$0xff] %v1492_v54  ;;  %1495 = vst [vmem:[%s10686_s10 + $0x3b8] sm:$0xff] %v1494_v55  ;;  %v1496_v56 = vld [vmem:[%s10681_s9 + $0x780] sm:$0xff]  ;;  %v1498_v57 = vld [vmem:[%s10681_s9 + $0x790] sm:$0xff] }
  0x58   : > { %v1500_v58 = vld [vmem:[%s10681_s9 + $0x7a0] sm:$0xff]  ;;  %1497 = vst [vmem:[%s10686_s10 + $0x3c0] sm:$0xff] %v1496_v56  ;;  %1499 = vst [vmem:[%s10686_s10 + $0x3c8] sm:$0xff] %v1498_v57  ;;  %v1502_v59 = vld [vmem:[%s10681_s9 + $0x7b0] sm:$0xff] }
  0x59   : > { %1501 = vst [vmem:[%s10686_s10 + $0x3d0] sm:$0xff] %v1500_v58  ;;  %v1504_v60 = vld [vmem:[%s10681_s9 + $0x7c0] sm:$0xff]  ;;  %v1506_v61 = vld [vmem:[%s10681_s9 + $0x7d0] sm:$0xff]  ;;  %1503 = vst [vmem:[%s10686_s10 + $0x3d8] sm:$0xff] %v1502_v59 }
  0x5a   : > { %1505 = vst [vmem:[%s10686_s10 + $0x3e0] sm:$0xff] %v1504_v60  ;;  %1507 = vst [vmem:[%s10686_s10 + $0x3e8] sm:$0xff] %v1506_v61  ;;  %v1508_v62 = vld [vmem:[%s10681_s9 + $0x7e0] sm:$0xff]  ;;  %v1510_v63 = vld [vmem:[%s10681_s9 + $0x7f0] sm:$0xff] }
  0x5b   : > { %v1512_v0 = vld [vmem:[%s10681_s9 + $0x800] sm:$0xff]  ;;  %1509 = vst [vmem:[%s10686_s10 + $0x3f0] sm:$0xff] %v1508_v62  ;;  %1511 = vst [vmem:[%s10686_s10 + $0x3f8] sm:$0xff] %v1510_v63  ;;  %v1514_v1 = vld [vmem:[%s10681_s9 + $0x810] sm:$0xff] }
  0x5c   : > { %1513 = vst [vmem:[%s10686_s10 + $0x400] sm:$0xff] %v1512_v0  ;;  %v1516_v2 = vld [vmem:[%s10681_s9 + $0x820] sm:$0xff]  ;;  %v1518_v3 = vld [vmem:[%s10681_s9 + $0x830] sm:$0xff]  ;;  %1515 = vst [vmem:[%s10686_s10 + $0x408] sm:$0xff] %v1514_v1 }
  0x5d   : > { %1517 = vst [vmem:[%s10686_s10 + $0x410] sm:$0xff] %v1516_v2  ;;  %1519 = vst [vmem:[%s10686_s10 + $0x418] sm:$0xff] %v1518_v3  ;;  %v1520_v4 = vld [vmem:[%s10681_s9 + $0x840] sm:$0xff]  ;;  %v1522_v5 = vld [vmem:[%s10681_s9 + $0x850] sm:$0xff] }
  0x5e   : > { %v1524_v6 = vld [vmem:[%s10681_s9 + $0x860] sm:$0xff]  ;;  %1521 = vst [vmem:[%s10686_s10 + $0x420] sm:$0xff] %v1520_v4  ;;  %1523 = vst [vmem:[%s10686_s10 + $0x428] sm:$0xff] %v1522_v5  ;;  %v1526_v7 = vld [vmem:[%s10681_s9 + $0x870] sm:$0xff] }
  0x5f   : > { %1525 = vst [vmem:[%s10686_s10 + $0x430] sm:$0xff] %v1524_v6  ;;  %v1528_v8 = vld [vmem:[%s10681_s9 + $0x880] sm:$0xff]  ;;  %v1530_v9 = vld [vmem:[%s10681_s9 + $0x890] sm:$0xff]  ;;  %1527 = vst [vmem:[%s10686_s10 + $0x438] sm:$0xff] %v1526_v7 }
  0x60   : > { %1529 = vst [vmem:[%s10686_s10 + $0x440] sm:$0xff] %v1528_v8  ;;  %1531 = vst [vmem:[%s10686_s10 + $0x448] sm:$0xff] %v1530_v9  ;;  %v1532_v10 = vld [vmem:[%s10681_s9 + $0x8a0] sm:$0xff]  ;;  %v1534_v11 = vld [vmem:[%s10681_s9 + $0x8b0] sm:$0xff] }
  0x61   : > { %v1536_v12 = vld [vmem:[%s10681_s9 + $0x8c0] sm:$0xff]  ;;  %1533 = vst [vmem:[%s10686_s10 + $0x450] sm:$0xff] %v1532_v10  ;;  %1535 = vst [vmem:[%s10686_s10 + $0x458] sm:$0xff] %v1534_v11  ;;  %v1538_v13 = vld [vmem:[%s10681_s9 + $0x8d0] sm:$0xff] }
  0x62   : > { %1537 = vst [vmem:[%s10686_s10 + $0x460] sm:$0xff] %v1536_v12  ;;  %v1540_v14 = vld [vmem:[%s10681_s9 + $0x8e0] sm:$0xff]  ;;  %v1542_v15 = vld [vmem:[%s10681_s9 + $0x8f0] sm:$0xff]  ;;  %1539 = vst [vmem:[%s10686_s10 + $0x468] sm:$0xff] %v1538_v13 }
  0x63   : > { %1541 = vst [vmem:[%s10686_s10 + $0x470] sm:$0xff] %v1540_v14  ;;  %1543 = vst [vmem:[%s10686_s10 + $0x478] sm:$0xff] %v1542_v15  ;;  %v1544_v16 = vld [vmem:[%s10681_s9 + $0x900] sm:$0xff]  ;;  %v1546_v17 = vld [vmem:[%s10681_s9 + $0x910] sm:$0xff] }
  0x64   : > { %v1548_v18 = vld [vmem:[%s10681_s9 + $0x920] sm:$0xff]  ;;  %1545 = vst [vmem:[%s10686_s10 + $0x480] sm:$0xff] %v1544_v16  ;;  %1547 = vst [vmem:[%s10686_s10 + $0x488] sm:$0xff] %v1546_v17  ;;  %v1550_v19 = vld [vmem:[%s10681_s9 + $0x930] sm:$0xff] }
  0x65   : > { %1549 = vst [vmem:[%s10686_s10 + $0x490] sm:$0xff] %v1548_v18  ;;  %v1552_v20 = vld [vmem:[%s10681_s9 + $0x940] sm:$0xff]  ;;  %v1554_v21 = vld [vmem:[%s10681_s9 + $0x950] sm:$0xff]  ;;  %1551 = vst [vmem:[%s10686_s10 + $0x498] sm:$0xff] %v1550_v19 }
  0x66   : > { %1553 = vst [vmem:[%s10686_s10 + $0x4a0] sm:$0xff] %v1552_v20  ;;  %1555 = vst [vmem:[%s10686_s10 + $0x4a8] sm:$0xff] %v1554_v21  ;;  %v1556_v22 = vld [vmem:[%s10681_s9 + $0x960] sm:$0xff]  ;;  %v1558_v23 = vld [vmem:[%s10681_s9 + $0x970] sm:$0xff] }
  0x67   : > { %v1560_v24 = vld [vmem:[%s10681_s9 + $0x980] sm:$0xff]  ;;  %1557 = vst [vmem:[%s10686_s10 + $0x4b0] sm:$0xff] %v1556_v22  ;;  %1559 = vst [vmem:[%s10686_s10 + $0x4b8] sm:$0xff] %v1558_v23  ;;  %v1562_v25 = vld [vmem:[%s10681_s9 + $0x990] sm:$0xff] }
  0x68   : > { %1561 = vst [vmem:[%s10686_s10 + $0x4c0] sm:$0xff] %v1560_v24  ;;  %v1564_v26 = vld [vmem:[%s10681_s9 + $0x9a0] sm:$0xff]  ;;  %v1566_v27 = vld [vmem:[%s10681_s9 + $0x9b0] sm:$0xff]  ;;  %1563 = vst [vmem:[%s10686_s10 + $0x4c8] sm:$0xff] %v1562_v25 }
  0x69   : > { %1565 = vst [vmem:[%s10686_s10 + $0x4d0] sm:$0xff] %v1564_v26  ;;  %1567 = vst [vmem:[%s10686_s10 + $0x4d8] sm:$0xff] %v1566_v27  ;;  %v1568_v28 = vld [vmem:[%s10681_s9 + $0x9c0] sm:$0xff]  ;;  %v1570_v29 = vld [vmem:[%s10681_s9 + $0x9d0] sm:$0xff] }
  0x6a   : > { %v1572_v30 = vld [vmem:[%s10681_s9 + $0x9e0] sm:$0xff]  ;;  %1569 = vst [vmem:[%s10686_s10 + $0x4e0] sm:$0xff] %v1568_v28  ;;  %1571 = vst [vmem:[%s10686_s10 + $0x4e8] sm:$0xff] %v1570_v29  ;;  %v1574_v31 = vld [vmem:[%s10681_s9 + $0x9f0] sm:$0xff] }
  0x6b   : > { %1573 = vst [vmem:[%s10686_s10 + $0x4f0] sm:$0xff] %v1572_v30  ;;  %v1576_v32 = vld [vmem:[%s10681_s9 + $0xa00] sm:$0xff]  ;;  %v1578_v33 = vld [vmem:[%s10681_s9 + $0xa10] sm:$0xff]  ;;  %1575 = vst [vmem:[%s10686_s10 + $0x4f8] sm:$0xff] %v1574_v31 }
  0x6c   : > { %1577 = vst [vmem:[%s10686_s10 + $0x500] sm:$0xff] %v1576_v32  ;;  %1579 = vst [vmem:[%s10686_s10 + $0x508] sm:$0xff] %v1578_v33  ;;  %v1580_v34 = vld [vmem:[%s10681_s9 + $0xa20] sm:$0xff]  ;;  %v1582_v35 = vld [vmem:[%s10681_s9 + $0xa30] sm:$0xff] }
  0x6d   : > { %v1584_v36 = vld [vmem:[%s10681_s9 + $0xa40] sm:$0xff]  ;;  %1581 = vst [vmem:[%s10686_s10 + $0x510] sm:$0xff] %v1580_v34  ;;  %1583 = vst [vmem:[%s10686_s10 + $0x518] sm:$0xff] %v1582_v35  ;;  %v1586_v37 = vld [vmem:[%s10681_s9 + $0xa50] sm:$0xff] }
  0x6e   : > { %1585 = vst [vmem:[%s10686_s10 + $0x520] sm:$0xff] %v1584_v36  ;;  %v1588_v38 = vld [vmem:[%s10681_s9 + $0xa60] sm:$0xff]  ;;  %v1590_v39 = vld [vmem:[%s10681_s9 + $0xa70] sm:$0xff]  ;;  %1587 = vst [vmem:[%s10686_s10 + $0x528] sm:$0xff] %v1586_v37 }
  0x6f   : > { %1589 = vst [vmem:[%s10686_s10 + $0x530] sm:$0xff] %v1588_v38  ;;  %1591 = vst [vmem:[%s10686_s10 + $0x538] sm:$0xff] %v1590_v39  ;;  %v1592_v40 = vld [vmem:[%s10681_s9 + $0xa80] sm:$0xff]  ;;  %v1594_v41 = vld [vmem:[%s10681_s9 + $0xa90] sm:$0xff] }
  0x70   : > { %v1596_v42 = vld [vmem:[%s10681_s9 + $0xaa0] sm:$0xff]  ;;  %1593 = vst [vmem:[%s10686_s10 + $0x540] sm:$0xff] %v1592_v40  ;;  %1595 = vst [vmem:[%s10686_s10 + $0x548] sm:$0xff] %v1594_v41  ;;  %v1598_v43 = vld [vmem:[%s10681_s9 + $0xab0] sm:$0xff] }
  0x71   : > { %1597 = vst [vmem:[%s10686_s10 + $0x550] sm:$0xff] %v1596_v42  ;;  %v1600_v44 = vld [vmem:[%s10681_s9 + $0xac0] sm:$0xff]  ;;  %v1602_v45 = vld [vmem:[%s10681_s9 + $0xad0] sm:$0xff]  ;;  %1599 = vst [vmem:[%s10686_s10 + $0x558] sm:$0xff] %v1598_v43 }
  0x72   : > { %1601 = vst [vmem:[%s10686_s10 + $0x560] sm:$0xff] %v1600_v44  ;;  %1603 = vst [vmem:[%s10686_s10 + $0x568] sm:$0xff] %v1602_v45  ;;  %v1604_v46 = vld [vmem:[%s10681_s9 + $0xae0] sm:$0xff]  ;;  %v1606_v47 = vld [vmem:[%s10681_s9 + $0xaf0] sm:$0xff] }
  0x73   : > { %v1608_v48 = vld [vmem:[%s10681_s9 + $0xb00] sm:$0xff]  ;;  %1605 = vst [vmem:[%s10686_s10 + $0x570] sm:$0xff] %v1604_v46  ;;  %1607 = vst [vmem:[%s10686_s10 + $0x578] sm:$0xff] %v1606_v47  ;;  %v1610_v49 = vld [vmem:[%s10681_s9 + $0xb10] sm:$0xff] }
  0x74   : > { %1609 = vst [vmem:[%s10686_s10 + $0x580] sm:$0xff] %v1608_v48  ;;  %v1612_v50 = vld [vmem:[%s10681_s9 + $0xb20] sm:$0xff]  ;;  %v1614_v51 = vld [vmem:[%s10681_s9 + $0xb30] sm:$0xff]  ;;  %1611 = vst [vmem:[%s10686_s10 + $0x588] sm:$0xff] %v1610_v49 }
  0x75   : > { %1613 = vst [vmem:[%s10686_s10 + $0x590] sm:$0xff] %v1612_v50  ;;  %1615 = vst [vmem:[%s10686_s10 + $0x598] sm:$0xff] %v1614_v51  ;;  %v1616_v52 = vld [vmem:[%s10681_s9 + $0xb40] sm:$0xff]  ;;  %v1618_v53 = vld [vmem:[%s10681_s9 + $0xb50] sm:$0xff] }
  0x76   : > { %v1620_v54 = vld [vmem:[%s10681_s9 + $0xb60] sm:$0xff]  ;;  %1617 = vst [vmem:[%s10686_s10 + $0x5a0] sm:$0xff] %v1616_v52  ;;  %1619 = vst [vmem:[%s10686_s10 + $0x5a8] sm:$0xff] %v1618_v53  ;;  %v1622_v55 = vld [vmem:[%s10681_s9 + $0xb70] sm:$0xff] }
  0x77   : > { %1621 = vst [vmem:[%s10686_s10 + $0x5b0] sm:$0xff] %v1620_v54  ;;  %v1624_v56 = vld [vmem:[%s10681_s9 + $0xb80] sm:$0xff]  ;;  %v1626_v57 = vld [vmem:[%s10681_s9 + $0xb90] sm:$0xff]  ;;  %1623 = vst [vmem:[%s10686_s10 + $0x5b8] sm:$0xff] %v1622_v55 }
  0x78   : > { %1625 = vst [vmem:[%s10686_s10 + $0x5c0] sm:$0xff] %v1624_v56  ;;  %1627 = vst [vmem:[%s10686_s10 + $0x5c8] sm:$0xff] %v1626_v57  ;;  %v1628_v58 = vld [vmem:[%s10681_s9 + $0xba0] sm:$0xff]  ;;  %v1630_v59 = vld [vmem:[%s10681_s9 + $0xbb0] sm:$0xff] }
  0x79   : > { %v1632_v60 = vld [vmem:[%s10681_s9 + $0xbc0] sm:$0xff]  ;;  %1629 = vst [vmem:[%s10686_s10 + $0x5d0] sm:$0xff] %v1628_v58  ;;  %1631 = vst [vmem:[%s10686_s10 + $0x5d8] sm:$0xff] %v1630_v59  ;;  %v1634_v61 = vld [vmem:[%s10681_s9 + $0xbd0] sm:$0xff] }
  0x7a   : > { %1633 = vst [vmem:[%s10686_s10 + $0x5e0] sm:$0xff] %v1632_v60  ;;  %v1636_v62 = vld [vmem:[%s10681_s9 + $0xbe0] sm:$0xff]  ;;  %v1638_v63 = vld [vmem:[%s10681_s9 + $0xbf0] sm:$0xff]  ;;  %1635 = vst [vmem:[%s10686_s10 + $0x5e8] sm:$0xff] %v1634_v61 }
  0x7b   : > { %1637 = vst [vmem:[%s10686_s10 + $0x5f0] sm:$0xff] %v1636_v62  ;;  %1639 = vst [vmem:[%s10686_s10 + $0x5f8] sm:$0xff] %v1638_v63  ;;  %v1640_v0 = vld [vmem:[%s10681_s9 + $0xc00] sm:$0xff]  ;;  %v1642_v1 = vld [vmem:[%s10681_s9 + $0xc10] sm:$0xff] }
  0x7c   : > { %v1644_v2 = vld [vmem:[%s10681_s9 + $0xc20] sm:$0xff]  ;;  %1641 = vst [vmem:[%s10686_s10 + $0x600] sm:$0xff] %v1640_v0  ;;  %1643 = vst [vmem:[%s10686_s10 + $0x608] sm:$0xff] %v1642_v1  ;;  %v1646_v3 = vld [vmem:[%s10681_s9 + $0xc30] sm:$0xff] }
  0x7d   : > { %1645 = vst [vmem:[%s10686_s10 + $0x610] sm:$0xff] %v1644_v2  ;;  %v1648_v4 = vld [vmem:[%s10681_s9 + $0xc40] sm:$0xff]  ;;  %v1650_v5 = vld [vmem:[%s10681_s9 + $0xc50] sm:$0xff]  ;;  %1647 = vst [vmem:[%s10686_s10 + $0x618] sm:$0xff] %v1646_v3 }
  0x7e   : > { %1649 = vst [vmem:[%s10686_s10 + $0x620] sm:$0xff] %v1648_v4  ;;  %1651 = vst [vmem:[%s10686_s10 + $0x628] sm:$0xff] %v1650_v5  ;;  %v1652_v6 = vld [vmem:[%s10681_s9 + $0xc60] sm:$0xff]  ;;  %v1654_v7 = vld [vmem:[%s10681_s9 + $0xc70] sm:$0xff] }
  0x7f   : > { %v1656_v8 = vld [vmem:[%s10681_s9 + $0xc80] sm:$0xff]  ;;  %1653 = vst [vmem:[%s10686_s10 + $0x630] sm:$0xff] %v1652_v6  ;;  %1655 = vst [vmem:[%s10686_s10 + $0x638] sm:$0xff] %v1654_v7  ;;  %v1658_v9 = vld [vmem:[%s10681_s9 + $0xc90] sm:$0xff] }
  0x80   : > { %1657 = vst [vmem:[%s10686_s10 + $0x640] sm:$0xff] %v1656_v8  ;;  %v1660_v10 = vld [vmem:[%s10681_s9 + $0xca0] sm:$0xff]  ;;  %v1662_v11 = vld [vmem:[%s10681_s9 + $0xcb0] sm:$0xff]  ;;  %1659 = vst [vmem:[%s10686_s10 + $0x648] sm:$0xff] %v1658_v9 }
  0x81   : > { %1661 = vst [vmem:[%s10686_s10 + $0x650] sm:$0xff] %v1660_v10  ;;  %1663 = vst [vmem:[%s10686_s10 + $0x658] sm:$0xff] %v1662_v11  ;;  %v1664_v12 = vld [vmem:[%s10681_s9 + $0xcc0] sm:$0xff]  ;;  %v1666_v13 = vld [vmem:[%s10681_s9 + $0xcd0] sm:$0xff] }
  0x82   : > { %v1668_v14 = vld [vmem:[%s10681_s9 + $0xce0] sm:$0xff]  ;;  %1665 = vst [vmem:[%s10686_s10 + $0x660] sm:$0xff] %v1664_v12  ;;  %1667 = vst [vmem:[%s10686_s10 + $0x668] sm:$0xff] %v1666_v13  ;;  %v1670_v15 = vld [vmem:[%s10681_s9 + $0xcf0] sm:$0xff] }
  0x83   : > { %1669 = vst [vmem:[%s10686_s10 + $0x670] sm:$0xff] %v1668_v14  ;;  %v1672_v16 = vld [vmem:[%s10681_s9 + $0xd00] sm:$0xff]  ;;  %v1674_v17 = vld [vmem:[%s10681_s9 + $0xd10] sm:$0xff]  ;;  %1671 = vst [vmem:[%s10686_s10 + $0x678] sm:$0xff] %v1670_v15 }
  0x84   : > { %1673 = vst [vmem:[%s10686_s10 + $0x680] sm:$0xff] %v1672_v16  ;;  %1675 = vst [vmem:[%s10686_s10 + $0x688] sm:$0xff] %v1674_v17  ;;  %v1676_v18 = vld [vmem:[%s10681_s9 + $0xd20] sm:$0xff]  ;;  %v1678_v19 = vld [vmem:[%s10681_s9 + $0xd30] sm:$0xff] }
  0x85   : > { %v1680_v20 = vld [vmem:[%s10681_s9 + $0xd40] sm:$0xff]  ;;  %1677 = vst [vmem:[%s10686_s10 + $0x690] sm:$0xff] %v1676_v18  ;;  %1679 = vst [vmem:[%s10686_s10 + $0x698] sm:$0xff] %v1678_v19  ;;  %v1682_v21 = vld [vmem:[%s10681_s9 + $0xd50] sm:$0xff] }
  0x86   : > { %1681 = vst [vmem:[%s10686_s10 + $0x6a0] sm:$0xff] %v1680_v20  ;;  %v1684_v22 = vld [vmem:[%s10681_s9 + $0xd60] sm:$0xff]  ;;  %v1686_v23 = vld [vmem:[%s10681_s9 + $0xd70] sm:$0xff]  ;;  %1683 = vst [vmem:[%s10686_s10 + $0x6a8] sm:$0xff] %v1682_v21 }
  0x87   : > { %1685 = vst [vmem:[%s10686_s10 + $0x6b0] sm:$0xff] %v1684_v22  ;;  %1687 = vst [vmem:[%s10686_s10 + $0x6b8] sm:$0xff] %v1686_v23  ;;  %v1688_v24 = vld [vmem:[%s10681_s9 + $0xd80] sm:$0xff]  ;;  %v1690_v25 = vld [vmem:[%s10681_s9 + $0xd90] sm:$0xff] }
  0x88   : > { %v1692_v26 = vld [vmem:[%s10681_s9 + $0xda0] sm:$0xff]  ;;  %1689 = vst [vmem:[%s10686_s10 + $0x6c0] sm:$0xff] %v1688_v24  ;;  %1691 = vst [vmem:[%s10686_s10 + $0x6c8] sm:$0xff] %v1690_v25  ;;  %v1694_v27 = vld [vmem:[%s10681_s9 + $0xdb0] sm:$0xff] }
  0x89   : > { %1693 = vst [vmem:[%s10686_s10 + $0x6d0] sm:$0xff] %v1692_v26  ;;  %v1696_v28 = vld [vmem:[%s10681_s9 + $0xdc0] sm:$0xff]  ;;  %v1698_v29 = vld [vmem:[%s10681_s9 + $0xdd0] sm:$0xff]  ;;  %1695 = vst [vmem:[%s10686_s10 + $0x6d8] sm:$0xff] %v1694_v27 }
  0x8a   : > { %1697 = vst [vmem:[%s10686_s10 + $0x6e0] sm:$0xff] %v1696_v28  ;;  %1699 = vst [vmem:[%s10686_s10 + $0x6e8] sm:$0xff] %v1698_v29  ;;  %v1700_v30 = vld [vmem:[%s10681_s9 + $0xde0] sm:$0xff]  ;;  %v1702_v31 = vld [vmem:[%s10681_s9 + $0xdf0] sm:$0xff] }
  0x8b   : > { %v1704_v32 = vld [vmem:[%s10681_s9 + $0xe00] sm:$0xff]  ;;  %1701 = vst [vmem:[%s10686_s10 + $0x6f0] sm:$0xff] %v1700_v30  ;;  %1703 = vst [vmem:[%s10686_s10 + $0x6f8] sm:$0xff] %v1702_v31  ;;  %v1706_v33 = vld [vmem:[%s10681_s9 + $0xe10] sm:$0xff] }
  0x8c   : > { %1705 = vst [vmem:[%s10686_s10 + $0x700] sm:$0xff] %v1704_v32  ;;  %v1708_v34 = vld [vmem:[%s10681_s9 + $0xe20] sm:$0xff]  ;;  %v1710_v35 = vld [vmem:[%s10681_s9 + $0xe30] sm:$0xff]  ;;  %1707 = vst [vmem:[%s10686_s10 + $0x708] sm:$0xff] %v1706_v33 }
  0x8d   : > { %1709 = vst [vmem:[%s10686_s10 + $0x710] sm:$0xff] %v1708_v34  ;;  %1711 = vst [vmem:[%s10686_s10 + $0x718] sm:$0xff] %v1710_v35  ;;  %v1712_v36 = vld [vmem:[%s10681_s9 + $0xe40] sm:$0xff]  ;;  %v1714_v37 = vld [vmem:[%s10681_s9 + $0xe50] sm:$0xff] }
  0x8e   : > { %v1716_v38 = vld [vmem:[%s10681_s9 + $0xe60] sm:$0xff]  ;;  %1713 = vst [vmem:[%s10686_s10 + $0x720] sm:$0xff] %v1712_v36  ;;  %1715 = vst [vmem:[%s10686_s10 + $0x728] sm:$0xff] %v1714_v37  ;;  %v1718_v39 = vld [vmem:[%s10681_s9 + $0xe70] sm:$0xff] }
  0x8f   : > { %1717 = vst [vmem:[%s10686_s10 + $0x730] sm:$0xff] %v1716_v38  ;;  %v1720_v40 = vld [vmem:[%s10681_s9 + $0xe80] sm:$0xff]  ;;  %v1722_v41 = vld [vmem:[%s10681_s9 + $0xe90] sm:$0xff]  ;;  %1719 = vst [vmem:[%s10686_s10 + $0x738] sm:$0xff] %v1718_v39 }
  0x90   : > { %1721 = vst [vmem:[%s10686_s10 + $0x740] sm:$0xff] %v1720_v40  ;;  %1723 = vst [vmem:[%s10686_s10 + $0x748] sm:$0xff] %v1722_v41  ;;  %v1724_v42 = vld [vmem:[%s10681_s9 + $0xea0] sm:$0xff]  ;;  %v1726_v43 = vld [vmem:[%s10681_s9 + $0xeb0] sm:$0xff] }
  0x91   : > { %v1728_v44 = vld [vmem:[%s10681_s9 + $0xec0] sm:$0xff]  ;;  %1725 = vst [vmem:[%s10686_s10 + $0x750] sm:$0xff] %v1724_v42  ;;  %1727 = vst [vmem:[%s10686_s10 + $0x758] sm:$0xff] %v1726_v43  ;;  %v1730_v45 = vld [vmem:[%s10681_s9 + $0xed0] sm:$0xff] }
  0x92   : > { %1729 = vst [vmem:[%s10686_s10 + $0x760] sm:$0xff] %v1728_v44  ;;  %v1732_v46 = vld [vmem:[%s10681_s9 + $0xee0] sm:$0xff]  ;;  %v1734_v47 = vld [vmem:[%s10681_s9 + $0xef0] sm:$0xff]  ;;  %1731 = vst [vmem:[%s10686_s10 + $0x768] sm:$0xff] %v1730_v45 }
  0x93   : > { %1733 = vst [vmem:[%s10686_s10 + $0x770] sm:$0xff] %v1732_v46  ;;  %1735 = vst [vmem:[%s10686_s10 + $0x778] sm:$0xff] %v1734_v47  ;;  %v1736_v48 = vld [vmem:[%s10681_s9 + $0xf00] sm:$0xff]  ;;  %v1738_v49 = vld [vmem:[%s10681_s9 + $0xf10] sm:$0xff] }
  0x94   : > { %v1740_v50 = vld [vmem:[%s10681_s9 + $0xf20] sm:$0xff]  ;;  %1737 = vst [vmem:[%s10686_s10 + $0x780] sm:$0xff] %v1736_v48  ;;  %1739 = vst [vmem:[%s10686_s10 + $0x788] sm:$0xff] %v1738_v49  ;;  %v1742_v51 = vld [vmem:[%s10681_s9 + $0xf30] sm:$0xff] }
  0x95   : > { %1741 = vst [vmem:[%s10686_s10 + $0x790] sm:$0xff] %v1740_v50  ;;  %v1744_v52 = vld [vmem:[%s10681_s9 + $0xf40] sm:$0xff]  ;;  %v1746_v53 = vld [vmem:[%s10681_s9 + $0xf50] sm:$0xff]  ;;  %1743 = vst [vmem:[%s10686_s10 + $0x798] sm:$0xff] %v1742_v51 }
  0x96   : > { %1745 = vst [vmem:[%s10686_s10 + $0x7a0] sm:$0xff] %v1744_v52  ;;  %1747 = vst [vmem:[%s10686_s10 + $0x7a8] sm:$0xff] %v1746_v53  ;;  %v1748_v54 = vld [vmem:[%s10681_s9 + $0xf60] sm:$0xff]  ;;  %v1750_v55 = vld [vmem:[%s10681_s9 + $0xf70] sm:$0xff] }
  0x97   : > { %v1752_v56 = vld [vmem:[%s10681_s9 + $0xf80] sm:$0xff]  ;;  %1749 = vst [vmem:[%s10686_s10 + $0x7b0] sm:$0xff] %v1748_v54  ;;  %1751 = vst [vmem:[%s10686_s10 + $0x7b8] sm:$0xff] %v1750_v55  ;;  %v1754_v57 = vld [vmem:[%s10681_s9 + $0xf90] sm:$0xff] }
  0x98   : > { %1753 = vst [vmem:[%s10686_s10 + $0x7c0] sm:$0xff] %v1752_v56  ;;  %v1756_v58 = vld [vmem:[%s10681_s9 + $0xfa0] sm:$0xff]  ;;  %v1758_v59 = vld [vmem:[%s10681_s9 + $0xfb0] sm:$0xff]  ;;  %1755 = vst [vmem:[%s10686_s10 + $0x7c8] sm:$0xff] %v1754_v57 }
  0x99   : > { %1757 = vst [vmem:[%s10686_s10 + $0x7d0] sm:$0xff] %v1756_v58  ;;  %1759 = vst [vmem:[%s10686_s10 + $0x7d8] sm:$0xff] %v1758_v59  ;;  %v1760_v60 = vld [vmem:[%s10681_s9 + $0xfc0] sm:$0xff]  ;;  %v1762_v61 = vld [vmem:[%s10681_s9 + $0xfd0] sm:$0xff] }
  0x9a   : > { %v1764_v62 = vld [vmem:[%s10681_s9 + $0xfe0] sm:$0xff]  ;;  %1761 = vst [vmem:[%s10686_s10 + $0x7e0] sm:$0xff] %v1760_v60  ;;  %1763 = vst [vmem:[%s10686_s10 + $0x7e8] sm:$0xff] %v1762_v61  ;;  %v1766_v63 = vld [vmem:[%s10681_s9 + $0xff0] sm:$0xff] }
  0x9b   : > { %1765 = vst [vmem:[%s10686_s10 + $0x7f0] sm:$0xff] %v1764_v62  ;;  %v1768_v0 = vld [vmem:[%s10681_s9 + $0x1000] sm:$0xff]  ;;  %v1770_v1 = vld [vmem:[%s10681_s9 + $0x1010] sm:$0xff]  ;;  %1767 = vst [vmem:[%s10686_s10 + $0x7f8] sm:$0xff] %v1766_v63 }
  0x9c   : > { %1769 = vst [vmem:[%s10686_s10 + $0x800] sm:$0xff] %v1768_v0  ;;  %1771 = vst [vmem:[%s10686_s10 + $0x808] sm:$0xff] %v1770_v1  ;;  %v1772_v2 = vld [vmem:[%s10681_s9 + $0x1020] sm:$0xff]  ;;  %v1774_v3 = vld [vmem:[%s10681_s9 + $0x1030] sm:$0xff] }
  0x9d   : > { %v1776_v4 = vld [vmem:[%s10681_s9 + $0x1040] sm:$0xff]  ;;  %1773 = vst [vmem:[%s10686_s10 + $0x810] sm:$0xff] %v1772_v2  ;;  %1775 = vst [vmem:[%s10686_s10 + $0x818] sm:$0xff] %v1774_v3  ;;  %v1778_v5 = vld [vmem:[%s10681_s9 + $0x1050] sm:$0xff] }
  0x9e   : > { %1777 = vst [vmem:[%s10686_s10 + $0x820] sm:$0xff] %v1776_v4  ;;  %v1780_v6 = vld [vmem:[%s10681_s9 + $0x1060] sm:$0xff]  ;;  %v1782_v7 = vld [vmem:[%s10681_s9 + $0x1070] sm:$0xff]  ;;  %1779 = vst [vmem:[%s10686_s10 + $0x828] sm:$0xff] %v1778_v5 }
  0x9f   : > { %1781 = vst [vmem:[%s10686_s10 + $0x830] sm:$0xff] %v1780_v6  ;;  %1783 = vst [vmem:[%s10686_s10 + $0x838] sm:$0xff] %v1782_v7  ;;  %v1784_v8 = vld [vmem:[%s10681_s9 + $0x1080] sm:$0xff]  ;;  %v1786_v9 = vld [vmem:[%s10681_s9 + $0x1090] sm:$0xff] }
  0xa0   : > { %v1788_v10 = vld [vmem:[%s10681_s9 + $0x10a0] sm:$0xff]  ;;  %1785 = vst [vmem:[%s10686_s10 + $0x840] sm:$0xff] %v1784_v8  ;;  %1787 = vst [vmem:[%s10686_s10 + $0x848] sm:$0xff] %v1786_v9  ;;  %v1790_v11 = vld [vmem:[%s10681_s9 + $0x10b0] sm:$0xff] }
  0xa1   : > { %1789 = vst [vmem:[%s10686_s10 + $0x850] sm:$0xff] %v1788_v10  ;;  %v1792_v12 = vld [vmem:[%s10681_s9 + $0x10c0] sm:$0xff]  ;;  %v1794_v13 = vld [vmem:[%s10681_s9 + $0x10d0] sm:$0xff]  ;;  %1791 = vst [vmem:[%s10686_s10 + $0x858] sm:$0xff] %v1790_v11 }
  0xa2   : > { %1793 = vst [vmem:[%s10686_s10 + $0x860] sm:$0xff] %v1792_v12  ;;  %1795 = vst [vmem:[%s10686_s10 + $0x868] sm:$0xff] %v1794_v13  ;;  %v1796_v14 = vld [vmem:[%s10681_s9 + $0x10e0] sm:$0xff]  ;;  %v1798_v15 = vld [vmem:[%s10681_s9 + $0x10f0] sm:$0xff] }
  0xa3   : > { %v1800_v16 = vld [vmem:[%s10681_s9 + $0x1100] sm:$0xff]  ;;  %1797 = vst [vmem:[%s10686_s10 + $0x870] sm:$0xff] %v1796_v14  ;;  %1799 = vst [vmem:[%s10686_s10 + $0x878] sm:$0xff] %v1798_v15  ;;  %v1802_v17 = vld [vmem:[%s10681_s9 + $0x1110] sm:$0xff] }
  0xa4   : > { %1801 = vst [vmem:[%s10686_s10 + $0x880] sm:$0xff] %v1800_v16  ;;  %v1804_v18 = vld [vmem:[%s10681_s9 + $0x1120] sm:$0xff]  ;;  %v1806_v19 = vld [vmem:[%s10681_s9 + $0x1130] sm:$0xff]  ;;  %1803 = vst [vmem:[%s10686_s10 + $0x888] sm:$0xff] %v1802_v17 }
  0xa5   : > { %1805 = vst [vmem:[%s10686_s10 + $0x890] sm:$0xff] %v1804_v18  ;;  %1807 = vst [vmem:[%s10686_s10 + $0x898] sm:$0xff] %v1806_v19  ;;  %v1808_v20 = vld [vmem:[%s10681_s9 + $0x1140] sm:$0xff]  ;;  %v1810_v21 = vld [vmem:[%s10681_s9 + $0x1150] sm:$0xff] }
  0xa6   : > { %v1812_v22 = vld [vmem:[%s10681_s9 + $0x1160] sm:$0xff]  ;;  %1809 = vst [vmem:[%s10686_s10 + $0x8a0] sm:$0xff] %v1808_v20  ;;  %1811 = vst [vmem:[%s10686_s10 + $0x8a8] sm:$0xff] %v1810_v21  ;;  %v1814_v23 = vld [vmem:[%s10681_s9 + $0x1170] sm:$0xff] }
  0xa7   : > { %1813 = vst [vmem:[%s10686_s10 + $0x8b0] sm:$0xff] %v1812_v22  ;;  %v1816_v24 = vld [vmem:[%s10681_s9 + $0x1180] sm:$0xff]  ;;  %v1818_v25 = vld [vmem:[%s10681_s9 + $0x1190] sm:$0xff]  ;;  %1815 = vst [vmem:[%s10686_s10 + $0x8b8] sm:$0xff] %v1814_v23 }
  0xa8   : > { %1817 = vst [vmem:[%s10686_s10 + $0x8c0] sm:$0xff] %v1816_v24  ;;  %1819 = vst [vmem:[%s10686_s10 + $0x8c8] sm:$0xff] %v1818_v25  ;;  %v1820_v26 = vld [vmem:[%s10681_s9 + $0x11a0] sm:$0xff]  ;;  %v1822_v27 = vld [vmem:[%s10681_s9 + $0x11b0] sm:$0xff] }
  0xa9   : > { %v1824_v28 = vld [vmem:[%s10681_s9 + $0x11c0] sm:$0xff]  ;;  %1821 = vst [vmem:[%s10686_s10 + $0x8d0] sm:$0xff] %v1820_v26  ;;  %1823 = vst [vmem:[%s10686_s10 + $0x8d8] sm:$0xff] %v1822_v27  ;;  %v1826_v29 = vld [vmem:[%s10681_s9 + $0x11d0] sm:$0xff] }
  0xaa   : > { %1825 = vst [vmem:[%s10686_s10 + $0x8e0] sm:$0xff] %v1824_v28  ;;  %v1828_v30 = vld [vmem:[%s10681_s9 + $0x11e0] sm:$0xff]  ;;  %v1830_v31 = vld [vmem:[%s10681_s9 + $0x11f0] sm:$0xff]  ;;  %1827 = vst [vmem:[%s10686_s10 + $0x8e8] sm:$0xff] %v1826_v29 }
  0xab   : > { %1829 = vst [vmem:[%s10686_s10 + $0x8f0] sm:$0xff] %v1828_v30  ;;  %1831 = vst [vmem:[%s10686_s10 + $0x8f8] sm:$0xff] %v1830_v31  ;;  %v1832_v32 = vld [vmem:[%s10681_s9 + $0x1200] sm:$0xff]  ;;  %v1834_v33 = vld [vmem:[%s10681_s9 + $0x1210] sm:$0xff] }
  0xac   : > { %v1836_v34 = vld [vmem:[%s10681_s9 + $0x1220] sm:$0xff]  ;;  %1833 = vst [vmem:[%s10686_s10 + $0x900] sm:$0xff] %v1832_v32  ;;  %1835 = vst [vmem:[%s10686_s10 + $0x908] sm:$0xff] %v1834_v33  ;;  %v1838_v35 = vld [vmem:[%s10681_s9 + $0x1230] sm:$0xff] }
  0xad   : > { %1837 = vst [vmem:[%s10686_s10 + $0x910] sm:$0xff] %v1836_v34  ;;  %v1840_v36 = vld [vmem:[%s10681_s9 + $0x1240] sm:$0xff]  ;;  %v1842_v37 = vld [vmem:[%s10681_s9 + $0x1250] sm:$0xff]  ;;  %1839 = vst [vmem:[%s10686_s10 + $0x918] sm:$0xff] %v1838_v35 }
  0xae   : > { %1841 = vst [vmem:[%s10686_s10 + $0x920] sm:$0xff] %v1840_v36  ;;  %1843 = vst [vmem:[%s10686_s10 + $0x928] sm:$0xff] %v1842_v37  ;;  %v1844_v38 = vld [vmem:[%s10681_s9 + $0x1260] sm:$0xff]  ;;  %v1846_v39 = vld [vmem:[%s10681_s9 + $0x1270] sm:$0xff] }
  0xaf   : > { %v1848_v40 = vld [vmem:[%s10681_s9 + $0x1280] sm:$0xff]  ;;  %1845 = vst [vmem:[%s10686_s10 + $0x930] sm:$0xff] %v1844_v38  ;;  %1847 = vst [vmem:[%s10686_s10 + $0x938] sm:$0xff] %v1846_v39  ;;  %v1850_v41 = vld [vmem:[%s10681_s9 + $0x1290] sm:$0xff] }
  0xb0   : > { %1849 = vst [vmem:[%s10686_s10 + $0x940] sm:$0xff] %v1848_v40  ;;  %v1852_v42 = vld [vmem:[%s10681_s9 + $0x12a0] sm:$0xff]  ;;  %v1854_v43 = vld [vmem:[%s10681_s9 + $0x12b0] sm:$0xff]  ;;  %1851 = vst [vmem:[%s10686_s10 + $0x948] sm:$0xff] %v1850_v41 }
  0xb1   : > { %1853 = vst [vmem:[%s10686_s10 + $0x950] sm:$0xff] %v1852_v42  ;;  %1855 = vst [vmem:[%s10686_s10 + $0x958] sm:$0xff] %v1854_v43  ;;  %v1856_v44 = vld [vmem:[%s10681_s9 + $0x12c0] sm:$0xff]  ;;  %v1858_v45 = vld [vmem:[%s10681_s9 + $0x12d0] sm:$0xff] }
  0xb2   : > { %v1860_v46 = vld [vmem:[%s10681_s9 + $0x12e0] sm:$0xff]  ;;  %1857 = vst [vmem:[%s10686_s10 + $0x960] sm:$0xff] %v1856_v44  ;;  %1859 = vst [vmem:[%s10686_s10 + $0x968] sm:$0xff] %v1858_v45  ;;  %v1862_v47 = vld [vmem:[%s10681_s9 + $0x12f0] sm:$0xff] }
  0xb3   : > { %1861 = vst [vmem:[%s10686_s10 + $0x970] sm:$0xff] %v1860_v46  ;;  %v1864_v48 = vld [vmem:[%s10681_s9 + $0x1300] sm:$0xff]  ;;  %v1866_v49 = vld [vmem:[%s10681_s9 + $0x1310] sm:$0xff]  ;;  %1863 = vst [vmem:[%s10686_s10 + $0x978] sm:$0xff] %v1862_v47 }
  0xb4   : > { %1865 = vst [vmem:[%s10686_s10 + $0x980] sm:$0xff] %v1864_v48  ;;  %1867 = vst [vmem:[%s10686_s10 + $0x988] sm:$0xff] %v1866_v49  ;;  %v1868_v50 = vld [vmem:[%s10681_s9 + $0x1320] sm:$0xff]  ;;  %v1870_v51 = vld [vmem:[%s10681_s9 + $0x1330] sm:$0xff] }
  0xb5   : > { %v1872_v52 = vld [vmem:[%s10681_s9 + $0x1340] sm:$0xff]  ;;  %1869 = vst [vmem:[%s10686_s10 + $0x990] sm:$0xff] %v1868_v50  ;;  %1871 = vst [vmem:[%s10686_s10 + $0x998] sm:$0xff] %v1870_v51  ;;  %v1874_v53 = vld [vmem:[%s10681_s9 + $0x1350] sm:$0xff] }
  0xb6   : > { %1873 = vst [vmem:[%s10686_s10 + $0x9a0] sm:$0xff] %v1872_v52  ;;  %v1876_v54 = vld [vmem:[%s10681_s9 + $0x1360] sm:$0xff]  ;;  %v1878_v55 = vld [vmem:[%s10681_s9 + $0x1370] sm:$0xff]  ;;  %1875 = vst [vmem:[%s10686_s10 + $0x9a8] sm:$0xff] %v1874_v53 }
  0xb7   : > { %1877 = vst [vmem:[%s10686_s10 + $0x9b0] sm:$0xff] %v1876_v54  ;;  %1879 = vst [vmem:[%s10686_s10 + $0x9b8] sm:$0xff] %v1878_v55  ;;  %v1880_v56 = vld [vmem:[%s10681_s9 + $0x1380] sm:$0xff]  ;;  %v1882_v57 = vld [vmem:[%s10681_s9 + $0x1390] sm:$0xff] }
  0xb8   : > { %v1884_v58 = vld [vmem:[%s10681_s9 + $0x13a0] sm:$0xff]  ;;  %1881 = vst [vmem:[%s10686_s10 + $0x9c0] sm:$0xff] %v1880_v56  ;;  %1883 = vst [vmem:[%s10686_s10 + $0x9c8] sm:$0xff] %v1882_v57  ;;  %v1886_v59 = vld [vmem:[%s10681_s9 + $0x13b0] sm:$0xff] }
  0xb9   : > { %1885 = vst [vmem:[%s10686_s10 + $0x9d0] sm:$0xff] %v1884_v58  ;;  %v1888_v60 = vld [vmem:[%s10681_s9 + $0x13c0] sm:$0xff]  ;;  %v1890_v61 = vld [vmem:[%s10681_s9 + $0x13d0] sm:$0xff]  ;;  %1887 = vst [vmem:[%s10686_s10 + $0x9d8] sm:$0xff] %v1886_v59 }
  0xba   : > { %1889 = vst [vmem:[%s10686_s10 + $0x9e0] sm:$0xff] %v1888_v60  ;;  %1891 = vst [vmem:[%s10686_s10 + $0x9e8] sm:$0xff] %v1890_v61  ;;  %v1892_v62 = vld [vmem:[%s10681_s9 + $0x13e0] sm:$0xff]  ;;  %v1894_v63 = vld [vmem:[%s10681_s9 + $0x13f0] sm:$0xff] }
  0xbb   : > { %v1896_v0 = vld [vmem:[%s10681_s9 + $0x1400] sm:$0xff]  ;;  %1893 = vst [vmem:[%s10686_s10 + $0x9f0] sm:$0xff] %v1892_v62  ;;  %1895 = vst [vmem:[%s10686_s10 + $0x9f8] sm:$0xff] %v1894_v63  ;;  %v1898_v1 = vld [vmem:[%s10681_s9 + $0x1410] sm:$0xff] }
  0xbc   : > { %1897 = vst [vmem:[%s10686_s10 + $0xa00] sm:$0xff] %v1896_v0  ;;  %v1900_v2 = vld [vmem:[%s10681_s9 + $0x1420] sm:$0xff]  ;;  %v1902_v3 = vld [vmem:[%s10681_s9 + $0x1430] sm:$0xff]  ;;  %1899 = vst [vmem:[%s10686_s10 + $0xa08] sm:$0xff] %v1898_v1 }
  0xbd   : > { %1901 = vst [vmem:[%s10686_s10 + $0xa10] sm:$0xff] %v1900_v2  ;;  %1903 = vst [vmem:[%s10686_s10 + $0xa18] sm:$0xff] %v1902_v3  ;;  %v1904_v4 = vld [vmem:[%s10681_s9 + $0x1440] sm:$0xff]  ;;  %v1906_v5 = vld [vmem:[%s10681_s9 + $0x1450] sm:$0xff] }
  0xbe   : > { %v1908_v6 = vld [vmem:[%s10681_s9 + $0x1460] sm:$0xff]  ;;  %1905 = vst [vmem:[%s10686_s10 + $0xa20] sm:$0xff] %v1904_v4  ;;  %1907 = vst [vmem:[%s10686_s10 + $0xa28] sm:$0xff] %v1906_v5  ;;  %v1910_v7 = vld [vmem:[%s10681_s9 + $0x1470] sm:$0xff] }
  0xbf   : > { %1909 = vst [vmem:[%s10686_s10 + $0xa30] sm:$0xff] %v1908_v6  ;;  %v1912_v8 = vld [vmem:[%s10681_s9 + $0x1480] sm:$0xff]  ;;  %v1914_v9 = vld [vmem:[%s10681_s9 + $0x1490] sm:$0xff]  ;;  %1911 = vst [vmem:[%s10686_s10 + $0xa38] sm:$0xff] %v1910_v7 }
  0xc0   : > { %1913 = vst [vmem:[%s10686_s10 + $0xa40] sm:$0xff] %v1912_v8  ;;  %1915 = vst [vmem:[%s10686_s10 + $0xa48] sm:$0xff] %v1914_v9  ;;  %v1916_v10 = vld [vmem:[%s10681_s9 + $0x14a0] sm:$0xff]  ;;  %v1918_v11 = vld [vmem:[%s10681_s9 + $0x14b0] sm:$0xff] }
  0xc1   : > { %v1920_v12 = vld [vmem:[%s10681_s9 + $0x14c0] sm:$0xff]  ;;  %1917 = vst [vmem:[%s10686_s10 + $0xa50] sm:$0xff] %v1916_v10  ;;  %1919 = vst [vmem:[%s10686_s10 + $0xa58] sm:$0xff] %v1918_v11  ;;  %v1922_v13 = vld [vmem:[%s10681_s9 + $0x14d0] sm:$0xff] }
  0xc2   : > { %1921 = vst [vmem:[%s10686_s10 + $0xa60] sm:$0xff] %v1920_v12  ;;  %v1924_v14 = vld [vmem:[%s10681_s9 + $0x14e0] sm:$0xff]  ;;  %v1926_v15 = vld [vmem:[%s10681_s9 + $0x14f0] sm:$0xff]  ;;  %1923 = vst [vmem:[%s10686_s10 + $0xa68] sm:$0xff] %v1922_v13 }
  0xc3   : > { %1925 = vst [vmem:[%s10686_s10 + $0xa70] sm:$0xff] %v1924_v14  ;;  %1927 = vst [vmem:[%s10686_s10 + $0xa78] sm:$0xff] %v1926_v15  ;;  %v1928_v16 = vld [vmem:[%s10681_s9 + $0x1500] sm:$0xff]  ;;  %v1930_v17 = vld [vmem:[%s10681_s9 + $0x1510] sm:$0xff] }
  0xc4   : > { %v1932_v18 = vld [vmem:[%s10681_s9 + $0x1520] sm:$0xff]  ;;  %1929 = vst [vmem:[%s10686_s10 + $0xa80] sm:$0xff] %v1928_v16  ;;  %1931 = vst [vmem:[%s10686_s10 + $0xa88] sm:$0xff] %v1930_v17  ;;  %v1934_v19 = vld [vmem:[%s10681_s9 + $0x1530] sm:$0xff] }
  0xc5   : > { %1933 = vst [vmem:[%s10686_s10 + $0xa90] sm:$0xff] %v1932_v18  ;;  %v1936_v20 = vld [vmem:[%s10681_s9 + $0x1540] sm:$0xff]  ;;  %v1938_v21 = vld [vmem:[%s10681_s9 + $0x1550] sm:$0xff]  ;;  %1935 = vst [vmem:[%s10686_s10 + $0xa98] sm:$0xff] %v1934_v19 }
  0xc6   : > { %1937 = vst [vmem:[%s10686_s10 + $0xaa0] sm:$0xff] %v1936_v20  ;;  %1939 = vst [vmem:[%s10686_s10 + $0xaa8] sm:$0xff] %v1938_v21  ;;  %v1940_v22 = vld [vmem:[%s10681_s9 + $0x1560] sm:$0xff]  ;;  %v1942_v23 = vld [vmem:[%s10681_s9 + $0x1570] sm:$0xff] }
  0xc7   : > { %v1944_v24 = vld [vmem:[%s10681_s9 + $0x1580] sm:$0xff]  ;;  %1941 = vst [vmem:[%s10686_s10 + $0xab0] sm:$0xff] %v1940_v22  ;;  %1943 = vst [vmem:[%s10686_s10 + $0xab8] sm:$0xff] %v1942_v23  ;;  %v1946_v25 = vld [vmem:[%s10681_s9 + $0x1590] sm:$0xff] }
  0xc8   : > { %1945 = vst [vmem:[%s10686_s10 + $0xac0] sm:$0xff] %v1944_v24  ;;  %v1948_v26 = vld [vmem:[%s10681_s9 + $0x15a0] sm:$0xff]  ;;  %v1950_v27 = vld [vmem:[%s10681_s9 + $0x15b0] sm:$0xff]  ;;  %1947 = vst [vmem:[%s10686_s10 + $0xac8] sm:$0xff] %v1946_v25 }
  0xc9   : > { %1949 = vst [vmem:[%s10686_s10 + $0xad0] sm:$0xff] %v1948_v26  ;;  %1951 = vst [vmem:[%s10686_s10 + $0xad8] sm:$0xff] %v1950_v27  ;;  %v1952_v28 = vld [vmem:[%s10681_s9 + $0x15c0] sm:$0xff]  ;;  %v1954_v29 = vld [vmem:[%s10681_s9 + $0x15d0] sm:$0xff] }
  0xca   : > { %v1956_v30 = vld [vmem:[%s10681_s9 + $0x15e0] sm:$0xff]  ;;  %1953 = vst [vmem:[%s10686_s10 + $0xae0] sm:$0xff] %v1952_v28  ;;  %1955 = vst [vmem:[%s10686_s10 + $0xae8] sm:$0xff] %v1954_v29  ;;  %v1958_v31 = vld [vmem:[%s10681_s9 + $0x15f0] sm:$0xff] }
  0xcb   : > { %1957 = vst [vmem:[%s10686_s10 + $0xaf0] sm:$0xff] %v1956_v30  ;;  %v1960_v32 = vld [vmem:[%s10681_s9 + $0x1600] sm:$0xff]  ;;  %v1962_v33 = vld [vmem:[%s10681_s9 + $0x1610] sm:$0xff]  ;;  %1959 = vst [vmem:[%s10686_s10 + $0xaf8] sm:$0xff] %v1958_v31 }
  0xcc   : > { %1961 = vst [vmem:[%s10686_s10 + $0xb00] sm:$0xff] %v1960_v32  ;;  %1963 = vst [vmem:[%s10686_s10 + $0xb08] sm:$0xff] %v1962_v33  ;;  %v1964_v34 = vld [vmem:[%s10681_s9 + $0x1620] sm:$0xff]  ;;  %v1966_v35 = vld [vmem:[%s10681_s9 + $0x1630] sm:$0xff] }
  0xcd   : > { %v1968_v36 = vld [vmem:[%s10681_s9 + $0x1640] sm:$0xff]  ;;  %1965 = vst [vmem:[%s10686_s10 + $0xb10] sm:$0xff] %v1964_v34  ;;  %1967 = vst [vmem:[%s10686_s10 + $0xb18] sm:$0xff] %v1966_v35  ;;  %v1970_v37 = vld [vmem:[%s10681_s9 + $0x1650] sm:$0xff] }
  0xce   : > { %1969 = vst [vmem:[%s10686_s10 + $0xb20] sm:$0xff] %v1968_v36  ;;  %v1972_v38 = vld [vmem:[%s10681_s9 + $0x1660] sm:$0xff]  ;;  %v1974_v39 = vld [vmem:[%s10681_s9 + $0x1670] sm:$0xff]  ;;  %1971 = vst [vmem:[%s10686_s10 + $0xb28] sm:$0xff] %v1970_v37 }
  0xcf   : > { %1973 = vst [vmem:[%s10686_s10 + $0xb30] sm:$0xff] %v1972_v38  ;;  %1975 = vst [vmem:[%s10686_s10 + $0xb38] sm:$0xff] %v1974_v39  ;;  %v1976_v40 = vld [vmem:[%s10681_s9 + $0x1680] sm:$0xff]  ;;  %v1978_v41 = vld [vmem:[%s10681_s9 + $0x1690] sm:$0xff] }
  0xd0   : > { %v1980_v42 = vld [vmem:[%s10681_s9 + $0x16a0] sm:$0xff]  ;;  %1977 = vst [vmem:[%s10686_s10 + $0xb40] sm:$0xff] %v1976_v40  ;;  %1979 = vst [vmem:[%s10686_s10 + $0xb48] sm:$0xff] %v1978_v41  ;;  %v1982_v43 = vld [vmem:[%s10681_s9 + $0x16b0] sm:$0xff] }
  0xd1   : > { %1981 = vst [vmem:[%s10686_s10 + $0xb50] sm:$0xff] %v1980_v42  ;;  %v1984_v44 = vld [vmem:[%s10681_s9 + $0x16c0] sm:$0xff]  ;;  %v1986_v45 = vld [vmem:[%s10681_s9 + $0x16d0] sm:$0xff]  ;;  %1983 = vst [vmem:[%s10686_s10 + $0xb58] sm:$0xff] %v1982_v43 }
  0xd2   : > { %1985 = vst [vmem:[%s10686_s10 + $0xb60] sm:$0xff] %v1984_v44  ;;  %1987 = vst [vmem:[%s10686_s10 + $0xb68] sm:$0xff] %v1986_v45  ;;  %v1988_v46 = vld [vmem:[%s10681_s9 + $0x16e0] sm:$0xff]  ;;  %v1990_v47 = vld [vmem:[%s10681_s9 + $0x16f0] sm:$0xff] }
  0xd3   : > { %v1992_v48 = vld [vmem:[%s10681_s9 + $0x1700] sm:$0xff]  ;;  %1989 = vst [vmem:[%s10686_s10 + $0xb70] sm:$0xff] %v1988_v46  ;;  %1991 = vst [vmem:[%s10686_s10 + $0xb78] sm:$0xff] %v1990_v47  ;;  %v1994_v49 = vld [vmem:[%s10681_s9 + $0x1710] sm:$0xff] }
  0xd4   : > { %1993 = vst [vmem:[%s10686_s10 + $0xb80] sm:$0xff] %v1992_v48  ;;  %v1996_v50 = vld [vmem:[%s10681_s9 + $0x1720] sm:$0xff]  ;;  %v1998_v51 = vld [vmem:[%s10681_s9 + $0x1730] sm:$0xff]  ;;  %1995 = vst [vmem:[%s10686_s10 + $0xb88] sm:$0xff] %v1994_v49 }
  0xd5   : > { %1997 = vst [vmem:[%s10686_s10 + $0xb90] sm:$0xff] %v1996_v50  ;;  %1999 = vst [vmem:[%s10686_s10 + $0xb98] sm:$0xff] %v1998_v51  ;;  %v2000_v52 = vld [vmem:[%s10681_s9 + $0x1740] sm:$0xff]  ;;  %v2002_v53 = vld [vmem:[%s10681_s9 + $0x1750] sm:$0xff] }
  0xd6   : > { %v2004_v54 = vld [vmem:[%s10681_s9 + $0x1760] sm:$0xff]  ;;  %2001 = vst [vmem:[%s10686_s10 + $0xba0] sm:$0xff] %v2000_v52  ;;  %2003 = vst [vmem:[%s10686_s10 + $0xba8] sm:$0xff] %v2002_v53  ;;  %v2006_v55 = vld [vmem:[%s10681_s9 + $0x1770] sm:$0xff] }
  0xd7   : > { %2005 = vst [vmem:[%s10686_s10 + $0xbb0] sm:$0xff] %v2004_v54  ;;  %v2008_v56 = vld [vmem:[%s10681_s9 + $0x1780] sm:$0xff]  ;;  %v2010_v57 = vld [vmem:[%s10681_s9 + $0x1790] sm:$0xff]  ;;  %2007 = vst [vmem:[%s10686_s10 + $0xbb8] sm:$0xff] %v2006_v55 }
  0xd8   : > { %2009 = vst [vmem:[%s10686_s10 + $0xbc0] sm:$0xff] %v2008_v56  ;;  %2011 = vst [vmem:[%s10686_s10 + $0xbc8] sm:$0xff] %v2010_v57  ;;  %v2012_v58 = vld [vmem:[%s10681_s9 + $0x17a0] sm:$0xff]  ;;  %v2014_v59 = vld [vmem:[%s10681_s9 + $0x17b0] sm:$0xff] }
  0xd9   : > { %v2016_v60 = vld [vmem:[%s10681_s9 + $0x17c0] sm:$0xff]  ;;  %2013 = vst [vmem:[%s10686_s10 + $0xbd0] sm:$0xff] %v2012_v58  ;;  %2015 = vst [vmem:[%s10686_s10 + $0xbd8] sm:$0xff] %v2014_v59  ;;  %v2018_v61 = vld [vmem:[%s10681_s9 + $0x17d0] sm:$0xff] }
  0xda   : > { %2017 = vst [vmem:[%s10686_s10 + $0xbe0] sm:$0xff] %v2016_v60  ;;  %v2020_v62 = vld [vmem:[%s10681_s9 + $0x17e0] sm:$0xff]  ;;  %v2022_v63 = vld [vmem:[%s10681_s9 + $0x17f0] sm:$0xff]  ;;  %2019 = vst [vmem:[%s10686_s10 + $0xbe8] sm:$0xff] %v2018_v61 }
  0xdb   : > { %2021 = vst [vmem:[%s10686_s10 + $0xbf0] sm:$0xff] %v2020_v62  ;;  %2023 = vst [vmem:[%s10686_s10 + $0xbf8] sm:$0xff] %v2022_v63  ;;  %v2024_v0 = vld [vmem:[%s10681_s9 + $0x1800] sm:$0xff]  ;;  %v2026_v1 = vld [vmem:[%s10681_s9 + $0x1810] sm:$0xff] }
  0xdc   : > { %v2028_v2 = vld [vmem:[%s10681_s9 + $0x1820] sm:$0xff]  ;;  %2025 = vst [vmem:[%s10686_s10 + $0xc00] sm:$0xff] %v2024_v0  ;;  %2027 = vst [vmem:[%s10686_s10 + $0xc08] sm:$0xff] %v2026_v1  ;;  %v2030_v3 = vld [vmem:[%s10681_s9 + $0x1830] sm:$0xff] }
  0xdd   : > { %2029 = vst [vmem:[%s10686_s10 + $0xc10] sm:$0xff] %v2028_v2  ;;  %v2032_v4 = vld [vmem:[%s10681_s9 + $0x1840] sm:$0xff]  ;;  %v2034_v5 = vld [vmem:[%s10681_s9 + $0x1850] sm:$0xff]  ;;  %2031 = vst [vmem:[%s10686_s10 + $0xc18] sm:$0xff] %v2030_v3 }
  0xde   : > { %2033 = vst [vmem:[%s10686_s10 + $0xc20] sm:$0xff] %v2032_v4  ;;  %2035 = vst [vmem:[%s10686_s10 + $0xc28] sm:$0xff] %v2034_v5  ;;  %v2036_v6 = vld [vmem:[%s10681_s9 + $0x1860] sm:$0xff]  ;;  %v2038_v7 = vld [vmem:[%s10681_s9 + $0x1870] sm:$0xff] }
  0xdf   : > { %v2040_v8 = vld [vmem:[%s10681_s9 + $0x1880] sm:$0xff]  ;;  %2037 = vst [vmem:[%s10686_s10 + $0xc30] sm:$0xff] %v2036_v6  ;;  %2039 = vst [vmem:[%s10686_s10 + $0xc38] sm:$0xff] %v2038_v7  ;;  %v2042_v9 = vld [vmem:[%s10681_s9 + $0x1890] sm:$0xff] }
  0xe0   : > { %2041 = vst [vmem:[%s10686_s10 + $0xc40] sm:$0xff] %v2040_v8  ;;  %v2044_v10 = vld [vmem:[%s10681_s9 + $0x18a0] sm:$0xff]  ;;  %v2046_v11 = vld [vmem:[%s10681_s9 + $0x18b0] sm:$0xff]  ;;  %2043 = vst [vmem:[%s10686_s10 + $0xc48] sm:$0xff] %v2042_v9 }
  0xe1   : > { %2045 = vst [vmem:[%s10686_s10 + $0xc50] sm:$0xff] %v2044_v10  ;;  %2047 = vst [vmem:[%s10686_s10 + $0xc58] sm:$0xff] %v2046_v11  ;;  %v2048_v12 = vld [vmem:[%s10681_s9 + $0x18c0] sm:$0xff]  ;;  %v2050_v13 = vld [vmem:[%s10681_s9 + $0x18d0] sm:$0xff] }
  0xe2   : > { %v2052_v14 = vld [vmem:[%s10681_s9 + $0x18e0] sm:$0xff]  ;;  %2049 = vst [vmem:[%s10686_s10 + $0xc60] sm:$0xff] %v2048_v12  ;;  %2051 = vst [vmem:[%s10686_s10 + $0xc68] sm:$0xff] %v2050_v13  ;;  %v2054_v15 = vld [vmem:[%s10681_s9 + $0x18f0] sm:$0xff] }
  0xe3   : > { %2053 = vst [vmem:[%s10686_s10 + $0xc70] sm:$0xff] %v2052_v14  ;;  %v2056_v16 = vld [vmem:[%s10681_s9 + $0x1900] sm:$0xff]  ;;  %v2058_v17 = vld [vmem:[%s10681_s9 + $0x1910] sm:$0xff]  ;;  %2055 = vst [vmem:[%s10686_s10 + $0xc78] sm:$0xff] %v2054_v15 }
  0xe4   : > { %2057 = vst [vmem:[%s10686_s10 + $0xc80] sm:$0xff] %v2056_v16  ;;  %2059 = vst [vmem:[%s10686_s10 + $0xc88] sm:$0xff] %v2058_v17  ;;  %v2060_v18 = vld [vmem:[%s10681_s9 + $0x1920] sm:$0xff]  ;;  %v2062_v19 = vld [vmem:[%s10681_s9 + $0x1930] sm:$0xff] }
  0xe5   : > { %v2064_v20 = vld [vmem:[%s10681_s9 + $0x1940] sm:$0xff]  ;;  %2061 = vst [vmem:[%s10686_s10 + $0xc90] sm:$0xff] %v2060_v18  ;;  %2063 = vst [vmem:[%s10686_s10 + $0xc98] sm:$0xff] %v2062_v19  ;;  %v2066_v21 = vld [vmem:[%s10681_s9 + $0x1950] sm:$0xff] }
  0xe6   : > { %2065 = vst [vmem:[%s10686_s10 + $0xca0] sm:$0xff] %v2064_v20  ;;  %v2068_v22 = vld [vmem:[%s10681_s9 + $0x1960] sm:$0xff]  ;;  %v2070_v23 = vld [vmem:[%s10681_s9 + $0x1970] sm:$0xff]  ;;  %2067 = vst [vmem:[%s10686_s10 + $0xca8] sm:$0xff] %v2066_v21 }
  0xe7   : > { %2069 = vst [vmem:[%s10686_s10 + $0xcb0] sm:$0xff] %v2068_v22  ;;  %2071 = vst [vmem:[%s10686_s10 + $0xcb8] sm:$0xff] %v2070_v23  ;;  %v2072_v24 = vld [vmem:[%s10681_s9 + $0x1980] sm:$0xff]  ;;  %v2074_v25 = vld [vmem:[%s10681_s9 + $0x1990] sm:$0xff] }
  0xe8   : > { %v2076_v26 = vld [vmem:[%s10681_s9 + $0x19a0] sm:$0xff]  ;;  %2073 = vst [vmem:[%s10686_s10 + $0xcc0] sm:$0xff] %v2072_v24  ;;  %2075 = vst [vmem:[%s10686_s10 + $0xcc8] sm:$0xff] %v2074_v25  ;;  %v2078_v27 = vld [vmem:[%s10681_s9 + $0x19b0] sm:$0xff] }
  0xe9   : > { %2077 = vst [vmem:[%s10686_s10 + $0xcd0] sm:$0xff] %v2076_v26  ;;  %v2080_v28 = vld [vmem:[%s10681_s9 + $0x19c0] sm:$0xff]  ;;  %v2082_v29 = vld [vmem:[%s10681_s9 + $0x19d0] sm:$0xff]  ;;  %2079 = vst [vmem:[%s10686_s10 + $0xcd8] sm:$0xff] %v2078_v27 }
  0xea   : > { %2081 = vst [vmem:[%s10686_s10 + $0xce0] sm:$0xff] %v2080_v28  ;;  %2083 = vst [vmem:[%s10686_s10 + $0xce8] sm:$0xff] %v2082_v29  ;;  %v2084_v30 = vld [vmem:[%s10681_s9 + $0x19e0] sm:$0xff]  ;;  %v2086_v31 = vld [vmem:[%s10681_s9 + $0x19f0] sm:$0xff] }
  0xeb   : > { %v2088_v32 = vld [vmem:[%s10681_s9 + $0x1a00] sm:$0xff]  ;;  %2085 = vst [vmem:[%s10686_s10 + $0xcf0] sm:$0xff] %v2084_v30  ;;  %2087 = vst [vmem:[%s10686_s10 + $0xcf8] sm:$0xff] %v2086_v31  ;;  %v2090_v33 = vld [vmem:[%s10681_s9 + $0x1a10] sm:$0xff] }
  0xec   : > { %2089 = vst [vmem:[%s10686_s10 + $0xd00] sm:$0xff] %v2088_v32  ;;  %v2092_v34 = vld [vmem:[%s10681_s9 + $0x1a20] sm:$0xff]  ;;  %v2094_v35 = vld [vmem:[%s10681_s9 + $0x1a30] sm:$0xff]  ;;  %2091 = vst [vmem:[%s10686_s10 + $0xd08] sm:$0xff] %v2090_v33 }
  0xed   : > { %2093 = vst [vmem:[%s10686_s10 + $0xd10] sm:$0xff] %v2092_v34  ;;  %2095 = vst [vmem:[%s10686_s10 + $0xd18] sm:$0xff] %v2094_v35  ;;  %v2096_v36 = vld [vmem:[%s10681_s9 + $0x1a40] sm:$0xff]  ;;  %v2098_v37 = vld [vmem:[%s10681_s9 + $0x1a50] sm:$0xff] }
  0xee   : > { %v2100_v38 = vld [vmem:[%s10681_s9 + $0x1a60] sm:$0xff]  ;;  %2097 = vst [vmem:[%s10686_s10 + $0xd20] sm:$0xff] %v2096_v36  ;;  %2099 = vst [vmem:[%s10686_s10 + $0xd28] sm:$0xff] %v2098_v37  ;;  %v2102_v39 = vld [vmem:[%s10681_s9 + $0x1a70] sm:$0xff] }
  0xef   : > { %2101 = vst [vmem:[%s10686_s10 + $0xd30] sm:$0xff] %v2100_v38  ;;  %v2104_v40 = vld [vmem:[%s10681_s9 + $0x1a80] sm:$0xff]  ;;  %v2106_v41 = vld [vmem:[%s10681_s9 + $0x1a90] sm:$0xff]  ;;  %2103 = vst [vmem:[%s10686_s10 + $0xd38] sm:$0xff] %v2102_v39 }
  0xf0   : > { %2105 = vst [vmem:[%s10686_s10 + $0xd40] sm:$0xff] %v2104_v40  ;;  %2107 = vst [vmem:[%s10686_s10 + $0xd48] sm:$0xff] %v2106_v41  ;;  %v2108_v42 = vld [vmem:[%s10681_s9 + $0x1aa0] sm:$0xff]  ;;  %v2110_v43 = vld [vmem:[%s10681_s9 + $0x1ab0] sm:$0xff] }
  0xf1   : > { %v2112_v44 = vld [vmem:[%s10681_s9 + $0x1ac0] sm:$0xff]  ;;  %2109 = vst [vmem:[%s10686_s10 + $0xd50] sm:$0xff] %v2108_v42  ;;  %2111 = vst [vmem:[%s10686_s10 + $0xd58] sm:$0xff] %v2110_v43  ;;  %v2114_v45 = vld [vmem:[%s10681_s9 + $0x1ad0] sm:$0xff] }
  0xf2   : > { %2113 = vst [vmem:[%s10686_s10 + $0xd60] sm:$0xff] %v2112_v44  ;;  %v2116_v46 = vld [vmem:[%s10681_s9 + $0x1ae0] sm:$0xff]  ;;  %v2118_v47 = vld [vmem:[%s10681_s9 + $0x1af0] sm:$0xff]  ;;  %2115 = vst [vmem:[%s10686_s10 + $0xd68] sm:$0xff] %v2114_v45 }
  0xf3   : > { %2117 = vst [vmem:[%s10686_s10 + $0xd70] sm:$0xff] %v2116_v46  ;;  %2119 = vst [vmem:[%s10686_s10 + $0xd78] sm:$0xff] %v2118_v47  ;;  %v2120_v48 = vld [vmem:[%s10681_s9 + $0x1b00] sm:$0xff]  ;;  %v2122_v49 = vld [vmem:[%s10681_s9 + $0x1b10] sm:$0xff] }
  0xf4   : > { %v2124_v50 = vld [vmem:[%s10681_s9 + $0x1b20] sm:$0xff]  ;;  %2121 = vst [vmem:[%s10686_s10 + $0xd80] sm:$0xff] %v2120_v48  ;;  %2123 = vst [vmem:[%s10686_s10 + $0xd88] sm:$0xff] %v2122_v49  ;;  %v2126_v51 = vld [vmem:[%s10681_s9 + $0x1b30] sm:$0xff] }
  0xf5   : > { %2125 = vst [vmem:[%s10686_s10 + $0xd90] sm:$0xff] %v2124_v50  ;;  %v2128_v52 = vld [vmem:[%s10681_s9 + $0x1b40] sm:$0xff]  ;;  %v2130_v53 = vld [vmem:[%s10681_s9 + $0x1b50] sm:$0xff]  ;;  %2127 = vst [vmem:[%s10686_s10 + $0xd98] sm:$0xff] %v2126_v51 }
  0xf6   : > { %2129 = vst [vmem:[%s10686_s10 + $0xda0] sm:$0xff] %v2128_v52  ;;  %2131 = vst [vmem:[%s10686_s10 + $0xda8] sm:$0xff] %v2130_v53  ;;  %v2132_v54 = vld [vmem:[%s10681_s9 + $0x1b60] sm:$0xff]  ;;  %v2134_v55 = vld [vmem:[%s10681_s9 + $0x1b70] sm:$0xff] }
  0xf7   : > { %v2136_v56 = vld [vmem:[%s10681_s9 + $0x1b80] sm:$0xff]  ;;  %2133 = vst [vmem:[%s10686_s10 + $0xdb0] sm:$0xff] %v2132_v54  ;;  %2135 = vst [vmem:[%s10686_s10 + $0xdb8] sm:$0xff] %v2134_v55  ;;  %v2138_v57 = vld [vmem:[%s10681_s9 + $0x1b90] sm:$0xff] }
  0xf8   : > { %2137 = vst [vmem:[%s10686_s10 + $0xdc0] sm:$0xff] %v2136_v56  ;;  %v2140_v58 = vld [vmem:[%s10681_s9 + $0x1ba0] sm:$0xff]  ;;  %v2142_v59 = vld [vmem:[%s10681_s9 + $0x1bb0] sm:$0xff]  ;;  %2139 = vst [vmem:[%s10686_s10 + $0xdc8] sm:$0xff] %v2138_v57 }
  0xf9   : > { %2141 = vst [vmem:[%s10686_s10 + $0xdd0] sm:$0xff] %v2140_v58  ;;  %2143 = vst [vmem:[%s10686_s10 + $0xdd8] sm:$0xff] %v2142_v59  ;;  %v2144_v60 = vld [vmem:[%s10681_s9 + $0x1bc0] sm:$0xff]  ;;  %v2146_v61 = vld [vmem:[%s10681_s9 + $0x1bd0] sm:$0xff] }
  0xfa   : > { %v2148_v62 = vld [vmem:[%s10681_s9 + $0x1be0] sm:$0xff]  ;;  %2145 = vst [vmem:[%s10686_s10 + $0xde0] sm:$0xff] %v2144_v60  ;;  %2147 = vst [vmem:[%s10686_s10 + $0xde8] sm:$0xff] %v2146_v61  ;;  %v2150_v63 = vld [vmem:[%s10681_s9 + $0x1bf0] sm:$0xff] }
  0xfb   : > { %2149 = vst [vmem:[%s10686_s10 + $0xdf0] sm:$0xff] %v2148_v62  ;;  %v2152_v0 = vld [vmem:[%s10681_s9 + $0x1c00] sm:$0xff]  ;;  %v2154_v1 = vld [vmem:[%s10681_s9 + $0x1c10] sm:$0xff]  ;;  %2151 = vst [vmem:[%s10686_s10 + $0xdf8] sm:$0xff] %v2150_v63 }
  0xfc   : > { %2153 = vst [vmem:[%s10686_s10 + $0xe00] sm:$0xff] %v2152_v0  ;;  %2155 = vst [vmem:[%s10686_s10 + $0xe08] sm:$0xff] %v2154_v1  ;;  %v2156_v2 = vld [vmem:[%s10681_s9 + $0x1c20] sm:$0xff]  ;;  %v2158_v3 = vld [vmem:[%s10681_s9 + $0x1c30] sm:$0xff] }
  0xfd   : > { %v2160_v4 = vld [vmem:[%s10681_s9 + $0x1c40] sm:$0xff]  ;;  %2157 = vst [vmem:[%s10686_s10 + $0xe10] sm:$0xff] %v2156_v2  ;;  %2159 = vst [vmem:[%s10686_s10 + $0xe18] sm:$0xff] %v2158_v3  ;;  %v2162_v5 = vld [vmem:[%s10681_s9 + $0x1c50] sm:$0xff] }
  0xfe   : > { %2161 = vst [vmem:[%s10686_s10 + $0xe20] sm:$0xff] %v2160_v4  ;;  %v2164_v6 = vld [vmem:[%s10681_s9 + $0x1c60] sm:$0xff]  ;;  %v2166_v7 = vld [vmem:[%s10681_s9 + $0x1c70] sm:$0xff]  ;;  %2163 = vst [vmem:[%s10686_s10 + $0xe28] sm:$0xff] %v2162_v5 }
  0xff   : > { %2165 = vst [vmem:[%s10686_s10 + $0xe30] sm:$0xff] %v2164_v6  ;;  %2167 = vst [vmem:[%s10686_s10 + $0xe38] sm:$0xff] %v2166_v7  ;;  %v2168_v8 = vld [vmem:[%s10681_s9 + $0x1c80] sm:$0xff]  ;;  %v2170_v9 = vld [vmem:[%s10681_s9 + $0x1c90] sm:$0xff] }
 0x100   : > { %v2172_v10 = vld [vmem:[%s10681_s9 + $0x1ca0] sm:$0xff]  ;;  %2169 = vst [vmem:[%s10686_s10 + $0xe40] sm:$0xff] %v2168_v8  ;;  %2171 = vst [vmem:[%s10686_s10 + $0xe48] sm:$0xff] %v2170_v9  ;;  %v2174_v11 = vld [vmem:[%s10681_s9 + $0x1cb0] sm:$0xff] }
 0x101   : > { %2173 = vst [vmem:[%s10686_s10 + $0xe50] sm:$0xff] %v2172_v10  ;;  %v2176_v12 = vld [vmem:[%s10681_s9 + $0x1cc0] sm:$0xff]  ;;  %v2178_v13 = vld [vmem:[%s10681_s9 + $0x1cd0] sm:$0xff]  ;;  %2175 = vst [vmem:[%s10686_s10 + $0xe58] sm:$0xff] %v2174_v11 }
 0x102   : > { %2177 = vst [vmem:[%s10686_s10 + $0xe60] sm:$0xff] %v2176_v12  ;;  %2179 = vst [vmem:[%s10686_s10 + $0xe68] sm:$0xff] %v2178_v13  ;;  %v2180_v14 = vld [vmem:[%s10681_s9 + $0x1ce0] sm:$0xff]  ;;  %v2182_v15 = vld [vmem:[%s10681_s9 + $0x1cf0] sm:$0xff] }
 0x103   : > { %v2184_v16 = vld [vmem:[%s10681_s9 + $0x1d00] sm:$0xff]  ;;  %2181 = vst [vmem:[%s10686_s10 + $0xe70] sm:$0xff] %v2180_v14  ;;  %2183 = vst [vmem:[%s10686_s10 + $0xe78] sm:$0xff] %v2182_v15  ;;  %v2186_v17 = vld [vmem:[%s10681_s9 + $0x1d10] sm:$0xff] }
 0x104   : > { %2185 = vst [vmem:[%s10686_s10 + $0xe80] sm:$0xff] %v2184_v16  ;;  %v2188_v18 = vld [vmem:[%s10681_s9 + $0x1d20] sm:$0xff]  ;;  %v2190_v19 = vld [vmem:[%s10681_s9 + $0x1d30] sm:$0xff]  ;;  %2187 = vst [vmem:[%s10686_s10 + $0xe88] sm:$0xff] %v2186_v17 }
 0x105   : > { %2189 = vst [vmem:[%s10686_s10 + $0xe90] sm:$0xff] %v2188_v18  ;;  %2191 = vst [vmem:[%s10686_s10 + $0xe98] sm:$0xff] %v2190_v19  ;;  %v2192_v20 = vld [vmem:[%s10681_s9 + $0x1d40] sm:$0xff]  ;;  %v2194_v21 = vld [vmem:[%s10681_s9 + $0x1d50] sm:$0xff] }
 0x106   : > { %v2196_v22 = vld [vmem:[%s10681_s9 + $0x1d60] sm:$0xff]  ;;  %2193 = vst [vmem:[%s10686_s10 + $0xea0] sm:$0xff] %v2192_v20  ;;  %2195 = vst [vmem:[%s10686_s10 + $0xea8] sm:$0xff] %v2194_v21  ;;  %v2198_v23 = vld [vmem:[%s10681_s9 + $0x1d70] sm:$0xff] }
 0x107   : > { %2197 = vst [vmem:[%s10686_s10 + $0xeb0] sm:$0xff] %v2196_v22  ;;  %v2200_v24 = vld [vmem:[%s10681_s9 + $0x1d80] sm:$0xff]  ;;  %v2202_v25 = vld [vmem:[%s10681_s9 + $0x1d90] sm:$0xff]  ;;  %2199 = vst [vmem:[%s10686_s10 + $0xeb8] sm:$0xff] %v2198_v23 }
 0x108   : > { %2201 = vst [vmem:[%s10686_s10 + $0xec0] sm:$0xff] %v2200_v24  ;;  %2203 = vst [vmem:[%s10686_s10 + $0xec8] sm:$0xff] %v2202_v25  ;;  %v2204_v26 = vld [vmem:[%s10681_s9 + $0x1da0] sm:$0xff]  ;;  %v2206_v27 = vld [vmem:[%s10681_s9 + $0x1db0] sm:$0xff] }
 0x109   : > { %v2208_v28 = vld [vmem:[%s10681_s9 + $0x1dc0] sm:$0xff]  ;;  %2205 = vst [vmem:[%s10686_s10 + $0xed0] sm:$0xff] %v2204_v26  ;;  %2207 = vst [vmem:[%s10686_s10 + $0xed8] sm:$0xff] %v2206_v27  ;;  %v2210_v29 = vld [vmem:[%s10681_s9 + $0x1dd0] sm:$0xff] }
 0x10a   : > { %2209 = vst [vmem:[%s10686_s10 + $0xee0] sm:$0xff] %v2208_v28  ;;  %v2212_v30 = vld [vmem:[%s10681_s9 + $0x1de0] sm:$0xff]  ;;  %v2214_v31 = vld [vmem:[%s10681_s9 + $0x1df0] sm:$0xff]  ;;  %2211 = vst [vmem:[%s10686_s10 + $0xee8] sm:$0xff] %v2210_v29 }
 0x10b   : > { %2213 = vst [vmem:[%s10686_s10 + $0xef0] sm:$0xff] %v2212_v30  ;;  %2215 = vst [vmem:[%s10686_s10 + $0xef8] sm:$0xff] %v2214_v31  ;;  %v2216_v32 = vld [vmem:[%s10681_s9 + $0x1e00] sm:$0xff]  ;;  %v2218_v33 = vld [vmem:[%s10681_s9 + $0x1e10] sm:$0xff] }
 0x10c   : > { %v2220_v34 = vld [vmem:[%s10681_s9 + $0x1e20] sm:$0xff]  ;;  %2217 = vst [vmem:[%s10686_s10 + $0xf00] sm:$0xff] %v2216_v32  ;;  %2219 = vst [vmem:[%s10686_s10 + $0xf08] sm:$0xff] %v2218_v33  ;;  %v2222_v35 = vld [vmem:[%s10681_s9 + $0x1e30] sm:$0xff] }
 0x10d   : > { %2221 = vst [vmem:[%s10686_s10 + $0xf10] sm:$0xff] %v2220_v34  ;;  %v2224_v36 = vld [vmem:[%s10681_s9 + $0x1e40] sm:$0xff]  ;;  %v2226_v37 = vld [vmem:[%s10681_s9 + $0x1e50] sm:$0xff]  ;;  %2223 = vst [vmem:[%s10686_s10 + $0xf18] sm:$0xff] %v2222_v35 }
 0x10e   : > { %2225 = vst [vmem:[%s10686_s10 + $0xf20] sm:$0xff] %v2224_v36  ;;  %2227 = vst [vmem:[%s10686_s10 + $0xf28] sm:$0xff] %v2226_v37  ;;  %v2228_v38 = vld [vmem:[%s10681_s9 + $0x1e60] sm:$0xff]  ;;  %v2230_v39 = vld [vmem:[%s10681_s9 + $0x1e70] sm:$0xff] }
 0x10f   : > { %v2232_v40 = vld [vmem:[%s10681_s9 + $0x1e80] sm:$0xff]  ;;  %2229 = vst [vmem:[%s10686_s10 + $0xf30] sm:$0xff] %v2228_v38  ;;  %2231 = vst [vmem:[%s10686_s10 + $0xf38] sm:$0xff] %v2230_v39  ;;  %v2234_v41 = vld [vmem:[%s10681_s9 + $0x1e90] sm:$0xff] }
 0x110   : > { %2233 = vst [vmem:[%s10686_s10 + $0xf40] sm:$0xff] %v2232_v40  ;;  %v2236_v42 = vld [vmem:[%s10681_s9 + $0x1ea0] sm:$0xff]  ;;  %v2238_v43 = vld [vmem:[%s10681_s9 + $0x1eb0] sm:$0xff]  ;;  %2235 = vst [vmem:[%s10686_s10 + $0xf48] sm:$0xff] %v2234_v41 }
 0x111   : > { %2237 = vst [vmem:[%s10686_s10 + $0xf50] sm:$0xff] %v2236_v42  ;;  %2239 = vst [vmem:[%s10686_s10 + $0xf58] sm:$0xff] %v2238_v43  ;;  %v2240_v44 = vld [vmem:[%s10681_s9 + $0x1ec0] sm:$0xff]  ;;  %v2242_v45 = vld [vmem:[%s10681_s9 + $0x1ed0] sm:$0xff] }
 0x112   : > { %v2244_v46 = vld [vmem:[%s10681_s9 + $0x1ee0] sm:$0xff]  ;;  %2241 = vst [vmem:[%s10686_s10 + $0xf60] sm:$0xff] %v2240_v44  ;;  %2243 = vst [vmem:[%s10686_s10 + $0xf68] sm:$0xff] %v2242_v45  ;;  %v2246_v47 = vld [vmem:[%s10681_s9 + $0x1ef0] sm:$0xff] }
 0x113   : > { %2245 = vst [vmem:[%s10686_s10 + $0xf70] sm:$0xff] %v2244_v46  ;;  %v2248_v48 = vld [vmem:[%s10681_s9 + $0x1f00] sm:$0xff]  ;;  %v2250_v49 = vld [vmem:[%s10681_s9 + $0x1f10] sm:$0xff]  ;;  %2247 = vst [vmem:[%s10686_s10 + $0xf78] sm:$0xff] %v2246_v47 }
 0x114   : > { %2249 = vst [vmem:[%s10686_s10 + $0xf80] sm:$0xff] %v2248_v48  ;;  %2251 = vst [vmem:[%s10686_s10 + $0xf88] sm:$0xff] %v2250_v49  ;;  %v2252_v50 = vld [vmem:[%s10681_s9 + $0x1f20] sm:$0xff]  ;;  %v2254_v51 = vld [vmem:[%s10681_s9 + $0x1f30] sm:$0xff] }
 0x115   : > { %v2256_v52 = vld [vmem:[%s10681_s9 + $0x1f40] sm:$0xff]  ;;  %2253 = vst [vmem:[%s10686_s10 + $0xf90] sm:$0xff] %v2252_v50  ;;  %2255 = vst [vmem:[%s10686_s10 + $0xf98] sm:$0xff] %v2254_v51  ;;  %v2258_v53 = vld [vmem:[%s10681_s9 + $0x1f50] sm:$0xff] }
 0x116   : > { %2257 = vst [vmem:[%s10686_s10 + $0xfa0] sm:$0xff] %v2256_v52  ;;  %v2260_v54 = vld [vmem:[%s10681_s9 + $0x1f60] sm:$0xff]  ;;  %v2262_v55 = vld [vmem:[%s10681_s9 + $0x1f70] sm:$0xff]  ;;  %2259 = vst [vmem:[%s10686_s10 + $0xfa8] sm:$0xff] %v2258_v53 }
 0x117   : > { %2261 = vst [vmem:[%s10686_s10 + $0xfb0] sm:$0xff] %v2260_v54  ;;  %2263 = vst [vmem:[%s10686_s10 + $0xfb8] sm:$0xff] %v2262_v55  ;;  %v2264_v56 = vld [vmem:[%s10681_s9 + $0x1f80] sm:$0xff]  ;;  %v2266_v57 = vld [vmem:[%s10681_s9 + $0x1f90] sm:$0xff] }
 0x118   : > { %v2268_v58 = vld [vmem:[%s10681_s9 + $0x1fa0] sm:$0xff]  ;;  %2265 = vst [vmem:[%s10686_s10 + $0xfc0] sm:$0xff] %v2264_v56  ;;  %2267 = vst [vmem:[%s10686_s10 + $0xfc8] sm:$0xff] %v2266_v57  ;;  %v2270_v59 = vld [vmem:[%s10681_s9 + $0x1fb0] sm:$0xff] }
 0x119   : > { %2269 = vst [vmem:[%s10686_s10 + $0xfd0] sm:$0xff] %v2268_v58  ;;  %v2272_v60 = vld [vmem:[%s10681_s9 + $0x1fc0] sm:$0xff]  ;;  %v2274_v61 = vld [vmem:[%s10681_s9 + $0x1fd0] sm:$0xff]  ;;  %2271 = vst [vmem:[%s10686_s10 + $0xfd8] sm:$0xff] %v2270_v59 }
 0x11a   : > { %2273 = vst [vmem:[%s10686_s10 + $0xfe0] sm:$0xff] %v2272_v60  ;;  %2275 = vst [vmem:[%s10686_s10 + $0xfe8] sm:$0xff] %v2274_v61  ;;  %v2276_v62 = vld [vmem:[%s10681_s9 + $0x1fe0] sm:$0xff]  ;;  %v2278_v63 = vld [vmem:[%s10681_s9 + $0x1ff0] sm:$0xff] }
 0x11b   : > { %2277 = vst [vmem:[%s10686_s10 + $0xff0] sm:$0xff] %v2276_v62  ;;  %2279 = vst [vmem:[%s10686_s10 + $0xff8] sm:$0xff] %v2278_v63 }
 0x11c PF: > { %p9007_p9 = scmp.ge.s32.totalorder %s10594_s18, 1  ;;  %p4376_p10 = scmp.lt.s32.totalorder %s10594_s18, 9 }
 0x11e   : > { %p4377_p11 = pnand %p9007_p9, %p4376_p10 }
 0x11f   : > { %s4383_s11 = sand.u32 (!%p4377_p11), 1, %s10570_s12   ;;  %p4425_p12 = scmp.lt.s32.totalorder (!%p4377_p11), %s10582_s15, 3 }
 0x120   : > { %4380 = sbr.rel (%p4377_p11) target bundleno = 1040 (0x410), region = 80  ;;  %s9008_s21 = sshll.u32 (!%p4377_p11), %s4383_s11, 12 }
 0x121   : > { %s11714_s22 = scalar_lea.vmem (!%p4377_p11), [#allocation3], %s9008_s21  ;;  %s12412_s30 = sshll.u32 (!%p4377_p11), %s10578_s14, 1 }
 0x122   : > { %v9772_v0 = vld [vmem:[%s11714_s22 + $0x4] ss:$8 sps:$4 sm:$0xff] (!%p4377_p11)   ;;  %v9776_v2 = vld [vmem:[%s11714_s22] ss:$8 sps:$4 sm:$0xff] (!%p4377_p11)   ;;  %v9778_v4 = vld [vmem:[%s11714_s22 + $0x14] ss:$8 sps:$4 sm:$0xff] (!%p4377_p11)  }
 0x123   : > { %v9774_v1 = vld [vmem:[%s11714_s22 + $0x804] ss:$8 sps:$4 sm:$0xff] (!%p4377_p11)   ;;  %7924 = vmatprep.subr.bf16.mxu1 (!%p4377_p11), %v9772_v0  ;;  %v9777_v3 = vld [vmem:[%s11714_s22 + $0x800] ss:$8 sps:$4 sm:$0xff] (!%p4377_p11)   ;;  %v9780_v5 = vld [vmem:[%s11714_s22 + $0x814] ss:$8 sps:$4 sm:$0xff] (!%p4377_p11)  }
 0x124   : > { %8348 = vmatprep.subr.bf16.mxu0 (!%p4377_p11), %v9774_v1  ;;  %7925 = vmatpush1.bf16.msra.mxu1 (!%p4377_p11), %v9776_v2  ;;  %v9782_v6 = vld [vmem:[%s11714_s22 + $0x10] ss:$8 sps:$4 sm:$0xff] (!%p4377_p11)   ;;  %v9784_v8 = vld [vmem:[%s11714_s22 + $0x24] ss:$8 sps:$4 sm:$0xff] (!%p4377_p11)   ;;  %v9788_v10 = vld [vmem:[%s11714_s22 + $0x20] ss:$8 sps:$4 sm:$0xff] (!%p4377_p11)  }
 0x125   : > { %8349 = vmatpush1.bf16.msra.mxu0 (!%p4377_p11), %v9777_v3  ;;  %7926 = vmatprep.subr.bf16.mxu1 (!%p4377_p11), %v9778_v4  ;;  %v9783_v7 = vld [vmem:[%s11714_s22 + $0x810] ss:$8 sps:$4 sm:$0xff] (!%p4377_p11)   ;;  %v9786_v9 = vld [vmem:[%s11714_s22 + $0x824] ss:$8 sps:$4 sm:$0xff] (!%p4377_p11)   ;;  %v9789_v11 = vld [vmem:[%s11714_s22 + $0x820] ss:$8 sps:$4 sm:$0xff] (!%p4377_p11)  }
 0x126   : > { %8350 = vmatprep.subr.bf16.mxu0 (!%p4377_p11), %v9780_v5  ;;  %v9790_v12 = vld [vmem:[%s11714_s22 + $0x34] ss:$8 sps:$4 sm:$0xff] (!%p4377_p11)   ;;  %v9794_v14 = vld [vmem:[%s11714_s22 + $0x30] ss:$8 sps:$4 sm:$0xff] (!%p4377_p11)   ;;  %v9796_v16 = vld [vmem:[%s11714_s22 + $0x44] ss:$8 sps:$4 sm:$0xff] (!%p4377_p11)  }
 0x127   : > { %v9792_v13 = vld [vmem:[%s11714_s22 + $0x834] ss:$8 sps:$4 sm:$0xff]   ;;  %v9795_v15 = vld [vmem:[%s11714_s22 + $0x830] ss:$8 sps:$4 sm:$0xff]   ;;  %v9798_v17 = vld [vmem:[%s11714_s22 + $0x844] ss:$8 sps:$4 sm:$0xff]  }
 0x128   : > { %7927 = vmatpush1.bf16.msra.mxu1 %v9782_v6  ;;  %v9800_v18 = vld [vmem:[%s11714_s22 + $0x40] ss:$8 sps:$4 sm:$0xff]   ;;  %v9802_v20 = vld [vmem:[%s11714_s22 + $0x54] ss:$8 sps:$4 sm:$0xff]   ;;  %v9806_v22 = vld [vmem:[%s11714_s22 + $0x50] ss:$8 sps:$4 sm:$0xff]  }
 0x129   : > { %8351 = vmatpush1.bf16.msra.mxu0 %v9783_v7  ;;  %7928 = vmatprep.subr.bf16.mxu1 %v9784_v8  ;;  %v9801_v19 = vld [vmem:[%s11714_s22 + $0x840] ss:$8 sps:$4 sm:$0xff]   ;;  %v9804_v21 = vld [vmem:[%s11714_s22 + $0x854] ss:$8 sps:$4 sm:$0xff]   ;;  %v9807_v23 = vld [vmem:[%s11714_s22 + $0x850] ss:$8 sps:$4 sm:$0xff]  }
 0x12a   : > { %8352 = vmatprep.subr.bf16.mxu0 %v9786_v9  ;;  %v9808_v24 = vld [vmem:[%s11714_s22 + $0x64] ss:$8 sps:$4 sm:$0xff]   ;;  %v9812_v26 = vld [vmem:[%s11714_s22 + $0x60] ss:$8 sps:$4 sm:$0xff]   ;;  %v9814_v28 = vld [vmem:[%s11714_s22 + $0x74] ss:$8 sps:$4 sm:$0xff]  }
 0x12b   : > { %v9810_v25 = vld [vmem:[%s11714_s22 + $0x864] ss:$8 sps:$4 sm:$0xff]   ;;  %v9813_v27 = vld [vmem:[%s11714_s22 + $0x860] ss:$8 sps:$4 sm:$0xff]   ;;  %v9816_v29 = vld [vmem:[%s11714_s22 + $0x874] ss:$8 sps:$4 sm:$0xff]  }
 0x12c   : > { %7929 = vmatpush1.bf16.msra.mxu1 %v9788_v10  ;;  %v9818_v30 = vld [vmem:[%s11714_s22 + $0x70] ss:$8 sps:$4 sm:$0xff]   ;;  %v9820_v32 = vld [vmem:[%s11714_s22 + $0x84] ss:$8 sps:$4 sm:$0xff]   ;;  %v9824_v34 = vld [vmem:[%s11714_s22 + $0x80] ss:$8 sps:$4 sm:$0xff]  }
 0x12d   : > { %8353 = vmatpush1.bf16.msra.mxu0 %v9789_v11  ;;  %7930 = vmatprep.subr.bf16.mxu1 %v9790_v12  ;;  %v9819_v31 = vld [vmem:[%s11714_s22 + $0x870] ss:$8 sps:$4 sm:$0xff]   ;;  %v9822_v33 = vld [vmem:[%s11714_s22 + $0x884] ss:$8 sps:$4 sm:$0xff]   ;;  %v9825_v35 = vld [vmem:[%s11714_s22 + $0x880] ss:$8 sps:$4 sm:$0xff]  }
 0x12e   : > { %8354 = vmatprep.subr.bf16.mxu0 %v9792_v13  ;;  %v9826_v36 = vld [vmem:[%s11714_s22 + $0x94] ss:$8 sps:$4 sm:$0xff]   ;;  %s4426_s24 = scalar_select %p4425_p12, %s10582_s15, 3  ;;  %v9830_v38 = vld [vmem:[%s11714_s22 + $0x90] ss:$8 sps:$4 sm:$0xff]  }
 0x12f   : > { %v9828_v37 = vld [vmem:[%s11714_s22 + $0x894] ss:$8 sps:$4 sm:$0xff]   ;;  %v9831_v39 = vld [vmem:[%s11714_s22 + $0x890] ss:$8 sps:$4 sm:$0xff]   ;;  %v9832_v40 = vld [vmem:[%s11714_s22 + $0xa4] ss:$8 sps:$4 sm:$0xff]  }
 0x130   : > { %7931 = vmatpush1.bf16.msra.mxu1 %v9794_v14  ;;  %s9595_s25 = sshll.u32 %s4426_s24, 9  ;;  %v9834_v41 = vld [vmem:[%s11714_s22 + $0x8a4] ss:$8 sps:$4 sm:$0xff]   ;;  %v9836_v42 = vld [vmem:[%s11714_s22 + $0xa0] ss:$8 sps:$4 sm:$0xff]   ;;  %p4442_p13 = scmp.lt.s32.totalorder %s12412_s30, 3 }
 0x131   : > { %8355 = vmatpush1.bf16.msra.mxu0 %v9795_v15  ;;  %7932 = vmatprep.subr.bf16.mxu1 %v9796_v16  ;;  %v9837_v43 = vld [vmem:[%s11714_s22 + $0x8a0] ss:$8 sps:$4 sm:$0xff]   ;;  %s11765_s29 = scalar_lea.vmem %s12467_s0, %s9595_s25  ;;  %v9838_v44 = vld [vmem:[%s11714_s22 + $0xb4] ss:$8 sps:$4 sm:$0xff]   ;;  %v9842_v46 = vld [vmem:[%s11714_s22 + $0xb0] ss:$8 sps:$4 sm:$0xff]  }
 0x132   : > { %8356 = vmatprep.subr.bf16.mxu0 %v9798_v17  ;;  %v9840_v45 = vld [vmem:[%s11714_s22 + $0x8b4] ss:$8 sps:$4 sm:$0xff]   ;;  %v9843_v47 = vld [vmem:[%s11714_s22 + $0x8b0] ss:$8 sps:$4 sm:$0xff]   ;;  %v4468_v48 = vld [vmem:[%s11765_s29] sm:$0xff]  ;;  %s4443_s4 = scalar_select %p4442_p13, %s12412_s30, 3 }
 0x133   : > { %v4484_v49 = vld [vmem:[%s11765_s29 + $0x80] sm:$0xff]  ;;  %v9850_v58 = vld [vmem:[%s11714_s22 + $0xd4] ss:$8 sps:$4 sm:$0xff]   ;;  %v9854_v60 = vld [vmem:[%s11714_s22 + $0xd0] ss:$8 sps:$4 sm:$0xff]   ;;  %s9009_s8 = sshll.u32 %s4383_s11, 6 }
 0x134   : > { %7933 = vmatpush1.bf16.msra.mxu1 %v9800_v18  ;;  %v9844_v50 = vld [vmem:[%s11714_s22 + $0xc4] ss:$8 sps:$4 sm:$0xff]   ;;  %v9014_v52 = vcombine.high %v4468_v48, %v4484_v49  ;;  %v9848_v56 = vld [vmem:[%s11714_s22 + $0xc0] ss:$8 sps:$4 sm:$0xff]   ;;  %v9852_v59 = vld [vmem:[%s11714_s22 + $0x8d4] ss:$8 sps:$4 sm:$0xff]   ;;  %v9013_v8 = vcombine.low %v4468_v48, %v4484_v49  ;;  %s4444_s7 = scalar_lea.vmem %s12469_s2, %s4443_s4 }
 0x135   : > { %8357 = vmatpush1.bf16.msra.mxu0 %v9801_v19  ;;  %7934 = vmatprep.subr.bf16.mxu1 %v9802_v20  ;;  %v9846_v51 = vld [vmem:[%s11714_s22 + $0x8c4] ss:$8 sps:$4 sm:$0xff]   ;;  %v9849_v57 = vld [vmem:[%s11714_s22 + $0x8c0] ss:$8 sps:$4 sm:$0xff]   ;;  %v9855_v61 = vld [vmem:[%s11714_s22 + $0x8d0] ss:$8 sps:$4 sm:$0xff]  }
 0x136   : > { %8358 = vmatprep.subr.bf16.mxu0 %v9804_v21  ;;  %v4476_v53 = vld [vmem:[%s11765_s29 + $0x40] sm:$0xff]  ;;  %7956 = vmatprep.mubr.bf16.mxu1 %v9014_v52  ;;  %v9862_v2 = vld [vmem:[%s11714_s22 + $0xf4] ss:$8 sps:$4 sm:$0xff]   ;;  %v9866_v4 = vld [vmem:[%s11714_s22 + $0xf0] ss:$8 sps:$4 sm:$0xff]   ;;  %s12421_s14 = scalar_lea.vmem [#allocation4], %s9009_s8 }
 0x137   : > { %v4492_v54 = vld [vmem:[%s11765_s29 + $0xc0] sm:$0xff]  ;;  %v9864_v3 = vld [vmem:[%s11714_s22 + $0x8f4] ss:$8 sps:$4 sm:$0xff]   ;;  %v9867_v5 = vld [vmem:[%s11714_s22 + $0x8f0] ss:$8 sps:$4 sm:$0xff]   ;;  %s9591_s12 = sshll.u32 (%p10664_p6), %s10582_s15, 4 }
 0x138   : > { %7935 = vmatpush1.bf16.msra.mxu1 %v9806_v22  ;;  %v9030_v55 = vcombine.high %v4476_v53, %v4492_v54  ;;  %v9856_v62 = vld [vmem:[%s11714_s22 + $0xe4] ss:$8 sps:$4 sm:$0xff]   ;;  %v9860_v0 = vld [vmem:[%s11714_s22 + $0xe0] ss:$8 sps:$4 sm:$0xff]   ;;  %v9029_v10 = vcombine.low %v4476_v53, %v4492_v54  ;;  %v9876_v12 = vld [vmem:[%s11714_s22 + $0x114] ss:$8 sps:$4 sm:$0xff]   ;;  %s8839_s9 = sadd.s32 (%p10664_p6), %s9591_s12, %s12412_s30 }
 0x139   : > { %8359 = vmatpush1.bf16.msra.mxu0 %v9807_v23  ;;  %7936 = vmatprep.subr.bf16.mxu1 %v9808_v24  ;;  %v9858_v63 = vld [vmem:[%s11714_s22 + $0x8e4] ss:$8 sps:$4 sm:$0xff]   ;;  %v9861_v1 = vld [vmem:[%s11714_s22 + $0x8e0] ss:$8 sps:$4 sm:$0xff]   ;;  %v9879_v13 = vld [vmem:[%s11714_s22 + $0x914] ss:$8 sps:$4 sm:$0xff]  }
 0x13a   : > { %8360 = vmatprep.subr.bf16.mxu0 %v9810_v25  ;;  %8380 = vmatprep.mubr.bf16.mxu0 %v9030_v55  ;;  %v9870_v6 = vld [vmem:[%s11714_s22 + $0x104] ss:$8 sps:$4 sm:$0xff]   ;;  %v9868_v9 = vld [vmem:[%s11714_s22 + $0x100] ss:$8 sps:$4 sm:$0xff]   ;;  %v9874_v14 = vld [vmem:[%s11714_s22 + $0x110] ss:$8 sps:$4 sm:$0xff]  }
 0x13b   : > { %v9873_v7 = vld [vmem:[%s11714_s22 + $0x904] ss:$8 sps:$4 sm:$0xff]   ;;  %v9871_v11 = vld [vmem:[%s11714_s22 + $0x900] ss:$8 sps:$4 sm:$0xff]   ;;  %v9877_v15 = vld [vmem:[%s11714_s22 + $0x910] ss:$8 sps:$4 sm:$0xff]  }
 0x13c   : > { %7937 = vmatpush1.bf16.msra.mxu1 %v9812_v26  ;;  %v9882_v16 = vld [vmem:[%s11714_s22 + $0x124] ss:$8 sps:$4 sm:$0xff]   ;;  %v9880_v18 = vld [vmem:[%s11714_s22 + $0x120] ss:$8 sps:$4 sm:$0xff]   ;;  %v9888_v20 = vld [vmem:[%s11714_s22 + $0x134] ss:$8 sps:$4 sm:$0xff]  }
 0x13d   : > { %8361 = vmatpush1.bf16.msra.mxu0 %v9813_v27  ;;  %7938 = vmatprep.subr.bf16.mxu1 %v9814_v28  ;;  %v9885_v17 = vld [vmem:[%s11714_s22 + $0x924] ss:$8 sps:$4 sm:$0xff]   ;;  %v9883_v19 = vld [vmem:[%s11714_s22 + $0x920] ss:$8 sps:$4 sm:$0xff]   ;;  %v9891_v21 = vld [vmem:[%s11714_s22 + $0x934] ss:$8 sps:$4 sm:$0xff]  }
 0x13e   : > { %8362 = vmatprep.subr.bf16.mxu0 %v9816_v29  ;;  %v9886_v22 = vld [vmem:[%s11714_s22 + $0x130] ss:$8 sps:$4 sm:$0xff]   ;;  %v9894_v24 = vld [vmem:[%s11714_s22 + $0x144] ss:$8 sps:$4 sm:$0xff]   ;;  %v9892_v26 = vld [vmem:[%s11714_s22 + $0x140] ss:$8 sps:$4 sm:$0xff]  }
 0x13f   : > { %v9889_v23 = vld [vmem:[%s11714_s22 + $0x930] ss:$8 sps:$4 sm:$0xff]   ;;  %v9897_v25 = vld [vmem:[%s11714_s22 + $0x944] ss:$8 sps:$4 sm:$0xff]   ;;  %v9895_v27 = vld [vmem:[%s11714_s22 + $0x940] ss:$8 sps:$4 sm:$0xff]  }
 0x140   : > { %7939 = vmatpush1.bf16.msra.mxu1 %v9818_v30  ;;  %v9900_v28 = vld [vmem:[%s11714_s22 + $0x154] ss:$8 sps:$4 sm:$0xff]   ;;  %v4500_v30 = vld [vmem:[%s11765_s29 + $0x100] sm:$0xff]  ;;  %v11834_v49 = vld [vmem:[%s11765_s29 + $0x48] sm:$0xff]  ;;  %s9592_s23 = sshll.u32 (%p10664_p6), %s8839_s9, 3 }
 0x141   : > { %8363 = vmatpush1.bf16.msra.mxu0 %v9819_v31  ;;  %7940 = vmatprep.subr.bf16.mxu1 %v9820_v32  ;;  %v9903_v29 = vld [vmem:[%s11714_s22 + $0x954] ss:$8 sps:$4 sm:$0xff]   ;;  %v4516_v31 = vld [vmem:[%s11765_s29 + $0x180] sm:$0xff]  ;;  %v9898_v32 = vld [vmem:[%s11714_s22 + $0x150] ss:$8 sps:$4 sm:$0xff]   ;;  %s8841_s21 = scalar_lea.vmem (%p10664_p6), %s12470_s3, %s9592_s23 }
 0x142   : > { %8364 = vmatprep.subr.bf16.mxu0 %v9822_v33  ;;  %v9046_v33 = vcombine.high %v4500_v30, %v4516_v31  ;;  %v9913_v52 = vld [vmem:[%s11714_s22 + $0x970] ss:$8 sps:$4 sm:$0xff]   ;;  %v9918_v54 = vld [vmem:[%s11714_s22 + $0x184] ss:$8 sps:$4 sm:$0xff]  }
 0x143   : > { %v9921_v55 = vld [vmem:[%s11714_s22 + $0x984] ss:$8 sps:$4 sm:$0xff]  }
 0x144   : > { %7941 = vmatpush1.bf16.msra.mxu1 %v9824_v34  ;;  %v9901_v34 = vld [vmem:[%s11714_s22 + $0x950] ss:$8 sps:$4 sm:$0xff]  }
 0x145   : > { %8365 = vmatpush1.bf16.msra.mxu0 %v9825_v35  ;;  %7942 = vmatprep.subr.bf16.mxu1 %v9826_v36  ;;  %v4508_v35 = vld [vmem:[%s11765_s29 + $0x140] sm:$0xff] }
 0x146   : > { %8366 = vmatprep.subr.bf16.mxu0 %v9828_v37  ;;  %v4524_v36 = vld [vmem:[%s11765_s29 + $0x1c0] sm:$0xff]  ;;  %v9045_v37 = vcombine.low %v4500_v30, %v4516_v31  ;;  %v9972_v30 = vld [vmem:[%s11714_s22 + $0x214] ss:$8 sps:$4 sm:$0xff]  }
 0x147   : > { %v9975_v31 = vld [vmem:[%s11714_s22 + $0xa14] ss:$8 sps:$4 sm:$0xff]  }
 0x148   : > { %7943 = vmatpush1.bf16.msra.mxu1 %v9830_v38  ;;  %v9906_v38 = vld [vmem:[%s11714_s22 + $0x164] ss:$8 sps:$4 sm:$0xff]  }
 0x149   : > { %8367 = vmatpush1.bf16.msra.mxu0 %v9831_v39  ;;  %7944 = vmatprep.subr.bf16.mxu1 %v9832_v40  ;;  %v9062_v39 = vcombine.high %v4508_v35, %v4524_v36  ;;  %v9061_v40 = vcombine.low %v4508_v35, %v4524_v36  ;;  %v9970_v36 = vld [vmem:[%s11714_s22 + $0x210] ss:$8 sps:$4 sm:$0xff]  }
 0x14a   : > { %8368 = vmatprep.subr.bf16.mxu0 %v9834_v41  ;;  %v9909_v41 = vld [vmem:[%s11714_s22 + $0x964] ss:$8 sps:$4 sm:$0xff]  }
 0x14c   : > { %7945 = vmatpush1.bf16.msra.mxu1 %v9836_v42  ;;  %v9904_v42 = vld [vmem:[%s11714_s22 + $0x160] ss:$8 sps:$4 sm:$0xff]  }
 0x14d   : > { %8369 = vmatpush1.bf16.msra.mxu0 %v9837_v43  ;;  %7946 = vmatprep.subr.bf16.mxu1 %v9838_v44  ;;  %v9907_v43 = vld [vmem:[%s11714_s22 + $0x960] ss:$8 sps:$4 sm:$0xff]  }
 0x14e   : > { %8370 = vmatprep.subr.bf16.mxu0 %v9840_v45  ;;  %v11824_v44 = vld [vmem:[%s11765_s29 + $0x8] sm:$0xff] }
 0x14f   : > { %v11827_v45 = vld [vmem:[%s11765_s29 + $0x88] sm:$0xff] }
 0x150   : > { %7947 = vmatpush1.bf16.msra.mxu1 %v9842_v46  ;;  %v9912_v46 = vld [vmem:[%s11714_s22 + $0x174] ss:$8 sps:$4 sm:$0xff]   ;;  %v9016_v48 = vcombine.high %v11824_v44, %v11827_v45 }
 0x151   : > { %8371 = vmatpush1.bf16.msra.mxu0 %v9843_v47  ;;  %7948 = vmatprep.subr.bf16.mxu1 %v9844_v50  ;;  %v9915_v47 = vld [vmem:[%s11714_s22 + $0x974] ss:$8 sps:$4 sm:$0xff]   ;;  %v11837_v50 = vld [vmem:[%s11765_s29 + $0xc8] sm:$0xff] }
 0x152   : > { %8372 = vmatprep.subr.bf16.mxu0 %v9846_v51  ;;  %v9910_v51 = vld [vmem:[%s11714_s22 + $0x170] ss:$8 sps:$4 sm:$0xff]   ;;  %v9032_v53 = vcombine.high %v11834_v49, %v11837_v50 }
 0x154   : > { %7949 = vmatpush1.bf16.msra.mxu1 %v9848_v56  ;;  %v9916_v56 = vld [vmem:[%s11714_s22 + $0x180] ss:$8 sps:$4 sm:$0xff]  }
 0x155   : > { %8373 = vmatpush1.bf16.msra.mxu0 %v9849_v57  ;;  %7950 = vmatprep.subr.bf16.mxu1 %v9850_v58  ;;  %v9919_v57 = vld [vmem:[%s11714_s22 + $0x980] ss:$8 sps:$4 sm:$0xff]   ;;  %v9924_v58 = vld [vmem:[%s11714_s22 + $0x194] ss:$8 sps:$4 sm:$0xff]  }
 0x156   : > { %8374 = vmatprep.subr.bf16.mxu0 %v9852_v59  ;;  %v9927_v59 = vld [vmem:[%s11714_s22 + $0x994] ss:$8 sps:$4 sm:$0xff]  }
 0x158   : > { %7951 = vmatpush1.bf16.msra.mxu1 %v9854_v60  ;;  %v9922_v60 = vld [vmem:[%s11714_s22 + $0x190] ss:$8 sps:$4 sm:$0xff]  }
 0x159   : > { %8375 = vmatpush1.bf16.msra.mxu0 %v9855_v61  ;;  %7952 = vmatprep.subr.bf16.mxu1 %v9856_v62  ;;  %v9925_v61 = vld [vmem:[%s11714_s22 + $0x990] ss:$8 sps:$4 sm:$0xff]   ;;  %v9930_v62 = vld [vmem:[%s11714_s22 + $0x1a4] ss:$8 sps:$4 sm:$0xff]  }
 0x15a   : > { %8376 = vmatprep.subr.bf16.mxu0 %v9858_v63  ;;  %v9933_v63 = vld [vmem:[%s11714_s22 + $0x9a4] ss:$8 sps:$4 sm:$0xff]  }
 0x15c   : > { %7953 = vmatpush1.bf16.msra.mxu1 %v9860_v0  ;;  %v9928_v0 = vld [vmem:[%s11714_s22 + $0x1a0] ss:$8 sps:$4 sm:$0xff]  }
 0x15d   : > { %8377 = vmatpush1.bf16.msra.mxu0 %v9861_v1  ;;  %7954 = vmatprep.subr.bf16.mxu1 %v9862_v2  ;;  %v9931_v1 = vld [vmem:[%s11714_s22 + $0x9a0] ss:$8 sps:$4 sm:$0xff]   ;;  %v9936_v2 = vld [vmem:[%s11714_s22 + $0x1b4] ss:$8 sps:$4 sm:$0xff]  }
 0x15e   : > { %8378 = vmatprep.subr.bf16.mxu0 %v9864_v3  ;;  %v9939_v3 = vld [vmem:[%s11714_s22 + $0x9b4] ss:$8 sps:$4 sm:$0xff]  }
 0x160   : > { %7955 = vmatpush1.bf16.msra.mxu1 %v9866_v4  ;;  %v9934_v4 = vld [vmem:[%s11714_s22 + $0x1b0] ss:$8 sps:$4 sm:$0xff]  }
 0x161   : > { %8379 = vmatpush1.bf16.msra.mxu0 %v9867_v5  ;;  %7977 = vmatprep.subr.bf16.mxu1 %v9870_v6  ;;  %v9937_v5 = vld [vmem:[%s11714_s22 + $0x9b0] ss:$8 sps:$4 sm:$0xff]   ;;  %v9942_v6 = vld [vmem:[%s11714_s22 + $0x1c4] ss:$8 sps:$4 sm:$0xff]  }
 0x162   : > { %8401 = vmatprep.subr.bf16.mxu0 %v9873_v7  ;;  %v9945_v7 = vld [vmem:[%s11714_s22 + $0x9c4] ss:$8 sps:$4 sm:$0xff]  }
 0x163   : > { %7957 = vmatmul.mubr.bf16.vlgmr.msra.gmra.mrb[0].mxu1 %v9013_v8  ;;  %v9940_v8 = vld [vmem:[%s11714_s22 + $0x1c0] ss:$8 sps:$4 sm:$0xff]  }
 0x164   : > { %8381 = vmatmul.mubr.bf16.vlgmr.msra.gmra.mrb[0].mxu0 %v9029_v10  ;;  %7978 = vmatpush1.bf16.msra.mxu1 %v9868_v9  ;;  %v9943_v9 = vld [vmem:[%s11714_s22 + $0x9c0] ss:$8 sps:$4 sm:$0xff]   ;;  %v9948_v10 = vld [vmem:[%s11714_s22 + $0x1d4] ss:$8 sps:$4 sm:$0xff]  }
 0x165   : > { %8402 = vmatpush1.bf16.msra.mxu0 %v9871_v11  ;;  %7979 = vmatprep.subr.bf16.mxu1 %v9876_v12  ;;  %v9951_v11 = vld [vmem:[%s11714_s22 + $0x9d4] ss:$8 sps:$4 sm:$0xff]   ;;  %v9946_v12 = vld [vmem:[%s11714_s22 + $0x1d0] ss:$8 sps:$4 sm:$0xff]  }
 0x166   : > { %8403 = vmatprep.subr.bf16.mxu0 %v9879_v13  ;;  %7966 = vmatprep.mubr.bf16.mxu1 %v9046_v33  ;;  %v9949_v13 = vld [vmem:[%s11714_s22 + $0x9d0] ss:$8 sps:$4 sm:$0xff]   ;;  %v4525_v33 = vld [vmem:[%s11765_s29 + $0x1c8] sm:$0xff] }
 0x167   : > { %8390 = vmatprep.mubr.bf16.mxu0 %v9062_v39  ;;  %v9981_v39 = vld [vmem:[%s11714_s22 + $0xa24] ss:$8 sps:$4 sm:$0xff]  }
 0x168   : > { %7980 = vmatpush1.bf16.msra.mxu1 %v9874_v14  ;;  %v9954_v14 = vld [vmem:[%s11714_s22 + $0x1e4] ss:$8 sps:$4 sm:$0xff]  }
 0x169   : > { %8404 = vmatpush1.bf16.msra.mxu0 %v9877_v15  ;;  %7981 = vmatprep.subr.bf16.mxu1 %v9882_v16  ;;  %v9957_v15 = vld [vmem:[%s11714_s22 + $0x9e4] ss:$8 sps:$4 sm:$0xff]   ;;  %v9952_v16 = vld [vmem:[%s11714_s22 + $0x1e0] ss:$8 sps:$4 sm:$0xff]  }
 0x16a   : > { %8405 = vmatprep.subr.bf16.mxu0 %v9885_v17  ;;  %v9955_v17 = vld [vmem:[%s11714_s22 + $0x9e0] ss:$8 sps:$4 sm:$0xff]  }
 0x16b   : > { %7967 = vmatmul.mubr.bf16.gmra.mrb[4].mxu1 %v9045_v37  ;;  %v9973_v37 = vld [vmem:[%s11714_s22 + $0xa10] ss:$8 sps:$4 sm:$0xff]  }
 0x16c   : > { %7982 = vmatpush1.bf16.msra.mxu1 %v9880_v18  ;;  %8391 = vmatmul.mubr.bf16.gmra.mrb[4].mxu0 %v9061_v40  ;;  %v9960_v18 = vld [vmem:[%s11714_s22 + $0x1f4] ss:$8 sps:$4 sm:$0xff]   ;;  %v9976_v40 = vld [vmem:[%s11714_s22 + $0x220] ss:$8 sps:$4 sm:$0xff]  }
 0x16d   : > { %8406 = vmatpush1.bf16.msra.mxu0 %v9883_v19  ;;  %7983 = vmatprep.subr.bf16.mxu1 %v9888_v20  ;;  %v9963_v19 = vld [vmem:[%s11714_s22 + $0x9f4] ss:$8 sps:$4 sm:$0xff]   ;;  %v9958_v20 = vld [vmem:[%s11714_s22 + $0x1f0] ss:$8 sps:$4 sm:$0xff]  }
 0x16e   : > { %8407 = vmatprep.subr.bf16.mxu0 %v9891_v21  ;;  %8009 = vmatprep.mubr.bf16.mxu1 %v9016_v48  ;;  %v9961_v21 = vld [vmem:[%s11714_s22 + $0x9f0] ss:$8 sps:$4 sm:$0xff]   ;;  %v9984_v48 = vld [vmem:[%s11714_s22 + $0x234] ss:$8 sps:$4 sm:$0xff]  }
 0x16f   : > { %8433 = vmatprep.mubr.bf16.mxu0 %v9032_v53  ;;  %v9985_v53 = vld [vmem:[%s11714_s22 + $0xa30] ss:$8 sps:$4 sm:$0xff]  }
 0x170   : > { %7984 = vmatpush1.bf16.msra.mxu1 %v9886_v22  ;;  %v9966_v22 = vld [vmem:[%s11714_s22 + $0x204] ss:$8 sps:$4 sm:$0xff]  }
 0x171   : > { %8408 = vmatpush1.bf16.msra.mxu0 %v9889_v23  ;;  %7985 = vmatprep.subr.bf16.mxu1 %v9894_v24  ;;  %v9969_v23 = vld [vmem:[%s11714_s22 + $0xa04] ss:$8 sps:$4 sm:$0xff]   ;;  %v9964_v24 = vld [vmem:[%s11714_s22 + $0x200] ss:$8 sps:$4 sm:$0xff]  }
 0x172   : > { %8409 = vmatprep.subr.bf16.mxu0 %v9897_v25  ;;  %v9967_v25 = vld [vmem:[%s11714_s22 + $0xa00] ss:$8 sps:$4 sm:$0xff]  }
 0x174   : > { %7986 = vmatpush1.bf16.msra.mxu1 %v9892_v26  ;;  %v4501_v26 = vld [vmem:[%s11765_s29 + $0x108] sm:$0xff] }
 0x175   : > { %8410 = vmatpush1.bf16.msra.mxu0 %v9895_v27  ;;  %7987 = vmatprep.subr.bf16.mxu1 %v9900_v28  ;;  %v9015_v27 = vcombine.low %v11824_v44, %v11827_v45  ;;  %v9031_v28 = vcombine.low %v11834_v49, %v11837_v50  ;;  %v11899_v45 = vld [vmem:[%s11765_s29 + $0x90] sm:$0xff] }
 0x176   : > { %8411 = vmatprep.subr.bf16.mxu0 %v9903_v29  ;;  %v4517_v29 = vld [vmem:[%s11765_s29 + $0x188] sm:$0xff]  ;;  %v9987_v49 = vld [vmem:[%s11714_s22 + $0xa34] ss:$8 sps:$4 sm:$0xff]  }
 0x178   : > { %7988 = vmatpush1.bf16.msra.mxu1 %v9898_v32  ;;  %v4509_v32 = vld [vmem:[%s11765_s29 + $0x148] sm:$0xff] }
 0x179   : > { %8412 = vmatpush1.bf16.msra.mxu0 %v9901_v34  ;;  %7989 = vmatprep.subr.bf16.mxu1 %v9906_v38  ;;  %v9048_v34 = vcombine.high %v4501_v26, %v4517_v29  ;;  %v9064_v35 = vcombine.high %v4509_v32, %v4525_v33  ;;  %v9978_v38 = vld [vmem:[%s11714_s22 + $0x224] ss:$8 sps:$4 sm:$0xff]   ;;  %v9063_v44 = vcombine.low %v4509_v32, %v4525_v33  ;;  %v10048_v32 = vld [vmem:[%s11714_s22 + $0x2e0] ss:$8 sps:$4 sm:$0xff]  }
 0x17a   : > { %8413 = vmatprep.subr.bf16.mxu0 %v9909_v41  ;;  %v9979_v41 = vld [vmem:[%s11714_s22 + $0xa20] ss:$8 sps:$4 sm:$0xff]  }
 0x17b   : > { %v10051_v33 = vld [vmem:[%s11714_s22 + $0xae0] ss:$8 sps:$4 sm:$0xff]  }
 0x17c   : > { %7990 = vmatpush1.bf16.msra.mxu1 %v9904_v42  ;;  %v11896_v42 = vld [vmem:[%s11765_s29 + $0x10] sm:$0xff] }
 0x17d   : > { %8414 = vmatpush1.bf16.msra.mxu0 %v9907_v43  ;;  %7991 = vmatprep.subr.bf16.mxu1 %v9912_v46  ;;  %v9047_v43 = vcombine.low %v4501_v26, %v4517_v29  ;;  %v11902_v46 = vld [vmem:[%s11765_s29 + $0x50] sm:$0xff]  ;;  %v9018_v50 = vcombine.high %v11896_v42, %v11899_v45 }
 0x17e   : > { %8415 = vmatprep.subr.bf16.mxu0 %v9915_v47  ;;  %v11905_v47 = vld [vmem:[%s11765_s29 + $0xd0] sm:$0xff] }
 0x17f   : > { %v10044_v26 = vld [vmem:[%s11714_s22 + $0x2d4] ss:$8 sps:$4 sm:$0xff]   ;;  %v10045_v29 = vld [vmem:[%s11714_s22 + $0xad0] ss:$8 sps:$4 sm:$0xff]  }
 0x180   : > { %7992 = vmatpush1.bf16.msra.mxu1 %v9910_v51  ;;  %v9034_v51 = vcombine.high %v11902_v46, %v11905_v47 }
 0x181   : > { %8416 = vmatpush1.bf16.msra.mxu0 %v9913_v52  ;;  %7993 = vmatprep.subr.bf16.mxu1 %v9918_v54  ;;  %v9982_v52 = vld [vmem:[%s11714_s22 + $0x230] ss:$8 sps:$4 sm:$0xff]   ;;  %v9990_v54 = vld [vmem:[%s11714_s22 + $0x244] ss:$8 sps:$4 sm:$0xff]  }
 0x182   : > { %8417 = vmatprep.subr.bf16.mxu0 %v9921_v55  ;;  %v9993_v55 = vld [vmem:[%s11714_s22 + $0xa44] ss:$8 sps:$4 sm:$0xff]  }
 0x184   : > { %7994 = vmatpush1.bf16.msra.mxu1 %v9916_v56  ;;  %v9988_v56 = vld [vmem:[%s11714_s22 + $0x240] ss:$8 sps:$4 sm:$0xff]  }
 0x185   : > { %8418 = vmatpush1.bf16.msra.mxu0 %v9919_v57  ;;  %7995 = vmatprep.subr.bf16.mxu1 %v9924_v58  ;;  %v9991_v57 = vld [vmem:[%s11714_s22 + $0xa40] ss:$8 sps:$4 sm:$0xff]   ;;  %v9996_v58 = vld [vmem:[%s11714_s22 + $0x254] ss:$8 sps:$4 sm:$0xff]  }
 0x186   : > { %8419 = vmatprep.subr.bf16.mxu0 %v9927_v59  ;;  %v9999_v59 = vld [vmem:[%s11714_s22 + $0xa54] ss:$8 sps:$4 sm:$0xff]  }
 0x188   : > { %7996 = vmatpush1.bf16.msra.mxu1 %v9922_v60  ;;  %v9994_v60 = vld [vmem:[%s11714_s22 + $0x250] ss:$8 sps:$4 sm:$0xff]  }
 0x189   : > { %8420 = vmatpush1.bf16.msra.mxu0 %v9925_v61  ;;  %7997 = vmatprep.subr.bf16.mxu1 %v9930_v62  ;;  %v9997_v61 = vld [vmem:[%s11714_s22 + $0xa50] ss:$8 sps:$4 sm:$0xff]   ;;  %v10002_v62 = vld [vmem:[%s11714_s22 + $0x264] ss:$8 sps:$4 sm:$0xff]  }
 0x18a   : > { %8421 = vmatprep.subr.bf16.mxu0 %v9933_v63  ;;  %v10005_v63 = vld [vmem:[%s11714_s22 + $0xa64] ss:$8 sps:$4 sm:$0xff]  }
 0x18c   : > { %7998 = vmatpush1.bf16.msra.mxu1 %v9928_v0  ;;  %v10000_v0 = vld [vmem:[%s11714_s22 + $0x260] ss:$8 sps:$4 sm:$0xff]  }
 0x18d   : > { %8422 = vmatpush1.bf16.msra.mxu0 %v9931_v1  ;;  %7999 = vmatprep.subr.bf16.mxu1 %v9936_v2  ;;  %v10003_v1 = vld [vmem:[%s11714_s22 + $0xa60] ss:$8 sps:$4 sm:$0xff]   ;;  %v10008_v2 = vld [vmem:[%s11714_s22 + $0x274] ss:$8 sps:$4 sm:$0xff]  }
 0x18e   : > { %8423 = vmatprep.subr.bf16.mxu0 %v9939_v3  ;;  %v10011_v3 = vld [vmem:[%s11714_s22 + $0xa74] ss:$8 sps:$4 sm:$0xff]  }
 0x190   : > { %8000 = vmatpush1.bf16.msra.mxu1 %v9934_v4  ;;  %v10006_v4 = vld [vmem:[%s11714_s22 + $0x270] ss:$8 sps:$4 sm:$0xff]  }
 0x191   : > { %8424 = vmatpush1.bf16.msra.mxu0 %v9937_v5  ;;  %8001 = vmatprep.subr.bf16.mxu1 %v9942_v6  ;;  %v10009_v5 = vld [vmem:[%s11714_s22 + $0xa70] ss:$8 sps:$4 sm:$0xff]   ;;  %v10014_v6 = vld [vmem:[%s11714_s22 + $0x284] ss:$8 sps:$4 sm:$0xff]  }
 0x192   : > { %8425 = vmatprep.subr.bf16.mxu0 %v9945_v7  ;;  %v10017_v7 = vld [vmem:[%s11714_s22 + $0xa84] ss:$8 sps:$4 sm:$0xff]  }
 0x194   : > { %8002 = vmatpush1.bf16.msra.mxu1 %v9940_v8  ;;  %v10012_v8 = vld [vmem:[%s11714_s22 + $0x280] ss:$8 sps:$4 sm:$0xff]  }
 0x195   : > { %8426 = vmatpush1.bf16.msra.mxu0 %v9943_v9  ;;  %8003 = vmatprep.subr.bf16.mxu1 %v9948_v10  ;;  %v10015_v9 = vld [vmem:[%s11714_s22 + $0xa80] ss:$8 sps:$4 sm:$0xff]   ;;  %v10020_v10 = vld [vmem:[%s11714_s22 + $0x294] ss:$8 sps:$4 sm:$0xff]  }
 0x196   : > { %8427 = vmatprep.subr.bf16.mxu0 %v9951_v11  ;;  %v10023_v11 = vld [vmem:[%s11714_s22 + $0xa94] ss:$8 sps:$4 sm:$0xff]  }
 0x198   : > { %8004 = vmatpush1.bf16.msra.mxu1 %v9946_v12  ;;  %v10018_v12 = vld [vmem:[%s11714_s22 + $0x290] ss:$8 sps:$4 sm:$0xff]  }
 0x199   : > { %8428 = vmatpush1.bf16.msra.mxu0 %v9949_v13  ;;  %8005 = vmatprep.subr.bf16.mxu1 %v9954_v14  ;;  %v10021_v13 = vld [vmem:[%s11714_s22 + $0xa90] ss:$8 sps:$4 sm:$0xff]   ;;  %v10026_v14 = vld [vmem:[%s11714_s22 + $0x2a4] ss:$8 sps:$4 sm:$0xff]  }
 0x19a   : > { %8429 = vmatprep.subr.bf16.mxu0 %v9957_v15  ;;  %v10029_v15 = vld [vmem:[%s11714_s22 + $0xaa4] ss:$8 sps:$4 sm:$0xff]  }
 0x19c   : > { %8006 = vmatpush1.bf16.msra.mxu1 %v9952_v16  ;;  %v10024_v16 = vld [vmem:[%s11714_s22 + $0x2a0] ss:$8 sps:$4 sm:$0xff]  }
 0x19d   : > { %8430 = vmatpush1.bf16.msra.mxu0 %v9955_v17  ;;  %8007 = vmatprep.subr.bf16.mxu1 %v9960_v18  ;;  %v10027_v17 = vld [vmem:[%s11714_s22 + $0xaa0] ss:$8 sps:$4 sm:$0xff]   ;;  %v10032_v18 = vld [vmem:[%s11714_s22 + $0x2b4] ss:$8 sps:$4 sm:$0xff]  }
 0x19e   : > { %8431 = vmatprep.subr.bf16.mxu0 %v9963_v19  ;;  %v10035_v19 = vld [vmem:[%s11714_s22 + $0xab4] ss:$8 sps:$4 sm:$0xff]  }
 0x1a0   : > { %8008 = vmatpush1.bf16.msra.mxu1 %v9958_v20  ;;  %v10030_v20 = vld [vmem:[%s11714_s22 + $0x2b0] ss:$8 sps:$4 sm:$0xff]  }
 0x1a1   : > { %8432 = vmatpush1.bf16.msra.mxu0 %v9961_v21  ;;  %8030 = vmatprep.subr.bf16.mxu1 %v9966_v22  ;;  %v10033_v21 = vld [vmem:[%s11714_s22 + $0xab0] ss:$8 sps:$4 sm:$0xff]   ;;  %v10038_v22 = vld [vmem:[%s11714_s22 + $0x2c4] ss:$8 sps:$4 sm:$0xff]  }
 0x1a2   : > { %8454 = vmatprep.subr.bf16.mxu0 %v9969_v23  ;;  %v10041_v23 = vld [vmem:[%s11714_s22 + $0xac4] ss:$8 sps:$4 sm:$0xff]  }
 0x1a3   : > { %8010 = vmatmul.mubr.bf16.vlgmr.msra.gmra.mrb[0].mxu1 %v9015_v27  ;;  %v10047_v27 = vld [vmem:[%s11714_s22 + $0xad4] ss:$8 sps:$4 sm:$0xff]  }
 0x1a4   : > { %8434 = vmatmul.mubr.bf16.vlgmr.msra.gmra.mrb[0].mxu0 %v9031_v28  ;;  %8031 = vmatpush1.bf16.msra.mxu1 %v9964_v24  ;;  %v10036_v24 = vld [vmem:[%s11714_s22 + $0x2c0] ss:$8 sps:$4 sm:$0xff]   ;;  %v10042_v28 = vld [vmem:[%s11714_s22 + $0x2d0] ss:$8 sps:$4 sm:$0xff]  }
 0x1a5   : > { %8455 = vmatpush1.bf16.msra.mxu0 %v9967_v25  ;;  %8032 = vmatprep.subr.bf16.mxu1 %v9972_v30  ;;  %v10039_v25 = vld [vmem:[%s11714_s22 + $0xac0] ss:$8 sps:$4 sm:$0xff]   ;;  %v10050_v30 = vld [vmem:[%s11714_s22 + $0x2e4] ss:$8 sps:$4 sm:$0xff]  }
 0x1a6   : > { %8456 = vmatprep.subr.bf16.mxu0 %v9975_v31  ;;  %8019 = vmatprep.mubr.bf16.mxu1 %v9048_v34  ;;  %v10053_v31 = vld [vmem:[%s11714_s22 + $0xae4] ss:$8 sps:$4 sm:$0xff]   ;;  %v10056_v34 = vld [vmem:[%s11714_s22 + $0x2f4] ss:$8 sps:$4 sm:$0xff]  }
 0x1a7   : > { %8443 = vmatprep.mubr.bf16.mxu0 %v9064_v35  ;;  %v10059_v35 = vld [vmem:[%s11714_s22 + $0xaf4] ss:$8 sps:$4 sm:$0xff]  }
 0x1a8   : > { %8033 = vmatpush1.bf16.msra.mxu1 %v9970_v36  ;;  %v10054_v36 = vld [vmem:[%s11714_s22 + $0x2f0] ss:$8 sps:$4 sm:$0xff]  }
 0x1a9   : > { %8457 = vmatpush1.bf16.msra.mxu0 %v9973_v37  ;;  %8034 = vmatprep.subr.bf16.mxu1 %v9978_v38  ;;  %v10057_v37 = vld [vmem:[%s11714_s22 + $0xaf0] ss:$8 sps:$4 sm:$0xff]   ;;  %v10062_v38 = vld [vmem:[%s11714_s22 + $0x304] ss:$8 sps:$4 sm:$0xff]  }
 0x1aa   : > { %8458 = vmatprep.subr.bf16.mxu0 %v9981_v39  ;;  %v10065_v39 = vld [vmem:[%s11714_s22 + $0xb04] ss:$8 sps:$4 sm:$0xff]  }
 0x1ab   : > { %8020 = vmatmul.mubr.bf16.gmra.mrb[4].mxu1 %v9047_v43  ;;  %v4502_v43 = vld [vmem:[%s11765_s29 + $0x110] sm:$0xff] }
 0x1ac   : > { %8444 = vmatmul.mubr.bf16.gmra.mrb[4].mxu0 %v9063_v44  ;;  %8035 = vmatpush1.bf16.msra.mxu1 %v9976_v40  ;;  %v10060_v40 = vld [vmem:[%s11714_s22 + $0x300] ss:$8 sps:$4 sm:$0xff]   ;;  %v4518_v44 = vld [vmem:[%s11765_s29 + $0x190] sm:$0xff] }
 0x1ad   : > { %8459 = vmatpush1.bf16.msra.mxu0 %v9979_v41  ;;  %8036 = vmatprep.subr.bf16.mxu1 %v9984_v48  ;;  %v10063_v41 = vld [vmem:[%s11714_s22 + $0xb00] ss:$8 sps:$4 sm:$0xff]   ;;  %v9017_v48 = vcombine.low %v11896_v42, %v11899_v45  ;;  %v10066_v42 = vld [vmem:[%s11714_s22 + $0x310] ss:$8 sps:$4 sm:$0xff]  }
 0x1ae   : > { %8460 = vmatprep.subr.bf16.mxu0 %v9987_v49  ;;  %8062 = vmatprep.mubr.bf16.mxu1 %v9018_v50  ;;  %v9033_v49 = vcombine.low %v11902_v46, %v11905_v47  ;;  %v4510_v50 = vld [vmem:[%s11765_s29 + $0x150] sm:$0xff]  ;;  %v10074_v46 = vld [vmem:[%s11714_s22 + $0x324] ss:$8 sps:$4 sm:$0xff]  }
 0x1af   : > { %8486 = vmatprep.mubr.bf16.mxu0 %v9034_v51  ;;  %v4526_v51 = vld [vmem:[%s11765_s29 + $0x1d0] sm:$0xff]  ;;  %v10077_v47 = vld [vmem:[%s11714_s22 + $0xb24] ss:$8 sps:$4 sm:$0xff]  }
 0x1b0   : > { %8037 = vmatpush1.bf16.msra.mxu1 %v9982_v52  ;;  %v10068_v52 = vld [vmem:[%s11714_s22 + $0x314] ss:$8 sps:$4 sm:$0xff]   ;;  %v10069_v45 = vld [vmem:[%s11714_s22 + $0xb10] ss:$8 sps:$4 sm:$0xff]  }
 0x1b1   : > { %8461 = vmatpush1.bf16.msra.mxu0 %v9985_v53  ;;  %8038 = vmatprep.subr.bf16.mxu1 %v9990_v54  ;;  %v10071_v53 = vld [vmem:[%s11714_s22 + $0xb14] ss:$8 sps:$4 sm:$0xff]   ;;  %v9050_v54 = vcombine.high %v4502_v43, %v4518_v44 }
 0x1b2   : > { %8462 = vmatprep.subr.bf16.mxu0 %v9993_v55  ;;  %v9066_v55 = vcombine.high %v4510_v50, %v4526_v51 }
 0x1b4   : > { %8039 = vmatpush1.bf16.msra.mxu1 %v9988_v56  ;;  %v10072_v56 = vld [vmem:[%s11714_s22 + $0x320] ss:$8 sps:$4 sm:$0xff]  }
 0x1b5   : > { %8463 = vmatpush1.bf16.msra.mxu0 %v9991_v57  ;;  %8040 = vmatprep.subr.bf16.mxu1 %v9996_v58  ;;  %v10075_v57 = vld [vmem:[%s11714_s22 + $0xb20] ss:$8 sps:$4 sm:$0xff]   ;;  %v11984_v58 = vld [vmem:[%s11765_s29 + $0x18] sm:$0xff] }
 0x1b6   : > { %8464 = vmatprep.subr.bf16.mxu0 %v9999_v59  ;;  %v11987_v59 = vld [vmem:[%s11765_s29 + $0x98] sm:$0xff] }
 0x1b8   : > { %8041 = vmatpush1.bf16.msra.mxu1 %v9994_v60  ;;  %v9049_v60 = vcombine.low %v4502_v43, %v4518_v44  ;;  %v10140_v43 = vld [vmem:[%s11714_s22 + $0x3d4] ss:$8 sps:$4 sm:$0xff]  }
 0x1b9   : > { %8465 = vmatpush1.bf16.msra.mxu0 %v9997_v61  ;;  %8042 = vmatprep.subr.bf16.mxu1 %v10002_v62  ;;  %v9065_v61 = vcombine.low %v4510_v50, %v4526_v51  ;;  %v11990_v62 = vld [vmem:[%s11765_s29 + $0x58] sm:$0xff]  ;;  %v10146_v50 = vld [vmem:[%s11714_s22 + $0x3e4] ss:$8 sps:$4 sm:$0xff]  }
 0x1ba   : > { %8466 = vmatprep.subr.bf16.mxu0 %v10005_v63  ;;  %v11993_v63 = vld [vmem:[%s11765_s29 + $0xd8] sm:$0xff]  ;;  %v10149_v51 = vld [vmem:[%s11714_s22 + $0xbe4] ss:$8 sps:$4 sm:$0xff]  }
 0x1bb   : > { %v10143_v44 = vld [vmem:[%s11714_s22 + $0xbd4] ss:$8 sps:$4 sm:$0xff]  }
 0x1bc   : > { %8043 = vmatpush1.bf16.msra.mxu1 %v10000_v0  ;;  %v10080_v0 = vld [vmem:[%s11714_s22 + $0x334] ss:$8 sps:$4 sm:$0xff]  }
 0x1bd   : > { %8467 = vmatpush1.bf16.msra.mxu0 %v10003_v1  ;;  %8044 = vmatprep.subr.bf16.mxu1 %v10008_v2  ;;  %v10083_v1 = vld [vmem:[%s11714_s22 + $0xb34] ss:$8 sps:$4 sm:$0xff]   ;;  %v9020_v2 = vcombine.high %v11984_v58, %v11987_v59 }
 0x1be   : > { %8468 = vmatprep.subr.bf16.mxu0 %v10011_v3  ;;  %v9036_v3 = vcombine.high %v11990_v62, %v11993_v63 }
 0x1c0   : > { %8045 = vmatpush1.bf16.msra.mxu1 %v10006_v4  ;;  %v10078_v4 = vld [vmem:[%s11714_s22 + $0x330] ss:$8 sps:$4 sm:$0xff]  }
 0x1c1   : > { %8469 = vmatpush1.bf16.msra.mxu0 %v10009_v5  ;;  %8046 = vmatprep.subr.bf16.mxu1 %v10014_v6  ;;  %v10081_v5 = vld [vmem:[%s11714_s22 + $0xb30] ss:$8 sps:$4 sm:$0xff]   ;;  %v10086_v6 = vld [vmem:[%s11714_s22 + $0x344] ss:$8 sps:$4 sm:$0xff]  }
 0x1c2   : > { %8470 = vmatprep.subr.bf16.mxu0 %v10017_v7  ;;  %v10089_v7 = vld [vmem:[%s11714_s22 + $0xb44] ss:$8 sps:$4 sm:$0xff]  }
 0x1c4   : > { %8047 = vmatpush1.bf16.msra.mxu1 %v10012_v8  ;;  %v10084_v8 = vld [vmem:[%s11714_s22 + $0x340] ss:$8 sps:$4 sm:$0xff]  }
 0x1c5   : > { %8471 = vmatpush1.bf16.msra.mxu0 %v10015_v9  ;;  %8048 = vmatprep.subr.bf16.mxu1 %v10020_v10  ;;  %v10087_v9 = vld [vmem:[%s11714_s22 + $0xb40] ss:$8 sps:$4 sm:$0xff]   ;;  %v10092_v10 = vld [vmem:[%s11714_s22 + $0x354] ss:$8 sps:$4 sm:$0xff]  }
 0x1c6   : > { %8472 = vmatprep.subr.bf16.mxu0 %v10023_v11  ;;  %v10095_v11 = vld [vmem:[%s11714_s22 + $0xb54] ss:$8 sps:$4 sm:$0xff]  }
 0x1c8   : > { %8049 = vmatpush1.bf16.msra.mxu1 %v10018_v12  ;;  %v10090_v12 = vld [vmem:[%s11714_s22 + $0x350] ss:$8 sps:$4 sm:$0xff]  }
 0x1c9   : > { %8473 = vmatpush1.bf16.msra.mxu0 %v10021_v13  ;;  %8050 = vmatprep.subr.bf16.mxu1 %v10026_v14  ;;  %v10093_v13 = vld [vmem:[%s11714_s22 + $0xb50] ss:$8 sps:$4 sm:$0xff]   ;;  %v10098_v14 = vld [vmem:[%s11714_s22 + $0x364] ss:$8 sps:$4 sm:$0xff]  }
 0x1ca   : > { %8474 = vmatprep.subr.bf16.mxu0 %v10029_v15  ;;  %v10101_v15 = vld [vmem:[%s11714_s22 + $0xb64] ss:$8 sps:$4 sm:$0xff]  }
 0x1cc   : > { %8051 = vmatpush1.bf16.msra.mxu1 %v10024_v16  ;;  %v10096_v16 = vld [vmem:[%s11714_s22 + $0x360] ss:$8 sps:$4 sm:$0xff]  }
 0x1cd   : > { %8475 = vmatpush1.bf16.msra.mxu0 %v10027_v17  ;;  %8052 = vmatprep.subr.bf16.mxu1 %v10032_v18  ;;  %v10099_v17 = vld [vmem:[%s11714_s22 + $0xb60] ss:$8 sps:$4 sm:$0xff]   ;;  %v10104_v18 = vld [vmem:[%s11714_s22 + $0x374] ss:$8 sps:$4 sm:$0xff]  }
 0x1ce   : > { %8476 = vmatprep.subr.bf16.mxu0 %v10035_v19  ;;  %v10107_v19 = vld [vmem:[%s11714_s22 + $0xb74] ss:$8 sps:$4 sm:$0xff]  }
 0x1d0   : > { %8053 = vmatpush1.bf16.msra.mxu1 %v10030_v20  ;;  %v10102_v20 = vld [vmem:[%s11714_s22 + $0x370] ss:$8 sps:$4 sm:$0xff]  }
 0x1d1   : > { %8477 = vmatpush1.bf16.msra.mxu0 %v10033_v21  ;;  %8054 = vmatprep.subr.bf16.mxu1 %v10038_v22  ;;  %v10105_v21 = vld [vmem:[%s11714_s22 + $0xb70] ss:$8 sps:$4 sm:$0xff]   ;;  %v10110_v22 = vld [vmem:[%s11714_s22 + $0x384] ss:$8 sps:$4 sm:$0xff]  }
 0x1d2   : > { %8478 = vmatprep.subr.bf16.mxu0 %v10041_v23  ;;  %v10113_v23 = vld [vmem:[%s11714_s22 + $0xb84] ss:$8 sps:$4 sm:$0xff]  }
 0x1d4   : > { %8055 = vmatpush1.bf16.msra.mxu1 %v10036_v24  ;;  %v10108_v24 = vld [vmem:[%s11714_s22 + $0x380] ss:$8 sps:$4 sm:$0xff]  }
 0x1d5   : > { %8479 = vmatpush1.bf16.msra.mxu0 %v10039_v25  ;;  %8056 = vmatprep.subr.bf16.mxu1 %v10044_v26  ;;  %v10111_v25 = vld [vmem:[%s11714_s22 + $0xb80] ss:$8 sps:$4 sm:$0xff]   ;;  %v10116_v26 = vld [vmem:[%s11714_s22 + $0x394] ss:$8 sps:$4 sm:$0xff]  }
 0x1d6   : > { %8480 = vmatprep.subr.bf16.mxu0 %v10047_v27  ;;  %v10119_v27 = vld [vmem:[%s11714_s22 + $0xb94] ss:$8 sps:$4 sm:$0xff]  }
 0x1d8   : > { %8057 = vmatpush1.bf16.msra.mxu1 %v10042_v28  ;;  %v10114_v28 = vld [vmem:[%s11714_s22 + $0x390] ss:$8 sps:$4 sm:$0xff]  }
 0x1d9   : > { %8481 = vmatpush1.bf16.msra.mxu0 %v10045_v29  ;;  %8058 = vmatprep.subr.bf16.mxu1 %v10050_v30  ;;  %v10117_v29 = vld [vmem:[%s11714_s22 + $0xb90] ss:$8 sps:$4 sm:$0xff]   ;;  %v10122_v30 = vld [vmem:[%s11714_s22 + $0x3a4] ss:$8 sps:$4 sm:$0xff]  }
 0x1da   : > { %8482 = vmatprep.subr.bf16.mxu0 %v10053_v31  ;;  %v10125_v31 = vld [vmem:[%s11714_s22 + $0xba4] ss:$8 sps:$4 sm:$0xff]  }
 0x1dc   : > { %8059 = vmatpush1.bf16.msra.mxu1 %v10048_v32  ;;  %v10120_v32 = vld [vmem:[%s11714_s22 + $0x3a0] ss:$8 sps:$4 sm:$0xff]  }
 0x1dd   : > { %8483 = vmatpush1.bf16.msra.mxu0 %v10051_v33  ;;  %8060 = vmatprep.subr.bf16.mxu1 %v10056_v34  ;;  %v10123_v33 = vld [vmem:[%s11714_s22 + $0xba0] ss:$8 sps:$4 sm:$0xff]   ;;  %v10128_v34 = vld [vmem:[%s11714_s22 + $0x3b4] ss:$8 sps:$4 sm:$0xff]  }
 0x1de   : > { %8484 = vmatprep.subr.bf16.mxu0 %v10059_v35  ;;  %v10131_v35 = vld [vmem:[%s11714_s22 + $0xbb4] ss:$8 sps:$4 sm:$0xff]  }
 0x1e0   : > { %8061 = vmatpush1.bf16.msra.mxu1 %v10054_v36  ;;  %v10126_v36 = vld [vmem:[%s11714_s22 + $0x3b0] ss:$8 sps:$4 sm:$0xff]  }
 0x1e1   : > { %8485 = vmatpush1.bf16.msra.mxu0 %v10057_v37  ;;  %8083 = vmatprep.subr.bf16.mxu1 %v10062_v38  ;;  %v10129_v37 = vld [vmem:[%s11714_s22 + $0xbb0] ss:$8 sps:$4 sm:$0xff]   ;;  %v10134_v38 = vld [vmem:[%s11714_s22 + $0x3c4] ss:$8 sps:$4 sm:$0xff]  }
 0x1e2   : > { %8507 = vmatprep.subr.bf16.mxu0 %v10065_v39  ;;  %v10137_v39 = vld [vmem:[%s11714_s22 + $0xbc4] ss:$8 sps:$4 sm:$0xff]  }
 0x1e3   : > { %8063 = vmatmul.mubr.bf16.vlgmr.msra.gmra.mrb[0].mxu1 %v9017_v48  ;;  %v10138_v48 = vld [vmem:[%s11714_s22 + $0x3d0] ss:$8 sps:$4 sm:$0xff]  }
 0x1e4   : > { %8487 = vmatmul.mubr.bf16.vlgmr.msra.gmra.mrb[0].mxu0 %v9033_v49  ;;  %8084 = vmatpush1.bf16.msra.mxu1 %v10060_v40  ;;  %v10132_v40 = vld [vmem:[%s11714_s22 + $0x3c0] ss:$8 sps:$4 sm:$0xff]   ;;  %v10141_v49 = vld [vmem:[%s11714_s22 + $0xbd0] ss:$8 sps:$4 sm:$0xff]  }
 0x1e5   : > { %8508 = vmatpush1.bf16.msra.mxu0 %v10063_v41  ;;  %8085 = vmatprep.subr.bf16.mxu1 %v10068_v52  ;;  %v10135_v41 = vld [vmem:[%s11714_s22 + $0xbc0] ss:$8 sps:$4 sm:$0xff]  }
 0x1e6   : > { %8509 = vmatprep.subr.bf16.mxu0 %v10071_v53  ;;  %8072 = vmatprep.mubr.bf16.mxu1 %v9050_v54  ;;  %v10144_v52 = vld [vmem:[%s11714_s22 + $0x3e0] ss:$8 sps:$4 sm:$0xff]   ;;  %v10152_v54 = vld [vmem:[%s11714_s22 + $0x3f4] ss:$8 sps:$4 sm:$0xff]  }
 0x1e7   : > { %8496 = vmatprep.mubr.bf16.mxu0 %v9066_v55  ;;  %v10147_v53 = vld [vmem:[%s11714_s22 + $0xbe0] ss:$8 sps:$4 sm:$0xff]   ;;  %v10155_v55 = vld [vmem:[%s11714_s22 + $0xbf4] ss:$8 sps:$4 sm:$0xff]  }
 0x1e8   : > { %8086 = vmatpush1.bf16.msra.mxu1 %v10066_v42  ;;  %v10150_v42 = vld [vmem:[%s11714_s22 + $0x3f0] ss:$8 sps:$4 sm:$0xff]  }
 0x1e9   : > { %8510 = vmatpush1.bf16.msra.mxu0 %v10069_v45  ;;  %8087 = vmatprep.subr.bf16.mxu1 %v10074_v46  ;;  %v10153_v45 = vld [vmem:[%s11714_s22 + $0xbf0] ss:$8 sps:$4 sm:$0xff]   ;;  %v10158_v46 = vld [vmem:[%s11714_s22 + $0x404] ss:$8 sps:$4 sm:$0xff]  }
 0x1ea   : > { %8511 = vmatprep.subr.bf16.mxu0 %v10077_v47  ;;  %v10161_v47 = vld [vmem:[%s11714_s22 + $0xc04] ss:$8 sps:$4 sm:$0xff]  }
 0x1eb   : > { %8073 = vmatmul.mubr.bf16.gmra.mrb[4].mxu1 %v9049_v60  ;;  %v4503_v60 = vld [vmem:[%s11765_s29 + $0x118] sm:$0xff] }
 0x1ec   : > { %8497 = vmatmul.mubr.bf16.gmra.mrb[4].mxu0 %v9065_v61  ;;  %8088 = vmatpush1.bf16.msra.mxu1 %v10072_v56  ;;  %v10156_v56 = vld [vmem:[%s11714_s22 + $0x400] ss:$8 sps:$4 sm:$0xff]   ;;  %v4519_v61 = vld [vmem:[%s11765_s29 + $0x198] sm:$0xff] }
 0x1ed   : > { %8512 = vmatpush1.bf16.msra.mxu0 %v10075_v57  ;;  %8089 = vmatprep.subr.bf16.mxu1 %v10080_v0  ;;  %v10159_v57 = vld [vmem:[%s11714_s22 + $0xc00] ss:$8 sps:$4 sm:$0xff]   ;;  %v9019_v0 = vcombine.low %v11984_v58, %v11987_v59  ;;  %v10162_v58 = vld [vmem:[%s11714_s22 + $0x410] ss:$8 sps:$4 sm:$0xff]  }
 0x1ee   : > { %8513 = vmatprep.subr.bf16.mxu0 %v10083_v1  ;;  %8115 = vmatprep.mubr.bf16.mxu1 %v9020_v2  ;;  %v9035_v1 = vcombine.low %v11990_v62, %v11993_v63  ;;  %v4511_v2 = vld [vmem:[%s11765_s29 + $0x158] sm:$0xff]  ;;  %v10170_v62 = vld [vmem:[%s11714_s22 + $0x424] ss:$8 sps:$4 sm:$0xff]  }
 0x1ef   : > { %8539 = vmatprep.mubr.bf16.mxu0 %v9036_v3  ;;  %v4527_v3 = vld [vmem:[%s11765_s29 + $0x1d8] sm:$0xff]  ;;  %v10173_v63 = vld [vmem:[%s11714_s22 + $0xc24] ss:$8 sps:$4 sm:$0xff]  }
 0x1f0   : > { %8090 = vmatpush1.bf16.msra.mxu1 %v10078_v4  ;;  %v10164_v4 = vld [vmem:[%s11714_s22 + $0x414] ss:$8 sps:$4 sm:$0xff]   ;;  %v10165_v59 = vld [vmem:[%s11714_s22 + $0xc10] ss:$8 sps:$4 sm:$0xff]  }
 0x1f1   : > { %8514 = vmatpush1.bf16.msra.mxu0 %v10081_v5  ;;  %8091 = vmatprep.subr.bf16.mxu1 %v10086_v6  ;;  %v10167_v5 = vld [vmem:[%s11714_s22 + $0xc14] ss:$8 sps:$4 sm:$0xff]   ;;  %v9052_v6 = vcombine.high %v4503_v60, %v4519_v61 }
 0x1f2   : > { %8515 = vmatprep.subr.bf16.mxu0 %v10089_v7  ;;  %v9068_v7 = vcombine.high %v4511_v2, %v4527_v3 }
 0x1f4   : > { %8092 = vmatpush1.bf16.msra.mxu1 %v10084_v8  ;;  %v12070_v8 = vld [vmem:[%s11765_s29 + $0x20] sm:$0xff] }
 0x1f5   : > { %8516 = vmatpush1.bf16.msra.mxu0 %v10087_v9  ;;  %8093 = vmatprep.subr.bf16.mxu1 %v10092_v10  ;;  %v12073_v9 = vld [vmem:[%s11765_s29 + $0xa0] sm:$0xff] }
 0x1f6   : > { %8517 = vmatprep.subr.bf16.mxu0 %v10095_v11  ;;  %v12076_v10 = vld [vmem:[%s11765_s29 + $0x60] sm:$0xff]  ;;  %v9051_v11 = vcombine.low %v4503_v60, %v4519_v61  ;;  %v10236_v60 = vld [vmem:[%s11714_s22 + $0x4d4] ss:$8 sps:$4 sm:$0xff]  }
 0x1f7   : > { %v10239_v61 = vld [vmem:[%s11714_s22 + $0xcd4] ss:$8 sps:$4 sm:$0xff]  }
 0x1f8   : > { %8094 = vmatpush1.bf16.msra.mxu1 %v10090_v12  ;;  %v9067_v12 = vcombine.low %v4511_v2, %v4527_v3  ;;  %v10242_v2 = vld [vmem:[%s11714_s22 + $0x4e4] ss:$8 sps:$4 sm:$0xff]  }
 0x1f9   : > { %8518 = vmatpush1.bf16.msra.mxu0 %v10093_v13  ;;  %8095 = vmatprep.subr.bf16.mxu1 %v10098_v14  ;;  %v12079_v13 = vld [vmem:[%s11765_s29 + $0xe0] sm:$0xff] }
 0x1fa   : > { %8519 = vmatprep.subr.bf16.mxu0 %v10101_v15  ;;  %v10168_v14 = vld [vmem:[%s11714_s22 + $0x420] ss:$8 sps:$4 sm:$0xff]   ;;  %v10245_v3 = vld [vmem:[%s11714_s22 + $0xce4] ss:$8 sps:$4 sm:$0xff]  }
 0x1fb   : > { %v10171_v15 = vld [vmem:[%s11714_s22 + $0xc20] ss:$8 sps:$4 sm:$0xff]  }
 0x1fc   : > { %8096 = vmatpush1.bf16.msra.mxu1 %v10096_v16  ;;  %v10176_v16 = vld [vmem:[%s11714_s22 + $0x434] ss:$8 sps:$4 sm:$0xff]  }
 0x1fd   : > { %8520 = vmatpush1.bf16.msra.mxu0 %v10099_v17  ;;  %8097 = vmatprep.subr.bf16.mxu1 %v10104_v18  ;;  %v10179_v17 = vld [vmem:[%s11714_s22 + $0xc34] ss:$8 sps:$4 sm:$0xff]   ;;  %v9022_v18 = vcombine.high %v12070_v8, %v12073_v9 }
 0x1fe   : > { %8521 = vmatprep.subr.bf16.mxu0 %v10107_v19  ;;  %v9038_v19 = vcombine.high %v12076_v10, %v12079_v13 }
 0x200   : > { %8098 = vmatpush1.bf16.msra.mxu1 %v10102_v20  ;;  %v10174_v20 = vld [vmem:[%s11714_s22 + $0x430] ss:$8 sps:$4 sm:$0xff]  }
 0x201   : > { %8522 = vmatpush1.bf16.msra.mxu0 %v10105_v21  ;;  %8099 = vmatprep.subr.bf16.mxu1 %v10110_v22  ;;  %v10177_v21 = vld [vmem:[%s11714_s22 + $0xc30] ss:$8 sps:$4 sm:$0xff]   ;;  %v10182_v22 = vld [vmem:[%s11714_s22 + $0x444] ss:$8 sps:$4 sm:$0xff]  }
 0x202   : > { %8523 = vmatprep.subr.bf16.mxu0 %v10113_v23  ;;  %v10185_v23 = vld [vmem:[%s11714_s22 + $0xc44] ss:$8 sps:$4 sm:$0xff]  }
 0x204   : > { %8100 = vmatpush1.bf16.msra.mxu1 %v10108_v24  ;;  %v10180_v24 = vld [vmem:[%s11714_s22 + $0x440] ss:$8 sps:$4 sm:$0xff]  }
 0x205   : > { %8524 = vmatpush1.bf16.msra.mxu0 %v10111_v25  ;;  %8101 = vmatprep.subr.bf16.mxu1 %v10116_v26  ;;  %v10183_v25 = vld [vmem:[%s11714_s22 + $0xc40] ss:$8 sps:$4 sm:$0xff]   ;;  %v10188_v26 = vld [vmem:[%s11714_s22 + $0x454] ss:$8 sps:$4 sm:$0xff]  }
 0x206   : > { %8525 = vmatprep.subr.bf16.mxu0 %v10119_v27  ;;  %v10191_v27 = vld [vmem:[%s11714_s22 + $0xc54] ss:$8 sps:$4 sm:$0xff]  }
 0x208   : > { %8102 = vmatpush1.bf16.msra.mxu1 %v10114_v28  ;;  %v10186_v28 = vld [vmem:[%s11714_s22 + $0x450] ss:$8 sps:$4 sm:$0xff]  }
 0x209   : > { %8526 = vmatpush1.bf16.msra.mxu0 %v10117_v29  ;;  %8103 = vmatprep.subr.bf16.mxu1 %v10122_v30  ;;  %v10189_v29 = vld [vmem:[%s11714_s22 + $0xc50] ss:$8 sps:$4 sm:$0xff]   ;;  %v10194_v30 = vld [vmem:[%s11714_s22 + $0x464] ss:$8 sps:$4 sm:$0xff]  }
 0x20a   : > { %8527 = vmatprep.subr.bf16.mxu0 %v10125_v31  ;;  %v10197_v31 = vld [vmem:[%s11714_s22 + $0xc64] ss:$8 sps:$4 sm:$0xff]  }
 0x20c   : > { %8104 = vmatpush1.bf16.msra.mxu1 %v10120_v32  ;;  %v10192_v32 = vld [vmem:[%s11714_s22 + $0x460] ss:$8 sps:$4 sm:$0xff]  }
 0x20d   : > { %8528 = vmatpush1.bf16.msra.mxu0 %v10123_v33  ;;  %8105 = vmatprep.subr.bf16.mxu1 %v10128_v34  ;;  %v10195_v33 = vld [vmem:[%s11714_s22 + $0xc60] ss:$8 sps:$4 sm:$0xff]   ;;  %v10200_v34 = vld [vmem:[%s11714_s22 + $0x474] ss:$8 sps:$4 sm:$0xff]  }
 0x20e   : > { %8529 = vmatprep.subr.bf16.mxu0 %v10131_v35  ;;  %v10203_v35 = vld [vmem:[%s11714_s22 + $0xc74] ss:$8 sps:$4 sm:$0xff]  }
 0x210   : > { %8106 = vmatpush1.bf16.msra.mxu1 %v10126_v36  ;;  %v10198_v36 = vld [vmem:[%s11714_s22 + $0x470] ss:$8 sps:$4 sm:$0xff]  }
 0x211   : > { %8530 = vmatpush1.bf16.msra.mxu0 %v10129_v37  ;;  %8107 = vmatprep.subr.bf16.mxu1 %v10134_v38  ;;  %v10201_v37 = vld [vmem:[%s11714_s22 + $0xc70] ss:$8 sps:$4 sm:$0xff]   ;;  %v10206_v38 = vld [vmem:[%s11714_s22 + $0x484] ss:$8 sps:$4 sm:$0xff]  }
 0x212   : > { %8531 = vmatprep.subr.bf16.mxu0 %v10137_v39  ;;  %v10209_v39 = vld [vmem:[%s11714_s22 + $0xc84] ss:$8 sps:$4 sm:$0xff]  }
 0x214   : > { %8108 = vmatpush1.bf16.msra.mxu1 %v10132_v40  ;;  %v10204_v40 = vld [vmem:[%s11714_s22 + $0x480] ss:$8 sps:$4 sm:$0xff]  }
 0x215   : > { %8532 = vmatpush1.bf16.msra.mxu0 %v10135_v41  ;;  %8109 = vmatprep.subr.bf16.mxu1 %v10140_v43  ;;  %v10207_v41 = vld [vmem:[%s11714_s22 + $0xc80] ss:$8 sps:$4 sm:$0xff]   ;;  %v10212_v43 = vld [vmem:[%s11714_s22 + $0x494] ss:$8 sps:$4 sm:$0xff]  }
 0x216   : > { %8533 = vmatprep.subr.bf16.mxu0 %v10143_v44  ;;  %v10215_v44 = vld [vmem:[%s11714_s22 + $0xc94] ss:$8 sps:$4 sm:$0xff]  }
 0x218   : > { %8110 = vmatpush1.bf16.msra.mxu1 %v10138_v48  ;;  %v10210_v48 = vld [vmem:[%s11714_s22 + $0x490] ss:$8 sps:$4 sm:$0xff]  }
 0x219   : > { %8534 = vmatpush1.bf16.msra.mxu0 %v10141_v49  ;;  %8111 = vmatprep.subr.bf16.mxu1 %v10146_v50  ;;  %v10213_v49 = vld [vmem:[%s11714_s22 + $0xc90] ss:$8 sps:$4 sm:$0xff]   ;;  %v10218_v50 = vld [vmem:[%s11714_s22 + $0x4a4] ss:$8 sps:$4 sm:$0xff]  }
 0x21a   : > { %8535 = vmatprep.subr.bf16.mxu0 %v10149_v51  ;;  %v10221_v51 = vld [vmem:[%s11714_s22 + $0xca4] ss:$8 sps:$4 sm:$0xff]  }
 0x21c   : > { %8112 = vmatpush1.bf16.msra.mxu1 %v10144_v52  ;;  %v10216_v52 = vld [vmem:[%s11714_s22 + $0x4a0] ss:$8 sps:$4 sm:$0xff]  }
 0x21d   : > { %8536 = vmatpush1.bf16.msra.mxu0 %v10147_v53  ;;  %8113 = vmatprep.subr.bf16.mxu1 %v10152_v54  ;;  %v10219_v53 = vld [vmem:[%s11714_s22 + $0xca0] ss:$8 sps:$4 sm:$0xff]   ;;  %v10224_v54 = vld [vmem:[%s11714_s22 + $0x4b4] ss:$8 sps:$4 sm:$0xff]  }
 0x21e   : > { %8537 = vmatprep.subr.bf16.mxu0 %v10155_v55  ;;  %v10227_v55 = vld [vmem:[%s11714_s22 + $0xcb4] ss:$8 sps:$4 sm:$0xff]  }
 0x220   : > { %8114 = vmatpush1.bf16.msra.mxu1 %v10150_v42  ;;  %v10222_v42 = vld [vmem:[%s11714_s22 + $0x4b0] ss:$8 sps:$4 sm:$0xff]  }
 0x221   : > { %8538 = vmatpush1.bf16.msra.mxu0 %v10153_v45  ;;  %8136 = vmatprep.subr.bf16.mxu1 %v10158_v46  ;;  %v10225_v45 = vld [vmem:[%s11714_s22 + $0xcb0] ss:$8 sps:$4 sm:$0xff]   ;;  %v10230_v46 = vld [vmem:[%s11714_s22 + $0x4c4] ss:$8 sps:$4 sm:$0xff]  }
 0x222   : > { %8560 = vmatprep.subr.bf16.mxu0 %v10161_v47  ;;  %v10233_v47 = vld [vmem:[%s11714_s22 + $0xcc4] ss:$8 sps:$4 sm:$0xff]  }
 0x223   : > { %8116 = vmatmul.mubr.bf16.vlgmr.msra.gmra.mrb[0].mxu1 %v9019_v0  ;;  %v10234_v0 = vld [vmem:[%s11714_s22 + $0x4d0] ss:$8 sps:$4 sm:$0xff]  }
 0x224   : > { %8540 = vmatmul.mubr.bf16.vlgmr.msra.gmra.mrb[0].mxu0 %v9035_v1  ;;  %8137 = vmatpush1.bf16.msra.mxu1 %v10156_v56  ;;  %v10228_v56 = vld [vmem:[%s11714_s22 + $0x4c0] ss:$8 sps:$4 sm:$0xff]   ;;  %v10237_v1 = vld [vmem:[%s11714_s22 + $0xcd0] ss:$8 sps:$4 sm:$0xff]  }
 0x225   : > { %8561 = vmatpush1.bf16.msra.mxu0 %v10159_v57  ;;  %8138 = vmatprep.subr.bf16.mxu1 %v10164_v4  ;;  %v10231_v57 = vld [vmem:[%s11714_s22 + $0xcc0] ss:$8 sps:$4 sm:$0xff]  }
 0x226   : > { %8562 = vmatprep.subr.bf16.mxu0 %v10167_v5  ;;  %8125 = vmatprep.mubr.bf16.mxu1 %v9052_v6  ;;  %v10240_v4 = vld [vmem:[%s11714_s22 + $0x4e0] ss:$8 sps:$4 sm:$0xff]   ;;  %v10248_v6 = vld [vmem:[%s11714_s22 + $0x4f4] ss:$8 sps:$4 sm:$0xff]  }
 0x227   : > { %8549 = vmatprep.mubr.bf16.mxu0 %v9068_v7  ;;  %v10243_v5 = vld [vmem:[%s11714_s22 + $0xce0] ss:$8 sps:$4 sm:$0xff]   ;;  %v10251_v7 = vld [vmem:[%s11714_s22 + $0xcf4] ss:$8 sps:$4 sm:$0xff]  }
 0x228   : > { %8139 = vmatpush1.bf16.msra.mxu1 %v10162_v58  ;;  %v10246_v58 = vld [vmem:[%s11714_s22 + $0x4f0] ss:$8 sps:$4 sm:$0xff]  }
 0x229   : > { %8563 = vmatpush1.bf16.msra.mxu0 %v10165_v59  ;;  %8140 = vmatprep.subr.bf16.mxu1 %v10170_v62  ;;  %v10249_v59 = vld [vmem:[%s11714_s22 + $0xcf0] ss:$8 sps:$4 sm:$0xff]   ;;  %v10254_v62 = vld [vmem:[%s11714_s22 + $0x504] ss:$8 sps:$4 sm:$0xff]  }
 0x22a   : > { %8564 = vmatprep.subr.bf16.mxu0 %v10173_v63  ;;  %v10257_v63 = vld [vmem:[%s11714_s22 + $0xd04] ss:$8 sps:$4 sm:$0xff]  }
 0x22b   : > { %8126 = vmatmul.mubr.bf16.gmra.mrb[4].mxu1 %v9051_v11  ;;  %v4504_v11 = vld [vmem:[%s11765_s29 + $0x120] sm:$0xff] }
 0x22c   : > { %8550 = vmatmul.mubr.bf16.gmra.mrb[4].mxu0 %v9067_v12  ;;  %8141 = vmatpush1.bf16.msra.mxu1 %v10168_v14  ;;  %v4520_v12 = vld [vmem:[%s11765_s29 + $0x1a0] sm:$0xff] }
 0x22d   : > { %8565 = vmatpush1.bf16.msra.mxu0 %v10171_v15  ;;  %8142 = vmatprep.subr.bf16.mxu1 %v10176_v16  ;;  %v4512_v14 = vld [vmem:[%s11765_s29 + $0x160] sm:$0xff]  ;;  %v9021_v16 = vcombine.low %v12070_v8, %v12073_v9  ;;  %v9054_v8 = vcombine.high %v4504_v11, %v4520_v12 }
 0x22e   : > { %8566 = vmatprep.subr.bf16.mxu0 %v10179_v17  ;;  %8168 = vmatprep.mubr.bf16.mxu1 %v9022_v18  ;;  %v4528_v15 = vld [vmem:[%s11765_s29 + $0x1e0] sm:$0xff]  ;;  %v9037_v17 = vcombine.low %v12076_v10, %v12079_v13 }
 0x22f   : > { %8592 = vmatprep.mubr.bf16.mxu0 %v9038_v19  ;;  %v10252_v18 = vld [vmem:[%s11714_s22 + $0x500] ss:$8 sps:$4 sm:$0xff]   ;;  %v9070_v9 = vcombine.high %v4512_v14, %v4528_v15  ;;  %v10266_v10 = vld [vmem:[%s11714_s22 + $0x524] ss:$8 sps:$4 sm:$0xff]  }
 0x230   : > { %8143 = vmatpush1.bf16.msra.mxu1 %v10174_v20  ;;  %v10255_v19 = vld [vmem:[%s11714_s22 + $0xd00] ss:$8 sps:$4 sm:$0xff]   ;;  %v10260_v20 = vld [vmem:[%s11714_s22 + $0x514] ss:$8 sps:$4 sm:$0xff]   ;;  %v10269_v13 = vld [vmem:[%s11714_s22 + $0xd24] ss:$8 sps:$4 sm:$0xff]  }
 0x231   : > { %8567 = vmatpush1.bf16.msra.mxu0 %v10177_v21  ;;  %8144 = vmatprep.subr.bf16.mxu1 %v10182_v22  ;;  %v10263_v21 = vld [vmem:[%s11714_s22 + $0xd14] ss:$8 sps:$4 sm:$0xff]   ;;  %v10258_v22 = vld [vmem:[%s11714_s22 + $0x510] ss:$8 sps:$4 sm:$0xff]  }
 0x232   : > { %8568 = vmatprep.subr.bf16.mxu0 %v10185_v23  ;;  %v10261_v23 = vld [vmem:[%s11714_s22 + $0xd10] ss:$8 sps:$4 sm:$0xff]  }
 0x234   : > { %8145 = vmatpush1.bf16.msra.mxu1 %v10180_v24  ;;  %v12158_v24 = vld [vmem:[%s11765_s29 + $0x28] sm:$0xff] }
 0x235   : > { %8569 = vmatpush1.bf16.msra.mxu0 %v10183_v25  ;;  %8146 = vmatprep.subr.bf16.mxu1 %v10188_v26  ;;  %v12161_v25 = vld [vmem:[%s11765_s29 + $0xa8] sm:$0xff] }
 0x236   : > { %8570 = vmatprep.subr.bf16.mxu0 %v10191_v27  ;;  %v12164_v26 = vld [vmem:[%s11765_s29 + $0x68] sm:$0xff] }
 0x237   : > { %v12167_v27 = vld [vmem:[%s11765_s29 + $0xe8] sm:$0xff] }
 0x238   : > { %8147 = vmatpush1.bf16.msra.mxu1 %v10186_v28  ;;  %v9053_v28 = vcombine.low %v4504_v11, %v4520_v12  ;;  %v10324_v11 = vld [vmem:[%s11714_s22 + $0x5c0] ss:$8 sps:$4 sm:$0xff]  }
 0x239   : > { %8571 = vmatpush1.bf16.msra.mxu0 %v10189_v29  ;;  %8148 = vmatprep.subr.bf16.mxu1 %v10194_v30  ;;  %v9069_v29 = vcombine.low %v4512_v14, %v4528_v15  ;;  %v10264_v30 = vld [vmem:[%s11714_s22 + $0x520] ss:$8 sps:$4 sm:$0xff]   ;;  %v10332_v14 = vld [vmem:[%s11714_s22 + $0x5d4] ss:$8 sps:$4 sm:$0xff]  }
 0x23a   : > { %8572 = vmatprep.subr.bf16.mxu0 %v10197_v31  ;;  %v10267_v31 = vld [vmem:[%s11714_s22 + $0xd20] ss:$8 sps:$4 sm:$0xff]   ;;  %v10335_v15 = vld [vmem:[%s11714_s22 + $0xdd4] ss:$8 sps:$4 sm:$0xff]  }
 0x23b   : > { %v10327_v12 = vld [vmem:[%s11714_s22 + $0xdc0] ss:$8 sps:$4 sm:$0xff]  }
 0x23c   : > { %8149 = vmatpush1.bf16.msra.mxu1 %v10192_v32  ;;  %v10272_v32 = vld [vmem:[%s11714_s22 + $0x534] ss:$8 sps:$4 sm:$0xff]  }
 0x23d   : > { %8573 = vmatpush1.bf16.msra.mxu0 %v10195_v33  ;;  %8150 = vmatprep.subr.bf16.mxu1 %v10200_v34  ;;  %v10275_v33 = vld [vmem:[%s11714_s22 + $0xd34] ss:$8 sps:$4 sm:$0xff]   ;;  %v9024_v34 = vcombine.high %v12158_v24, %v12161_v25 }
 0x23e   : > { %8574 = vmatprep.subr.bf16.mxu0 %v10203_v35  ;;  %v9040_v35 = vcombine.high %v12164_v26, %v12167_v27 }
 0x240   : > { %8151 = vmatpush1.bf16.msra.mxu1 %v10198_v36  ;;  %v10270_v36 = vld [vmem:[%s11714_s22 + $0x530] ss:$8 sps:$4 sm:$0xff]  }
 0x241   : > { %8575 = vmatpush1.bf16.msra.mxu0 %v10201_v37  ;;  %8152 = vmatprep.subr.bf16.mxu1 %v10206_v38  ;;  %v10273_v37 = vld [vmem:[%s11714_s22 + $0xd30] ss:$8 sps:$4 sm:$0xff]   ;;  %v10278_v38 = vld [vmem:[%s11714_s22 + $0x544] ss:$8 sps:$4 sm:$0xff]  }
 0x242   : > { %8576 = vmatprep.subr.bf16.mxu0 %v10209_v39  ;;  %v10281_v39 = vld [vmem:[%s11714_s22 + $0xd44] ss:$8 sps:$4 sm:$0xff]  }
 0x244   : > { %8153 = vmatpush1.bf16.msra.mxu1 %v10204_v40  ;;  %v10276_v40 = vld [vmem:[%s11714_s22 + $0x540] ss:$8 sps:$4 sm:$0xff]  }
 0x245   : > { %8577 = vmatpush1.bf16.msra.mxu0 %v10207_v41  ;;  %8154 = vmatprep.subr.bf16.mxu1 %v10212_v43  ;;  %v10279_v41 = vld [vmem:[%s11714_s22 + $0xd40] ss:$8 sps:$4 sm:$0xff]   ;;  %v10284_v43 = vld [vmem:[%s11714_s22 + $0x554] ss:$8 sps:$4 sm:$0xff]  }
 0x246   : > { %8578 = vmatprep.subr.bf16.mxu0 %v10215_v44  ;;  %v10287_v44 = vld [vmem:[%s11714_s22 + $0xd54] ss:$8 sps:$4 sm:$0xff]  }
 0x248   : > { %8155 = vmatpush1.bf16.msra.mxu1 %v10210_v48  ;;  %v10282_v48 = vld [vmem:[%s11714_s22 + $0x550] ss:$8 sps:$4 sm:$0xff]  }
 0x249   : > { %8579 = vmatpush1.bf16.msra.mxu0 %v10213_v49  ;;  %8156 = vmatprep.subr.bf16.mxu1 %v10218_v50  ;;  %v10285_v49 = vld [vmem:[%s11714_s22 + $0xd50] ss:$8 sps:$4 sm:$0xff]   ;;  %v10290_v50 = vld [vmem:[%s11714_s22 + $0x564] ss:$8 sps:$4 sm:$0xff]  }
 0x24a   : > { %8580 = vmatprep.subr.bf16.mxu0 %v10221_v51  ;;  %v10293_v51 = vld [vmem:[%s11714_s22 + $0xd64] ss:$8 sps:$4 sm:$0xff]  }
 0x24c   : > { %8157 = vmatpush1.bf16.msra.mxu1 %v10216_v52  ;;  %v10288_v52 = vld [vmem:[%s11714_s22 + $0x560] ss:$8 sps:$4 sm:$0xff]  }
 0x24d   : > { %8581 = vmatpush1.bf16.msra.mxu0 %v10219_v53  ;;  %8158 = vmatprep.subr.bf16.mxu1 %v10224_v54  ;;  %v10291_v53 = vld [vmem:[%s11714_s22 + $0xd60] ss:$8 sps:$4 sm:$0xff]   ;;  %v10296_v54 = vld [vmem:[%s11714_s22 + $0x574] ss:$8 sps:$4 sm:$0xff]  }
 0x24e   : > { %8582 = vmatprep.subr.bf16.mxu0 %v10227_v55  ;;  %v10299_v55 = vld [vmem:[%s11714_s22 + $0xd74] ss:$8 sps:$4 sm:$0xff]  }
 0x250   : > { %8159 = vmatpush1.bf16.msra.mxu1 %v10222_v42  ;;  %v10294_v42 = vld [vmem:[%s11714_s22 + $0x570] ss:$8 sps:$4 sm:$0xff]  }
 0x251   : > { %8583 = vmatpush1.bf16.msra.mxu0 %v10225_v45  ;;  %8160 = vmatprep.subr.bf16.mxu1 %v10230_v46  ;;  %v10297_v45 = vld [vmem:[%s11714_s22 + $0xd70] ss:$8 sps:$4 sm:$0xff]   ;;  %v10302_v46 = vld [vmem:[%s11714_s22 + $0x584] ss:$8 sps:$4 sm:$0xff]  }
 0x252   : > { %8584 = vmatprep.subr.bf16.mxu0 %v10233_v47  ;;  %v10305_v47 = vld [vmem:[%s11714_s22 + $0xd84] ss:$8 sps:$4 sm:$0xff]  }
 0x254   : > { %8161 = vmatpush1.bf16.msra.mxu1 %v10228_v56  ;;  %v10300_v56 = vld [vmem:[%s11714_s22 + $0x580] ss:$8 sps:$4 sm:$0xff]  }
 0x255   : > { %8585 = vmatpush1.bf16.msra.mxu0 %v10231_v57  ;;  %8162 = vmatprep.subr.bf16.mxu1 %v10236_v60  ;;  %v10303_v57 = vld [vmem:[%s11714_s22 + $0xd80] ss:$8 sps:$4 sm:$0xff]   ;;  %v10308_v60 = vld [vmem:[%s11714_s22 + $0x594] ss:$8 sps:$4 sm:$0xff]  }
 0x256   : > { %8586 = vmatprep.subr.bf16.mxu0 %v10239_v61  ;;  %v10311_v61 = vld [vmem:[%s11714_s22 + $0xd94] ss:$8 sps:$4 sm:$0xff]  }
 0x258   : > { %8163 = vmatpush1.bf16.msra.mxu1 %v10234_v0  ;;  %v10306_v0 = vld [vmem:[%s11714_s22 + $0x590] ss:$8 sps:$4 sm:$0xff]  }
 0x259   : > { %8587 = vmatpush1.bf16.msra.mxu0 %v10237_v1  ;;  %8164 = vmatprep.subr.bf16.mxu1 %v10242_v2  ;;  %v10309_v1 = vld [vmem:[%s11714_s22 + $0xd90] ss:$8 sps:$4 sm:$0xff]   ;;  %v10314_v2 = vld [vmem:[%s11714_s22 + $0x5a4] ss:$8 sps:$4 sm:$0xff]  }
 0x25a   : > { %8588 = vmatprep.subr.bf16.mxu0 %v10245_v3  ;;  %v10317_v3 = vld [vmem:[%s11714_s22 + $0xda4] ss:$8 sps:$4 sm:$0xff]  }
 0x25c   : > { %8165 = vmatpush1.bf16.msra.mxu1 %v10240_v4  ;;  %v10312_v4 = vld [vmem:[%s11714_s22 + $0x5a0] ss:$8 sps:$4 sm:$0xff]  }
 0x25d   : > { %8589 = vmatpush1.bf16.msra.mxu0 %v10243_v5  ;;  %8166 = vmatprep.subr.bf16.mxu1 %v10248_v6  ;;  %v10315_v5 = vld [vmem:[%s11714_s22 + $0xda0] ss:$8 sps:$4 sm:$0xff]   ;;  %v10320_v6 = vld [vmem:[%s11714_s22 + $0x5b4] ss:$8 sps:$4 sm:$0xff]  }
 0x25e   : > { %8590 = vmatprep.subr.bf16.mxu0 %v10251_v7  ;;  %v10323_v7 = vld [vmem:[%s11714_s22 + $0xdb4] ss:$8 sps:$4 sm:$0xff]  }
 0x260   : > { %8167 = vmatpush1.bf16.msra.mxu1 %v10246_v58  ;;  %v10318_v58 = vld [vmem:[%s11714_s22 + $0x5b0] ss:$8 sps:$4 sm:$0xff]  }
 0x261   : > { %8591 = vmatpush1.bf16.msra.mxu0 %v10249_v59  ;;  %8189 = vmatprep.subr.bf16.mxu1 %v10254_v62  ;;  %v10321_v59 = vld [vmem:[%s11714_s22 + $0xdb0] ss:$8 sps:$4 sm:$0xff]   ;;  %v10326_v62 = vld [vmem:[%s11714_s22 + $0x5c4] ss:$8 sps:$4 sm:$0xff]  }
 0x262   : > { %8613 = vmatprep.subr.bf16.mxu0 %v10257_v63  ;;  %v10329_v63 = vld [vmem:[%s11714_s22 + $0xdc4] ss:$8 sps:$4 sm:$0xff]  }
 0x263   : > { %8169 = vmatmul.mubr.bf16.vlgmr.msra.gmra.mrb[0].mxu1 %v9021_v16  ;;  %v10330_v16 = vld [vmem:[%s11714_s22 + $0x5d0] ss:$8 sps:$4 sm:$0xff]  }
 0x264   : > { %8593 = vmatmul.mubr.bf16.vlgmr.msra.gmra.mrb[0].mxu0 %v9037_v17  ;;  %8190 = vmatpush1.bf16.msra.mxu1 %v10252_v18  ;;  %v10333_v17 = vld [vmem:[%s11714_s22 + $0xdd0] ss:$8 sps:$4 sm:$0xff]   ;;  %v10338_v18 = vld [vmem:[%s11714_s22 + $0x5e4] ss:$8 sps:$4 sm:$0xff]  }
 0x265   : > { %8614 = vmatpush1.bf16.msra.mxu0 %v10255_v19  ;;  %8191 = vmatprep.subr.bf16.mxu1 %v10260_v20  ;;  %v10341_v19 = vld [vmem:[%s11714_s22 + $0xde4] ss:$8 sps:$4 sm:$0xff]   ;;  %v10336_v20 = vld [vmem:[%s11714_s22 + $0x5e0] ss:$8 sps:$4 sm:$0xff]  }
 0x266   : > { %8615 = vmatprep.subr.bf16.mxu0 %v10263_v21  ;;  %8178 = vmatprep.mubr.bf16.mxu1 %v9054_v8  ;;  %v10339_v21 = vld [vmem:[%s11714_s22 + $0xde0] ss:$8 sps:$4 sm:$0xff]   ;;  %v10342_v8 = vld [vmem:[%s11714_s22 + $0x5f0] ss:$8 sps:$4 sm:$0xff]  }
 0x267   : > { %8602 = vmatprep.mubr.bf16.mxu0 %v9070_v9  ;;  %v10345_v9 = vld [vmem:[%s11714_s22 + $0xdf0] ss:$8 sps:$4 sm:$0xff]  }
 0x268   : > { %8192 = vmatpush1.bf16.msra.mxu1 %v10258_v22  ;;  %v10344_v22 = vld [vmem:[%s11714_s22 + $0x5f4] ss:$8 sps:$4 sm:$0xff]  }
 0x269   : > { %8616 = vmatpush1.bf16.msra.mxu0 %v10261_v23  ;;  %8193 = vmatprep.subr.bf16.mxu1 %v10266_v10  ;;  %v10347_v23 = vld [vmem:[%s11714_s22 + $0xdf4] ss:$8 sps:$4 sm:$0xff]   ;;  %v10350_v10 = vld [vmem:[%s11714_s22 + $0x604] ss:$8 sps:$4 sm:$0xff]  }
 0x26a   : > { %8617 = vmatprep.subr.bf16.mxu0 %v10269_v13  ;;  %v10353_v13 = vld [vmem:[%s11714_s22 + $0xe04] ss:$8 sps:$4 sm:$0xff]  }
 0x26b   : > { %8179 = vmatmul.mubr.bf16.gmra.mrb[4].mxu1 %v9053_v28  ;;  %v4505_v28 = vld [vmem:[%s11765_s29 + $0x128] sm:$0xff] }
 0x26c   : > { %8603 = vmatmul.mubr.bf16.gmra.mrb[4].mxu0 %v9069_v29  ;;  %8194 = vmatpush1.bf16.msra.mxu1 %v10264_v30  ;;  %v9023_v29 = vcombine.low %v12158_v24, %v12161_v25  ;;  %v9039_v30 = vcombine.low %v12164_v26, %v12167_v27  ;;  %v10354_v26 = vld [vmem:[%s11714_s22 + $0x610] ss:$8 sps:$4 sm:$0xff]  }
 0x26d   : > { %8618 = vmatpush1.bf16.msra.mxu0 %v10267_v31  ;;  %8195 = vmatprep.subr.bf16.mxu1 %v10272_v32  ;;  %v4521_v31 = vld [vmem:[%s11765_s29 + $0x1a8] sm:$0xff]  ;;  %v10357_v27 = vld [vmem:[%s11714_s22 + $0xe10] ss:$8 sps:$4 sm:$0xff]  }
 0x26e   : > { %8619 = vmatprep.subr.bf16.mxu0 %v10275_v33  ;;  %8221 = vmatprep.mubr.bf16.mxu1 %v9024_v34  ;;  %v4513_v32 = vld [vmem:[%s11765_s29 + $0x168] sm:$0xff]  ;;  %v9056_v24 = vcombine.high %v4505_v28, %v4521_v31 }
 0x26f   : > { %8645 = vmatprep.mubr.bf16.mxu0 %v9040_v35  ;;  %v4529_v33 = vld [vmem:[%s11765_s29 + $0x1e8] sm:$0xff] }
 0x270   : > { %8196 = vmatpush1.bf16.msra.mxu1 %v10270_v36  ;;  %v10348_v34 = vld [vmem:[%s11714_s22 + $0x600] ss:$8 sps:$4 sm:$0xff]   ;;  %v10356_v36 = vld [vmem:[%s11714_s22 + $0x614] ss:$8 sps:$4 sm:$0xff]   ;;  %v9072_v25 = vcombine.high %v4513_v32, %v4529_v33 }
 0x271   : > { %8620 = vmatpush1.bf16.msra.mxu0 %v10273_v37  ;;  %8197 = vmatprep.subr.bf16.mxu1 %v10278_v38  ;;  %v10351_v35 = vld [vmem:[%s11714_s22 + $0xe00] ss:$8 sps:$4 sm:$0xff]   ;;  %v10359_v37 = vld [vmem:[%s11714_s22 + $0xe14] ss:$8 sps:$4 sm:$0xff]   ;;  %v10362_v38 = vld [vmem:[%s11714_s22 + $0x624] ss:$8 sps:$4 sm:$0xff]  }
 0x272   : > { %8621 = vmatprep.subr.bf16.mxu0 %v10281_v39  ;;  %v10365_v39 = vld [vmem:[%s11714_s22 + $0xe24] ss:$8 sps:$4 sm:$0xff]  }
 0x274   : > { %8198 = vmatpush1.bf16.msra.mxu1 %v10276_v40  ;;  %v12246_v40 = vld [vmem:[%s11765_s29 + $0x30] sm:$0xff] }
 0x275   : > { %8622 = vmatpush1.bf16.msra.mxu0 %v10279_v41  ;;  %8199 = vmatprep.subr.bf16.mxu1 %v10284_v43  ;;  %v9055_v41 = vcombine.low %v4505_v28, %v4521_v31  ;;  %v9071_v43 = vcombine.low %v4513_v32, %v4529_v33  ;;  %v10420_v28 = vld [vmem:[%s11714_s22 + $0x6c0] ss:$8 sps:$4 sm:$0xff]   ;;  %v10431_v31 = vld [vmem:[%s11714_s22 + $0xed4] ss:$8 sps:$4 sm:$0xff]   ;;  %v10426_v32 = vld [vmem:[%s11714_s22 + $0x6d0] ss:$8 sps:$4 sm:$0xff]  }
 0x276   : > { %8623 = vmatprep.subr.bf16.mxu0 %v10287_v44  ;;  %v12249_v44 = vld [vmem:[%s11765_s29 + $0xb0] sm:$0xff] }
 0x277   : > { %v10429_v33 = vld [vmem:[%s11714_s22 + $0xed0] ss:$8 sps:$4 sm:$0xff]  }
 0x278   : > { %8200 = vmatpush1.bf16.msra.mxu1 %v10282_v48  ;;  %v12252_v48 = vld [vmem:[%s11765_s29 + $0x70] sm:$0xff] }
 0x279   : > { %8624 = vmatpush1.bf16.msra.mxu0 %v10285_v49  ;;  %8201 = vmatprep.subr.bf16.mxu1 %v10290_v50  ;;  %v12255_v49 = vld [vmem:[%s11765_s29 + $0xf0] sm:$0xff]  ;;  %v10360_v50 = vld [vmem:[%s11714_s22 + $0x620] ss:$8 sps:$4 sm:$0xff]  }
 0x27a   : > { %8625 = vmatprep.subr.bf16.mxu0 %v10293_v51  ;;  %v10363_v51 = vld [vmem:[%s11714_s22 + $0xe20] ss:$8 sps:$4 sm:$0xff]  }
 0x27c   : > { %8202 = vmatpush1.bf16.msra.mxu1 %v10288_v52  ;;  %v10368_v52 = vld [vmem:[%s11714_s22 + $0x634] ss:$8 sps:$4 sm:$0xff]  }
 0x27d   : > { %8626 = vmatpush1.bf16.msra.mxu0 %v10291_v53  ;;  %8203 = vmatprep.subr.bf16.mxu1 %v10296_v54  ;;  %v10371_v53 = vld [vmem:[%s11714_s22 + $0xe34] ss:$8 sps:$4 sm:$0xff]   ;;  %v9026_v54 = vcombine.high %v12246_v40, %v12249_v44 }
 0x27e   : > { %8627 = vmatprep.subr.bf16.mxu0 %v10299_v55  ;;  %v9042_v55 = vcombine.high %v12252_v48, %v12255_v49 }
 0x280   : > { %8204 = vmatpush1.bf16.msra.mxu1 %v10294_v42  ;;  %v10366_v42 = vld [vmem:[%s11714_s22 + $0x630] ss:$8 sps:$4 sm:$0xff]  }
 0x281   : > { %8628 = vmatpush1.bf16.msra.mxu0 %v10297_v45  ;;  %8205 = vmatprep.subr.bf16.mxu1 %v10302_v46  ;;  %v10369_v45 = vld [vmem:[%s11714_s22 + $0xe30] ss:$8 sps:$4 sm:$0xff]   ;;  %v10374_v46 = vld [vmem:[%s11714_s22 + $0x644] ss:$8 sps:$4 sm:$0xff]  }
 0x282   : > { %8629 = vmatprep.subr.bf16.mxu0 %v10305_v47  ;;  %v10377_v47 = vld [vmem:[%s11714_s22 + $0xe44] ss:$8 sps:$4 sm:$0xff]  }
 0x284   : > { %8206 = vmatpush1.bf16.msra.mxu1 %v10300_v56  ;;  %v10372_v56 = vld [vmem:[%s11714_s22 + $0x640] ss:$8 sps:$4 sm:$0xff]  }
 0x285   : > { %8630 = vmatpush1.bf16.msra.mxu0 %v10303_v57  ;;  %8207 = vmatprep.subr.bf16.mxu1 %v10308_v60  ;;  %v10375_v57 = vld [vmem:[%s11714_s22 + $0xe40] ss:$8 sps:$4 sm:$0xff]   ;;  %v10380_v60 = vld [vmem:[%s11714_s22 + $0x654] ss:$8 sps:$4 sm:$0xff]  }
 0x286   : > { %8631 = vmatprep.subr.bf16.mxu0 %v10311_v61  ;;  %v10383_v61 = vld [vmem:[%s11714_s22 + $0xe54] ss:$8 sps:$4 sm:$0xff]  }
 0x288   : > { %8208 = vmatpush1.bf16.msra.mxu1 %v10306_v0  ;;  %v10378_v0 = vld [vmem:[%s11714_s22 + $0x650] ss:$8 sps:$4 sm:$0xff]  }
 0x289   : > { %8632 = vmatpush1.bf16.msra.mxu0 %v10309_v1  ;;  %8209 = vmatprep.subr.bf16.mxu1 %v10314_v2  ;;  %v10381_v1 = vld [vmem:[%s11714_s22 + $0xe50] ss:$8 sps:$4 sm:$0xff]   ;;  %v10386_v2 = vld [vmem:[%s11714_s22 + $0x664] ss:$8 sps:$4 sm:$0xff]  }
 0x28a   : > { %8633 = vmatprep.subr.bf16.mxu0 %v10317_v3  ;;  %v10389_v3 = vld [vmem:[%s11714_s22 + $0xe64] ss:$8 sps:$4 sm:$0xff]  }
 0x28c   : > { %8210 = vmatpush1.bf16.msra.mxu1 %v10312_v4  ;;  %v10384_v4 = vld [vmem:[%s11714_s22 + $0x660] ss:$8 sps:$4 sm:$0xff]  }
 0x28d   : > { %8634 = vmatpush1.bf16.msra.mxu0 %v10315_v5  ;;  %8211 = vmatprep.subr.bf16.mxu1 %v10320_v6  ;;  %v10387_v5 = vld [vmem:[%s11714_s22 + $0xe60] ss:$8 sps:$4 sm:$0xff]   ;;  %v10392_v6 = vld [vmem:[%s11714_s22 + $0x674] ss:$8 sps:$4 sm:$0xff]  }
 0x28e   : > { %8635 = vmatprep.subr.bf16.mxu0 %v10323_v7  ;;  %v10395_v7 = vld [vmem:[%s11714_s22 + $0xe74] ss:$8 sps:$4 sm:$0xff]  }
 0x290   : > { %8212 = vmatpush1.bf16.msra.mxu1 %v10318_v58  ;;  %v10390_v58 = vld [vmem:[%s11714_s22 + $0x670] ss:$8 sps:$4 sm:$0xff]  }
 0x291   : > { %8636 = vmatpush1.bf16.msra.mxu0 %v10321_v59  ;;  %8213 = vmatprep.subr.bf16.mxu1 %v10326_v62  ;;  %v10393_v59 = vld [vmem:[%s11714_s22 + $0xe70] ss:$8 sps:$4 sm:$0xff]   ;;  %v10398_v62 = vld [vmem:[%s11714_s22 + $0x684] ss:$8 sps:$4 sm:$0xff]  }
 0x292   : > { %8637 = vmatprep.subr.bf16.mxu0 %v10329_v63  ;;  %v10401_v63 = vld [vmem:[%s11714_s22 + $0xe84] ss:$8 sps:$4 sm:$0xff]  }
 0x294   : > { %8214 = vmatpush1.bf16.msra.mxu1 %v10324_v11  ;;  %v10396_v11 = vld [vmem:[%s11714_s22 + $0x680] ss:$8 sps:$4 sm:$0xff]  }
 0x295   : > { %8638 = vmatpush1.bf16.msra.mxu0 %v10327_v12  ;;  %8215 = vmatprep.subr.bf16.mxu1 %v10332_v14  ;;  %v10399_v12 = vld [vmem:[%s11714_s22 + $0xe80] ss:$8 sps:$4 sm:$0xff]   ;;  %v10404_v14 = vld [vmem:[%s11714_s22 + $0x694] ss:$8 sps:$4 sm:$0xff]  }
 0x296   : > { %8639 = vmatprep.subr.bf16.mxu0 %v10335_v15  ;;  %v10407_v15 = vld [vmem:[%s11714_s22 + $0xe94] ss:$8 sps:$4 sm:$0xff]  }
 0x298   : > { %8216 = vmatpush1.bf16.msra.mxu1 %v10330_v16  ;;  %v10402_v16 = vld [vmem:[%s11714_s22 + $0x690] ss:$8 sps:$4 sm:$0xff]  }
 0x299   : > { %8640 = vmatpush1.bf16.msra.mxu0 %v10333_v17  ;;  %8217 = vmatprep.subr.bf16.mxu1 %v10338_v18  ;;  %v10405_v17 = vld [vmem:[%s11714_s22 + $0xe90] ss:$8 sps:$4 sm:$0xff]   ;;  %v10410_v18 = vld [vmem:[%s11714_s22 + $0x6a4] ss:$8 sps:$4 sm:$0xff]  }
 0x29a   : > { %8641 = vmatprep.subr.bf16.mxu0 %v10341_v19  ;;  %v10413_v19 = vld [vmem:[%s11714_s22 + $0xea4] ss:$8 sps:$4 sm:$0xff]  }
 0x29c   : > { %8218 = vmatpush1.bf16.msra.mxu1 %v10336_v20  ;;  %v10408_v20 = vld [vmem:[%s11714_s22 + $0x6a0] ss:$8 sps:$4 sm:$0xff]  }
 0x29d   : > { %8642 = vmatpush1.bf16.msra.mxu0 %v10339_v21  ;;  %8219 = vmatprep.subr.bf16.mxu1 %v10344_v22  ;;  %v10411_v21 = vld [vmem:[%s11714_s22 + $0xea0] ss:$8 sps:$4 sm:$0xff]   ;;  %v10416_v22 = vld [vmem:[%s11714_s22 + $0x6b4] ss:$8 sps:$4 sm:$0xff]  }
 0x29e   : > { %8643 = vmatprep.subr.bf16.mxu0 %v10347_v23  ;;  %v10419_v23 = vld [vmem:[%s11714_s22 + $0xeb4] ss:$8 sps:$4 sm:$0xff]  }
 0x2a0   : > { %8220 = vmatpush1.bf16.msra.mxu1 %v10342_v8  ;;  %v10414_v8 = vld [vmem:[%s11714_s22 + $0x6b0] ss:$8 sps:$4 sm:$0xff]  }
 0x2a1   : > { %8644 = vmatpush1.bf16.msra.mxu0 %v10345_v9  ;;  %8242 = vmatprep.subr.bf16.mxu1 %v10350_v10  ;;  %v10417_v9 = vld [vmem:[%s11714_s22 + $0xeb0] ss:$8 sps:$4 sm:$0xff]   ;;  %v10422_v10 = vld [vmem:[%s11714_s22 + $0x6c4] ss:$8 sps:$4 sm:$0xff]  }
 0x2a2   : > { %8666 = vmatprep.subr.bf16.mxu0 %v10353_v13  ;;  %v10425_v13 = vld [vmem:[%s11714_s22 + $0xec4] ss:$8 sps:$4 sm:$0xff]  }
 0x2a3   : > { %8222 = vmatmul.mubr.bf16.vlgmr.msra.gmra.mrb[0].mxu1 %v9023_v29  ;;  %v10423_v29 = vld [vmem:[%s11714_s22 + $0xec0] ss:$8 sps:$4 sm:$0xff]  }
 0x2a4   : > { %8646 = vmatmul.mubr.bf16.vlgmr.msra.gmra.mrb[0].mxu0 %v9039_v30  ;;  %8243 = vmatpush1.bf16.msra.mxu1 %v10348_v34  ;;  %v10428_v30 = vld [vmem:[%s11714_s22 + $0x6d4] ss:$8 sps:$4 sm:$0xff]   ;;  %v10434_v34 = vld [vmem:[%s11714_s22 + $0x6e4] ss:$8 sps:$4 sm:$0xff]  }
 0x2a5   : > { %8667 = vmatpush1.bf16.msra.mxu0 %v10351_v35  ;;  %8244 = vmatprep.subr.bf16.mxu1 %v10356_v36  ;;  %v10437_v35 = vld [vmem:[%s11714_s22 + $0xee4] ss:$8 sps:$4 sm:$0xff]   ;;  %v10432_v36 = vld [vmem:[%s11714_s22 + $0x6e0] ss:$8 sps:$4 sm:$0xff]  }
 0x2a6   : > { %8668 = vmatprep.subr.bf16.mxu0 %v10359_v37  ;;  %8231 = vmatprep.mubr.bf16.mxu1 %v9056_v24  ;;  %v10435_v37 = vld [vmem:[%s11714_s22 + $0xee0] ss:$8 sps:$4 sm:$0xff]   ;;  %v10440_v24 = vld [vmem:[%s11714_s22 + $0x6f4] ss:$8 sps:$4 sm:$0xff]  }
 0x2a7   : > { %8655 = vmatprep.mubr.bf16.mxu0 %v9072_v25  ;;  %v10443_v25 = vld [vmem:[%s11714_s22 + $0xef4] ss:$8 sps:$4 sm:$0xff]  }
 0x2a8   : > { %8245 = vmatpush1.bf16.msra.mxu1 %v10354_v26  ;;  %v10438_v26 = vld [vmem:[%s11714_s22 + $0x6f0] ss:$8 sps:$4 sm:$0xff]  }
 0x2a9   : > { %8669 = vmatpush1.bf16.msra.mxu0 %v10357_v27  ;;  %8246 = vmatprep.subr.bf16.mxu1 %v10362_v38  ;;  %v10441_v27 = vld [vmem:[%s11714_s22 + $0xef0] ss:$8 sps:$4 sm:$0xff]   ;;  %v10446_v38 = vld [vmem:[%s11714_s22 + $0x704] ss:$8 sps:$4 sm:$0xff]  }
 0x2aa   : > { %8670 = vmatprep.subr.bf16.mxu0 %v10365_v39  ;;  %v10449_v39 = vld [vmem:[%s11714_s22 + $0xf04] ss:$8 sps:$4 sm:$0xff]  }
 0x2ab   : > { %8232 = vmatmul.mubr.bf16.gmra.mrb[4].mxu1 %v9055_v41  ;;  %v4506_v41 = vld [vmem:[%s11765_s29 + $0x130] sm:$0xff] }
 0x2ac   : > { %8656 = vmatmul.mubr.bf16.gmra.mrb[4].mxu0 %v9071_v43  ;;  %8247 = vmatpush1.bf16.msra.mxu1 %v10360_v50  ;;  %v9025_v43 = vcombine.low %v12246_v40, %v12249_v44  ;;  %v9041_v50 = vcombine.low %v12252_v48, %v12255_v49  ;;  %v10450_v48 = vld [vmem:[%s11714_s22 + $0x710] ss:$8 sps:$4 sm:$0xff]  }
 0x2ad   : > { %8671 = vmatpush1.bf16.msra.mxu0 %v10363_v51  ;;  %8248 = vmatprep.subr.bf16.mxu1 %v10368_v52  ;;  %v4522_v51 = vld [vmem:[%s11765_s29 + $0x1b0] sm:$0xff] }
 0x2ae   : > { %8672 = vmatprep.subr.bf16.mxu0 %v10371_v53  ;;  %8274 = vmatprep.mubr.bf16.mxu1 %v9026_v54  ;;  %v4514_v52 = vld [vmem:[%s11765_s29 + $0x170] sm:$0xff]  ;;  %v10444_v54 = vld [vmem:[%s11714_s22 + $0x700] ss:$8 sps:$4 sm:$0xff]   ;;  %v9058_v40 = vcombine.high %v4506_v41, %v4522_v51 }
 0x2af   : > { %8698 = vmatprep.mubr.bf16.mxu0 %v9042_v55  ;;  %v4530_v53 = vld [vmem:[%s11765_s29 + $0x1f0] sm:$0xff]  ;;  %v10447_v55 = vld [vmem:[%s11714_s22 + $0xf00] ss:$8 sps:$4 sm:$0xff]  }
 0x2b0   : > { %8249 = vmatpush1.bf16.msra.mxu1 %v10366_v42  ;;  %v10452_v42 = vld [vmem:[%s11714_s22 + $0x714] ss:$8 sps:$4 sm:$0xff]   ;;  %v9074_v44 = vcombine.high %v4514_v52, %v4530_v53  ;;  %v10453_v49 = vld [vmem:[%s11714_s22 + $0xf10] ss:$8 sps:$4 sm:$0xff]  }
 0x2b1   : > { %8673 = vmatpush1.bf16.msra.mxu0 %v10369_v45  ;;  %8250 = vmatprep.subr.bf16.mxu1 %v10374_v46  ;;  %v10455_v45 = vld [vmem:[%s11714_s22 + $0xf14] ss:$8 sps:$4 sm:$0xff]   ;;  %v10458_v46 = vld [vmem:[%s11714_s22 + $0x724] ss:$8 sps:$4 sm:$0xff]  }
 0x2b2   : > { %8674 = vmatprep.subr.bf16.mxu0 %v10377_v47  ;;  %v10461_v47 = vld [vmem:[%s11714_s22 + $0xf24] ss:$8 sps:$4 sm:$0xff]  }
 0x2b4   : > { %8251 = vmatpush1.bf16.msra.mxu1 %v10372_v56  ;;  %v12334_v56 = vld [vmem:[%s11765_s29 + $0x38] sm:$0xff] }
 0x2b5   : > { %8675 = vmatpush1.bf16.msra.mxu0 %v10375_v57  ;;  %8252 = vmatprep.subr.bf16.mxu1 %v10380_v60  ;;  %v9057_v57 = vcombine.low %v4506_v41, %v4522_v51  ;;  %v9073_v60 = vcombine.low %v4514_v52, %v4530_v53  ;;  %v10516_v41 = vld [vmem:[%s11714_s22 + $0x7c0] ss:$8 sps:$4 sm:$0xff]   ;;  %v10527_v51 = vld [vmem:[%s11714_s22 + $0xfd4] ss:$8 sps:$4 sm:$0xff]   ;;  %v10522_v52 = vld [vmem:[%s11714_s22 + $0x7d0] ss:$8 sps:$4 sm:$0xff]  }
 0x2b6   : > { %8676 = vmatprep.subr.bf16.mxu0 %v10383_v61  ;;  %v12337_v61 = vld [vmem:[%s11765_s29 + $0xb8] sm:$0xff] }
 0x2b7   : > { %v10525_v53 = vld [vmem:[%s11714_s22 + $0xfd0] ss:$8 sps:$4 sm:$0xff]  }
 0x2b8   : > { %8253 = vmatpush1.bf16.msra.mxu1 %v10378_v0  ;;  %v12340_v0 = vld [vmem:[%s11765_s29 + $0x78] sm:$0xff] }
 0x2b9   : > { %8677 = vmatpush1.bf16.msra.mxu0 %v10381_v1  ;;  %8254 = vmatprep.subr.bf16.mxu1 %v10386_v2  ;;  %v12343_v1 = vld [vmem:[%s11765_s29 + $0xf8] sm:$0xff]  ;;  %v10456_v2 = vld [vmem:[%s11714_s22 + $0x720] ss:$8 sps:$4 sm:$0xff]  }
 0x2ba   : > { %8678 = vmatprep.subr.bf16.mxu0 %v10389_v3  ;;  %v10459_v3 = vld [vmem:[%s11714_s22 + $0xf20] ss:$8 sps:$4 sm:$0xff]  }
 0x2bc   : > { %8255 = vmatpush1.bf16.msra.mxu1 %v10384_v4  ;;  %v10464_v4 = vld [vmem:[%s11714_s22 + $0x734] ss:$8 sps:$4 sm:$0xff]  }
 0x2bd   : > { %8679 = vmatpush1.bf16.msra.mxu0 %v10387_v5  ;;  %8256 = vmatprep.subr.bf16.mxu1 %v10392_v6  ;;  %v10467_v5 = vld [vmem:[%s11714_s22 + $0xf34] ss:$8 sps:$4 sm:$0xff]   ;;  %v9028_v6 = vcombine.high %v12334_v56, %v12337_v61 }
 0x2be   : > { %8680 = vmatprep.subr.bf16.mxu0 %v10395_v7  ;;  %v9044_v7 = vcombine.high %v12340_v0, %v12343_v1 }
 0x2c0   : > { %8257 = vmatpush1.bf16.msra.mxu1 %v10390_v58  ;;  %v10462_v58 = vld [vmem:[%s11714_s22 + $0x730] ss:$8 sps:$4 sm:$0xff]  }
 0x2c1   : > { %8681 = vmatpush1.bf16.msra.mxu0 %v10393_v59  ;;  %8258 = vmatprep.subr.bf16.mxu1 %v10398_v62  ;;  %v10465_v59 = vld [vmem:[%s11714_s22 + $0xf30] ss:$8 sps:$4 sm:$0xff]   ;;  %v10470_v62 = vld [vmem:[%s11714_s22 + $0x744] ss:$8 sps:$4 sm:$0xff]  }
 0x2c2   : > { %8682 = vmatprep.subr.bf16.mxu0 %v10401_v63  ;;  %v10473_v63 = vld [vmem:[%s11714_s22 + $0xf44] ss:$8 sps:$4 sm:$0xff]  }
 0x2c4   : > { %8259 = vmatpush1.bf16.msra.mxu1 %v10396_v11  ;;  %v10468_v11 = vld [vmem:[%s11714_s22 + $0x740] ss:$8 sps:$4 sm:$0xff]  }
 0x2c5   : > { %8683 = vmatpush1.bf16.msra.mxu0 %v10399_v12  ;;  %8260 = vmatprep.subr.bf16.mxu1 %v10404_v14  ;;  %v10471_v12 = vld [vmem:[%s11714_s22 + $0xf40] ss:$8 sps:$4 sm:$0xff]   ;;  %v10476_v14 = vld [vmem:[%s11714_s22 + $0x754] ss:$8 sps:$4 sm:$0xff]  }
 0x2c6   : > { %8684 = vmatprep.subr.bf16.mxu0 %v10407_v15  ;;  %v10479_v15 = vld [vmem:[%s11714_s22 + $0xf54] ss:$8 sps:$4 sm:$0xff]  }
 0x2c8   : > { %8261 = vmatpush1.bf16.msra.mxu1 %v10402_v16  ;;  %v10474_v16 = vld [vmem:[%s11714_s22 + $0x750] ss:$8 sps:$4 sm:$0xff]  }
 0x2c9   : > { %8685 = vmatpush1.bf16.msra.mxu0 %v10405_v17  ;;  %8262 = vmatprep.subr.bf16.mxu1 %v10410_v18  ;;  %v10477_v17 = vld [vmem:[%s11714_s22 + $0xf50] ss:$8 sps:$4 sm:$0xff]   ;;  %v10482_v18 = vld [vmem:[%s11714_s22 + $0x764] ss:$8 sps:$4 sm:$0xff]  }
 0x2ca   : > { %8686 = vmatprep.subr.bf16.mxu0 %v10413_v19  ;;  %v10485_v19 = vld [vmem:[%s11714_s22 + $0xf64] ss:$8 sps:$4 sm:$0xff]  }
 0x2cc   : > { %8263 = vmatpush1.bf16.msra.mxu1 %v10408_v20  ;;  %v10480_v20 = vld [vmem:[%s11714_s22 + $0x760] ss:$8 sps:$4 sm:$0xff]  }
 0x2cd   : > { %8687 = vmatpush1.bf16.msra.mxu0 %v10411_v21  ;;  %8264 = vmatprep.subr.bf16.mxu1 %v10416_v22  ;;  %v10483_v21 = vld [vmem:[%s11714_s22 + $0xf60] ss:$8 sps:$4 sm:$0xff]   ;;  %v10488_v22 = vld [vmem:[%s11714_s22 + $0x774] ss:$8 sps:$4 sm:$0xff]  }
 0x2ce   : > { %8688 = vmatprep.subr.bf16.mxu0 %v10419_v23  ;;  %v10491_v23 = vld [vmem:[%s11714_s22 + $0xf74] ss:$8 sps:$4 sm:$0xff]  }
 0x2d0   : > { %8265 = vmatpush1.bf16.msra.mxu1 %v10414_v8  ;;  %v10486_v8 = vld [vmem:[%s11714_s22 + $0x770] ss:$8 sps:$4 sm:$0xff]  }
 0x2d1   : > { %8689 = vmatpush1.bf16.msra.mxu0 %v10417_v9  ;;  %8266 = vmatprep.subr.bf16.mxu1 %v10422_v10  ;;  %v10489_v9 = vld [vmem:[%s11714_s22 + $0xf70] ss:$8 sps:$4 sm:$0xff]   ;;  %v10494_v10 = vld [vmem:[%s11714_s22 + $0x784] ss:$8 sps:$4 sm:$0xff]  }
 0x2d2   : > { %8690 = vmatprep.subr.bf16.mxu0 %v10425_v13  ;;  %v10497_v13 = vld [vmem:[%s11714_s22 + $0xf84] ss:$8 sps:$4 sm:$0xff]  }
 0x2d4   : > { %8267 = vmatpush1.bf16.msra.mxu1 %v10420_v28  ;;  %v10492_v28 = vld [vmem:[%s11714_s22 + $0x780] ss:$8 sps:$4 sm:$0xff]  }
 0x2d5   : > { %8691 = vmatpush1.bf16.msra.mxu0 %v10423_v29  ;;  %8268 = vmatprep.subr.bf16.mxu1 %v10428_v30  ;;  %v10495_v29 = vld [vmem:[%s11714_s22 + $0xf80] ss:$8 sps:$4 sm:$0xff]   ;;  %v10500_v30 = vld [vmem:[%s11714_s22 + $0x794] ss:$8 sps:$4 sm:$0xff]  }
 0x2d6   : > { %8692 = vmatprep.subr.bf16.mxu0 %v10431_v31  ;;  %v10503_v31 = vld [vmem:[%s11714_s22 + $0xf94] ss:$8 sps:$4 sm:$0xff]  }
 0x2d8   : > { %8269 = vmatpush1.bf16.msra.mxu1 %v10426_v32  ;;  %v10498_v32 = vld [vmem:[%s11714_s22 + $0x790] ss:$8 sps:$4 sm:$0xff]  }
 0x2d9   : > { %8693 = vmatpush1.bf16.msra.mxu0 %v10429_v33  ;;  %8270 = vmatprep.subr.bf16.mxu1 %v10434_v34  ;;  %v10501_v33 = vld [vmem:[%s11714_s22 + $0xf90] ss:$8 sps:$4 sm:$0xff]   ;;  %v10506_v34 = vld [vmem:[%s11714_s22 + $0x7a4] ss:$8 sps:$4 sm:$0xff]  }
 0x2da   : > { %8694 = vmatprep.subr.bf16.mxu0 %v10437_v35  ;;  %v10509_v35 = vld [vmem:[%s11714_s22 + $0xfa4] ss:$8 sps:$4 sm:$0xff]  }
 0x2dc   : > { %8271 = vmatpush1.bf16.msra.mxu1 %v10432_v36  ;;  %v10504_v36 = vld [vmem:[%s11714_s22 + $0x7a0] ss:$8 sps:$4 sm:$0xff]  }
 0x2dd   : > { %8695 = vmatpush1.bf16.msra.mxu0 %v10435_v37  ;;  %8272 = vmatprep.subr.bf16.mxu1 %v10440_v24  ;;  %v10507_v37 = vld [vmem:[%s11714_s22 + $0xfa0] ss:$8 sps:$4 sm:$0xff]   ;;  %v10512_v24 = vld [vmem:[%s11714_s22 + $0x7b4] ss:$8 sps:$4 sm:$0xff]  }
 0x2de   : > { %8696 = vmatprep.subr.bf16.mxu0 %v10443_v25  ;;  %v10515_v25 = vld [vmem:[%s11714_s22 + $0xfb4] ss:$8 sps:$4 sm:$0xff]  }
 0x2e0   : > { %8273 = vmatpush1.bf16.msra.mxu1 %v10438_v26  ;;  %v10510_v26 = vld [vmem:[%s11714_s22 + $0x7b0] ss:$8 sps:$4 sm:$0xff]  }
 0x2e1   : > { %8697 = vmatpush1.bf16.msra.mxu0 %v10441_v27  ;;  %8295 = vmatprep.subr.bf16.mxu1 %v10446_v38  ;;  %v10513_v27 = vld [vmem:[%s11714_s22 + $0xfb0] ss:$8 sps:$4 sm:$0xff]   ;;  %v10518_v38 = vld [vmem:[%s11714_s22 + $0x7c4] ss:$8 sps:$4 sm:$0xff]  }
 0x2e2   : > { %8719 = vmatprep.subr.bf16.mxu0 %v10449_v39  ;;  %v10521_v39 = vld [vmem:[%s11714_s22 + $0xfc4] ss:$8 sps:$4 sm:$0xff]  }
 0x2e3   : > { %8275 = vmatmul.mubr.bf16.vlgmr.msra.gmra.mrb[0].mxu1 %v9025_v43  ;;  %v10519_v43 = vld [vmem:[%s11714_s22 + $0xfc0] ss:$8 sps:$4 sm:$0xff]  }
 0x2e4   : > { %8699 = vmatmul.mubr.bf16.vlgmr.msra.gmra.mrb[0].mxu0 %v9041_v50  ;;  %8296 = vmatpush1.bf16.msra.mxu1 %v10444_v54  ;;  %v10524_v50 = vld [vmem:[%s11714_s22 + $0x7d4] ss:$8 sps:$4 sm:$0xff]   ;;  %v10530_v54 = vld [vmem:[%s11714_s22 + $0x7e4] ss:$8 sps:$4 sm:$0xff]  }
 0x2e5   : > { %8720 = vmatpush1.bf16.msra.mxu0 %v10447_v55  ;;  %8297 = vmatprep.subr.bf16.mxu1 %v10452_v42  ;;  %v10533_v55 = vld [vmem:[%s11714_s22 + $0xfe4] ss:$8 sps:$4 sm:$0xff]   ;;  %v10528_v42 = vld [vmem:[%s11714_s22 + $0x7e0] ss:$8 sps:$4 sm:$0xff]  }
 0x2e6   : > { %8721 = vmatprep.subr.bf16.mxu0 %v10455_v45  ;;  %8284 = vmatprep.mubr.bf16.mxu1 %v9058_v40  ;;  %v10531_v45 = vld [vmem:[%s11714_s22 + $0xfe0] ss:$8 sps:$4 sm:$0xff]   ;;  %v10536_v40 = vld [vmem:[%s11714_s22 + $0x7f4] ss:$8 sps:$4 sm:$0xff]  }
 0x2e7   : > { %8708 = vmatprep.mubr.bf16.mxu0 %v9074_v44  ;;  %v10539_v44 = vld [vmem:[%s11714_s22 + $0xff4] ss:$8 sps:$4 sm:$0xff]  }
 0x2e8   : > { %8298 = vmatpush1.bf16.msra.mxu1 %v10450_v48  ;;  %v10534_v48 = vld [vmem:[%s11714_s22 + $0x7f0] ss:$8 sps:$4 sm:$0xff]  }
 0x2e9   : > { %8722 = vmatpush1.bf16.msra.mxu0 %v10453_v49  ;;  %8299 = vmatprep.subr.bf16.mxu1 %v10458_v46  ;;  %v10537_v49 = vld [vmem:[%s11714_s22 + $0xff0] ss:$8 sps:$4 sm:$0xff]  }
 0x2ea   : > { %8723 = vmatprep.subr.bf16.mxu0 %v10461_v47  ;;  %v4507_v46 = vld [vmem:[%s11765_s29 + $0x138] sm:$0xff] }
 0x2eb   : > { %8285 = vmatmul.mubr.bf16.gmra.mrb[4].mxu1 %v9057_v57  ;;  %v4523_v47 = vld [vmem:[%s11765_s29 + $0x1b8] sm:$0xff] }
 0x2ec   : > { %8709 = vmatmul.mubr.bf16.gmra.mrb[4].mxu0 %v9073_v60  ;;  %8300 = vmatpush1.bf16.msra.mxu1 %v10456_v2  ;;  %v4515_v57 = vld [vmem:[%s11765_s29 + $0x178] sm:$0xff]  ;;  %v9027_v2 = vcombine.low %v12334_v56, %v12337_v61  ;;  %v8801_v56 = vlaneseq }
 0x2ed   : > { %8724 = vmatpush1.bf16.msra.mxu0 %v10459_v3  ;;  %8301 = vmatprep.subr.bf16.mxu1 %v10464_v4  ;;  %v4531_v60 = vld [vmem:[%s11765_s29 + $0x1f8] sm:$0xff]  ;;  %v9043_v3 = vcombine.low %v12340_v0, %v12343_v1  ;;  %v9060_v4 = vcombine.high %v4507_v46, %v4523_v47  ;;  %v8799_v1 = vld [vmem:[%s4444_s7] sm:$0x3] }
 0x2ee   : > { %8725 = vmatprep.subr.bf16.mxu0 %v10467_v5  ;;  %8327 = vmatprep.mubr.bf16.mxu1 %v9028_v6  ;;  %v9076_v5 = vcombine.high %v4515_v57, %v4531_v60  ;;  %v9059_v6 = vcombine.low %v4507_v46, %v4523_v47  ;;  %v8802_v61 = vshrl.u32 %v8801_v56, 7 }
 0x2ef   : > { %8751 = vmatprep.mubr.bf16.mxu0 %v9044_v7  ;;  %v9075_v7 = vcombine.low %v4515_v57, %v4531_v60 }
 0x2f0   : > { %8302 = vmatpush1.bf16.msra.mxu1 %v10462_v58  ;;  %v8803_v0 = vsub.s32 0, %v8802_v61  ;;  %v8807_v58 = vsub.s32 1, %v8802_v61 }
 0x2f1   : > { %8726 = vmatpush1.bf16.msra.mxu0 %v10465_v59  ;;  %8303 = vmatprep.subr.bf16.mxu1 %v10470_v62 }
 0x2f2   : > { %8727 = vmatprep.subr.bf16.mxu0 %v10473_v63  ;;  %v8804_v59 = vrot.slane %v8799_v1, %v8803_v0 }
 0x2f4   : > { %8304 = vmatpush1.bf16.msra.mxu1 %v10468_v11  ;;  %v8808_v11 = vrot.slane %v8799_v1, %v8807_v58 }
 0x2f5   : > { %8728 = vmatpush1.bf16.msra.mxu0 %v10471_v12  ;;  %8305 = vmatprep.subr.bf16.mxu1 %v10476_v14 }
 0x2f6   : > { %8729 = vmatprep.subr.bf16.mxu0 %v10479_v15 }
 0x2f8   : > { %8306 = vmatpush1.bf16.msra.mxu1 %v10474_v16 }
 0x2f9   : > { %8730 = vmatpush1.bf16.msra.mxu0 %v10477_v17  ;;  %8307 = vmatprep.subr.bf16.mxu1 %v10482_v18 }
 0x2fa   : > { %8731 = vmatprep.subr.bf16.mxu0 %v10485_v19 }
 0x2fc   : > { %8308 = vmatpush1.bf16.msra.mxu1 %v10480_v20 }
 0x2fd   : > { %8732 = vmatpush1.bf16.msra.mxu0 %v10483_v21  ;;  %8309 = vmatprep.subr.bf16.mxu1 %v10488_v22 }
 0x2fe   : > { %8733 = vmatprep.subr.bf16.mxu0 %v10491_v23 }
 0x300   : > { %8310 = vmatpush1.bf16.msra.mxu1 %v10486_v8 }
 0x301   : > { %8734 = vmatpush1.bf16.msra.mxu0 %v10489_v9  ;;  %8311 = vmatprep.subr.bf16.mxu1 %v10494_v10 }
 0x302   : > { %8735 = vmatprep.subr.bf16.mxu0 %v10497_v13 }
 0x304   : > { %8312 = vmatpush1.bf16.msra.mxu1 %v10492_v28 }
 0x305   : > { %8736 = vmatpush1.bf16.msra.mxu0 %v10495_v29  ;;  %8313 = vmatprep.subr.bf16.mxu1 %v10500_v30 }
 0x306   : > { %8737 = vmatprep.subr.bf16.mxu0 %v10503_v31 }
 0x308   : > { %8314 = vmatpush1.bf16.msra.mxu1 %v10498_v32 }
 0x309   : > { %8738 = vmatpush1.bf16.msra.mxu0 %v10501_v33  ;;  %8315 = vmatprep.subr.bf16.mxu1 %v10506_v34 }
 0x30a   : > { %8739 = vmatprep.subr.bf16.mxu0 %v10509_v35 }
 0x30c   : > { %8316 = vmatpush1.bf16.msra.mxu1 %v10504_v36 }
 0x30d   : > { %8740 = vmatpush1.bf16.msra.mxu0 %v10507_v37  ;;  %8317 = vmatprep.subr.bf16.mxu1 %v10512_v24 }
 0x30e   : > { %8741 = vmatprep.subr.bf16.mxu0 %v10515_v25 }
 0x310   : > { %8318 = vmatpush1.bf16.msra.mxu1 %v10510_v26 }
 0x311   : > { %8742 = vmatpush1.bf16.msra.mxu0 %v10513_v27  ;;  %8319 = vmatprep.subr.bf16.mxu1 %v10518_v38 }
 0x312   : > { %8743 = vmatprep.subr.bf16.mxu0 %v10521_v39 }
 0x314   : > { %8320 = vmatpush1.bf16.msra.mxu1 %v10516_v41 }
 0x315   : > { %8744 = vmatpush1.bf16.msra.mxu0 %v10519_v43  ;;  %8321 = vmatprep.subr.bf16.mxu1 %v10524_v50 }
 0x316   : > { %8745 = vmatprep.subr.bf16.mxu0 %v10527_v51 }
 0x318   : > { %8322 = vmatpush1.bf16.msra.mxu1 %v10522_v52 }
 0x319   : > { %8746 = vmatpush1.bf16.msra.mxu0 %v10525_v53  ;;  %8323 = vmatprep.subr.bf16.mxu1 %v10530_v54 }
 0x31a   : > { %8747 = vmatprep.subr.bf16.mxu0 %v10533_v55 }
 0x31c   : > { %8324 = vmatpush1.bf16.msra.mxu1 %v10528_v42 }
 0x31d   : > { %8748 = vmatpush1.bf16.msra.mxu0 %v10531_v45  ;;  %8325 = vmatprep.subr.bf16.mxu1 %v10536_v40 }
 0x31e   : > { %8749 = vmatprep.subr.bf16.mxu0 %v10539_v44 }
 0x320   : > { %8326 = vmatpush1.bf16.msra.mxu1 %v10534_v48 }
 0x321   : > { %8750 = vmatpush1.bf16.msra.mxu0 %v10537_v49 }
 0x323   : > { %8328 = vmatmul.mubr.bf16.vlgmr.msra.gmra.mrb[0].mxu1 %v9027_v2 }
 0x324   : > { %8752 = vmatmul.mubr.bf16.vlgmr.msra.gmra.mrb[0].mxu0 %v9043_v3  ;;  %8337 = vmatprep.mubr.bf16.mxu1 %v9060_v4 }
 0x325   : > { %8761 = vmatprep.mubr.bf16.mxu0 %v9076_v5 }
 0x32b   : > { %8338 = vmatmul.mubr.bf16.gmra.mrb[4].mxu1 %v9059_v6 }
 0x32c   : > { %8762 = vmatmul.mubr.bf16.gmra.mrb[4].mxu0 %v9075_v7 }
 0x3f6   : > { %v8329_v62 = vpop.f32.mrb[0].mxu1 }
 0x3f7   : > { %v8753_v63 = vpop.f32.mrb[0].mxu0  ;;  %v8331_v14 = vpop.f32.mrb[1].mxu1 }
 0x3f8   : > { %v9596_v12 = vadd.f32 %v8753_v63, %v8329_v62  ;;  %v8755_v15 = vpop.f32.mrb[1].mxu0  ;;  %v8333_v17 = vpop.f32.mrb[2].mxu1 }
 0x3f9   : > { %v9597_v16 = vadd.f32 %v8755_v15, %v8331_v14  ;;  %v8757_v18 = vpop.f32.mrb[2].mxu0  ;;  %v8335_v21 = vpop.f32.mrb[3].mxu1 }
 0x3fa   : > { %v8811_v19 = vadd.f32 %v9596_v12, %v8804_v59  ;;  %v9598_v20 = vadd.f32 %v8757_v18, %v8333_v17  ;;  %v8759_v22 = vpop.f32.mrb[3].mxu0 }
 0x3fb   : > { %v8812_v23 = vadd.f32 %v9597_v16, %v8808_v11  ;;  %v9599_v8 = vadd.f32 %v8759_v22, %v8335_v21 }
 0x3fc   : > { %8819 = vst [vmem:[%s12421_s14] sm:$0xff] %v8811_v19  ;;  %v8813_v9 = vadd.f32 %v9598_v20, %v8804_v59 }
 0x3fd   : > { %8820 = vst [vmem:[%s12421_s14 + $0x8] sm:$0xff] %v8812_v23  ;;  %v8814_v10 = vadd.f32 %v9599_v8, %v8808_v11 }
 0x3fe   : > { %8821 = vst [vmem:[%s12421_s14 + $0x10] sm:$0xff] %v8813_v9  ;;  %v8339_v13 = vpop.f32.mrb[4].mxu1 }
 0x3ff   : > { %8822 = vst [vmem:[%s12421_s14 + $0x18] sm:$0xff] %v8814_v10  ;;  %v8763_v28 = vpop.f32.mrb[4].mxu0  ;;  %v8341_v30 = vpop.f32.mrb[5].mxu1 }
 0x400   : > { %v9600_v29 = vadd.f32 %v8763_v28, %v8339_v13  ;;  %v8765_v31 = vpop.f32.mrb[5].mxu0  ;;  %v8343_v33 = vpop.f32.mrb[6].mxu1 }
 0x401   : > { %v9601_v32 = vadd.f32 %v8765_v31, %v8341_v30  ;;  %v8767_v34 = vpop.f32.mrb[6].mxu0  ;;  %v8345_v37 = vpop.f32.mrb[7].mxu1  ;;  %8833 = sbr.rel (!%p10664_p6) target bundleno = 1040 (0x410), region = 96 }
 0x402   : > { %v8815_v35 = vadd.f32 %v9600_v29, %v8804_v59  ;;  %v9602_v36 = vadd.f32 %v8767_v34, %v8343_v33  ;;  %v8769_v24 = vpop.f32.mrb[7].mxu0 }
 0x403   : > { %v8816_v25 = vadd.f32 %v9601_v32, %v8808_v11  ;;  %v9603_v26 = vadd.f32 %v8769_v24, %v8345_v37  ;;  %v8854_v39 = vld [vmem:[%s12421_s14] sm:$0xff] (%p10664_p6) }
 0x404   : > { %8823 = vst [vmem:[%s12421_s14 + $0x20] sm:$0xff] %v8815_v35  ;;  %v8817_v27 = vadd.f32 %v9602_v36, %v8804_v59  ;;  %v8856_v41 = vld [vmem:[%s12421_s14 + $0x8] sm:$0xff] (%p10664_p6)  ;;  %8855 = vst [vmem:[%s8841_s21] sm:$0xff] (%p10664_p6), %v8854_v39 }
 0x405   : > { %8824 = vst [vmem:[%s12421_s14 + $0x28] sm:$0xff] %v8816_v25  ;;  %v8818_v38 = vadd.f32 %v9603_v26, %v8808_v11  ;;  %v8858_v43 = vld [vmem:[%s12421_s14 + $0x10] sm:$0xff] (%p10664_p6)  ;;  %8857 = vst [vmem:[%s8841_s21 + $0x8] sm:$0xff] (%p10664_p6), %v8856_v41 }
 0x406   : > { %8825 = vst [vmem:[%s12421_s14 + $0x30] sm:$0xff] %v8817_v27  ;;  %v8860_v50 = vld [vmem:[%s12421_s14 + $0x18] sm:$0xff] (%p10664_p6)  ;;  %8859 = vst [vmem:[%s8841_s21 + $0x20] sm:$0xff] (%p10664_p6), %v8858_v43 }
 0x407   : > { %8826 = vst [vmem:[%s12421_s14 + $0x38] sm:$0xff] %v8818_v38  ;;  %8861 = vst [vmem:[%s8841_s21 + $0x28] sm:$0xff] (%p10664_p6), %v8860_v50 }
 0x40b   : > { %v8862_v51 = vld [vmem:[%s12421_s14 + $0x20] sm:$0xff] }
 0x40c   : > { %v8864_v52 = vld [vmem:[%s12421_s14 + $0x28] sm:$0xff]  ;;  %8863 = vst [vmem:[%s8841_s21 + $0x40] sm:$0xff] %v8862_v51 }
 0x40d   : > { %v8866_v53 = vld [vmem:[%s12421_s14 + $0x30] sm:$0xff]  ;;  %8865 = vst [vmem:[%s8841_s21 + $0x48] sm:$0xff] %v8864_v52 }
 0x40e   : > { %v8868_v54 = vld [vmem:[%s12421_s14 + $0x38] sm:$0xff]  ;;  %8867 = vst [vmem:[%s8841_s21 + $0x60] sm:$0xff] %v8866_v53 }
 0x40f   : > { %8869 = vst [vmem:[%s8841_s21 + $0x68] sm:$0xff] %v8868_v54 }
 0x410 PF: > { %s13_s18 = sadd.s32 1, %s10594_s18   ;;  %s12472_s12 = smov %s10574_s13 }
 0x411   : > { %p10_p0 = scmp.ge.s32.totalorder %s13_s18, 10   ;;  %s12473_s13 = smov %s10672_s27 }
 0x412   : > { %s12474_s14 = smov %s10586_s16  ;;  %s12475_s15 = smov %s10590_s17 }
 0x413   : > { %s12476_s16 = smov %s12479_s19  ;;  %s12477_s17 = smov %s12483_s20 }
 0x414   :  { %12 = sbr.rel (!%p10_p0) target bundleno = 4 (0x4), region = 162 }

// kernel: generator_28_forward.10
= control target key start
LH: loop header
LB: loop body
LE: loop exit
PB: predicated region body
PF: predicated region fallthrough
CT: control target
= control target key end

     0   :  { %s736_s12 = smov 0   ;;  %s738_s13 = smov 0   ;;  %s900_s0 = inlined_call_operand.vmem [shape: f32[128,512], index: 0, kind: input, shape index: {}]   ;;  %s901_s1 = inlined_call_operand.vmem [shape: f32[1,512], index: 1, kind: input, shape index: {}]   ;;  %s902_s2 = inlined_call_operand.vmem [shape: f32[1,512], index: 2, kind: input, shape index: {}]   ;;  %s903_s3 = inlined_call_operand.vmem [shape: f32[128,512], index: 3, kind: output, shape index: {}]  }
   0x1   :  { %s740_s14 = smov 0  }
   0x2 LB: > { %s752_s15 = sadd.s32 4294967295, %s714_s14   ;;  %s755_s16 = sadd.s32 1, %s714_s14   ;;  %s714_s14 = sphi %s740_s14, %s907_s14   ;;  %s710_s13 = sphi %s738_s13, %s906_s13   ;;  %s706_s12 = sphi %s736_s12, %s905_s12  }
   0x3   : > { %s17_s17 = ssub.s32 %s714_s14, %s755_s16  ;;  %s20_s18 = sadd.s32 1, %s710_s13 }
   0x4   : > { %p18_p0 = scmp.eq.s32.totalorder %s17_s17, 0  ;;  %p27_p1 = scmp.ne.s32.totalorder %s710_s13, %s706_s12 }
   0x5   : > { %p28_p2 = scmp.eq.s32.totalorder %s714_s14, 0  ;;  %p109_p3 = scmp.eq.s32.totalorder %s752_s15, 3 }
   0x6   : > { %s765_s19 = scalar_select %p18_p0, %s710_s13, %s20_s18  }
   0x7   : > { %p29_p4 = por %p28_p2, %p27_p1  ;;  %p767_p5 = por %p109_p3, %p27_p1 }
   0x8   : > { %p654_p6 = scmp.ge.s32.totalorder %s714_s14, 4 }
   0xa   : > { %131 = sbr.rel (%p654_p6) target bundleno = 37 (0x25), region = 16 }
  0x11   : > { %134 = sbr.rel (!%p29_p4) target bundleno = 37 (0x25), region = 20  ;;  %s136_s21 = sand.u32 (%p29_p4), 1, %s710_s13  }
  0x12   : > { %s656_s22 = sshll.u32 (%p29_p4), %s714_s14, 3  ;;  %s655_s23 = sshll.u32 (%p29_p4), %s136_s21, 7 }
  0x13   : > { %s777_s26 = scalar_lea.vmem (%p29_p4), %s900_s0, %s656_s22  ;;  %s138_s27 = scalar_lea.vmem (%p29_p4), [#allocation2], %s655_s23 }
  0x14   : > { %v198_v0 = vld [vmem:[%s777_s26] sm:$0xff] (%p29_p4) }
  0x15   : > { %v200_v1 = vld [vmem:[%s777_s26 + $0x20] sm:$0xff] (%p29_p4)  ;;  %199 = vst [vmem:[%s138_s27] sm:$0xff] (%p29_p4), %v198_v0 }
  0x16   : > { %v202_v2 = vld [vmem:[%s777_s26 + $0x40] sm:$0xff] (%p29_p4)  ;;  %201 = vst [vmem:[%s138_s27 + $0x8] sm:$0xff] (%p29_p4), %v200_v1 }
  0x17   : > { %203 = vst [vmem:[%s138_s27 + $0x10] sm:$0xff] (%p29_p4), %v202_v2  ;;  %v204_v3 = vld [vmem:[%s777_s26 + $0x60] sm:$0xff] (%p29_p4) }
  0x18   : > { %v206_v4 = vld [vmem:[%s777_s26 + $0x80] sm:$0xff]  ;;  %205 = vst [vmem:[%s138_s27 + $0x18] sm:$0xff] %v204_v3 }
  0x19   : > { %v208_v5 = vld [vmem:[%s777_s26 + $0xa0] sm:$0xff]  ;;  %207 = vst [vmem:[%s138_s27 + $0x20] sm:$0xff] %v206_v4 }
  0x1a   : > { %209 = vst [vmem:[%s138_s27 + $0x28] sm:$0xff] %v208_v5  ;;  %v210_v6 = vld [vmem:[%s777_s26 + $0xc0] sm:$0xff] }
  0x1b   : > { %v212_v7 = vld [vmem:[%s777_s26 + $0xe0] sm:$0xff]  ;;  %211 = vst [vmem:[%s138_s27 + $0x30] sm:$0xff] %v210_v6 }
  0x1c   : > { %v214_v8 = vld [vmem:[%s777_s26 + $0x100] sm:$0xff]  ;;  %213 = vst [vmem:[%s138_s27 + $0x38] sm:$0xff] %v212_v7 }
  0x1d   : > { %215 = vst [vmem:[%s138_s27 + $0x40] sm:$0xff] %v214_v8  ;;  %v216_v9 = vld [vmem:[%s777_s26 + $0x120] sm:$0xff] }
  0x1e   : > { %v218_v10 = vld [vmem:[%s777_s26 + $0x140] sm:$0xff]  ;;  %217 = vst [vmem:[%s138_s27 + $0x48] sm:$0xff] %v216_v9 }
  0x1f   : > { %v220_v11 = vld [vmem:[%s777_s26 + $0x160] sm:$0xff]  ;;  %219 = vst [vmem:[%s138_s27 + $0x50] sm:$0xff] %v218_v10 }
  0x20   : > { %221 = vst [vmem:[%s138_s27 + $0x58] sm:$0xff] %v220_v11  ;;  %v222_v12 = vld [vmem:[%s777_s26 + $0x180] sm:$0xff] }
  0x21   : > { %v224_v13 = vld [vmem:[%s777_s26 + $0x1a0] sm:$0xff]  ;;  %223 = vst [vmem:[%s138_s27 + $0x60] sm:$0xff] %v222_v12 }
  0x22   : > { %v226_v14 = vld [vmem:[%s777_s26 + $0x1c0] sm:$0xff]  ;;  %225 = vst [vmem:[%s138_s27 + $0x68] sm:$0xff] %v224_v13 }
  0x23   : > { %227 = vst [vmem:[%s138_s27 + $0x70] sm:$0xff] %v226_v14  ;;  %v228_v15 = vld [vmem:[%s777_s26 + $0x1e0] sm:$0xff] }
  0x24   : > { %229 = vst [vmem:[%s138_s27 + $0x78] sm:$0xff] %v228_v15 }
  0x25 PF: > { %p657_p7 = scmp.ge.s32.totalorder %s714_s14, 1  ;;  %p246_p8 = scmp.lt.s32.totalorder %s714_s14, 5 }
  0x27   : > { %p247_p9 = pnand %p657_p7, %p246_p8 }
  0x28   : > { %s253_s28 = sand.u32 (!%p247_p9), 1, %s706_s12   ;;  %p281_p10 = scmp.lt.s32.totalorder (!%p247_p9), %s752_s15, 3 }
  0x29   : > { %250 = sbr.rel (%p247_p9) target bundleno = 178 (0xb2), region = 66  ;;  %s798_s29 = sshll.u32 (!%p247_p9), %s253_s28, 7 }
  0x2a   : > { %s255_s30 = scalar_lea.vmem (!%p247_p9), [#allocation2], %s798_s29  ;;  %s842_s11 = scalar_lea.vmem (!%p247_p9), [#allocation3], %s798_s29 }
  0x2b   : > { %v287_v16 = vld [vmem:[%s255_s30] sm:$0xff] (!%p247_p9)  ;;  %v288_v17 = vld [vmem:[%s255_s30 + $0x8] sm:$0xff] (!%p247_p9)  ;;  %v289_v18 = vld [vmem:[%s255_s30 + $0x10] sm:$0xff] (!%p247_p9) }
  0x2c   : > { %v303_v19 = vadd.f32 (!%p247_p9), %v288_v17, %v287_v16  ;;  %v290_v20 = vld [vmem:[%s255_s30 + $0x18] sm:$0xff] (!%p247_p9)  ;;  %v291_v22 = vld [vmem:[%s255_s30 + $0x20] sm:$0xff] (!%p247_p9)  ;;  %v292_v24 = vld [vmem:[%s255_s30 + $0x28] sm:$0xff] (!%p247_p9) }
  0x2d   : > { %v293_v26 = vld [vmem:[%s255_s30 + $0x30] sm:$0xff] (!%p247_p9)  ;;  %v294_v28 = vld [vmem:[%s255_s30 + $0x38] sm:$0xff] (!%p247_p9)  ;;  %v295_v30 = vld [vmem:[%s255_s30 + $0x40] sm:$0xff] (!%p247_p9) }
  0x2e   : > { %v304_v21 = vadd.f32 (!%p247_p9), %v303_v19, %v289_v18  ;;  %v296_v32 = vld [vmem:[%s255_s30 + $0x48] sm:$0xff] (!%p247_p9)  ;;  %v297_v34 = vld [vmem:[%s255_s30 + $0x50] sm:$0xff] (!%p247_p9)  ;;  %v298_v36 = vld [vmem:[%s255_s30 + $0x58] sm:$0xff] (!%p247_p9) }
  0x2f   : > { %v299_v38 = vld [vmem:[%s255_s30 + $0x60] sm:$0xff] (!%p247_p9)  ;;  %v300_v40 = vld [vmem:[%s255_s30 + $0x68] sm:$0xff] (!%p247_p9)  ;;  %v301_v42 = vld [vmem:[%s255_s30 + $0x70] sm:$0xff] (!%p247_p9) }
  0x30   : > { %v305_v23 = vadd.f32 %v304_v21, %v290_v20  ;;  %v302_v44 = vld [vmem:[%s255_s30 + $0x78] sm:$0xff]  ;;  %s282_s4 = scalar_select %p281_p10, %s752_s15, 3 }
  0x31   : > { %s663_s12 = sshll.u32 (%p767_p5), %s752_s15, 3 }
  0x32   : > { %v306_v25 = vadd.f32 %v305_v23, %v291_v22  ;;  %s283_s7 = scalar_lea.vmem %s901_s1, %s282_s4  ;;  %s286_s10 = scalar_lea.vmem %s902_s2, %s282_s4 }
  0x33   : > { %s484_s18 = scalar_lea.vmem (%p767_p5), %s903_s3, %s663_s12 }
  0x34   : > { %v307_v27 = vadd.f32 %v306_v25, %v292_v24 }
  0x36   : > { %v308_v29 = vadd.f32 %v307_v27, %v293_v26 }
  0x38   : > { %v309_v31 = vadd.f32 %v308_v29, %v294_v28 }
  0x3a   : > { %v310_v33 = vadd.f32 %v309_v31, %v295_v30 }
  0x3c   : > { %v311_v35 = vadd.f32 %v310_v33, %v296_v32 }
  0x3e   : > { %v312_v37 = vadd.f32 %v311_v35, %v297_v34 }
  0x40   : > { %v313_v39 = vadd.f32 %v312_v37, %v298_v36 }
  0x42   : > { %v314_v41 = vadd.f32 %v313_v39, %v299_v38 }
  0x44   : > { %v315_v43 = vadd.f32 %v314_v41, %v300_v40 }
  0x46   : > { %v316_v45 = vadd.f32 %v315_v43, %v301_v42 }
  0x48   : > { %v317_v46 = vadd.f32 %v316_v45, %v302_v44 }
  0x4a   : > { %v318_v47 = vrot.slane %v317_v46, 4 }
  0x4c   : > { %v319_v48 = vadd.f32 %v318_v47, %v317_v46  ;;  %v660_v46 = vld [vmem:[%s283_s7] ss:$0 sm:$0xff] }
  0x4e   : > { %v320_v49 = vrot.slane %v319_v48, 2 }
  0x50   : > { %v321_v50 = vadd.f32 %v320_v49, %v319_v48 }
  0x52   : > { %v322_v51 = vrot.slane %v321_v50, 1 }
  0x54   : > { %v323_v52 = vadd.f32 %v322_v51, %v321_v50  ;;  %v661_v51 = vld [vmem:[%s286_s10] ss:$0 sm:$0xff] }
  0x56   : > { %v325_v53 = vmul.f32 0.0078125, %v323_v52 }
  0x58   : > { %v326_v54 = vsub.f32 %v287_v16, %v325_v53  ;;  %v327_v55 = vsub.f32 %v288_v17, %v325_v53  ;;  %v328_v56 = vsub.f32 %v289_v18, %v325_v53  ;;  %v329_v57 = vsub.f32 %v290_v20, %v325_v53 }
  0x59   : > { %v330_v60 = vsub.f32 %v291_v22, %v325_v53  ;;  %v331_v62 = vsub.f32 %v292_v24, %v325_v53  ;;  %v332_v1 = vsub.f32 %v293_v26, %v325_v53  ;;  %v333_v4 = vsub.f32 %v294_v28, %v325_v53 }
  0x5a   : > { %v342_v58 = vmul.f32 %v326_v54, %v326_v54  ;;  %v343_v59 = vmul.f32 %v327_v55, %v327_v55  ;;  %v344_v61 = vmul.f32 %v328_v56, %v328_v56  ;;  %v345_v63 = vmul.f32 %v329_v57, %v329_v57 }
  0x5b   : > { %v346_v2 = vmul.f32 %v330_v60, %v330_v60  ;;  %v347_v5 = vmul.f32 %v331_v62, %v331_v62  ;;  %v801_v7 = vsub.f32 %v295_v30, %v325_v53  ;;  %v348_v8 = vmul.f32 %v332_v1, %v332_v1 }
  0x5c   : > { %v358_v0 = vadd.f32 %v343_v59, %v342_v58  ;;  %v803_v10 = vsub.f32 %v296_v32, %v325_v53  ;;  %v349_v11 = vmul.f32 %v333_v4, %v333_v4  ;;  %v805_v13 = vsub.f32 %v297_v34, %v325_v53 }
  0x5d   : > { %v350_v14 = vmul.f32 %v801_v7, %v801_v7  ;;  %v809_v16 = vsub.f32 %v298_v36, %v325_v53  ;;  %v813_v19 = vsub.f32 %v299_v38, %v325_v53  ;;  %v817_v22 = vsub.f32 %v300_v40, %v325_v53 }
  0x5e   : > { %v359_v3 = vadd.f32 %v358_v0, %v344_v61  ;;  %v351_v17 = vmul.f32 %v803_v10, %v803_v10  ;;  %v352_v20 = vmul.f32 %v805_v13, %v805_v13  ;;  %v821_v25 = vsub.f32 %v301_v42, %v325_v53 }
  0x5f   : > { %v353_v23 = vmul.f32 %v809_v16, %v809_v16  ;;  %v354_v26 = vmul.f32 %v813_v19, %v813_v19  ;;  %v825_v28 = vsub.f32 %v302_v44, %v325_v53  ;;  %v355_v29 = vmul.f32 %v817_v22, %v817_v22 }
  0x60   : > { %v360_v6 = vadd.f32 %v359_v3, %v345_v63  ;;  %v356_v31 = vmul.f32 %v821_v25, %v821_v25 }
  0x61   : > { %v357_v33 = vmul.f32 %v825_v28, %v825_v28 }
  0x62   : > { %v361_v9 = vadd.f32 %v360_v6, %v346_v2 }
  0x64   : > { %v362_v12 = vadd.f32 %v361_v9, %v347_v5 }
  0x66   : > { %v363_v15 = vadd.f32 %v362_v12, %v348_v8 }
  0x68   : > { %v364_v18 = vadd.f32 %v363_v15, %v349_v11 }
  0x6a   : > { %v365_v21 = vadd.f32 %v364_v18, %v350_v14 }
  0x6c   : > { %v366_v24 = vadd.f32 %v365_v21, %v351_v17 }
  0x6e   : > { %v367_v27 = vadd.f32 %v366_v24, %v352_v20 }
  0x70   : > { %v368_v30 = vadd.f32 %v367_v27, %v353_v23 }
  0x72   : > { %v369_v32 = vadd.f32 %v368_v30, %v354_v26 }
  0x74   : > { %v370_v34 = vadd.f32 %v369_v32, %v355_v29 }
  0x76   : > { %v371_v35 = vadd.f32 %v370_v34, %v356_v31 }
  0x78   : > { %v372_v36 = vadd.f32 %v371_v35, %v357_v33 }
  0x7a   : > { %v373_v37 = vrot.slane %v372_v36, 4 }
  0x7c   : > { %v374_v38 = vadd.f32 %v373_v37, %v372_v36 }
  0x7e   : > { %v375_v39 = vrot.slane %v374_v38, 2 }
  0x80   : > { %v376_v40 = vadd.f32 %v375_v39, %v374_v38 }
  0x82   : > { %v377_v41 = vrot.slane %v376_v40, 1 }
  0x84   : > { %v378_v42 = vadd.f32 %v377_v41, %v376_v40 }
  0x86   : > { %v379_v43 = vmul.f32 0.0078125, %v378_v42 }
  0x88   : > { %v380_v44 = vadd.f32 1e-05, %v379_v43 }
  0x8a   : > { %690 = vrsqrt.f32 %v380_v44 }
  0x94   : > { %v691_v45 = vpop.eup %690 }
  0x95   : > { %v382_v47 = vmul.f32 %v691_v45, %v326_v54  ;;  %v383_v48 = vmul.f32 %v691_v45, %v327_v55  ;;  %v384_v49 = vmul.f32 %v691_v45, %v328_v56  ;;  %v385_v50 = vmul.f32 %v691_v45, %v329_v57 }
  0x96   : > { %v386_v52 = vmul.f32 %v691_v45, %v330_v60  ;;  %v387_v53 = vmul.f32 %v691_v45, %v331_v62  ;;  %v388_v58 = vmul.f32 %v691_v45, %v332_v1  ;;  %v389_v59 = vmul.f32 %v691_v45, %v333_v4 }
  0x97   : > { %v405_v61 = vmul.f32 %v660_v46, %v382_v47  ;;  %v406_v63 = vmul.f32 %v660_v46, %v383_v48  ;;  %v407_v0 = vmul.f32 %v660_v46, %v384_v49  ;;  %v408_v2 = vmul.f32 %v660_v46, %v385_v50 }
  0x98   : > { %v409_v3 = vmul.f32 %v660_v46, %v386_v52  ;;  %v410_v5 = vmul.f32 %v660_v46, %v387_v53  ;;  %v411_v6 = vmul.f32 %v660_v46, %v388_v58  ;;  %v412_v8 = vmul.f32 %v660_v46, %v389_v59 }
  0x99   : > { %v428_v9 = vadd.f32 %v661_v51, %v405_v61  ;;  %v429_v11 = vadd.f32 %v661_v51, %v406_v63  ;;  %v430_v54 = vadd.f32 %v661_v51, %v407_v0  ;;  %v431_v55 = vadd.f32 %v661_v51, %v408_v2 }
  0x9a   : > { %v432_v56 = vadd.f32 %v661_v51, %v409_v3  ;;  %v433_v57 = vadd.f32 %v661_v51, %v410_v5  ;;  %v434_v12 = vadd.f32 %v661_v51, %v411_v6  ;;  %v435_v60 = vadd.f32 %v661_v51, %v412_v8 }
  0x9b   : > { %v444_v62 = vmax.f32 %v428_v9, 0.0  ;;  %v445_v1 = vmax.f32 %v429_v11, 0.0  ;;  %v446_v4 = vmax.f32 %v430_v54, 0.0  ;;  %v447_v14 = vmax.f32 %v431_v55, 0.0 }
  0x9c   : > { %v448_v15 = vmax.f32 %v432_v56, 0.0  ;;  %v449_v17 = vmax.f32 %v433_v57, 0.0  ;;  %v450_v18 = vmax.f32 %v434_v12, 0.0  ;;  %v451_v20 = vmax.f32 %v435_v60, 0.0 }
  0x9d   : > { %460 = vst [vmem:[%s842_s11] sm:$0xff] %v444_v62  ;;  %461 = vst [vmem:[%s842_s11 + $0x8] sm:$0xff] %v445_v1  ;;  %v390_v21 = vmul.f32 %v691_v45, %v801_v7  ;;  %v391_v23 = vmul.f32 %v691_v45, %v803_v10  ;;  %v392_v24 = vmul.f32 %v691_v45, %v805_v13 }
  0x9e   : > { %462 = vst [vmem:[%s842_s11 + $0x10] sm:$0xff] %v446_v4  ;;  %463 = vst [vmem:[%s842_s11 + $0x18] sm:$0xff] %v447_v14  ;;  %v393_v26 = vmul.f32 %v691_v45, %v809_v16  ;;  %v394_v27 = vmul.f32 %v691_v45, %v813_v19  ;;  %v395_v29 = vmul.f32 %v691_v45, %v817_v22 }
  0x9f   : > { %464 = vst [vmem:[%s842_s11 + $0x20] sm:$0xff] %v448_v15  ;;  %465 = vst [vmem:[%s842_s11 + $0x28] sm:$0xff] %v449_v17  ;;  %v396_v30 = vmul.f32 %v691_v45, %v821_v25  ;;  %v397_v31 = vmul.f32 %v691_v45, %v825_v28  ;;  %v413_v32 = vmul.f32 %v660_v46, %v390_v21 }
  0xa0   : > { %466 = vst [vmem:[%s842_s11 + $0x30] sm:$0xff] %v450_v18  ;;  %467 = vst [vmem:[%s842_s11 + $0x38] sm:$0xff] %v451_v20  ;;  %v414_v7 = vmul.f32 %v660_v46, %v391_v23  ;;  %v415_v33 = vmul.f32 %v660_v46, %v392_v24  ;;  %v416_v10 = vmul.f32 %v660_v46, %v393_v26 }
  0xa1   : > { %v417_v34 = vmul.f32 %v660_v46, %v394_v27  ;;  %v418_v13 = vmul.f32 %v660_v46, %v395_v29  ;;  %v419_v35 = vmul.f32 %v660_v46, %v396_v30  ;;  %v420_v16 = vmul.f32 %v660_v46, %v397_v31 }
  0xa2   : > { %v436_v36 = vadd.f32 %v661_v51, %v413_v32  ;;  %v437_v37 = vadd.f32 %v661_v51, %v414_v7  ;;  %v438_v38 = vadd.f32 %v661_v51, %v415_v33  ;;  %v439_v19 = vadd.f32 %v661_v51, %v416_v10 }
  0xa3   : > { %v440_v22 = vadd.f32 %v661_v51, %v417_v34  ;;  %v441_v25 = vadd.f32 %v661_v51, %v418_v13  ;;  %v442_v28 = vadd.f32 %v661_v51, %v419_v35  ;;  %v443_v39 = vadd.f32 %v661_v51, %v420_v16  ;;  %482 = sbr.rel (!%p767_p5) target bundleno = 178 (0xb2), region = 74 }
  0xa4   : > { %v452_v40 = vmax.f32 %v436_v36, 0.0  ;;  %v453_v41 = vmax.f32 %v437_v37, 0.0  ;;  %v454_v42 = vmax.f32 %v438_v38, 0.0  ;;  %v455_v43 = vmax.f32 %v439_v19, 0.0  ;;  %v542_v48 = vld [vmem:[%s842_s11] sm:$0xff] (%p767_p5)  ;;  %v544_v49 = vld [vmem:[%s842_s11 + $0x8] sm:$0xff] (%p767_p5) }
  0xa5   : > { %v456_v44 = vmax.f32 %v440_v22, 0.0  ;;  %v457_v45 = vmax.f32 %v441_v25, 0.0  ;;  %v458_v46 = vmax.f32 %v442_v28, 0.0  ;;  %v459_v47 = vmax.f32 %v443_v39, 0.0  ;;  %v546_v50 = vld [vmem:[%s842_s11 + $0x10] sm:$0xff] (%p767_p5)  ;;  %v548_v51 = vld [vmem:[%s842_s11 + $0x18] sm:$0xff] (%p767_p5)  ;;  %543 = vst [vmem:[%s484_s18] sm:$0xff] (%p767_p5), %v542_v48 }
  0xa6   : > { %468 = vst [vmem:[%s842_s11 + $0x40] sm:$0xff] %v452_v40  ;;  %469 = vst [vmem:[%s842_s11 + $0x48] sm:$0xff] %v453_v41  ;;  %v550_v52 = vld [vmem:[%s842_s11 + $0x20] sm:$0xff] (%p767_p5)  ;;  %v552_v53 = vld [vmem:[%s842_s11 + $0x28] sm:$0xff] (%p767_p5) }
  0xa7   : > { %470 = vst [vmem:[%s842_s11 + $0x50] sm:$0xff] %v454_v42  ;;  %471 = vst [vmem:[%s842_s11 + $0x58] sm:$0xff] %v455_v43  ;;  %v554_v58 = vld [vmem:[%s842_s11 + $0x30] sm:$0xff] (%p767_p5)  ;;  %v556_v59 = vld [vmem:[%s842_s11 + $0x38] sm:$0xff] (%p767_p5) }
  0xa8   : > { %472 = vst [vmem:[%s842_s11 + $0x60] sm:$0xff] %v456_v44  ;;  %473 = vst [vmem:[%s842_s11 + $0x68] sm:$0xff] %v457_v45 }
  0xa9   : > { %474 = vst [vmem:[%s842_s11 + $0x70] sm:$0xff] %v458_v46  ;;  %475 = vst [vmem:[%s842_s11 + $0x78] sm:$0xff] %v459_v47 }
  0xaa   : > { %545 = vst [vmem:[%s484_s18 + $0x20] sm:$0xff] %v544_v49  ;;  %547 = vst [vmem:[%s484_s18 + $0x40] sm:$0xff] %v546_v50 }
  0xab   : > { %549 = vst [vmem:[%s484_s18 + $0x60] sm:$0xff] %v548_v51  ;;  %551 = vst [vmem:[%s484_s18 + $0x80] sm:$0xff] %v550_v52 }
  0xac   : > { %553 = vst [vmem:[%s484_s18 + $0xa0] sm:$0xff] %v552_v53  ;;  %555 = vst [vmem:[%s484_s18 + $0xc0] sm:$0xff] %v554_v58 }
  0xad   : > { %v558_v61 = vld [vmem:[%s842_s11 + $0x40] sm:$0xff]  ;;  %557 = vst [vmem:[%s484_s18 + $0xe0] sm:$0xff] %v556_v59  ;;  %v560_v63 = vld [vmem:[%s842_s11 + $0x48] sm:$0xff] }
  0xae   : > { %559 = vst [vmem:[%s484_s18 + $0x100] sm:$0xff] %v558_v61  ;;  %v562_v0 = vld [vmem:[%s842_s11 + $0x50] sm:$0xff]  ;;  %v564_v2 = vld [vmem:[%s842_s11 + $0x58] sm:$0xff]  ;;  %561 = vst [vmem:[%s484_s18 + $0x120] sm:$0xff] %v560_v63 }
  0xaf   : > { %563 = vst [vmem:[%s484_s18 + $0x140] sm:$0xff] %v562_v0  ;;  %565 = vst [vmem:[%s484_s18 + $0x160] sm:$0xff] %v564_v2  ;;  %v566_v3 = vld [vmem:[%s842_s11 + $0x60] sm:$0xff]  ;;  %v568_v5 = vld [vmem:[%s842_s11 + $0x68] sm:$0xff] }
  0xb0   : > { %v570_v6 = vld [vmem:[%s842_s11 + $0x70] sm:$0xff]  ;;  %567 = vst [vmem:[%s484_s18 + $0x180] sm:$0xff] %v566_v3  ;;  %569 = vst [vmem:[%s484_s18 + $0x1a0] sm:$0xff] %v568_v5  ;;  %v572_v8 = vld [vmem:[%s842_s11 + $0x78] sm:$0xff] }
  0xb1   : > { %571 = vst [vmem:[%s484_s18 + $0x1c0] sm:$0xff] %v570_v6  ;;  %573 = vst [vmem:[%s484_s18 + $0x1e0] sm:$0xff] %v572_v8 }
  0xb2 PF: > { %p10_p11 = scmp.ge.s32.totalorder %s755_s16, 6   ;;  %s905_s12 = smov %s710_s13 }
  0xb3   : > { %s906_s13 = smov %s765_s19  ;;  %s907_s14 = smov %s755_s16 }
  0xb4   :  { %12 = sbr.rel (!%p10_p11) target bundleno = 2 (0x2), region = 149 }

// kernel: squeeze.12
= control target key start
LH: loop header
LB: loop body
LE: loop exit
PB: predicated region body
PF: predicated region fallthrough
CT: control target
= control target key end

     0   :  { %s517_s0 = inlined_call_operand.vmem [shape: f32[32,512], index: 0, kind: input, shape index: {}]   ;;  %s518_s1 = inlined_call_operand.vmem [shape: f32[2,4,4,512], index: 1, kind: output, shape index: {}]  }
   0x1   :  { %v2_v0 = vld [vmem:[%s517_s0] sm:$0xff]   ;;  %v317_v1 = vld [vmem:[%s517_s0 + $0x8] sm:$0xff]   ;;  %v318_v2 = vld [vmem:[%s517_s0 + $0x10] sm:$0xff]  }
   0x2   :  { %3 = vst [vmem:[#allocation0] sm:$0xf] %v2_v0   ;;  %5 = vst [vmem:[#allocation0 + $0x1c] sm:$0xf0] %v2_v0   ;;  %v319_v3 = vld [vmem:[%s517_s0 + $0x18] sm:$0xff]   ;;  %v320_v4 = vld [vmem:[%s517_s0 + $0x20] sm:$0xff]  }
   0x3   :  { %9 = vst [vmem:[#allocation0 + $0x8] sm:$0xf] %v317_v1   ;;  %11 = vst [vmem:[#allocation0 + $0x24] sm:$0xf0] %v317_v1   ;;  %v321_v5 = vld [vmem:[%s517_s0 + $0x28] sm:$0xff]   ;;  %v322_v6 = vld [vmem:[%s517_s0 + $0x30] sm:$0xff]  }
   0x4   :  { %15 = vst [vmem:[#allocation0 + $0x10] sm:$0xf] %v318_v2   ;;  %17 = vst [vmem:[#allocation0 + $0x2c] sm:$0xf0] %v318_v2   ;;  %v323_v7 = vld [vmem:[%s517_s0 + $0x38] sm:$0xff]   ;;  %v324_v8 = vld [vmem:[%s517_s0 + $0x40] sm:$0xff]  }
   0x5   :  { %21 = vst [vmem:[#allocation0 + $0x18] sm:$0xf] %v319_v3   ;;  %23 = vst [vmem:[#allocation0 + $0x34] sm:$0xf0] %v319_v3   ;;  %v325_v9 = vld [vmem:[%s517_s0 + $0x48] sm:$0xff]   ;;  %v326_v10 = vld [vmem:[%s517_s0 + $0x50] sm:$0xff]  }
   0x6   :  { %27 = vst [vmem:[#allocation0 + $0x40] sm:$0xf] %v320_v4   ;;  %29 = vst [vmem:[#allocation0 + $0x5c] sm:$0xf0] %v320_v4   ;;  %v327_v11 = vld [vmem:[%s517_s0 + $0x58] sm:$0xff]   ;;  %v328_v12 = vld [vmem:[%s517_s0 + $0x60] sm:$0xff]  }
   0x7   :  { %33 = vst [vmem:[#allocation0 + $0x48] sm:$0xf] %v321_v5   ;;  %35 = vst [vmem:[#allocation0 + $0x64] sm:$0xf0] %v321_v5   ;;  %v329_v13 = vld [vmem:[%s517_s0 + $0x68] sm:$0xff]   ;;  %v330_v14 = vld [vmem:[%s517_s0 + $0x70] sm:$0xff]  }
   0x8   :  { %39 = vst [vmem:[#allocation0 + $0x50] sm:$0xf] %v322_v6   ;;  %41 = vst [vmem:[#allocation0 + $0x6c] sm:$0xf0] %v322_v6   ;;  %v331_v15 = vld [vmem:[%s517_s0 + $0x78] sm:$0xff]  }
   0x9   :  { %45 = vst [vmem:[#allocation0 + $0x58] sm:$0xf] %v323_v7   ;;  %47 = vst [vmem:[#allocation0 + $0x74] sm:$0xf0] %v323_v7   ;;  %v99_v16 = vld [vmem:[#allocation0] sm:$0xf] }
   0xa   :  { %51 = vst [vmem:[#allocation0 + $0x80] sm:$0xf] %v324_v8   ;;  %53 = vst [vmem:[#allocation0 + $0x9c] sm:$0xf0] %v324_v8   ;;  %v103_v17 = vld [vmem:[#allocation0 + $0x8] sm:$0xf] }
   0xb   :  { %57 = vst [vmem:[#allocation0 + $0x88] sm:$0xf] %v325_v9   ;;  %59 = vst [vmem:[#allocation0 + $0xa4] sm:$0xf0] %v325_v9   ;;  %v108_v18 = vld [vmem:[#allocation0 + $0x10] sm:$0xf] }
   0xc   :  { %63 = vst [vmem:[#allocation0 + $0x90] sm:$0xf] %v326_v10   ;;  %65 = vst [vmem:[#allocation0 + $0xac] sm:$0xf0] %v326_v10   ;;  %v114_v19 = vld [vmem:[#allocation0 + $0x18] sm:$0xf] }
   0xd   :  { %69 = vst [vmem:[#allocation0 + $0x98] sm:$0xf] %v327_v11   ;;  %71 = vst [vmem:[#allocation0 + $0xb4] sm:$0xf0] %v327_v11   ;;  %v120_v20 = vld [vmem:[#allocation0 + $0x20] sm:$0xf] }
   0xe   :  { %75 = vst [vmem:[#allocation0 + $0xc0] sm:$0xf] %v328_v12   ;;  %77 = vst [vmem:[#allocation0 + $0xdc] sm:$0xf0] %v328_v12   ;;  %v126_v21 = vld [vmem:[#allocation0 + $0x28] sm:$0xf] }
   0xf   :  { %81 = vst [vmem:[#allocation0 + $0xc8] sm:$0xf] %v329_v13   ;;  %83 = vst [vmem:[#allocation0 + $0xe4] sm:$0xf0] %v329_v13   ;;  %v132_v22 = vld [vmem:[#allocation0 + $0x30] sm:$0xf] }
  0x10   :  { %87 = vst [vmem:[#allocation0 + $0xd0] sm:$0xf] %v330_v14   ;;  %89 = vst [vmem:[#allocation0 + $0xec] sm:$0xf0] %v330_v14   ;;  %v138_v23 = vld [vmem:[#allocation0 + $0x38] sm:$0xf] }
  0x11   :  { %93 = vst [vmem:[#allocation0 + $0xd8] sm:$0xf] %v331_v15   ;;  %95 = vst [vmem:[#allocation0 + $0xf4] sm:$0xf0] %v331_v15   ;;  %v144_v24 = vld [vmem:[#allocation0 + $0x40] sm:$0xf] }
  0x12   :  { %101 = vst [vmem:[%s518_s1] sm:$0xf] %v99_v16  ;;  %332 = vst [vmem:[%s518_s1 + $0x4] sm:$0xf] %v103_v17  ;;  %v150_v25 = vld [vmem:[#allocation0 + $0x48] sm:$0xf] }
  0x13   :  { %333 = vst [vmem:[%s518_s1 + $0x8] sm:$0xf] %v108_v18  ;;  %334 = vst [vmem:[%s518_s1 + $0xc] sm:$0xf] %v114_v19  ;;  %v156_v26 = vld [vmem:[#allocation0 + $0x50] sm:$0xf] }
  0x14   :  { %335 = vst [vmem:[%s518_s1 + $0x10] sm:$0xf] %v120_v20  ;;  %336 = vst [vmem:[%s518_s1 + $0x14] sm:$0xf] %v126_v21  ;;  %v162_v27 = vld [vmem:[#allocation0 + $0x58] sm:$0xf] }
  0x15   :  { %337 = vst [vmem:[%s518_s1 + $0x18] sm:$0xf] %v132_v22  ;;  %338 = vst [vmem:[%s518_s1 + $0x1c] sm:$0xf] %v138_v23  ;;  %v168_v28 = vld [vmem:[#allocation0 + $0x60] sm:$0xf] }
  0x16   :  { %339 = vst [vmem:[%s518_s1 + $0x20] sm:$0xf] %v144_v24  ;;  %340 = vst [vmem:[%s518_s1 + $0x24] sm:$0xf] %v150_v25  ;;  %v174_v29 = vld [vmem:[#allocation0 + $0x68] sm:$0xf] }
  0x17   :  { %341 = vst [vmem:[%s518_s1 + $0x28] sm:$0xf] %v156_v26  ;;  %342 = vst [vmem:[%s518_s1 + $0x2c] sm:$0xf] %v162_v27  ;;  %v180_v30 = vld [vmem:[#allocation0 + $0x70] sm:$0xf] }
  0x18   :  { %343 = vst [vmem:[%s518_s1 + $0x30] sm:$0xf] %v168_v28  ;;  %344 = vst [vmem:[%s518_s1 + $0x34] sm:$0xf] %v174_v29  ;;  %v186_v31 = vld [vmem:[#allocation0 + $0x78] sm:$0xf] }
  0x19   :  { %345 = vst [vmem:[%s518_s1 + $0x38] sm:$0xf] %v180_v30  ;;  %v192_v32 = vld [vmem:[#allocation0 + $0x80] sm:$0xf]  ;;  %v198_v33 = vld [vmem:[#allocation0 + $0x88] sm:$0xf] }
  0x1a   :  { %346 = vst [vmem:[%s518_s1 + $0x3c] sm:$0xf] %v186_v31  ;;  %347 = vst [vmem:[%s518_s1 + $0x40] sm:$0xf] %v192_v32  ;;  %v204_v34 = vld [vmem:[#allocation0 + $0x90] sm:$0xf] }
  0x1b   :  { %348 = vst [vmem:[%s518_s1 + $0x44] sm:$0xf] %v198_v33  ;;  %v210_v35 = vld [vmem:[#allocation0 + $0x98] sm:$0xf]  ;;  %v216_v36 = vld [vmem:[#allocation0 + $0xa0] sm:$0xf] }
  0x1c   :  { %349 = vst [vmem:[%s518_s1 + $0x48] sm:$0xf] %v204_v34  ;;  %350 = vst [vmem:[%s518_s1 + $0x4c] sm:$0xf] %v210_v35  ;;  %v222_v37 = vld [vmem:[#allocation0 + $0xa8] sm:$0xf] }
  0x1d   :  { %351 = vst [vmem:[%s518_s1 + $0x50] sm:$0xf] %v216_v36  ;;  %v228_v38 = vld [vmem:[#allocation0 + $0xb0] sm:$0xf]  ;;  %v234_v39 = vld [vmem:[#allocation0 + $0xb8] sm:$0xf] }
  0x1e   :  { %352 = vst [vmem:[%s518_s1 + $0x54] sm:$0xf] %v222_v37  ;;  %353 = vst [vmem:[%s518_s1 + $0x58] sm:$0xf] %v228_v38  ;;  %v240_v40 = vld [vmem:[#allocation0 + $0xc0] sm:$0xf] }
  0x1f   :  { %354 = vst [vmem:[%s518_s1 + $0x5c] sm:$0xf] %v234_v39  ;;  %v246_v41 = vld [vmem:[#allocation0 + $0xc8] sm:$0xf]  ;;  %v252_v42 = vld [vmem:[#allocation0 + $0xd0] sm:$0xf] }
  0x20   :  { %355 = vst [vmem:[%s518_s1 + $0x60] sm:$0xf] %v240_v40  ;;  %356 = vst [vmem:[%s518_s1 + $0x64] sm:$0xf] %v246_v41  ;;  %v258_v43 = vld [vmem:[#allocation0 + $0xd8] sm:$0xf] }
  0x21   :  { %357 = vst [vmem:[%s518_s1 + $0x68] sm:$0xf] %v252_v42  ;;  %v264_v44 = vld [vmem:[#allocation0 + $0xe0] sm:$0xf]  ;;  %v270_v45 = vld [vmem:[#allocation0 + $0xe8] sm:$0xf] }
  0x22   :  { %358 = vst [vmem:[%s518_s1 + $0x6c] sm:$0xf] %v258_v43  ;;  %359 = vst [vmem:[%s518_s1 + $0x70] sm:$0xf] %v264_v44  ;;  %v276_v46 = vld [vmem:[#allocation0 + $0xf0] sm:$0xf] }
  0x23   :  { %360 = vst [vmem:[%s518_s1 + $0x74] sm:$0xf] %v270_v45  ;;  %v282_v47 = vld [vmem:[#allocation0 + $0xf8] sm:$0xf]  ;;  %361 = vst [vmem:[%s518_s1 + $0x78] sm:$0xf] %v276_v46 }
  0x24   :  { %362 = vst [vmem:[%s518_s1 + $0x7c] sm:$0xf] %v282_v47 }

// kernel: generator_28_forward.11
= control target key start
LH: loop header
LB: loop body
LE: loop exit
PB: predicated region body
PF: predicated region fallthrough
CT: control target
= control target key end

     0   :  { %s4688_s12 = smov 0   ;;  %s4690_s13 = smov 0   ;;  %s5178_s0 = inlined_call_operand.vmem [shape: bf16[4,104,2048], index: 0, kind: input, shape index: {}]   ;;  %s5179_s1 = inlined_call_operand.vmem [shape: bf16[4,2048,256], index: 1, kind: input, shape index: {}]   ;;  %s5180_s2 = inlined_call_operand.vmem [shape: f32[1,256], index: 2, kind: input, shape index: {}]   ;;  %s5181_s3 = inlined_call_operand.vmem [shape: f32[4,104,256], index: 3, kind: output, shape index: {}]  }
   0x1   :  { %s4692_s14 = smov 0  }
   0x2 LB: > { %s39_s15 = sadd.s32 1, %s4662_s13  ;;  %p3674_p0 = scmp.ge.s32.totalorder %s4666_s14, 1  ;;  %s4666_s14 = sphi %s4692_s14, %s13_s14   ;;  %s4662_s13 = sphi %s4690_s13, %s5183_s13   ;;  %s4658_s12 = sphi %s4688_s12, %s5182_s12  }
   0x3   : > { %p41_p1 = scmp.ge.s32.totalorder %s39_s15, 4  ;;  %p217_p2 = scmp.lt.s32.totalorder %s4666_s14, 5 }
   0x5   : > { %s5185_s15 = smov (%p41_p1, %s39_s15), 0  ;;  %p218_p3 = pnand %p3674_p0, %p217_p2 }
   0x6   : > { %p279_p4 = scmp.lt.s32.totalorder (!%p218_p3), %s4658_s12, 3 }
   0x7   : > { %221 = sbr.rel (%p218_p3) target bundleno = 548 (0x224), region = 32 }
   0xe   : > { %s5187_s12 = smov (!%p279_p4, %s4658_s12), 3 }
   0xf   : > { %s4049_s16 = sshll.u32 %s5187_s12, 11  ;;  %s4218_s20 = smul.u32 832, %s5187_s12 }
  0x10   : > { %s4712_s19 = scalar_lea.vmem %s5179_s1, %s4049_s16  ;;  %s4219_s26 = smul.u32 208, %s5187_s12 }
  0x11   : > { %v4244_v0 = vld [vmem:[%s4712_s19 + $0x4] ss:$8 sps:$4 sm:$0xff]   ;;  %v4248_v2 = vld [vmem:[%s4712_s19] ss:$8 sps:$4 sm:$0xff]   ;;  %v4250_v4 = vld [vmem:[%s4712_s19 + $0x14] ss:$8 sps:$4 sm:$0xff]   ;;  %s4762_s23 = scalar_lea.vmem %s5178_s0, %s4218_s20 }
  0x12   : > { %v4246_v1 = vld [vmem:[%s4712_s19 + $0x404] ss:$8 sps:$4 sm:$0xff]   ;;  %2562 = vmatprep.subr.bf16.mxu1 %v4244_v0  ;;  %v4249_v3 = vld [vmem:[%s4712_s19 + $0x400] ss:$8 sps:$4 sm:$0xff]   ;;  %v4252_v5 = vld [vmem:[%s4712_s19 + $0x414] ss:$8 sps:$4 sm:$0xff]   ;;  %s5107_s29 = scalar_lea.vmem %s5181_s3, %s4219_s26 }
  0x13   : > { %2966 = vmatprep.subr.bf16.mxu0 %v4246_v1  ;;  %2563 = vmatpush1.bf16.msra.mxu1 %v4248_v2  ;;  %v4254_v6 = vld [vmem:[%s4712_s19 + $0x10] ss:$8 sps:$4 sm:$0xff]   ;;  %v4256_v8 = vld [vmem:[%s4712_s19 + $0x24] ss:$8 sps:$4 sm:$0xff]   ;;  %v4260_v10 = vld [vmem:[%s4712_s19 + $0x20] ss:$8 sps:$4 sm:$0xff]  }
  0x14   : > { %2967 = vmatpush1.bf16.msra.mxu0 %v4249_v3  ;;  %2564 = vmatprep.subr.bf16.mxu1 %v4250_v4  ;;  %v4255_v7 = vld [vmem:[%s4712_s19 + $0x410] ss:$8 sps:$4 sm:$0xff]   ;;  %v4258_v9 = vld [vmem:[%s4712_s19 + $0x424] ss:$8 sps:$4 sm:$0xff]   ;;  %v4261_v11 = vld [vmem:[%s4712_s19 + $0x420] ss:$8 sps:$4 sm:$0xff]  }
  0x15   : > { %2968 = vmatprep.subr.bf16.mxu0 %v4252_v5  ;;  %v4262_v12 = vld [vmem:[%s4712_s19 + $0x34] ss:$8 sps:$4 sm:$0xff]   ;;  %v4266_v14 = vld [vmem:[%s4712_s19 + $0x30] ss:$8 sps:$4 sm:$0xff]   ;;  %v4268_v16 = vld [vmem:[%s4712_s19 + $0x44] ss:$8 sps:$4 sm:$0xff]  }
  0x16   : > { %v4264_v13 = vld [vmem:[%s4712_s19 + $0x434] ss:$8 sps:$4 sm:$0xff]   ;;  %v4267_v15 = vld [vmem:[%s4712_s19 + $0x430] ss:$8 sps:$4 sm:$0xff]   ;;  %v4270_v17 = vld [vmem:[%s4712_s19 + $0x444] ss:$8 sps:$4 sm:$0xff]  }
  0x17   : > { %2565 = vmatpush1.bf16.msra.mxu1 %v4254_v6  ;;  %v4272_v18 = vld [vmem:[%s4712_s19 + $0x40] ss:$8 sps:$4 sm:$0xff]   ;;  %v4274_v20 = vld [vmem:[%s4712_s19 + $0x54] ss:$8 sps:$4 sm:$0xff]   ;;  %v4278_v22 = vld [vmem:[%s4712_s19 + $0x50] ss:$8 sps:$4 sm:$0xff]  }
  0x18   : > { %2969 = vmatpush1.bf16.msra.mxu0 %v4255_v7  ;;  %2566 = vmatprep.subr.bf16.mxu1 %v4256_v8  ;;  %v4273_v19 = vld [vmem:[%s4712_s19 + $0x440] ss:$8 sps:$4 sm:$0xff]   ;;  %v4276_v21 = vld [vmem:[%s4712_s19 + $0x454] ss:$8 sps:$4 sm:$0xff]   ;;  %v4279_v23 = vld [vmem:[%s4712_s19 + $0x450] ss:$8 sps:$4 sm:$0xff]  }
  0x19   : > { %2970 = vmatprep.subr.bf16.mxu0 %v4258_v9  ;;  %v4280_v24 = vld [vmem:[%s4712_s19 + $0x64] ss:$8 sps:$4 sm:$0xff]   ;;  %v4284_v26 = vld [vmem:[%s4712_s19 + $0x60] ss:$8 sps:$4 sm:$0xff]   ;;  %v4286_v28 = vld [vmem:[%s4712_s19 + $0x74] ss:$8 sps:$4 sm:$0xff]  }
  0x1a   : > { %v4282_v25 = vld [vmem:[%s4712_s19 + $0x464] ss:$8 sps:$4 sm:$0xff]   ;;  %v4285_v27 = vld [vmem:[%s4712_s19 + $0x460] ss:$8 sps:$4 sm:$0xff]   ;;  %v4288_v29 = vld [vmem:[%s4712_s19 + $0x474] ss:$8 sps:$4 sm:$0xff]  }
  0x1b   : > { %2567 = vmatpush1.bf16.msra.mxu1 %v4260_v10  ;;  %v4290_v30 = vld [vmem:[%s4712_s19 + $0x70] ss:$8 sps:$4 sm:$0xff]   ;;  %v4292_v32 = vld [vmem:[%s4712_s19 + $0x84] ss:$8 sps:$4 sm:$0xff]   ;;  %v4296_v34 = vld [vmem:[%s4712_s19 + $0x80] ss:$8 sps:$4 sm:$0xff]  }
  0x1c   : > { %2971 = vmatpush1.bf16.msra.mxu0 %v4261_v11  ;;  %2568 = vmatprep.subr.bf16.mxu1 %v4262_v12  ;;  %v4291_v31 = vld [vmem:[%s4712_s19 + $0x470] ss:$8 sps:$4 sm:$0xff]   ;;  %v4294_v33 = vld [vmem:[%s4712_s19 + $0x484] ss:$8 sps:$4 sm:$0xff]   ;;  %v4297_v35 = vld [vmem:[%s4712_s19 + $0x480] ss:$8 sps:$4 sm:$0xff]  }
  0x1d   : > { %2972 = vmatprep.subr.bf16.mxu0 %v4264_v13  ;;  %v4298_v36 = vld [vmem:[%s4712_s19 + $0x94] ss:$8 sps:$4 sm:$0xff]   ;;  %v4302_v38 = vld [vmem:[%s4712_s19 + $0x90] ss:$8 sps:$4 sm:$0xff]   ;;  %v4304_v40 = vld [vmem:[%s4712_s19 + $0xa4] ss:$8 sps:$4 sm:$0xff]  }
  0x1e   : > { %v4300_v37 = vld [vmem:[%s4712_s19 + $0x494] ss:$8 sps:$4 sm:$0xff]   ;;  %v4303_v39 = vld [vmem:[%s4712_s19 + $0x490] ss:$8 sps:$4 sm:$0xff]   ;;  %v4306_v41 = vld [vmem:[%s4712_s19 + $0x4a4] ss:$8 sps:$4 sm:$0xff]  }
  0x1f   : > { %2569 = vmatpush1.bf16.msra.mxu1 %v4266_v14  ;;  %v4308_v42 = vld [vmem:[%s4712_s19 + $0xa0] ss:$8 sps:$4 sm:$0xff]   ;;  %v4310_v44 = vld [vmem:[%s4712_s19 + $0xb4] ss:$8 sps:$4 sm:$0xff]   ;;  %v4314_v46 = vld [vmem:[%s4712_s19 + $0xb0] ss:$8 sps:$4 sm:$0xff]  }
  0x20   : > { %2973 = vmatpush1.bf16.msra.mxu0 %v4267_v15  ;;  %2570 = vmatprep.subr.bf16.mxu1 %v4268_v16  ;;  %v4309_v43 = vld [vmem:[%s4712_s19 + $0x4a0] ss:$8 sps:$4 sm:$0xff]   ;;  %v4312_v45 = vld [vmem:[%s4712_s19 + $0x4b4] ss:$8 sps:$4 sm:$0xff]   ;;  %v4315_v47 = vld [vmem:[%s4712_s19 + $0x4b0] ss:$8 sps:$4 sm:$0xff]  }
  0x21   : > { %2974 = vmatprep.subr.bf16.mxu0 %v4270_v17  ;;  %v386_v48 = vld [vmem:[%s4762_s23] sm:$0xff]  ;;  %v4322_v58 = vld [vmem:[%s4712_s19 + $0xd4] ss:$8 sps:$4 sm:$0xff]   ;;  %v4326_v60 = vld [vmem:[%s4712_s19 + $0xd0] ss:$8 sps:$4 sm:$0xff]  }
  0x22   : > { %v394_v49 = vld [vmem:[%s4762_s23 + $0x40] sm:$0xff]  ;;  %v4324_v59 = vld [vmem:[%s4712_s19 + $0x4d4] ss:$8 sps:$4 sm:$0xff]   ;;  %v4327_v61 = vld [vmem:[%s4712_s19 + $0x4d0] ss:$8 sps:$4 sm:$0xff]  }
  0x23   : > { %2571 = vmatpush1.bf16.msra.mxu1 %v4272_v18  ;;  %v4316_v50 = vld [vmem:[%s4712_s19 + $0xc4] ss:$8 sps:$4 sm:$0xff]   ;;  %v3680_v52 = vcombine.high %v386_v48, %v394_v49  ;;  %v4320_v56 = vld [vmem:[%s4712_s19 + $0xc0] ss:$8 sps:$4 sm:$0xff]   ;;  %v4334_v2 = vld [vmem:[%s4712_s19 + $0xf4] ss:$8 sps:$4 sm:$0xff]   ;;  %v3679_v11 = vcombine.low %v386_v48, %v394_v49 }
  0x24   : > { %2975 = vmatpush1.bf16.msra.mxu0 %v4273_v19  ;;  %2572 = vmatprep.subr.bf16.mxu1 %v4274_v20  ;;  %v4318_v51 = vld [vmem:[%s4712_s19 + $0x4c4] ss:$8 sps:$4 sm:$0xff]   ;;  %v4321_v57 = vld [vmem:[%s4712_s19 + $0x4c0] ss:$8 sps:$4 sm:$0xff]   ;;  %v4336_v3 = vld [vmem:[%s4712_s19 + $0x4f4] ss:$8 sps:$4 sm:$0xff]  }
  0x25   : > { %2976 = vmatprep.subr.bf16.mxu0 %v4276_v21  ;;  %v390_v53 = vld [vmem:[%s4762_s23 + $0x20] sm:$0xff]  ;;  %2594 = vmatprep.mubr.bf16.mxu1 %v3680_v52  ;;  %v4338_v4 = vld [vmem:[%s4712_s19 + $0xf0] ss:$8 sps:$4 sm:$0xff]   ;;  %v4348_v16 = vld [vmem:[%s4712_s19 + $0x114] ss:$8 sps:$4 sm:$0xff]  }
  0x26   : > { %v398_v54 = vld [vmem:[%s4762_s23 + $0x60] sm:$0xff]  ;;  %v4339_v5 = vld [vmem:[%s4712_s19 + $0x4f0] ss:$8 sps:$4 sm:$0xff]   ;;  %v4351_v17 = vld [vmem:[%s4712_s19 + $0x514] ss:$8 sps:$4 sm:$0xff]  }
  0x27   : > { %2573 = vmatpush1.bf16.msra.mxu1 %v4278_v22  ;;  %v3688_v55 = vcombine.high %v390_v53, %v398_v54  ;;  %v4328_v62 = vld [vmem:[%s4712_s19 + $0xe4] ss:$8 sps:$4 sm:$0xff]   ;;  %v4332_v0 = vld [vmem:[%s4712_s19 + $0xe0] ss:$8 sps:$4 sm:$0xff]   ;;  %v3687_v12 = vcombine.low %v390_v53, %v398_v54  ;;  %v4346_v20 = vld [vmem:[%s4712_s19 + $0x110] ss:$8 sps:$4 sm:$0xff]  }
  0x28   : > { %2977 = vmatpush1.bf16.msra.mxu0 %v4279_v23  ;;  %2574 = vmatprep.subr.bf16.mxu1 %v4280_v24  ;;  %v4330_v63 = vld [vmem:[%s4712_s19 + $0x4e4] ss:$8 sps:$4 sm:$0xff]   ;;  %v4333_v1 = vld [vmem:[%s4712_s19 + $0x4e0] ss:$8 sps:$4 sm:$0xff]   ;;  %v4349_v21 = vld [vmem:[%s4712_s19 + $0x510] ss:$8 sps:$4 sm:$0xff]  }
  0x29   : > { %2978 = vmatprep.subr.bf16.mxu0 %v4282_v25  ;;  %2998 = vmatprep.mubr.bf16.mxu0 %v3688_v55  ;;  %v4342_v6 = vld [vmem:[%s4712_s19 + $0x104] ss:$8 sps:$4 sm:$0xff]   ;;  %v4340_v8 = vld [vmem:[%s4712_s19 + $0x100] ss:$8 sps:$4 sm:$0xff]   ;;  %v4372_v48 = vld [vmem:[%s4712_s19 + $0x154] ss:$8 sps:$4 sm:$0xff]  }
  0x2a   : > { %v4345_v7 = vld [vmem:[%s4712_s19 + $0x504] ss:$8 sps:$4 sm:$0xff]   ;;  %v4343_v9 = vld [vmem:[%s4712_s19 + $0x500] ss:$8 sps:$4 sm:$0xff]   ;;  %v4375_v49 = vld [vmem:[%s4712_s19 + $0x554] ss:$8 sps:$4 sm:$0xff]  }
  0x2b   : > { %2575 = vmatpush1.bf16.msra.mxu1 %v4284_v26  ;;  %v402_v10 = vld [vmem:[%s4762_s23 + $0x80] sm:$0xff]  ;;  %v4370_v52 = vld [vmem:[%s4712_s19 + $0x150] ss:$8 sps:$4 sm:$0xff]  }
  0x2c   : > { %2979 = vmatpush1.bf16.msra.mxu0 %v4285_v27  ;;  %2576 = vmatprep.subr.bf16.mxu1 %v4286_v28  ;;  %v410_v13 = vld [vmem:[%s4762_s23 + $0xc0] sm:$0xff]  ;;  %v4373_v53 = vld [vmem:[%s4712_s19 + $0x550] ss:$8 sps:$4 sm:$0xff]  }
  0x2d   : > { %2980 = vmatprep.subr.bf16.mxu0 %v4288_v29  ;;  %v406_v14 = vld [vmem:[%s4762_s23 + $0xa0] sm:$0xff]  ;;  %v3696_v18 = vcombine.high %v402_v10, %v410_v13  ;;  %v3695_v28 = vcombine.low %v402_v10, %v410_v13 }
  0x2e   : > { %v414_v15 = vld [vmem:[%s4762_s23 + $0xe0] sm:$0xff] }
  0x2f   : > { %2577 = vmatpush1.bf16.msra.mxu1 %v4290_v30  ;;  %v3704_v19 = vcombine.high %v406_v14, %v414_v15  ;;  %v4354_v22 = vld [vmem:[%s4712_s19 + $0x124] ss:$8 sps:$4 sm:$0xff]   ;;  %v4352_v24 = vld [vmem:[%s4712_s19 + $0x120] ss:$8 sps:$4 sm:$0xff]   ;;  %v3703_v29 = vcombine.low %v406_v14, %v414_v15 }
  0x30   : > { %2981 = vmatpush1.bf16.msra.mxu0 %v4291_v31  ;;  %2578 = vmatprep.subr.bf16.mxu1 %v4292_v32  ;;  %v4357_v23 = vld [vmem:[%s4712_s19 + $0x524] ss:$8 sps:$4 sm:$0xff]   ;;  %v4355_v25 = vld [vmem:[%s4712_s19 + $0x520] ss:$8 sps:$4 sm:$0xff]   ;;  %v4360_v32 = vld [vmem:[%s4712_s19 + $0x134] ss:$8 sps:$4 sm:$0xff]  }
  0x31   : > { %2982 = vmatprep.subr.bf16.mxu0 %v4294_v33  ;;  %v418_v26 = vld [vmem:[%s4762_s23 + $0x100] sm:$0xff]  ;;  %v4363_v33 = vld [vmem:[%s4712_s19 + $0x534] ss:$8 sps:$4 sm:$0xff]  }
  0x32   : > { %v426_v27 = vld [vmem:[%s4762_s23 + $0x140] sm:$0xff] }
  0x33   : > { %2579 = vmatpush1.bf16.msra.mxu1 %v4296_v34  ;;  %v422_v30 = vld [vmem:[%s4762_s23 + $0x120] sm:$0xff]  ;;  %v3712_v34 = vcombine.high %v418_v26, %v426_v27 }
  0x34   : > { %2983 = vmatpush1.bf16.msra.mxu0 %v4297_v35  ;;  %2580 = vmatprep.subr.bf16.mxu1 %v4298_v36  ;;  %v430_v31 = vld [vmem:[%s4762_s23 + $0x160] sm:$0xff]  ;;  %v4358_v36 = vld [vmem:[%s4712_s19 + $0x130] ss:$8 sps:$4 sm:$0xff]  }
  0x35   : > { %2984 = vmatprep.subr.bf16.mxu0 %v4300_v37  ;;  %v3720_v35 = vcombine.high %v422_v30, %v430_v31  ;;  %v4361_v37 = vld [vmem:[%s4712_s19 + $0x530] ss:$8 sps:$4 sm:$0xff]   ;;  %v4378_v54 = vld [vmem:[%s4712_s19 + $0x164] ss:$8 sps:$4 sm:$0xff]   ;;  %v4388_v14 = vld [vmem:[%s4712_s19 + $0x180] ss:$8 sps:$4 sm:$0xff]  }
  0x36   : > { %v4381_v55 = vld [vmem:[%s4712_s19 + $0x564] ss:$8 sps:$4 sm:$0xff]   ;;  %v4391_v15 = vld [vmem:[%s4712_s19 + $0x580] ss:$8 sps:$4 sm:$0xff]  }
  0x37   : > { %2581 = vmatpush1.bf16.msra.mxu1 %v4302_v38  ;;  %v4366_v38 = vld [vmem:[%s4712_s19 + $0x144] ss:$8 sps:$4 sm:$0xff]  }
  0x38   : > { %2985 = vmatpush1.bf16.msra.mxu0 %v4303_v39  ;;  %2582 = vmatprep.subr.bf16.mxu1 %v4304_v40  ;;  %v4369_v39 = vld [vmem:[%s4712_s19 + $0x544] ss:$8 sps:$4 sm:$0xff]   ;;  %v4364_v40 = vld [vmem:[%s4712_s19 + $0x140] ss:$8 sps:$4 sm:$0xff]  }
  0x39   : > { %2986 = vmatprep.subr.bf16.mxu0 %v4306_v41  ;;  %v434_v41 = vld [vmem:[%s4762_s23 + $0x180] sm:$0xff] }
  0x3a   : > { %v478_v13 = vld [vmem:[%s4762_s23 + $0x2e0] sm:$0xff] }
  0x3b   : > { %2583 = vmatpush1.bf16.msra.mxu1 %v4308_v42  ;;  %v442_v42 = vld [vmem:[%s4762_s23 + $0x1c0] sm:$0xff] }
  0x3c   : > { %2987 = vmatpush1.bf16.msra.mxu0 %v4309_v43  ;;  %2584 = vmatprep.subr.bf16.mxu1 %v4310_v44  ;;  %v3711_v43 = vcombine.low %v418_v26, %v426_v27  ;;  %v3719_v44 = vcombine.low %v422_v30, %v430_v31  ;;  %v4408_v30 = vld [vmem:[%s4712_s19 + $0x1b4] ss:$8 sps:$4 sm:$0xff]  }
  0x3d   : > { %2988 = vmatprep.subr.bf16.mxu0 %v4312_v45  ;;  %v438_v45 = vld [vmem:[%s4762_s23 + $0x1a0] sm:$0xff]  ;;  %v4411_v31 = vld [vmem:[%s4712_s19 + $0x5b4] ss:$8 sps:$4 sm:$0xff]  }
  0x3f   : > { %2585 = vmatpush1.bf16.msra.mxu1 %v4314_v46  ;;  %v446_v46 = vld [vmem:[%s4762_s23 + $0x1e0] sm:$0xff] }
  0x40   : > { %2989 = vmatpush1.bf16.msra.mxu0 %v4315_v47  ;;  %2586 = vmatprep.subr.bf16.mxu1 %v4316_v50  ;;  %v4367_v47 = vld [vmem:[%s4712_s19 + $0x540] ss:$8 sps:$4 sm:$0xff]   ;;  %v3728_v50 = vcombine.high %v434_v41, %v442_v42 }
  0x41   : > { %2990 = vmatprep.subr.bf16.mxu0 %v4318_v51  ;;  %v3736_v51 = vcombine.high %v438_v45, %v446_v46 }
  0x43   : > { %2587 = vmatpush1.bf16.msra.mxu1 %v4320_v56  ;;  %v4376_v56 = vld [vmem:[%s4712_s19 + $0x160] ss:$8 sps:$4 sm:$0xff]  }
  0x44   : > { %2991 = vmatpush1.bf16.msra.mxu0 %v4321_v57  ;;  %2588 = vmatprep.subr.bf16.mxu1 %v4322_v58  ;;  %v450_v57 = vld [vmem:[%s4762_s23 + $0x200] sm:$0xff] }
  0x45   : > { %2992 = vmatprep.subr.bf16.mxu0 %v4324_v59  ;;  %v458_v58 = vld [vmem:[%s4762_s23 + $0x240] sm:$0xff]  ;;  %v3727_v59 = vcombine.low %v434_v41, %v442_v42 }
  0x46   : > { %v3743_v10 = vcombine.low %v450_v57, %v458_v58 }
  0x47   : > { %2589 = vmatpush1.bf16.msra.mxu1 %v4326_v60  ;;  %v3735_v60 = vcombine.low %v438_v45, %v446_v46  ;;  %v4415_v45 = vld [vmem:[%s4712_s19 + $0x5c0] ss:$8 sps:$4 sm:$0xff]   ;;  %v4420_v46 = vld [vmem:[%s4712_s19 + $0x1d4] ss:$8 sps:$4 sm:$0xff]  }
  0x48   : > { %2993 = vmatpush1.bf16.msra.mxu0 %v4327_v61  ;;  %2590 = vmatprep.subr.bf16.mxu1 %v4328_v62  ;;  %v454_v61 = vld [vmem:[%s4762_s23 + $0x220] sm:$0xff] }
  0x49   : > { %2994 = vmatprep.subr.bf16.mxu0 %v4330_v63  ;;  %v462_v62 = vld [vmem:[%s4762_s23 + $0x260] sm:$0xff] }
  0x4a   : > { %v4379_v63 = vld [vmem:[%s4712_s19 + $0x560] ss:$8 sps:$4 sm:$0xff]  }
  0x4b   : > { %2591 = vmatpush1.bf16.msra.mxu1 %v4332_v0  ;;  %v4384_v0 = vld [vmem:[%s4712_s19 + $0x174] ss:$8 sps:$4 sm:$0xff]  }
  0x4c   : > { %2995 = vmatpush1.bf16.msra.mxu0 %v4333_v1  ;;  %2592 = vmatprep.subr.bf16.mxu1 %v4334_v2  ;;  %v4387_v1 = vld [vmem:[%s4712_s19 + $0x574] ss:$8 sps:$4 sm:$0xff]   ;;  %v3744_v2 = vcombine.high %v450_v57, %v458_v58  ;;  %v4434_v58 = vld [vmem:[%s4712_s19 + $0x1f0] ss:$8 sps:$4 sm:$0xff]  }
  0x4d   : > { %2996 = vmatprep.subr.bf16.mxu0 %v4336_v3  ;;  %v3752_v3 = vcombine.high %v454_v61, %v462_v62  ;;  %v4439_v57 = vld [vmem:[%s4712_s19 + $0x5f4] ss:$8 sps:$4 sm:$0xff]  }
  0x4f   : > { %2593 = vmatpush1.bf16.msra.mxu1 %v4338_v4  ;;  %v4382_v4 = vld [vmem:[%s4712_s19 + $0x170] ss:$8 sps:$4 sm:$0xff]  }
  0x50   : > { %2997 = vmatpush1.bf16.msra.mxu0 %v4339_v5  ;;  %2663 = vmatprep.subr.bf16.mxu1 %v4342_v6  ;;  %v4385_v5 = vld [vmem:[%s4712_s19 + $0x570] ss:$8 sps:$4 sm:$0xff]   ;;  %v4390_v6 = vld [vmem:[%s4712_s19 + $0x184] ss:$8 sps:$4 sm:$0xff]  }
  0x51   : > { %3067 = vmatprep.subr.bf16.mxu0 %v4345_v7  ;;  %v4393_v7 = vld [vmem:[%s4712_s19 + $0x584] ss:$8 sps:$4 sm:$0xff]  }
  0x52   : > { %2595 = vmatmul.mubr.bf16.vlgmr.msra.gmra.mrb[0].mxu1 %v3679_v11  ;;  %v3751_v11 = vcombine.low %v454_v61, %v462_v62  ;;  %v4445_v61 = vld [vmem:[%s4712_s19 + $0x604] ss:$8 sps:$4 sm:$0xff]  }
  0x53   : > { %2999 = vmatmul.mubr.bf16.vlgmr.msra.gmra.mrb[0].mxu0 %v3687_v12  ;;  %2664 = vmatpush1.bf16.msra.mxu1 %v4340_v8  ;;  %v466_v8 = vld [vmem:[%s4762_s23 + $0x280] sm:$0xff]  ;;  %v403_v62 = vld [vmem:[%s4762_s23 + $0x88] sm:$0xff] }
  0x54   : > { %3068 = vmatpush1.bf16.msra.mxu0 %v4343_v9  ;;  %2665 = vmatprep.subr.bf16.mxu1 %v4348_v16  ;;  %v474_v9 = vld [vmem:[%s4762_s23 + $0x2c0] sm:$0xff]  ;;  %v4396_v16 = vld [vmem:[%s4712_s19 + $0x194] ss:$8 sps:$4 sm:$0xff]  }
  0x55   : > { %3069 = vmatprep.subr.bf16.mxu0 %v4351_v17  ;;  %2604 = vmatprep.mubr.bf16.mxu1 %v3696_v18  ;;  %v470_v12 = vld [vmem:[%s4762_s23 + $0x2a0] sm:$0xff]  ;;  %v4399_v17 = vld [vmem:[%s4712_s19 + $0x594] ss:$8 sps:$4 sm:$0xff]   ;;  %v3760_v18 = vcombine.high %v466_v8, %v474_v9  ;;  %v3759_v26 = vcombine.low %v466_v8, %v474_v9 }
  0x56   : > { %3008 = vmatprep.mubr.bf16.mxu0 %v3704_v19  ;;  %v3768_v19 = vcombine.high %v470_v12, %v478_v13  ;;  %v3767_v27 = vcombine.low %v470_v12, %v478_v13  ;;  %v4454_v12 = vld [vmem:[%s4712_s19 + $0x224] ss:$8 sps:$4 sm:$0xff]  }
  0x57   : > { %2666 = vmatpush1.bf16.msra.mxu1 %v4346_v20  ;;  %v4394_v20 = vld [vmem:[%s4712_s19 + $0x190] ss:$8 sps:$4 sm:$0xff]   ;;  %v4457_v13 = vld [vmem:[%s4712_s19 + $0x624] ss:$8 sps:$4 sm:$0xff]  }
  0x58   : > { %3070 = vmatpush1.bf16.msra.mxu0 %v4349_v21  ;;  %2667 = vmatprep.subr.bf16.mxu1 %v4354_v22  ;;  %v4397_v21 = vld [vmem:[%s4712_s19 + $0x590] ss:$8 sps:$4 sm:$0xff]   ;;  %v4402_v22 = vld [vmem:[%s4712_s19 + $0x1a4] ss:$8 sps:$4 sm:$0xff]  }
  0x59   : > { %3071 = vmatprep.subr.bf16.mxu0 %v4357_v23  ;;  %v4405_v23 = vld [vmem:[%s4712_s19 + $0x5a4] ss:$8 sps:$4 sm:$0xff]  }
  0x5a   : > { %2605 = vmatmul.mubr.bf16.gmra.mrb[4].mxu1 %v3695_v28  ;;  %v482_v28 = vld [vmem:[%s4762_s23 + $0x300] sm:$0xff] }
  0x5b   : > { %3009 = vmatmul.mubr.bf16.gmra.mrb[4].mxu0 %v3703_v29  ;;  %2668 = vmatpush1.bf16.msra.mxu1 %v4352_v24  ;;  %v4400_v24 = vld [vmem:[%s4712_s19 + $0x1a0] ss:$8 sps:$4 sm:$0xff]   ;;  %v3775_v41 = vcombine.low %v482_v28, %v482_v28 }
  0x5c   : > { %3072 = vmatpush1.bf16.msra.mxu0 %v4355_v25  ;;  %2669 = vmatprep.subr.bf16.mxu1 %v4360_v32  ;;  %v4403_v25 = vld [vmem:[%s4712_s19 + $0x5a0] ss:$8 sps:$4 sm:$0xff]   ;;  %v3776_v32 = vcombine.high %v482_v28, %v482_v28  ;;  %v4466_v28 = vld [vmem:[%s4712_s19 + $0x244] ss:$8 sps:$4 sm:$0xff]  }
  0x5d   : > { %3073 = vmatprep.subr.bf16.mxu0 %v4363_v33  ;;  %2614 = vmatprep.mubr.bf16.mxu1 %v3712_v34  ;;  %v486_v29 = vld [vmem:[%s4762_s23 + $0x320] sm:$0xff]  ;;  %v4406_v34 = vld [vmem:[%s4712_s19 + $0x1b0] ss:$8 sps:$4 sm:$0xff]  }
  0x5e   : > { %3018 = vmatprep.mubr.bf16.mxu0 %v3720_v35  ;;  %v3784_v33 = vcombine.high %v486_v29, %v486_v29  ;;  %v4409_v35 = vld [vmem:[%s4712_s19 + $0x5b0] ss:$8 sps:$4 sm:$0xff]   ;;  %v3783_v42 = vcombine.low %v486_v29, %v486_v29  ;;  %v4469_v29 = vld [vmem:[%s4712_s19 + $0x644] ss:$8 sps:$4 sm:$0xff]  }
  0x5f   : > { %2670 = vmatpush1.bf16.msra.mxu1 %v4358_v36  ;;  %v4414_v36 = vld [vmem:[%s4712_s19 + $0x1c4] ss:$8 sps:$4 sm:$0xff]  }
  0x60   : > { %3074 = vmatpush1.bf16.msra.mxu0 %v4361_v37  ;;  %2671 = vmatprep.subr.bf16.mxu1 %v4366_v38  ;;  %v4417_v37 = vld [vmem:[%s4712_s19 + $0x5c4] ss:$8 sps:$4 sm:$0xff]   ;;  %v4412_v38 = vld [vmem:[%s4712_s19 + $0x1c0] ss:$8 sps:$4 sm:$0xff]  }
  0x61   : > { %3075 = vmatprep.subr.bf16.mxu0 %v4369_v39  ;;  %v387_v39 = vld [vmem:[%s4762_s23 + $0x8] sm:$0xff] }
  0x62   : > { %2615 = vmatmul.mubr.bf16.gmra.mrb[8].mxu1 %v3711_v43  ;;  %v391_v43 = vld [vmem:[%s4762_s23 + $0x28] sm:$0xff] }
  0x63   : > { %3019 = vmatmul.mubr.bf16.gmra.mrb[8].mxu0 %v3719_v44  ;;  %2672 = vmatpush1.bf16.msra.mxu1 %v4364_v40  ;;  %v395_v40 = vld [vmem:[%s4762_s23 + $0x48] sm:$0xff] }
  0x64   : > { %3076 = vmatpush1.bf16.msra.mxu0 %v4367_v47  ;;  %2673 = vmatprep.subr.bf16.mxu1 %v4372_v48  ;;  %v399_v44 = vld [vmem:[%s4762_s23 + $0x68] sm:$0xff]  ;;  %v4423_v47 = vld [vmem:[%s4712_s19 + $0x5d4] ss:$8 sps:$4 sm:$0xff]   ;;  %v3682_v48 = vcombine.high %v387_v39, %v395_v40 }
  0x65   : > { %3077 = vmatprep.subr.bf16.mxu0 %v4375_v49  ;;  %2624 = vmatprep.mubr.bf16.mxu1 %v3728_v50  ;;  %v3690_v49 = vcombine.high %v391_v43, %v399_v44  ;;  %v4418_v50 = vld [vmem:[%s4712_s19 + $0x1d0] ss:$8 sps:$4 sm:$0xff]  }
  0x66   : > { %3028 = vmatprep.mubr.bf16.mxu0 %v3736_v51  ;;  %v4421_v51 = vld [vmem:[%s4712_s19 + $0x5d0] ss:$8 sps:$4 sm:$0xff]  }
  0x67   : > { %2674 = vmatpush1.bf16.msra.mxu1 %v4370_v52  ;;  %v4428_v52 = vld [vmem:[%s4712_s19 + $0x1e4] ss:$8 sps:$4 sm:$0xff]  }
  0x68   : > { %3078 = vmatpush1.bf16.msra.mxu0 %v4373_v53  ;;  %2675 = vmatprep.subr.bf16.mxu1 %v4378_v54  ;;  %v4432_v53 = vld [vmem:[%s4712_s19 + $0x5e4] ss:$8 sps:$4 sm:$0xff]   ;;  %v4426_v54 = vld [vmem:[%s4712_s19 + $0x1e0] ss:$8 sps:$4 sm:$0xff]  }
  0x69   : > { %3079 = vmatprep.subr.bf16.mxu0 %v4381_v55  ;;  %v4430_v55 = vld [vmem:[%s4712_s19 + $0x5e0] ss:$8 sps:$4 sm:$0xff]  }
  0x6a   : > { %2625 = vmatmul.mubr.bf16.gmra.mrb[12].mxu1 %v3727_v59  ;;  %v4437_v59 = vld [vmem:[%s4712_s19 + $0x5f0] ss:$8 sps:$4 sm:$0xff]  }
  0x6b   : > { %3029 = vmatmul.mubr.bf16.gmra.mrb[12].mxu0 %v3735_v60  ;;  %2676 = vmatpush1.bf16.msra.mxu1 %v4376_v56  ;;  %v4436_v56 = vld [vmem:[%s4712_s19 + $0x1f4] ss:$8 sps:$4 sm:$0xff]   ;;  %v4442_v60 = vld [vmem:[%s4712_s19 + $0x204] ss:$8 sps:$4 sm:$0xff]  }
  0x6c   : > { %3080 = vmatpush1.bf16.msra.mxu0 %v4379_v63  ;;  %2677 = vmatprep.subr.bf16.mxu1 %v4384_v0  ;;  %v411_v63 = vld [vmem:[%s4762_s23 + $0xc8] sm:$0xff] }
  0x6d   : > { %3081 = vmatprep.subr.bf16.mxu0 %v4387_v1  ;;  %2634 = vmatprep.mubr.bf16.mxu1 %v3744_v2  ;;  %v407_v0 = vld [vmem:[%s4762_s23 + $0xa8] sm:$0xff]  ;;  %v3681_v1 = vcombine.low %v387_v39, %v395_v40  ;;  %v3689_v2 = vcombine.low %v391_v43, %v399_v44  ;;  %v3698_v8 = vcombine.high %v403_v62, %v411_v63  ;;  %v4475_v39 = vld [vmem:[%s4712_s19 + $0x654] ss:$8 sps:$4 sm:$0xff]   ;;  %v4473_v43 = vld [vmem:[%s4712_s19 + $0x650] ss:$8 sps:$4 sm:$0xff]  }
  0x6e   : > { %3038 = vmatprep.mubr.bf16.mxu0 %v3752_v3  ;;  %v415_v3 = vld [vmem:[%s4762_s23 + $0xe8] sm:$0xff] }
  0x6f   : > { %2678 = vmatpush1.bf16.msra.mxu1 %v4382_v4  ;;  %v4440_v4 = vld [vmem:[%s4712_s19 + $0x200] ss:$8 sps:$4 sm:$0xff]   ;;  %v3706_v9 = vcombine.high %v407_v0, %v415_v3  ;;  %v4478_v44 = vld [vmem:[%s4712_s19 + $0x264] ss:$8 sps:$4 sm:$0xff]  }
  0x70   : > { %3082 = vmatpush1.bf16.msra.mxu0 %v4385_v5  ;;  %2679 = vmatprep.subr.bf16.mxu1 %v4390_v6  ;;  %v4443_v5 = vld [vmem:[%s4712_s19 + $0x600] ss:$8 sps:$4 sm:$0xff]   ;;  %v4448_v6 = vld [vmem:[%s4712_s19 + $0x214] ss:$8 sps:$4 sm:$0xff]  }
  0x71   : > { %3083 = vmatprep.subr.bf16.mxu0 %v4393_v7  ;;  %v4451_v7 = vld [vmem:[%s4712_s19 + $0x614] ss:$8 sps:$4 sm:$0xff]  }
  0x72   : > { %2635 = vmatmul.mubr.bf16.gmra.mrb[16].mxu1 %v3743_v10  ;;  %v4446_v10 = vld [vmem:[%s4712_s19 + $0x210] ss:$8 sps:$4 sm:$0xff]  }
  0x73   : > { %3039 = vmatmul.mubr.bf16.gmra.mrb[16].mxu0 %v3751_v11  ;;  %2680 = vmatpush1.bf16.msra.mxu1 %v4388_v14  ;;  %v4449_v11 = vld [vmem:[%s4712_s19 + $0x610] ss:$8 sps:$4 sm:$0xff]   ;;  %v4452_v14 = vld [vmem:[%s4712_s19 + $0x220] ss:$8 sps:$4 sm:$0xff]  }
  0x74   : > { %3084 = vmatpush1.bf16.msra.mxu0 %v4391_v15  ;;  %2681 = vmatprep.subr.bf16.mxu1 %v4396_v16  ;;  %v419_v15 = vld [vmem:[%s4762_s23 + $0x108] sm:$0xff] }
  0x75   : > { %3085 = vmatprep.subr.bf16.mxu0 %v4399_v17  ;;  %2644 = vmatprep.mubr.bf16.mxu1 %v3760_v18  ;;  %v427_v16 = vld [vmem:[%s4762_s23 + $0x148] sm:$0xff]  ;;  %v3697_v17 = vcombine.low %v403_v62, %v411_v63  ;;  %v3705_v18 = vcombine.low %v407_v0, %v415_v3 }
  0x76   : > { %3048 = vmatprep.mubr.bf16.mxu0 %v3768_v19  ;;  %v423_v19 = vld [vmem:[%s4762_s23 + $0x128] sm:$0xff] }
  0x77   : > { %2682 = vmatpush1.bf16.msra.mxu1 %v4394_v20  ;;  %v431_v20 = vld [vmem:[%s4762_s23 + $0x168] sm:$0xff] }
  0x78   : > { %3086 = vmatpush1.bf16.msra.mxu0 %v4397_v21  ;;  %2683 = vmatprep.subr.bf16.mxu1 %v4402_v22  ;;  %v4455_v21 = vld [vmem:[%s4712_s19 + $0x620] ss:$8 sps:$4 sm:$0xff]   ;;  %v4460_v22 = vld [vmem:[%s4712_s19 + $0x234] ss:$8 sps:$4 sm:$0xff]  }
  0x79   : > { %3087 = vmatprep.subr.bf16.mxu0 %v4405_v23  ;;  %v4463_v23 = vld [vmem:[%s4712_s19 + $0x634] ss:$8 sps:$4 sm:$0xff]   ;;  %v467_v62 = vld [vmem:[%s4762_s23 + $0x288] sm:$0xff] }
  0x7a   : > { %2645 = vmatmul.mubr.bf16.gmra.mrb[20].mxu1 %v3759_v26  ;;  %v4458_v26 = vld [vmem:[%s4712_s19 + $0x230] ss:$8 sps:$4 sm:$0xff]   ;;  %v475_v63 = vld [vmem:[%s4762_s23 + $0x2c8] sm:$0xff] }
  0x7b   : > { %3049 = vmatmul.mubr.bf16.gmra.mrb[20].mxu0 %v3767_v27  ;;  %2684 = vmatpush1.bf16.msra.mxu1 %v4400_v24  ;;  %v3714_v24 = vcombine.high %v419_v15, %v427_v16  ;;  %v4461_v27 = vld [vmem:[%s4712_s19 + $0x630] ss:$8 sps:$4 sm:$0xff]   ;;  %v471_v0 = vld [vmem:[%s4762_s23 + $0x2a8] sm:$0xff] }
  0x7c   : > { %3088 = vmatpush1.bf16.msra.mxu0 %v4403_v25  ;;  %2685 = vmatprep.subr.bf16.mxu1 %v4408_v30  ;;  %v3722_v25 = vcombine.high %v423_v19, %v431_v20  ;;  %v4464_v30 = vld [vmem:[%s4712_s19 + $0x240] ss:$8 sps:$4 sm:$0xff]  }
  0x7d   : > { %3089 = vmatprep.subr.bf16.mxu0 %v4411_v31  ;;  %2654 = vmatprep.mubr.bf16.mxu1 %v3776_v32  ;;  %v435_v31 = vld [vmem:[%s4762_s23 + $0x188] sm:$0xff] }
  0x7e   : > { %3058 = vmatprep.mubr.bf16.mxu0 %v3784_v33  ;;  %v443_v32 = vld [vmem:[%s4762_s23 + $0x1c8] sm:$0xff]  ;;  %v3713_v33 = vcombine.low %v419_v15, %v427_v16  ;;  %v3761_v15 = vcombine.low %v467_v62, %v475_v63 }
  0x7f   : > { %2686 = vmatpush1.bf16.msra.mxu1 %v4406_v34  ;;  %v3721_v34 = vcombine.low %v423_v19, %v431_v20  ;;  %v3730_v40 = vcombine.high %v435_v31, %v443_v32  ;;  %v479_v3 = vld [vmem:[%s4762_s23 + $0x2e8] sm:$0xff]  ;;  %v4508_v20 = vld [vmem:[%s4712_s19 + $0x2b4] ss:$8 sps:$4 sm:$0xff]  }
  0x80   : > { %3090 = vmatpush1.bf16.msra.mxu0 %v4409_v35  ;;  %2687 = vmatprep.subr.bf16.mxu1 %v4414_v36  ;;  %v439_v35 = vld [vmem:[%s4762_s23 + $0x1a8] sm:$0xff]  ;;  %v3769_v16 = vcombine.low %v471_v0, %v479_v3 }
  0x81   : > { %3091 = vmatprep.subr.bf16.mxu0 %v4417_v37  ;;  %v447_v36 = vld [vmem:[%s4762_s23 + $0x1e8] sm:$0xff] }
  0x82   : > { %2655 = vmatmul.mubr.bf16.gmra.mrb[24].mxu1 %v3775_v41  ;;  %v4467_v37 = vld [vmem:[%s4712_s19 + $0x640] ss:$8 sps:$4 sm:$0xff]   ;;  %v3738_v41 = vcombine.high %v439_v35, %v447_v36 }
  0x83   : > { %3059 = vmatmul.mubr.bf16.gmra.mrb[24].mxu0 %v3783_v42  ;;  %2688 = vmatpush1.bf16.msra.mxu1 %v4412_v38  ;;  %v4472_v38 = vld [vmem:[%s4712_s19 + $0x254] ss:$8 sps:$4 sm:$0xff]   ;;  %v4470_v42 = vld [vmem:[%s4712_s19 + $0x250] ss:$8 sps:$4 sm:$0xff]   ;;  %v4503_v19 = vld [vmem:[%s4712_s19 + $0x6a0] ss:$8 sps:$4 sm:$0xff]  }
  0x84   : > { %3092 = vmatpush1.bf16.msra.mxu0 %v4415_v45  ;;  %2689 = vmatprep.subr.bf16.mxu1 %v4420_v46  ;;  %v4481_v45 = vld [vmem:[%s4712_s19 + $0x664] ss:$8 sps:$4 sm:$0xff]  }
  0x85   : > { %3093 = vmatprep.subr.bf16.mxu0 %v4423_v47  ;;  %2695 = vmatprep.mubr.bf16.mxu1 %v3682_v48  ;;  %v451_v46 = vld [vmem:[%s4762_s23 + $0x208] sm:$0xff]  ;;  %v3729_v48 = vcombine.low %v435_v31, %v443_v32 }
  0x86   : > { %3099 = vmatprep.mubr.bf16.mxu0 %v3690_v49  ;;  %v459_v47 = vld [vmem:[%s4762_s23 + $0x248] sm:$0xff]  ;;  %v3737_v49 = vcombine.low %v439_v35, %v447_v36  ;;  %v4522_v36 = vld [vmem:[%s4712_s19 + $0x2d4] ss:$8 sps:$4 sm:$0xff]  }
  0x87   : > { %2690 = vmatpush1.bf16.msra.mxu1 %v4418_v50  ;;  %v455_v50 = vld [vmem:[%s4762_s23 + $0x228] sm:$0xff] }
  0x88   : > { %3094 = vmatpush1.bf16.msra.mxu0 %v4421_v51  ;;  %2691 = vmatprep.subr.bf16.mxu1 %v4428_v52  ;;  %v463_v51 = vld [vmem:[%s4762_s23 + $0x268] sm:$0xff] }
  0x89   : > { %3095 = vmatprep.subr.bf16.mxu0 %v4432_v53  ;;  %v4476_v52 = vld [vmem:[%s4712_s19 + $0x260] ss:$8 sps:$4 sm:$0xff]  }
  0x8a   : > { %v4479_v53 = vld [vmem:[%s4712_s19 + $0x660] ss:$8 sps:$4 sm:$0xff]  }
  0x8b   : > { %2692 = vmatpush1.bf16.msra.mxu1 %v4426_v54  ;;  %v4484_v54 = vld [vmem:[%s4712_s19 + $0x274] ss:$8 sps:$4 sm:$0xff]   ;;  %v4517_v35 = vld [vmem:[%s4712_s19 + $0x6c0] ss:$8 sps:$4 sm:$0xff]  }
  0x8c   : > { %3096 = vmatpush1.bf16.msra.mxu0 %v4430_v55  ;;  %2693 = vmatprep.subr.bf16.mxu1 %v4436_v56  ;;  %v4487_v55 = vld [vmem:[%s4712_s19 + $0x674] ss:$8 sps:$4 sm:$0xff]   ;;  %v3746_v56 = vcombine.high %v451_v46, %v459_v47 }
  0x8d   : > { %3097 = vmatprep.subr.bf16.mxu0 %v4439_v57  ;;  %v3754_v57 = vcombine.high %v455_v50, %v463_v51 }
  0x8f   : > { %2694 = vmatpush1.bf16.msra.mxu1 %v4434_v58  ;;  %v4482_v58 = vld [vmem:[%s4712_s19 + $0x270] ss:$8 sps:$4 sm:$0xff]  }
  0x90   : > { %3098 = vmatpush1.bf16.msra.mxu0 %v4437_v59  ;;  %2764 = vmatprep.subr.bf16.mxu1 %v4442_v60  ;;  %v4485_v59 = vld [vmem:[%s4712_s19 + $0x670] ss:$8 sps:$4 sm:$0xff]   ;;  %v4490_v60 = vld [vmem:[%s4712_s19 + $0x284] ss:$8 sps:$4 sm:$0xff]  }
  0x91   : > { %3168 = vmatprep.subr.bf16.mxu0 %v4445_v61  ;;  %v4493_v61 = vld [vmem:[%s4712_s19 + $0x684] ss:$8 sps:$4 sm:$0xff]  }
  0x92   : > { %2696 = vmatmul.mubr.bf16.vlgmr.msra.gmra.mrb[0].mxu1 %v3681_v1  ;;  %v3745_v1 = vcombine.low %v451_v46, %v459_v47  ;;  %v4536_v46 = vld [vmem:[%s4712_s19 + $0x2f4] ss:$8 sps:$4 sm:$0xff]  }
  0x93   : > { %3100 = vmatmul.mubr.bf16.vlgmr.msra.gmra.mrb[0].mxu0 %v3689_v2  ;;  %2765 = vmatpush1.bf16.msra.mxu1 %v4440_v4  ;;  %v3753_v2 = vcombine.low %v455_v50, %v463_v51  ;;  %v4488_v4 = vld [vmem:[%s4712_s19 + $0x280] ss:$8 sps:$4 sm:$0xff]   ;;  %v4539_v47 = vld [vmem:[%s4712_s19 + $0x6f4] ss:$8 sps:$4 sm:$0xff]   ;;  %v4542_v50 = vld [vmem:[%s4712_s19 + $0x304] ss:$8 sps:$4 sm:$0xff]  }
  0x94   : > { %3169 = vmatpush1.bf16.msra.mxu0 %v4443_v5  ;;  %2766 = vmatprep.subr.bf16.mxu1 %v4448_v6  ;;  %v4491_v5 = vld [vmem:[%s4712_s19 + $0x680] ss:$8 sps:$4 sm:$0xff]   ;;  %v4496_v6 = vld [vmem:[%s4712_s19 + $0x294] ss:$8 sps:$4 sm:$0xff]   ;;  %v4545_v51 = vld [vmem:[%s4712_s19 + $0x704] ss:$8 sps:$4 sm:$0xff]  }
  0x95   : > { %3170 = vmatprep.subr.bf16.mxu0 %v4451_v7  ;;  %2705 = vmatprep.mubr.bf16.mxu1 %v3698_v8  ;;  %v4499_v7 = vld [vmem:[%s4712_s19 + $0x694] ss:$8 sps:$4 sm:$0xff]   ;;  %v3762_v8 = vcombine.high %v467_v62, %v475_v63 }
  0x96   : > { %3109 = vmatprep.mubr.bf16.mxu0 %v3706_v9  ;;  %v3770_v9 = vcombine.high %v471_v0, %v479_v3  ;;  %v4546_v0 = vld [vmem:[%s4712_s19 + $0x310] ss:$8 sps:$4 sm:$0xff]   ;;  %v4557_v3 = vld [vmem:[%s4712_s19 + $0x724] ss:$8 sps:$4 sm:$0xff]  }
  0x97   : > { %2767 = vmatpush1.bf16.msra.mxu1 %v4446_v10  ;;  %v4494_v10 = vld [vmem:[%s4712_s19 + $0x290] ss:$8 sps:$4 sm:$0xff]  }
  0x98   : > { %3171 = vmatpush1.bf16.msra.mxu0 %v4449_v11  ;;  %2768 = vmatprep.subr.bf16.mxu1 %v4454_v12  ;;  %v4497_v11 = vld [vmem:[%s4712_s19 + $0x690] ss:$8 sps:$4 sm:$0xff]   ;;  %v4502_v12 = vld [vmem:[%s4712_s19 + $0x2a4] ss:$8 sps:$4 sm:$0xff]  }
  0x99   : > { %3172 = vmatprep.subr.bf16.mxu0 %v4457_v13  ;;  %v4505_v13 = vld [vmem:[%s4712_s19 + $0x6a4] ss:$8 sps:$4 sm:$0xff]  }
  0x9a   : > { %2706 = vmatmul.mubr.bf16.gmra.mrb[4].mxu1 %v3697_v17  ;;  %v487_v17 = vld [vmem:[%s4762_s23 + $0x328] sm:$0xff] }
  0x9b   : > { %3110 = vmatmul.mubr.bf16.gmra.mrb[4].mxu0 %v3705_v18  ;;  %2769 = vmatpush1.bf16.msra.mxu1 %v4452_v14  ;;  %v483_v14 = vld [vmem:[%s4762_s23 + $0x308] sm:$0xff]  ;;  %v3785_v32 = vcombine.low %v487_v17, %v487_v17 }
  0x9c   : > { %3173 = vmatpush1.bf16.msra.mxu0 %v4455_v21  ;;  %2770 = vmatprep.subr.bf16.mxu1 %v4460_v22  ;;  %v4500_v18 = vld [vmem:[%s4712_s19 + $0x2a0] ss:$8 sps:$4 sm:$0xff]   ;;  %v4511_v21 = vld [vmem:[%s4712_s19 + $0x6b4] ss:$8 sps:$4 sm:$0xff]   ;;  %v3778_v22 = vcombine.high %v483_v14, %v483_v14  ;;  %v3777_v31 = vcombine.low %v483_v14, %v483_v14 }
  0x9d   : > { %3174 = vmatprep.subr.bf16.mxu0 %v4463_v23  ;;  %2715 = vmatprep.mubr.bf16.mxu1 %v3714_v24  ;;  %v3786_v23 = vcombine.high %v487_v17, %v487_v17  ;;  %v4506_v24 = vld [vmem:[%s4712_s19 + $0x2b0] ss:$8 sps:$4 sm:$0xff]  }
  0x9e   : > { %3119 = vmatprep.mubr.bf16.mxu0 %v3722_v25  ;;  %v4509_v25 = vld [vmem:[%s4712_s19 + $0x6b0] ss:$8 sps:$4 sm:$0xff]  }
  0x9f   : > { %2771 = vmatpush1.bf16.msra.mxu1 %v4458_v26  ;;  %v4516_v26 = vld [vmem:[%s4712_s19 + $0x2c4] ss:$8 sps:$4 sm:$0xff]   ;;  %v4561_v17 = vld [vmem:[%s4712_s19 + $0x730] ss:$8 sps:$4 sm:$0xff]  }
  0xa0   : > { %3175 = vmatpush1.bf16.msra.mxu0 %v4461_v27  ;;  %2772 = vmatprep.subr.bf16.mxu1 %v4466_v28  ;;  %v4519_v27 = vld [vmem:[%s4712_s19 + $0x6c4] ss:$8 sps:$4 sm:$0xff]   ;;  %v388_v28 = vld [vmem:[%s4762_s23 + $0x10] sm:$0xff] }
  0xa1   : > { %3176 = vmatprep.subr.bf16.mxu0 %v4469_v29  ;;  %v396_v29 = vld [vmem:[%s4762_s23 + $0x50] sm:$0xff] }
  0xa2   : > { %2716 = vmatmul.mubr.bf16.gmra.mrb[8].mxu1 %v3713_v33  ;;  %v400_v33 = vld [vmem:[%s4762_s23 + $0x70] sm:$0xff] }
  0xa3   : > { %3120 = vmatmul.mubr.bf16.gmra.mrb[8].mxu0 %v3721_v34  ;;  %2773 = vmatpush1.bf16.msra.mxu1 %v4464_v30  ;;  %v392_v30 = vld [vmem:[%s4762_s23 + $0x30] sm:$0xff]  ;;  %v4514_v34 = vld [vmem:[%s4712_s19 + $0x2c0] ss:$8 sps:$4 sm:$0xff]  }
  0xa4   : > { %3177 = vmatpush1.bf16.msra.mxu0 %v4467_v37  ;;  %2774 = vmatprep.subr.bf16.mxu1 %v4472_v38  ;;  %v4525_v37 = vld [vmem:[%s4712_s19 + $0x6d4] ss:$8 sps:$4 sm:$0xff]   ;;  %v3684_v38 = vcombine.high %v388_v28, %v396_v29 }
  0xa5   : > { %3178 = vmatprep.subr.bf16.mxu0 %v4475_v39  ;;  %2725 = vmatprep.mubr.bf16.mxu1 %v3730_v40  ;;  %v3692_v39 = vcombine.high %v392_v30, %v400_v33  ;;  %v4520_v40 = vld [vmem:[%s4712_s19 + $0x2d0] ss:$8 sps:$4 sm:$0xff]  }
  0xa6   : > { %3129 = vmatprep.mubr.bf16.mxu0 %v3738_v41  ;;  %v4523_v41 = vld [vmem:[%s4712_s19 + $0x6d0] ss:$8 sps:$4 sm:$0xff]  }
  0xa7   : > { %2775 = vmatpush1.bf16.msra.mxu1 %v4470_v42  ;;  %v4528_v42 = vld [vmem:[%s4712_s19 + $0x2e4] ss:$8 sps:$4 sm:$0xff]  }
  0xa8   : > { %3179 = vmatpush1.bf16.msra.mxu0 %v4473_v43  ;;  %2776 = vmatprep.subr.bf16.mxu1 %v4478_v44  ;;  %v4532_v43 = vld [vmem:[%s4712_s19 + $0x6e4] ss:$8 sps:$4 sm:$0xff]   ;;  %v4526_v44 = vld [vmem:[%s4712_s19 + $0x2e0] ss:$8 sps:$4 sm:$0xff]  }
  0xa9   : > { %3180 = vmatprep.subr.bf16.mxu0 %v4481_v45  ;;  %v4530_v45 = vld [vmem:[%s4712_s19 + $0x6e0] ss:$8 sps:$4 sm:$0xff]  }
  0xaa   : > { %2726 = vmatmul.mubr.bf16.gmra.mrb[12].mxu1 %v3729_v48  ;;  %v4534_v48 = vld [vmem:[%s4712_s19 + $0x2f0] ss:$8 sps:$4 sm:$0xff]  }
  0xab   : > { %3130 = vmatmul.mubr.bf16.gmra.mrb[12].mxu0 %v3737_v49  ;;  %2777 = vmatpush1.bf16.msra.mxu1 %v4476_v52  ;;  %v4537_v49 = vld [vmem:[%s4712_s19 + $0x6f0] ss:$8 sps:$4 sm:$0xff]  }
  0xac   : > { %3181 = vmatpush1.bf16.msra.mxu0 %v4479_v53  ;;  %2778 = vmatprep.subr.bf16.mxu1 %v4484_v54  ;;  %v404_v52 = vld [vmem:[%s4762_s23 + $0x90] sm:$0xff] }
  0xad   : > { %3182 = vmatprep.subr.bf16.mxu0 %v4487_v55  ;;  %2735 = vmatprep.mubr.bf16.mxu1 %v3746_v56  ;;  %v412_v53 = vld [vmem:[%s4762_s23 + $0xd0] sm:$0xff]  ;;  %v3683_v55 = vcombine.low %v388_v28, %v396_v29  ;;  %v3691_v56 = vcombine.low %v392_v30, %v400_v33 }
  0xae   : > { %3139 = vmatprep.mubr.bf16.mxu0 %v3754_v57  ;;  %v408_v54 = vld [vmem:[%s4762_s23 + $0xb0] sm:$0xff]  ;;  %v3700_v62 = vcombine.high %v404_v52, %v412_v53 }
  0xaf   : > { %2779 = vmatpush1.bf16.msra.mxu1 %v4482_v58  ;;  %v416_v57 = vld [vmem:[%s4762_s23 + $0xf0] sm:$0xff]  ;;  %v4540_v58 = vld [vmem:[%s4712_s19 + $0x300] ss:$8 sps:$4 sm:$0xff]  }
  0xb0   : > { %3183 = vmatpush1.bf16.msra.mxu0 %v4485_v59  ;;  %2780 = vmatprep.subr.bf16.mxu1 %v4490_v60  ;;  %v4543_v59 = vld [vmem:[%s4712_s19 + $0x700] ss:$8 sps:$4 sm:$0xff]   ;;  %v4548_v60 = vld [vmem:[%s4712_s19 + $0x314] ss:$8 sps:$4 sm:$0xff]   ;;  %v3708_v63 = vcombine.high %v408_v54, %v416_v57  ;;  %v4573_v33 = vld [vmem:[%s4712_s19 + $0x750] ss:$8 sps:$4 sm:$0xff]  }
  0xb1   : > { %3184 = vmatprep.subr.bf16.mxu0 %v4493_v61  ;;  %v4551_v61 = vld [vmem:[%s4712_s19 + $0x714] ss:$8 sps:$4 sm:$0xff]  }
  0xb2   : > { %2736 = vmatmul.mubr.bf16.gmra.mrb[16].mxu1 %v3745_v1  ;;  %v4549_v1 = vld [vmem:[%s4712_s19 + $0x710] ss:$8 sps:$4 sm:$0xff]   ;;  %v4572_v28 = vld [vmem:[%s4712_s19 + $0x354] ss:$8 sps:$4 sm:$0xff]  }
  0xb3   : > { %3140 = vmatmul.mubr.bf16.gmra.mrb[16].mxu0 %v3753_v2  ;;  %2781 = vmatpush1.bf16.msra.mxu1 %v4488_v4  ;;  %v4554_v2 = vld [vmem:[%s4712_s19 + $0x324] ss:$8 sps:$4 sm:$0xff]   ;;  %v420_v4 = vld [vmem:[%s4762_s23 + $0x110] sm:$0xff] }
  0xb4   : > { %3185 = vmatpush1.bf16.msra.mxu0 %v4491_v5  ;;  %2782 = vmatprep.subr.bf16.mxu1 %v4496_v6  ;;  %v3699_v5 = vcombine.low %v404_v52, %v412_v53  ;;  %v428_v6 = vld [vmem:[%s4762_s23 + $0x150] sm:$0xff] }
  0xb5   : > { %3186 = vmatprep.subr.bf16.mxu0 %v4499_v7  ;;  %2745 = vmatprep.mubr.bf16.mxu1 %v3762_v8  ;;  %v3707_v7 = vcombine.low %v408_v54, %v416_v57  ;;  %v424_v8 = vld [vmem:[%s4762_s23 + $0x130] sm:$0xff]  ;;  %v3716_v14 = vcombine.high %v420_v4, %v428_v6 }
  0xb6   : > { %3149 = vmatprep.mubr.bf16.mxu0 %v3770_v9  ;;  %v432_v9 = vld [vmem:[%s4762_s23 + $0x170] sm:$0xff] }
  0xb7   : > { %2783 = vmatpush1.bf16.msra.mxu1 %v4494_v10  ;;  %v4552_v10 = vld [vmem:[%s4712_s19 + $0x320] ss:$8 sps:$4 sm:$0xff]   ;;  %v4575_v29 = vld [vmem:[%s4712_s19 + $0x754] ss:$8 sps:$4 sm:$0xff]  }
  0xb8   : > { %3187 = vmatpush1.bf16.msra.mxu0 %v4497_v11  ;;  %2784 = vmatprep.subr.bf16.mxu1 %v4502_v12  ;;  %v4555_v11 = vld [vmem:[%s4712_s19 + $0x720] ss:$8 sps:$4 sm:$0xff]   ;;  %v4560_v12 = vld [vmem:[%s4712_s19 + $0x334] ss:$8 sps:$4 sm:$0xff]  }
  0xb9   : > { %3188 = vmatprep.subr.bf16.mxu0 %v4505_v13  ;;  %v4563_v13 = vld [vmem:[%s4712_s19 + $0x734] ss:$8 sps:$4 sm:$0xff]  }
  0xba   : > { %2746 = vmatmul.mubr.bf16.gmra.mrb[20].mxu1 %v3761_v15  ;;  %v3724_v15 = vcombine.high %v424_v8, %v432_v9  ;;  %v468_v52 = vld [vmem:[%s4762_s23 + $0x290] sm:$0xff] }
  0xbb   : > { %3150 = vmatmul.mubr.bf16.gmra.mrb[20].mxu0 %v3769_v16  ;;  %2785 = vmatpush1.bf16.msra.mxu1 %v4500_v18  ;;  %v4558_v16 = vld [vmem:[%s4712_s19 + $0x330] ss:$8 sps:$4 sm:$0xff]   ;;  %v4566_v18 = vld [vmem:[%s4712_s19 + $0x344] ss:$8 sps:$4 sm:$0xff]  }
  0xbc   : > { %3189 = vmatpush1.bf16.msra.mxu0 %v4503_v19  ;;  %2786 = vmatprep.subr.bf16.mxu1 %v4508_v20  ;;  %v4569_v19 = vld [vmem:[%s4712_s19 + $0x744] ss:$8 sps:$4 sm:$0xff]   ;;  %v436_v20 = vld [vmem:[%s4762_s23 + $0x190] sm:$0xff] }
  0xbd   : > { %3190 = vmatprep.subr.bf16.mxu0 %v4511_v21  ;;  %2755 = vmatprep.mubr.bf16.mxu1 %v3778_v22  ;;  %v3715_v21 = vcombine.low %v420_v4, %v428_v6  ;;  %v444_v22 = vld [vmem:[%s4762_s23 + $0x1d0] sm:$0xff] }
  0xbe   : > { %3159 = vmatprep.mubr.bf16.mxu0 %v3786_v23  ;;  %v3723_v23 = vcombine.low %v424_v8, %v432_v9  ;;  %v3732_v30 = vcombine.high %v436_v20, %v444_v22  ;;  %v476_v54 = vld [vmem:[%s4762_s23 + $0x2d0] sm:$0xff]  ;;  %v4600_v8 = vld [vmem:[%s4712_s19 + $0x3a0] ss:$8 sps:$4 sm:$0xff]  }
  0xbf   : > { %2787 = vmatpush1.bf16.msra.mxu1 %v4506_v24  ;;  %v440_v24 = vld [vmem:[%s4762_s23 + $0x1b0] sm:$0xff]  ;;  %v3763_v4 = vcombine.low %v468_v52, %v476_v54  ;;  %v4603_v9 = vld [vmem:[%s4712_s19 + $0x7a0] ss:$8 sps:$4 sm:$0xff]  }
  0xc0   : > { %3191 = vmatpush1.bf16.msra.mxu0 %v4509_v25  ;;  %2788 = vmatprep.subr.bf16.mxu1 %v4516_v26  ;;  %v448_v25 = vld [vmem:[%s4762_s23 + $0x1f0] sm:$0xff]  ;;  %v4564_v26 = vld [vmem:[%s4712_s19 + $0x340] ss:$8 sps:$4 sm:$0xff]  }
  0xc1   : > { %3192 = vmatprep.subr.bf16.mxu0 %v4519_v27  ;;  %v4567_v27 = vld [vmem:[%s4712_s19 + $0x740] ss:$8 sps:$4 sm:$0xff]   ;;  %v480_v57 = vld [vmem:[%s4762_s23 + $0x2f0] sm:$0xff] }
  0xc2   : > { %2756 = vmatmul.mubr.bf16.gmra.mrb[28].mxu1 %v3777_v31  ;;  %v3740_v31 = vcombine.high %v440_v24, %v448_v25 }
  0xc3   : > { %3160 = vmatmul.mubr.bf16.gmra.mrb[28].mxu0 %v3785_v32  ;;  %2789 = vmatpush1.bf16.msra.mxu1 %v4514_v34  ;;  %v4570_v32 = vld [vmem:[%s4712_s19 + $0x350] ss:$8 sps:$4 sm:$0xff]   ;;  %v4578_v34 = vld [vmem:[%s4712_s19 + $0x364] ss:$8 sps:$4 sm:$0xff]  }
  0xc4   : > { %3193 = vmatpush1.bf16.msra.mxu0 %v4517_v35  ;;  %2790 = vmatprep.subr.bf16.mxu1 %v4522_v36  ;;  %v4581_v35 = vld [vmem:[%s4712_s19 + $0x764] ss:$8 sps:$4 sm:$0xff]   ;;  %v452_v36 = vld [vmem:[%s4762_s23 + $0x210] sm:$0xff] }
  0xc5   : > { %3194 = vmatprep.subr.bf16.mxu0 %v4525_v37  ;;  %2796 = vmatprep.mubr.bf16.mxu1 %v3684_v38  ;;  %v3731_v37 = vcombine.low %v436_v20, %v444_v22  ;;  %v460_v38 = vld [vmem:[%s4762_s23 + $0x250] sm:$0xff]  ;;  %v393_v22 = vld [vmem:[%s4762_s23 + $0x38] sm:$0xff] }
  0xc6   : > { %3200 = vmatprep.mubr.bf16.mxu0 %v3692_v39  ;;  %v3739_v39 = vcombine.low %v440_v24, %v448_v25  ;;  %v3747_v53 = vcombine.low %v452_v36, %v460_v38  ;;  %v4614_v24 = vld [vmem:[%s4712_s19 + $0x3c0] ss:$8 sps:$4 sm:$0xff]  }
  0xc7   : > { %2791 = vmatpush1.bf16.msra.mxu1 %v4520_v40  ;;  %v456_v40 = vld [vmem:[%s4762_s23 + $0x230] sm:$0xff]  ;;  %v4617_v25 = vld [vmem:[%s4712_s19 + $0x7c0] ss:$8 sps:$4 sm:$0xff]  }
  0xc8   : > { %3195 = vmatpush1.bf16.msra.mxu0 %v4523_v41  ;;  %2792 = vmatprep.subr.bf16.mxu1 %v4528_v42  ;;  %v464_v41 = vld [vmem:[%s4762_s23 + $0x270] sm:$0xff]  ;;  %v4576_v42 = vld [vmem:[%s4712_s19 + $0x360] ss:$8 sps:$4 sm:$0xff]  }
  0xc9   : > { %3196 = vmatprep.subr.bf16.mxu0 %v4532_v43  ;;  %v4579_v43 = vld [vmem:[%s4712_s19 + $0x760] ss:$8 sps:$4 sm:$0xff]  }
  0xcb   : > { %2793 = vmatpush1.bf16.msra.mxu1 %v4526_v44  ;;  %v4584_v44 = vld [vmem:[%s4712_s19 + $0x374] ss:$8 sps:$4 sm:$0xff]  }
  0xcc   : > { %3197 = vmatpush1.bf16.msra.mxu0 %v4530_v45  ;;  %2794 = vmatprep.subr.bf16.mxu1 %v4536_v46  ;;  %v4587_v45 = vld [vmem:[%s4712_s19 + $0x774] ss:$8 sps:$4 sm:$0xff]   ;;  %v3748_v46 = vcombine.high %v452_v36, %v460_v38  ;;  %v4634_v38 = vld [vmem:[%s4712_s19 + $0x3f0] ss:$8 sps:$4 sm:$0xff]  }
  0xcd   : > { %3198 = vmatprep.subr.bf16.mxu0 %v4539_v47  ;;  %v3756_v47 = vcombine.high %v456_v40, %v464_v41  ;;  %v4636_v36 = vld [vmem:[%s4712_s19 + $0x3f4] ss:$8 sps:$4 sm:$0xff]  }
  0xcf   : > { %2795 = vmatpush1.bf16.msra.mxu1 %v4534_v48  ;;  %v4582_v48 = vld [vmem:[%s4712_s19 + $0x370] ss:$8 sps:$4 sm:$0xff]  }
  0xd0   : > { %3199 = vmatpush1.bf16.msra.mxu0 %v4537_v49  ;;  %2865 = vmatprep.subr.bf16.mxu1 %v4542_v50  ;;  %v4585_v49 = vld [vmem:[%s4712_s19 + $0x770] ss:$8 sps:$4 sm:$0xff]   ;;  %v4590_v50 = vld [vmem:[%s4712_s19 + $0x384] ss:$8 sps:$4 sm:$0xff]  }
  0xd1   : > { %3269 = vmatprep.subr.bf16.mxu0 %v4545_v51  ;;  %v4593_v51 = vld [vmem:[%s4712_s19 + $0x784] ss:$8 sps:$4 sm:$0xff]  }
  0xd2   : > { %2797 = vmatmul.mubr.bf16.vlgmr.msra.gmra.mrb[0].mxu1 %v3683_v55  ;;  %v3755_v55 = vcombine.low %v456_v40, %v464_v41  ;;  %v405_v40 = vld [vmem:[%s4762_s23 + $0x98] sm:$0xff] }
  0xd3   : > { %3201 = vmatmul.mubr.bf16.vlgmr.msra.gmra.mrb[0].mxu0 %v3691_v56  ;;  %2866 = vmatpush1.bf16.msra.mxu1 %v4540_v58  ;;  %v472_v56 = vld [vmem:[%s4762_s23 + $0x2b0] sm:$0xff]  ;;  %v4588_v58 = vld [vmem:[%s4712_s19 + $0x380] ss:$8 sps:$4 sm:$0xff]   ;;  %v413_v41 = vld [vmem:[%s4762_s23 + $0xd8] sm:$0xff] }
  0xd4   : > { %3270 = vmatpush1.bf16.msra.mxu0 %v4543_v59  ;;  %2867 = vmatprep.subr.bf16.mxu1 %v4548_v60  ;;  %v4591_v59 = vld [vmem:[%s4712_s19 + $0x780] ss:$8 sps:$4 sm:$0xff]   ;;  %v4596_v60 = vld [vmem:[%s4712_s19 + $0x394] ss:$8 sps:$4 sm:$0xff]   ;;  %v3771_v6 = vcombine.low %v472_v56, %v480_v57 }
  0xd5   : > { %3271 = vmatprep.subr.bf16.mxu0 %v4551_v61  ;;  %2806 = vmatprep.mubr.bf16.mxu1 %v3700_v62  ;;  %v4599_v61 = vld [vmem:[%s4712_s19 + $0x794] ss:$8 sps:$4 sm:$0xff]   ;;  %v3764_v62 = vcombine.high %v468_v52, %v476_v54  ;;  %v3701_v52 = vcombine.low %v405_v40, %v413_v41 }
  0xd6   : > { %3210 = vmatprep.mubr.bf16.mxu0 %v3708_v63  ;;  %v3772_v63 = vcombine.high %v472_v56, %v480_v57  ;;  %v437_v56 = vld [vmem:[%s4762_s23 + $0x198] sm:$0xff] }
  0xd7   : > { %2868 = vmatpush1.bf16.msra.mxu1 %v4546_v0  ;;  %v4594_v0 = vld [vmem:[%s4712_s19 + $0x390] ss:$8 sps:$4 sm:$0xff]  }
  0xd8   : > { %3272 = vmatpush1.bf16.msra.mxu0 %v4549_v1  ;;  %2869 = vmatprep.subr.bf16.mxu1 %v4554_v2  ;;  %v4597_v1 = vld [vmem:[%s4712_s19 + $0x790] ss:$8 sps:$4 sm:$0xff]   ;;  %v4602_v2 = vld [vmem:[%s4712_s19 + $0x3a4] ss:$8 sps:$4 sm:$0xff]  }
  0xd9   : > { %3273 = vmatprep.subr.bf16.mxu0 %v4557_v3  ;;  %v4605_v3 = vld [vmem:[%s4712_s19 + $0x7a4] ss:$8 sps:$4 sm:$0xff]   ;;  %v445_v57 = vld [vmem:[%s4762_s23 + $0x1d8] sm:$0xff] }
  0xda   : > { %2807 = vmatmul.mubr.bf16.gmra.mrb[4].mxu1 %v3699_v5  ;;  %v484_v5 = vld [vmem:[%s4762_s23 + $0x310] sm:$0xff] }
  0xdb   : > { %3211 = vmatmul.mubr.bf16.gmra.mrb[4].mxu0 %v3707_v7  ;;  %2870 = vmatpush1.bf16.msra.mxu1 %v4552_v10  ;;  %v488_v7 = vld [vmem:[%s4762_s23 + $0x330] sm:$0xff] }
  0xdc   : > { %3274 = vmatpush1.bf16.msra.mxu0 %v4555_v11  ;;  %2871 = vmatprep.subr.bf16.mxu1 %v4560_v12  ;;  %v4608_v10 = vld [vmem:[%s4712_s19 + $0x3b4] ss:$8 sps:$4 sm:$0xff]   ;;  %v3780_v12 = vcombine.high %v484_v5, %v484_v5  ;;  %v3787_v20 = vcombine.low %v488_v7, %v488_v7 }
  0xdd   : > { %3275 = vmatprep.subr.bf16.mxu0 %v4563_v13  ;;  %2816 = vmatprep.mubr.bf16.mxu1 %v3716_v14  ;;  %v4611_v11 = vld [vmem:[%s4712_s19 + $0x7b4] ss:$8 sps:$4 sm:$0xff]   ;;  %v3788_v13 = vcombine.high %v488_v7, %v488_v7  ;;  %v4606_v14 = vld [vmem:[%s4712_s19 + $0x3b0] ss:$8 sps:$4 sm:$0xff]  }
  0xde   : > { %3220 = vmatprep.mubr.bf16.mxu0 %v3724_v15  ;;  %v4609_v15 = vld [vmem:[%s4712_s19 + $0x7b0] ss:$8 sps:$4 sm:$0xff]  }
  0xdf   : > { %2872 = vmatpush1.bf16.msra.mxu1 %v4558_v16  ;;  %v4616_v16 = vld [vmem:[%s4712_s19 + $0x3c4] ss:$8 sps:$4 sm:$0xff]  }
  0xe0   : > { %3276 = vmatpush1.bf16.msra.mxu0 %v4561_v17  ;;  %2873 = vmatprep.subr.bf16.mxu1 %v4566_v18  ;;  %v4619_v17 = vld [vmem:[%s4712_s19 + $0x7c4] ss:$8 sps:$4 sm:$0xff]   ;;  %v389_v18 = vld [vmem:[%s4762_s23 + $0x18] sm:$0xff] }
  0xe1   : > { %3277 = vmatprep.subr.bf16.mxu0 %v4569_v19  ;;  %v3779_v19 = vcombine.low %v484_v5, %v484_v5 }
  0xe2   : > { %2817 = vmatmul.mubr.bf16.gmra.mrb[8].mxu1 %v3715_v21  ;;  %v397_v21 = vld [vmem:[%s4762_s23 + $0x58] sm:$0xff] }
  0xe3   : > { %3221 = vmatmul.mubr.bf16.gmra.mrb[8].mxu0 %v3723_v23  ;;  %2874 = vmatpush1.bf16.msra.mxu1 %v4564_v26  ;;  %v401_v23 = vld [vmem:[%s4762_s23 + $0x78] sm:$0xff] }
  0xe4   : > { %3278 = vmatpush1.bf16.msra.mxu0 %v4567_v27  ;;  %2875 = vmatprep.subr.bf16.mxu1 %v4572_v28  ;;  %v4622_v26 = vld [vmem:[%s4712_s19 + $0x3d4] ss:$8 sps:$4 sm:$0xff]   ;;  %v3686_v28 = vcombine.high %v389_v18, %v397_v21 }
  0xe5   : > { %3279 = vmatprep.subr.bf16.mxu0 %v4575_v29  ;;  %2826 = vmatprep.mubr.bf16.mxu1 %v3732_v30  ;;  %v4625_v27 = vld [vmem:[%s4712_s19 + $0x7d4] ss:$8 sps:$4 sm:$0xff]   ;;  %v3694_v29 = vcombine.high %v393_v22, %v401_v23  ;;  %v4620_v30 = vld [vmem:[%s4712_s19 + $0x3d0] ss:$8 sps:$4 sm:$0xff]  }
  0xe6   : > { %3230 = vmatprep.mubr.bf16.mxu0 %v3740_v31  ;;  %v4623_v31 = vld [vmem:[%s4712_s19 + $0x7d0] ss:$8 sps:$4 sm:$0xff]  }
  0xe7   : > { %2876 = vmatpush1.bf16.msra.mxu1 %v4570_v32  ;;  %v4629_v32 = vld [vmem:[%s4712_s19 + $0x3e4] ss:$8 sps:$4 sm:$0xff]  }
  0xe8   : > { %3280 = vmatpush1.bf16.msra.mxu0 %v4573_v33  ;;  %2877 = vmatprep.subr.bf16.mxu1 %v4578_v34  ;;  %v4633_v33 = vld [vmem:[%s4712_s19 + $0x7e4] ss:$8 sps:$4 sm:$0xff]   ;;  %v4627_v34 = vld [vmem:[%s4712_s19 + $0x3e0] ss:$8 sps:$4 sm:$0xff]  }
  0xe9   : > { %3281 = vmatprep.subr.bf16.mxu0 %v4581_v35  ;;  %v4631_v35 = vld [vmem:[%s4712_s19 + $0x7e0] ss:$8 sps:$4 sm:$0xff]  }
  0xea   : > { %2827 = vmatmul.mubr.bf16.gmra.mrb[12].mxu1 %v3731_v37  ;;  %v4639_v37 = vld [vmem:[%s4712_s19 + $0x7f4] ss:$8 sps:$4 sm:$0xff]  }
  0xeb   : > { %3231 = vmatmul.mubr.bf16.gmra.mrb[12].mxu0 %v3739_v39  ;;  %2878 = vmatpush1.bf16.msra.mxu1 %v4576_v42  ;;  %v4637_v39 = vld [vmem:[%s4712_s19 + $0x7f0] ss:$8 sps:$4 sm:$0xff]  }
  0xec   : > { %3282 = vmatpush1.bf16.msra.mxu0 %v4579_v43  ;;  %2879 = vmatprep.subr.bf16.mxu1 %v4584_v44  ;;  %v409_v42 = vld [vmem:[%s4762_s23 + $0xb8] sm:$0xff]  ;;  %v3685_v44 = vcombine.low %v389_v18, %v397_v21 }
  0xed   : > { %3283 = vmatprep.subr.bf16.mxu0 %v4587_v45  ;;  %2836 = vmatprep.mubr.bf16.mxu1 %v3748_v46  ;;  %v417_v43 = vld [vmem:[%s4762_s23 + $0xf8] sm:$0xff]  ;;  %v3693_v45 = vcombine.low %v393_v22, %v401_v23  ;;  %v3702_v46 = vcombine.high %v405_v40, %v413_v41 }
  0xee   : > { %3240 = vmatprep.mubr.bf16.mxu0 %v3756_v47  ;;  %v3710_v47 = vcombine.high %v409_v42, %v417_v43 }
  0xef   : > { %2880 = vmatpush1.bf16.msra.mxu1 %v4582_v48  ;;  %v421_v48 = vld [vmem:[%s4762_s23 + $0x118] sm:$0xff] }
  0xf0   : > { %3284 = vmatpush1.bf16.msra.mxu0 %v4585_v49  ;;  %2881 = vmatprep.subr.bf16.mxu1 %v4590_v50  ;;  %v429_v49 = vld [vmem:[%s4762_s23 + $0x158] sm:$0xff] }
  0xf1   : > { %3285 = vmatprep.subr.bf16.mxu0 %v4593_v51  ;;  %v425_v50 = vld [vmem:[%s4762_s23 + $0x138] sm:$0xff]  ;;  %v3718_v54 = vcombine.high %v421_v48, %v429_v49 }
  0xf2   : > { %2837 = vmatmul.mubr.bf16.gmra.mrb[16].mxu1 %v3747_v53  ;;  %v433_v51 = vld [vmem:[%s4762_s23 + $0x178] sm:$0xff]  ;;  %v3709_v53 = vcombine.low %v409_v42, %v417_v43 }
  0xf3   : > { %3241 = vmatmul.mubr.bf16.gmra.mrb[16].mxu0 %v3755_v55  ;;  %2882 = vmatpush1.bf16.msra.mxu1 %v4588_v58  ;;  %v3726_v55 = vcombine.high %v425_v50, %v433_v51  ;;  %v441_v58 = vld [vmem:[%s4762_s23 + $0x1b8] sm:$0xff] }
  0xf4   : > { %3286 = vmatpush1.bf16.msra.mxu0 %v4591_v59  ;;  %2883 = vmatprep.subr.bf16.mxu1 %v4596_v60  ;;  %v449_v59 = vld [vmem:[%s4762_s23 + $0x1f8] sm:$0xff]  ;;  %v3717_v60 = vcombine.low %v421_v48, %v429_v49 }
  0xf5   : > { %3287 = vmatprep.subr.bf16.mxu0 %v4599_v61  ;;  %2846 = vmatprep.mubr.bf16.mxu1 %v3764_v62  ;;  %v3725_v61 = vcombine.low %v425_v50, %v433_v51  ;;  %v3734_v62 = vcombine.high %v437_v56, %v445_v57  ;;  %v3741_v5 = vcombine.low %v441_v58, %v449_v59 }
  0xf6   : > { %3250 = vmatprep.mubr.bf16.mxu0 %v3772_v63  ;;  %v3742_v63 = vcombine.high %v441_v58, %v449_v59 }
  0xf7   : > { %2884 = vmatpush1.bf16.msra.mxu1 %v4594_v0  ;;  %v453_v0 = vld [vmem:[%s4762_s23 + $0x218] sm:$0xff] }
  0xf8   : > { %3288 = vmatpush1.bf16.msra.mxu0 %v4597_v1  ;;  %2885 = vmatprep.subr.bf16.mxu1 %v4602_v2  ;;  %v461_v1 = vld [vmem:[%s4762_s23 + $0x258] sm:$0xff] }
  0xf9   : > { %3289 = vmatprep.subr.bf16.mxu0 %v4605_v3  ;;  %v457_v2 = vld [vmem:[%s4762_s23 + $0x238] sm:$0xff] }
  0xfa   : > { %2847 = vmatmul.mubr.bf16.gmra.mrb[20].mxu1 %v3763_v4  ;;  %v465_v3 = vld [vmem:[%s4762_s23 + $0x278] sm:$0xff]  ;;  %v3733_v4 = vcombine.low %v437_v56, %v445_v57 }
  0xfb   : > { %3251 = vmatmul.mubr.bf16.gmra.mrb[20].mxu0 %v3771_v6  ;;  %2886 = vmatpush1.bf16.msra.mxu1 %v4600_v8  ;;  %v3750_v6 = vcombine.high %v453_v0, %v461_v1  ;;  %v3758_v7 = vcombine.high %v457_v2, %v465_v3  ;;  %v469_v8 = vld [vmem:[%s4762_s23 + $0x298] sm:$0xff] }
  0xfc   : > { %3290 = vmatpush1.bf16.msra.mxu0 %v4603_v9  ;;  %2887 = vmatprep.subr.bf16.mxu1 %v4608_v10  ;;  %v477_v9 = vld [vmem:[%s4762_s23 + $0x2d8] sm:$0xff] }
  0xfd   : > { %3291 = vmatprep.subr.bf16.mxu0 %v4611_v11  ;;  %2856 = vmatprep.mubr.bf16.mxu1 %v3780_v12  ;;  %v473_v10 = vld [vmem:[%s4762_s23 + $0x2b8] sm:$0xff]  ;;  %v3749_v12 = vcombine.low %v453_v0, %v461_v1  ;;  %v3765_v18 = vcombine.low %v469_v8, %v477_v9 }
  0xfe   : > { %3260 = vmatprep.mubr.bf16.mxu0 %v3788_v13  ;;  %v481_v11 = vld [vmem:[%s4762_s23 + $0x2f8] sm:$0xff]  ;;  %v3757_v13 = vcombine.low %v457_v2, %v465_v3 }
  0xff   : > { %2888 = vmatpush1.bf16.msra.mxu1 %v4606_v14  ;;  %v3766_v14 = vcombine.high %v469_v8, %v477_v9 }
 0x100   : > { %3292 = vmatpush1.bf16.msra.mxu0 %v4609_v15  ;;  %2889 = vmatprep.subr.bf16.mxu1 %v4616_v16  ;;  %v3774_v15 = vcombine.high %v473_v10, %v481_v11  ;;  %v485_v16 = vld [vmem:[%s4762_s23 + $0x318] sm:$0xff] }
 0x101   : > { %3293 = vmatprep.subr.bf16.mxu0 %v4619_v17  ;;  %v489_v17 = vld [vmem:[%s4762_s23 + $0x338] sm:$0xff]  ;;  %v3781_v22 = vcombine.low %v485_v16, %v485_v16 }
 0x102   : > { %2857 = vmatmul.mubr.bf16.gmra.mrb[32].mxu1 %v3779_v19  ;;  %v3773_v19 = vcombine.low %v473_v10, %v481_v11  ;;  %v3790_v21 = vcombine.high %v489_v17, %v489_v17  ;;  %v3789_v23 = vcombine.low %v489_v17, %v489_v17 }
 0x103   : > { %3261 = vmatmul.mubr.bf16.gmra.mrb[32].mxu0 %v3787_v20  ;;  %2890 = vmatpush1.bf16.msra.mxu1 %v4614_v24  ;;  %v3782_v20 = vcombine.high %v485_v16, %v485_v16 }
 0x104   : > { %3294 = vmatpush1.bf16.msra.mxu0 %v4617_v25  ;;  %2891 = vmatprep.subr.bf16.mxu1 %v4622_v26 }
 0x105   : > { %3295 = vmatprep.subr.bf16.mxu0 %v4625_v27  ;;  %2897 = vmatprep.mubr.bf16.mxu1 %v3686_v28 }
 0x106   : > { %3301 = vmatprep.mubr.bf16.mxu0 %v3694_v29 }
 0x107   : > { %2892 = vmatpush1.bf16.msra.mxu1 %v4620_v30 }
 0x108   : > { %3296 = vmatpush1.bf16.msra.mxu0 %v4623_v31  ;;  %2893 = vmatprep.subr.bf16.mxu1 %v4629_v32 }
 0x109   : > { %3297 = vmatprep.subr.bf16.mxu0 %v4633_v33 }
 0x10b   : > { %2894 = vmatpush1.bf16.msra.mxu1 %v4627_v34 }
 0x10c   : > { %3298 = vmatpush1.bf16.msra.mxu0 %v4631_v35  ;;  %2895 = vmatprep.subr.bf16.mxu1 %v4636_v36 }
 0x10d   : > { %3299 = vmatprep.subr.bf16.mxu0 %v4639_v37 }
 0x10f   : > { %2896 = vmatpush1.bf16.msra.mxu1 %v4634_v38 }
 0x110   : > { %3300 = vmatpush1.bf16.msra.mxu0 %v4637_v39 }
 0x112   : > { %2898 = vmatmul.mubr.bf16.vlgmr.msra.gmra.mrb[0].mxu1 %v3685_v44 }
 0x113   : > { %3302 = vmatmul.mubr.bf16.vlgmr.msra.gmra.mrb[0].mxu0 %v3693_v45  ;;  %2907 = vmatprep.mubr.bf16.mxu1 %v3702_v46 }
 0x114   : > { %3311 = vmatprep.mubr.bf16.mxu0 %v3710_v47 }
 0x11a   : > { %2908 = vmatmul.mubr.bf16.gmra.mrb[4].mxu1 %v3701_v52  ;;  %v3453_v52 = vlaneseq }
 0x11b   : > { %3312 = vmatmul.mubr.bf16.gmra.mrb[4].mxu0 %v3709_v53  ;;  %2917 = vmatprep.mubr.bf16.mxu1 %v3718_v54 }
 0x11c   : > { %3321 = vmatprep.mubr.bf16.mxu0 %v3726_v55  ;;  %v3454_v53 = vshrl.u32 %v3453_v52, 7  ;;  %v3451_v55 = vld [vmem:[%s5180_s2] sm:$0x3] }
 0x11e   : > { %v3455_v54 = vsub.s32 0, %v3454_v53  ;;  %v3459_v56 = vsub.s32 1, %v3454_v53 }
 0x120   : > { %v5100_v57 = vrot.slane %v3451_v55, %v3455_v54 }
 0x122   : > { %2918 = vmatmul.mubr.bf16.gmra.mrb[8].mxu1 %v3717_v60  ;;  %v5102_v60 = vrot.slane %v3451_v55, %v3459_v56 }
 0x123   : > { %3322 = vmatmul.mubr.bf16.gmra.mrb[8].mxu0 %v3725_v61  ;;  %2927 = vmatprep.mubr.bf16.mxu1 %v3734_v62 }
 0x124   : > { %3331 = vmatprep.mubr.bf16.mxu0 %v3742_v63 }
 0x12a   : > { %2928 = vmatmul.mubr.bf16.gmra.mrb[12].mxu1 %v3733_v4 }
 0x12b   : > { %3332 = vmatmul.mubr.bf16.gmra.mrb[12].mxu0 %v3741_v5  ;;  %2937 = vmatprep.mubr.bf16.mxu1 %v3750_v6 }
 0x12c   : > { %3341 = vmatprep.mubr.bf16.mxu0 %v3758_v7 }
 0x132   : > { %2938 = vmatmul.mubr.bf16.gmra.mrb[16].mxu1 %v3749_v12 }
 0x133   : > { %3342 = vmatmul.mubr.bf16.gmra.mrb[16].mxu0 %v3757_v13  ;;  %2947 = vmatprep.mubr.bf16.mxu1 %v3766_v14 }
 0x134   : > { %3351 = vmatprep.mubr.bf16.mxu0 %v3774_v15 }
 0x13a   : > { %2948 = vmatmul.mubr.bf16.gmra.mrb[20].mxu1 %v3765_v18 }
 0x13b   : > { %3352 = vmatmul.mubr.bf16.gmra.mrb[20].mxu0 %v3773_v19  ;;  %2957 = vmatprep.mubr.bf16.mxu1 %v3782_v20 }
 0x13c   : > { %3361 = vmatprep.mubr.bf16.mxu0 %v3790_v21 }
 0x142   : > { %2958 = vmatmul.mubr.bf16.gmra.mrb[36].mxu1 %v3781_v22 }
 0x143   : > { %3362 = vmatmul.mubr.bf16.gmra.mrb[36].mxu0 %v3789_v23 }
 0x155   : > { %v2656_v24 = vpop.f32.mrb[24].mxu1 }
 0x156   : > { %v5080_v25 = vpop.f32.mrb[24].mxu0  ;;  %v2658_v26 = vpop.f32.mrb[25].mxu1 }
 0x157   : > { %v5082_v27 = vpop.f32.mrb[25].mxu0  ;;  %v2660_v28 = vpop.f32.mrb[26].mxu1 }
 0x158   : > { %v3064_v29 = vpop.f32.mrb[26].mxu0  ;;  %v2661_v30 = vpop.f32.mrb[27].mxu1 }
 0x159   : > { %v3065_v31 = vpop.f32.mrb[27].mxu0 }
 0x195   : > { %v2757_v32 = vpop.f32.mrb[28].mxu1 }
 0x196   : > { %v5084_v33 = vpop.f32.mrb[28].mxu0  ;;  %v2758_v34 = vadd.f32 %v2757_v32, %v2656_v24  ;;  %v2759_v35 = vpop.f32.mrb[29].mxu1 }
 0x197   : > { %v5086_v36 = vpop.f32.mrb[29].mxu0  ;;  %v2760_v37 = vadd.f32 %v2759_v35, %v2658_v26  ;;  %v2761_v38 = vpop.f32.mrb[30].mxu1 }
 0x198   : > { %v3165_v39 = vpop.f32.mrb[30].mxu0  ;;  %v2762_v40 = vpop.f32.mrb[31].mxu1 }
 0x199   : > { %v3166_v41 = vpop.f32.mrb[31].mxu0 }
 0x1d5   : > { %v2858_v42 = vpop.f32.mrb[32].mxu1 }
 0x1d6   : > { %v5088_v43 = vpop.f32.mrb[32].mxu0  ;;  %v5090_v44 = vadd.f32 %v2858_v42, %v2758_v34  ;;  %v2860_v45 = vpop.f32.mrb[33].mxu1 }
 0x1d7   : > { %v5092_v46 = vpop.f32.mrb[33].mxu0  ;;  %v5094_v47 = vadd.f32 %v2860_v45, %v2760_v37  ;;  %v2862_v48 = vpop.f32.mrb[34].mxu1 }
 0x1d8   : > { %v3266_v49 = vpop.f32.mrb[34].mxu0  ;;  %v2863_v50 = vpop.f32.mrb[35].mxu1 }
 0x1d9   : > { %v3267_v51 = vpop.f32.mrb[35].mxu0 }
 0x1e5   : > { %v2899_v58 = vpop.f32.mrb[0].mxu1 }
 0x1e6   : > { %v3303_v59 = vpop.f32.mrb[0].mxu0  ;;  %v2901_v62 = vpop.f32.mrb[1].mxu1 }
 0x1e7   : > { %v4050_v61 = vadd.f32 %v3303_v59, %v2899_v58  ;;  %v3305_v63 = vpop.f32.mrb[1].mxu0  ;;  %v2903_v1 = vpop.f32.mrb[2].mxu1 }
 0x1e8   : > { %v4051_v0 = vadd.f32 %v3305_v63, %v2901_v62  ;;  %v3307_v2 = vpop.f32.mrb[2].mxu0  ;;  %v2905_v5 = vpop.f32.mrb[3].mxu1 }
 0x1e9   : > { %v3463_v3 = vadd.f32 %v4050_v61, %v5100_v57  ;;  %v4052_v4 = vadd.f32 %v3307_v2, %v2903_v1  ;;  %v3309_v6 = vpop.f32.mrb[3].mxu0 }
 0x1ea   : > { %v3464_v7 = vadd.f32 %v4051_v0, %v5102_v60  ;;  %v4053_v8 = vadd.f32 %v3309_v6, %v2905_v5 }
 0x1eb   : > { %3489 = vst [vmem:[%s5107_s29] sm:$0xff] %v3463_v3  ;;  %v3465_v9 = vadd.f32 %v4052_v4, %v5100_v57 }
 0x1ec   : > { %3490 = vst [vmem:[%s5107_s29 + $0x8] sm:$0xff] %v3464_v7  ;;  %v3466_v10 = vadd.f32 %v4053_v8, %v5102_v60 }
 0x1ed   : > { %3491 = vst [vmem:[%s5107_s29 + $0x10] sm:$0xff] %v3465_v9  ;;  %v2909_v11 = vpop.f32.mrb[4].mxu1 }
 0x1ee   : > { %3492 = vst [vmem:[%s5107_s29 + $0x18] sm:$0xff] %v3466_v10  ;;  %v3313_v12 = vpop.f32.mrb[4].mxu0  ;;  %v2911_v14 = vpop.f32.mrb[5].mxu1 }
 0x1ef   : > { %v4054_v13 = vadd.f32 %v3313_v12, %v2909_v11  ;;  %v3315_v15 = vpop.f32.mrb[5].mxu0  ;;  %v2913_v17 = vpop.f32.mrb[6].mxu1 }
 0x1f0   : > { %v4055_v16 = vadd.f32 %v3315_v15, %v2911_v14  ;;  %v3317_v18 = vpop.f32.mrb[6].mxu0  ;;  %v2915_v21 = vpop.f32.mrb[7].mxu1 }
 0x1f1   : > { %v3467_v19 = vadd.f32 %v4054_v13, %v5100_v57  ;;  %v4056_v20 = vadd.f32 %v3317_v18, %v2913_v17  ;;  %v3319_v22 = vpop.f32.mrb[7].mxu0 }
 0x1f2   : > { %v3468_v23 = vadd.f32 %v4055_v16, %v5102_v60  ;;  %v4057_v24 = vadd.f32 %v3319_v22, %v2915_v21 }
 0x1f3   : > { %3493 = vst [vmem:[%s5107_s29 + $0x20] sm:$0xff] %v3467_v19  ;;  %v3469_v26 = vadd.f32 %v4056_v20, %v5100_v57 }
 0x1f4   : > { %3494 = vst [vmem:[%s5107_s29 + $0x28] sm:$0xff] %v3468_v23  ;;  %v3470_v28 = vadd.f32 %v4057_v24, %v5102_v60 }
 0x1f5   : > { %3495 = vst [vmem:[%s5107_s29 + $0x30] sm:$0xff] %v3469_v26  ;;  %v2919_v29 = vpop.f32.mrb[8].mxu1 }
 0x1f6   : > { %3496 = vst [vmem:[%s5107_s29 + $0x38] sm:$0xff] %v3470_v28  ;;  %v3323_v30 = vpop.f32.mrb[8].mxu0  ;;  %v2921_v32 = vpop.f32.mrb[9].mxu1 }
 0x1f7   : > { %v4058_v31 = vadd.f32 %v3323_v30, %v2919_v29  ;;  %v3325_v34 = vpop.f32.mrb[9].mxu0  ;;  %v2923_v37 = vpop.f32.mrb[10].mxu1 }
 0x1f8   : > { %v4059_v35 = vadd.f32 %v3325_v34, %v2921_v32  ;;  %v3327_v38 = vpop.f32.mrb[10].mxu0  ;;  %v2925_v41 = vpop.f32.mrb[11].mxu1 }
 0x1f9   : > { %v3471_v39 = vadd.f32 %v4058_v31, %v5100_v57  ;;  %v4060_v40 = vadd.f32 %v3327_v38, %v2923_v37  ;;  %v3329_v42 = vpop.f32.mrb[11].mxu0 }
 0x1fa   : > { %v3472_v45 = vadd.f32 %v4059_v35, %v5102_v60  ;;  %v4061_v48 = vadd.f32 %v3329_v42, %v2925_v41 }
 0x1fb   : > { %3497 = vst [vmem:[%s5107_s29 + $0x40] sm:$0xff] %v3471_v39  ;;  %v3473_v49 = vadd.f32 %v4060_v40, %v5100_v57 }
 0x1fc   : > { %3498 = vst [vmem:[%s5107_s29 + $0x48] sm:$0xff] %v3472_v45  ;;  %v3474_v50 = vadd.f32 %v4061_v48, %v5102_v60 }
 0x1fd   : > { %3499 = vst [vmem:[%s5107_s29 + $0x50] sm:$0xff] %v3473_v49  ;;  %v2929_v51 = vpop.f32.mrb[12].mxu1 }
 0x1fe   : > { %3500 = vst [vmem:[%s5107_s29 + $0x58] sm:$0xff] %v3474_v50  ;;  %v3333_v52 = vpop.f32.mrb[12].mxu0  ;;  %v2931_v54 = vpop.f32.mrb[13].mxu1 }
 0x1ff   : > { %v4062_v53 = vadd.f32 %v3333_v52, %v2929_v51  ;;  %v3335_v55 = vpop.f32.mrb[13].mxu0  ;;  %v2933_v58 = vpop.f32.mrb[14].mxu1 }
 0x200   : > { %v4063_v56 = vadd.f32 %v3335_v55, %v2931_v54  ;;  %v3337_v59 = vpop.f32.mrb[14].mxu0  ;;  %v2935_v63 = vpop.f32.mrb[15].mxu1 }
 0x201   : > { %v3475_v61 = vadd.f32 %v4062_v53, %v5100_v57  ;;  %v4064_v62 = vadd.f32 %v3337_v59, %v2933_v58  ;;  %v3339_v0 = vpop.f32.mrb[15].mxu0 }
 0x202   : > { %v3476_v1 = vadd.f32 %v4063_v56, %v5102_v60  ;;  %v4065_v2 = vadd.f32 %v3339_v0, %v2935_v63 }
 0x203   : > { %3501 = vst [vmem:[%s5107_s29 + $0x60] sm:$0xff] %v3475_v61  ;;  %v3477_v3 = vadd.f32 %v4064_v62, %v5100_v57 }
 0x204   : > { %3502 = vst [vmem:[%s5107_s29 + $0x68] sm:$0xff] %v3476_v1  ;;  %v3478_v4 = vadd.f32 %v4065_v2, %v5102_v60 }
 0x205   : > { %3503 = vst [vmem:[%s5107_s29 + $0x70] sm:$0xff] %v3477_v3  ;;  %v2939_v5 = vpop.f32.mrb[16].mxu1 }
 0x206   : > { %3504 = vst [vmem:[%s5107_s29 + $0x78] sm:$0xff] %v3478_v4  ;;  %v3343_v6 = vpop.f32.mrb[16].mxu0  ;;  %v2941_v8 = vpop.f32.mrb[17].mxu1 }
 0x207   : > { %v4066_v7 = vadd.f32 %v3343_v6, %v2939_v5  ;;  %v3345_v9 = vpop.f32.mrb[17].mxu0  ;;  %v2943_v11 = vpop.f32.mrb[18].mxu1 }
 0x208   : > { %v4067_v10 = vadd.f32 %v3345_v9, %v2941_v8  ;;  %v3347_v12 = vpop.f32.mrb[18].mxu0  ;;  %v2945_v15 = vpop.f32.mrb[19].mxu1 }
 0x209   : > { %v3479_v13 = vadd.f32 %v4066_v7, %v5100_v57  ;;  %v4068_v14 = vadd.f32 %v3347_v12, %v2943_v11  ;;  %v3349_v16 = vpop.f32.mrb[19].mxu0 }
 0x20a   : > { %v3480_v17 = vadd.f32 %v4067_v10, %v5102_v60  ;;  %v4069_v18 = vadd.f32 %v3349_v16, %v2945_v15 }
 0x20b   : > { %3505 = vst [vmem:[%s5107_s29 + $0x80] sm:$0xff] %v3479_v13  ;;  %v3481_v19 = vadd.f32 %v4068_v14, %v5100_v57 }
 0x20c   : > { %3506 = vst [vmem:[%s5107_s29 + $0x88] sm:$0xff] %v3480_v17  ;;  %v3482_v20 = vadd.f32 %v4069_v18, %v5102_v60 }
 0x20d   : > { %3507 = vst [vmem:[%s5107_s29 + $0x90] sm:$0xff] %v3481_v19  ;;  %v2949_v21 = vpop.f32.mrb[20].mxu1 }
 0x20e   : > { %3508 = vst [vmem:[%s5107_s29 + $0x98] sm:$0xff] %v3482_v20  ;;  %v3353_v22 = vpop.f32.mrb[20].mxu0  ;;  %v2951_v24 = vpop.f32.mrb[21].mxu1 }
 0x20f   : > { %v4070_v23 = vadd.f32 %v3353_v22, %v2949_v21  ;;  %v3355_v26 = vpop.f32.mrb[21].mxu0  ;;  %v2953_v29 = vpop.f32.mrb[22].mxu1 }
 0x210   : > { %v4071_v28 = vadd.f32 %v3355_v26, %v2951_v24  ;;  %v3357_v30 = vpop.f32.mrb[22].mxu0  ;;  %v2955_v34 = vpop.f32.mrb[23].mxu1 }
 0x211   : > { %v3483_v31 = vadd.f32 %v4070_v23, %v5100_v57  ;;  %v4072_v32 = vadd.f32 %v3357_v30, %v2953_v29  ;;  %v3359_v35 = vpop.f32.mrb[23].mxu0 }
 0x212   : > { %v3484_v37 = vadd.f32 %v4071_v28, %v5102_v60  ;;  %v4073_v38 = vadd.f32 %v3359_v35, %v2955_v34 }
 0x213   : > { %3509 = vst [vmem:[%s5107_s29 + $0xa0] sm:$0xff] %v3483_v31  ;;  %v3485_v39 = vadd.f32 %v4072_v32, %v5100_v57 }
 0x214   : > { %3510 = vst [vmem:[%s5107_s29 + $0xa8] sm:$0xff] %v3484_v37  ;;  %v3486_v40 = vadd.f32 %v4073_v38, %v5102_v60 }
 0x215   : > { %3511 = vst [vmem:[%s5107_s29 + $0xb0] sm:$0xff] %v3485_v39  ;;  %v2959_v41 = vpop.f32.mrb[36].mxu1 }
 0x216   : > { %3512 = vst [vmem:[%s5107_s29 + $0xb8] sm:$0xff] %v3486_v40  ;;  %v3363_v42 = vpop.f32.mrb[36].mxu0  ;;  %v2960_v45 = vadd.f32 %v2959_v41, %v5090_v44  ;;  %v2961_v48 = vpop.f32.mrb[37].mxu1 }
 0x217   : > { %v3365_v49 = vpop.f32.mrb[37].mxu0  ;;  %v2962_v50 = vadd.f32 %v2961_v48, %v5094_v47  ;;  %v2963_v51 = vpop.f32.mrb[38].mxu1 }
 0x218   : > { %v3367_v52 = vpop.f32.mrb[38].mxu0  ;;  %v3061_v53 = vadd.f32 %v5080_v25, %v2960_v45  ;;  %v2964_v54 = vpop.f32.mrb[39].mxu1 }
 0x219   : > { %v3368_v55 = vpop.f32.mrb[39].mxu0  ;;  %v3063_v56 = vadd.f32 %v5082_v27, %v2962_v50 }
 0x21a   : > { %v3162_v58 = vadd.f32 %v5084_v33, %v3061_v53 }
 0x21b   : > { %v3164_v59 = vadd.f32 %v5086_v36, %v3063_v56 }
 0x21c   : > { %v3263_v44 = vadd.f32 %v5088_v43, %v3162_v58 }
 0x21d   : > { %v3265_v61 = vadd.f32 %v5092_v46, %v3164_v59 }
 0x21e   : > { %v3364_v62 = vadd.f32 %v3363_v42, %v3263_v44 }
 0x21f   : > { %v3366_v63 = vadd.f32 %v3365_v49, %v3265_v61 }
 0x220   : > { %v3487_v47 = vadd.f32 %v5100_v57, %v3364_v62 }
 0x221   : > { %v3488_v0 = vadd.f32 %v5102_v60, %v3366_v63 }
 0x222   : > { %3513 = vst [vmem:[%s5107_s29 + $0xc0] sm:$0xff] %v3487_v47 }
 0x223   : > { %3514 = vst [vmem:[%s5107_s29 + $0xc8] sm:$0xff] %v3488_v0 }
 0x224 PF: > { %s13_s14 = sadd.s32 1, %s4666_s14   ;;  %s5182_s12 = smov %s4662_s13 }
 0x225   : > { %p10_p5 = scmp.ge.s32.totalorder %s13_s14, 6   ;;  %s5183_s13 = smov %s5185_s15 }
 0x227   :  { %12 = sbr.rel (!%p10_p5) target bundleno = 2 (0x2), region = 76 }

// kernel: generator_28_forward.12
= control target key start
LH: loop header
LB: loop body
LE: loop exit
PB: predicated region body
PF: predicated region fallthrough
CT: control target
= control target key end

     0   :  { %s1328_s12 = smov 0   ;;  %s1330_s13 = smov 0   ;;  %s2261_s0 = inlined_call_operand.vmem [shape: f32[392,256], index: 0, kind: input, shape index: {}]   ;;  %s2262_s1 = inlined_call_operand.vmem [shape: f32[1,256], index: 1, kind: input, shape index: {}]   ;;  %s2263_s2 = inlined_call_operand.vmem [shape: f32[1,256], index: 2, kind: input, shape index: {}]   ;;  %s2264_s3 = inlined_call_operand.vmem [shape: f32[392,256], index: 3, kind: output, shape index: {}]  }
   0x1   :  { %s1332_s14 = smov 0  }
   0x2 LB: > { %s1344_s15 = sadd.s32 4294967295, %s1306_s14   ;;  %s1347_s16 = sadd.s32 1, %s1306_s14   ;;  %s1306_s14 = sphi %s1332_s14, %s2280_s14   ;;  %s1302_s13 = sphi %s1330_s13, %s2279_s13   ;;  %s1298_s12 = sphi %s1328_s12, %s2278_s12  }
   0x3   : > { %s17_s17 = ssub.s32 %s1306_s14, %s1347_s16  ;;  %s20_s18 = sadd.s32 1, %s1302_s13 }
   0x4   : > { %p18_p0 = scmp.eq.s32.totalorder %s17_s17, 0  ;;  %p27_p1 = scmp.ne.s32.totalorder %s1302_s13, %s1298_s12 }
   0x5   : > { %p28_p2 = scmp.eq.s32.totalorder %s1306_s14, 0  ;;  %p109_p3 = scmp.eq.s32.totalorder %s1344_s15, 1 }
   0x6   : > { %s1357_s19 = scalar_select %p18_p0, %s1302_s13, %s20_s18  }
   0x7   : > { %p29_p4 = por %p28_p2, %p27_p1  ;;  %p1359_p5 = por %p109_p3, %p27_p1 }
   0x8   : > { %p1248_p6 = scmp.ge.s32.totalorder %s1306_s14, 2 }
   0xa   : > { %131 = sbr.rel (%p1248_p6) target bundleno = 46 (0x2e), region = 16 }
  0x11   : > { %134 = sbr.rel (!%p29_p4) target bundleno = 46 (0x2e), region = 20  ;;  %s136_s21 = sand.u32 (%p29_p4), 1, %s1302_s13  }
  0x12   : > { %s1249_s22 = sshll.u32 (%p29_p4), %s1306_s14, 3  ;;  %s1256_s23 = smul.u32 (%p29_p4), 392, %s136_s21 }
  0x13   : > { %s1369_s26 = scalar_lea.vmem (%p29_p4), %s2261_s0, %s1249_s22 }
  0x14   : > { %v264_v0 = vld [vmem:[%s1369_s26] sm:$0xff] (%p29_p4)  ;;  %v266_v1 = vld [vmem:[%s1369_s26 + $0x10] sm:$0xff] (%p29_p4)  ;;  %s1377_s27 = scalar_lea.vmem (%p29_p4), [#allocation2], %s1256_s23 }
  0x15   : > { %v268_v2 = vld [vmem:[%s1369_s26 + $0x20] sm:$0xff] (%p29_p4)  ;;  %v270_v3 = vld [vmem:[%s1369_s26 + $0x30] sm:$0xff] (%p29_p4)  ;;  %265 = vst [vmem:[%s1377_s27] sm:$0xff] (%p29_p4), %v264_v0  ;;  %267 = vst [vmem:[%s1377_s27 + $0x8] sm:$0xff] (%p29_p4), %v266_v1 }
  0x16   : > { %v272_v4 = vld [vmem:[%s1369_s26 + $0x40] sm:$0xff] (%p29_p4)  ;;  %v274_v5 = vld [vmem:[%s1369_s26 + $0x50] sm:$0xff] (%p29_p4)  ;;  %269 = vst [vmem:[%s1377_s27 + $0x10] sm:$0xff] (%p29_p4), %v268_v2  ;;  %271 = vst [vmem:[%s1377_s27 + $0x18] sm:$0xff] (%p29_p4), %v270_v3 }
  0x17   : > { %273 = vst [vmem:[%s1377_s27 + $0x20] sm:$0xff] (%p29_p4), %v272_v4  ;;  %275 = vst [vmem:[%s1377_s27 + $0x28] sm:$0xff] (%p29_p4), %v274_v5  ;;  %v276_v6 = vld [vmem:[%s1369_s26 + $0x60] sm:$0xff] (%p29_p4)  ;;  %v278_v7 = vld [vmem:[%s1369_s26 + $0x70] sm:$0xff] (%p29_p4) }
  0x18   : > { %v280_v8 = vld [vmem:[%s1369_s26 + $0x80] sm:$0xff]  ;;  %277 = vst [vmem:[%s1377_s27 + $0x30] sm:$0xff] %v276_v6  ;;  %279 = vst [vmem:[%s1377_s27 + $0x38] sm:$0xff] %v278_v7  ;;  %v282_v9 = vld [vmem:[%s1369_s26 + $0x90] sm:$0xff] }
  0x19   : > { %281 = vst [vmem:[%s1377_s27 + $0x40] sm:$0xff] %v280_v8  ;;  %v284_v10 = vld [vmem:[%s1369_s26 + $0xa0] sm:$0xff]  ;;  %v286_v11 = vld [vmem:[%s1369_s26 + $0xb0] sm:$0xff]  ;;  %283 = vst [vmem:[%s1377_s27 + $0x48] sm:$0xff] %v282_v9 }
  0x1a   : > { %285 = vst [vmem:[%s1377_s27 + $0x50] sm:$0xff] %v284_v10  ;;  %287 = vst [vmem:[%s1377_s27 + $0x58] sm:$0xff] %v286_v11  ;;  %v288_v12 = vld [vmem:[%s1369_s26 + $0xc0] sm:$0xff]  ;;  %v290_v13 = vld [vmem:[%s1369_s26 + $0xd0] sm:$0xff] }
  0x1b   : > { %v292_v14 = vld [vmem:[%s1369_s26 + $0xe0] sm:$0xff]  ;;  %289 = vst [vmem:[%s1377_s27 + $0x60] sm:$0xff] %v288_v12  ;;  %291 = vst [vmem:[%s1377_s27 + $0x68] sm:$0xff] %v290_v13  ;;  %v294_v15 = vld [vmem:[%s1369_s26 + $0xf0] sm:$0xff] }
  0x1c   : > { %293 = vst [vmem:[%s1377_s27 + $0x70] sm:$0xff] %v292_v14  ;;  %v296_v16 = vld [vmem:[%s1369_s26 + $0x100] sm:$0xff]  ;;  %v298_v17 = vld [vmem:[%s1369_s26 + $0x110] sm:$0xff]  ;;  %295 = vst [vmem:[%s1377_s27 + $0x78] sm:$0xff] %v294_v15 }
  0x1d   : > { %297 = vst [vmem:[%s1377_s27 + $0x80] sm:$0xff] %v296_v16  ;;  %299 = vst [vmem:[%s1377_s27 + $0x88] sm:$0xff] %v298_v17  ;;  %v300_v18 = vld [vmem:[%s1369_s26 + $0x120] sm:$0xff]  ;;  %v302_v19 = vld [vmem:[%s1369_s26 + $0x130] sm:$0xff] }
  0x1e   : > { %v304_v20 = vld [vmem:[%s1369_s26 + $0x140] sm:$0xff]  ;;  %301 = vst [vmem:[%s1377_s27 + $0x90] sm:$0xff] %v300_v18  ;;  %303 = vst [vmem:[%s1377_s27 + $0x98] sm:$0xff] %v302_v19  ;;  %v306_v21 = vld [vmem:[%s1369_s26 + $0x150] sm:$0xff] }
  0x1f   : > { %305 = vst [vmem:[%s1377_s27 + $0xa0] sm:$0xff] %v304_v20  ;;  %v308_v22 = vld [vmem:[%s1369_s26 + $0x160] sm:$0xff]  ;;  %v310_v23 = vld [vmem:[%s1369_s26 + $0x170] sm:$0xff]  ;;  %307 = vst [vmem:[%s1377_s27 + $0xa8] sm:$0xff] %v306_v21 }
  0x20   : > { %309 = vst [vmem:[%s1377_s27 + $0xb0] sm:$0xff] %v308_v22  ;;  %311 = vst [vmem:[%s1377_s27 + $0xb8] sm:$0xff] %v310_v23  ;;  %v312_v24 = vld [vmem:[%s1369_s26 + $0x180] sm:$0xff]  ;;  %v314_v25 = vld [vmem:[%s1369_s26 + $0x190] sm:$0xff] }
  0x21   : > { %v316_v26 = vld [vmem:[%s1369_s26 + $0x1a0] sm:$0xff]  ;;  %313 = vst [vmem:[%s1377_s27 + $0xc0] sm:$0xff] %v312_v24  ;;  %315 = vst [vmem:[%s1377_s27 + $0xc8] sm:$0xff] %v314_v25  ;;  %v318_v27 = vld [vmem:[%s1369_s26 + $0x1b0] sm:$0xff] }
  0x22   : > { %317 = vst [vmem:[%s1377_s27 + $0xd0] sm:$0xff] %v316_v26  ;;  %v320_v28 = vld [vmem:[%s1369_s26 + $0x1c0] sm:$0xff]  ;;  %v322_v29 = vld [vmem:[%s1369_s26 + $0x1d0] sm:$0xff]  ;;  %319 = vst [vmem:[%s1377_s27 + $0xd8] sm:$0xff] %v318_v27 }
  0x23   : > { %321 = vst [vmem:[%s1377_s27 + $0xe0] sm:$0xff] %v320_v28  ;;  %323 = vst [vmem:[%s1377_s27 + $0xe8] sm:$0xff] %v322_v29  ;;  %v324_v30 = vld [vmem:[%s1369_s26 + $0x1e0] sm:$0xff]  ;;  %v326_v31 = vld [vmem:[%s1369_s26 + $0x1f0] sm:$0xff] }
  0x24   : > { %v328_v32 = vld [vmem:[%s1369_s26 + $0x200] sm:$0xff]  ;;  %325 = vst [vmem:[%s1377_s27 + $0xf0] sm:$0xff] %v324_v30  ;;  %327 = vst [vmem:[%s1377_s27 + $0xf8] sm:$0xff] %v326_v31  ;;  %v330_v33 = vld [vmem:[%s1369_s26 + $0x210] sm:$0xff] }
  0x25   : > { %329 = vst [vmem:[%s1377_s27 + $0x100] sm:$0xff] %v328_v32  ;;  %v332_v34 = vld [vmem:[%s1369_s26 + $0x220] sm:$0xff]  ;;  %v334_v35 = vld [vmem:[%s1369_s26 + $0x230] sm:$0xff]  ;;  %331 = vst [vmem:[%s1377_s27 + $0x108] sm:$0xff] %v330_v33 }
  0x26   : > { %333 = vst [vmem:[%s1377_s27 + $0x110] sm:$0xff] %v332_v34  ;;  %335 = vst [vmem:[%s1377_s27 + $0x118] sm:$0xff] %v334_v35  ;;  %v336_v36 = vld [vmem:[%s1369_s26 + $0x240] sm:$0xff]  ;;  %v338_v37 = vld [vmem:[%s1369_s26 + $0x250] sm:$0xff] }
  0x27   : > { %v340_v38 = vld [vmem:[%s1369_s26 + $0x260] sm:$0xff]  ;;  %337 = vst [vmem:[%s1377_s27 + $0x120] sm:$0xff] %v336_v36  ;;  %339 = vst [vmem:[%s1377_s27 + $0x128] sm:$0xff] %v338_v37  ;;  %v342_v39 = vld [vmem:[%s1369_s26 + $0x270] sm:$0xff] }
  0x28   : > { %341 = vst [vmem:[%s1377_s27 + $0x130] sm:$0xff] %v340_v38  ;;  %v344_v40 = vld [vmem:[%s1369_s26 + $0x280] sm:$0xff]  ;;  %v346_v41 = vld [vmem:[%s1369_s26 + $0x290] sm:$0xff]  ;;  %343 = vst [vmem:[%s1377_s27 + $0x138] sm:$0xff] %v342_v39 }
  0x29   : > { %345 = vst [vmem:[%s1377_s27 + $0x140] sm:$0xff] %v344_v40  ;;  %347 = vst [vmem:[%s1377_s27 + $0x148] sm:$0xff] %v346_v41  ;;  %v348_v42 = vld [vmem:[%s1369_s26 + $0x2a0] sm:$0xff]  ;;  %v350_v43 = vld [vmem:[%s1369_s26 + $0x2b0] sm:$0xff] }
  0x2a   : > { %v352_v44 = vld [vmem:[%s1369_s26 + $0x2c0] sm:$0xff]  ;;  %349 = vst [vmem:[%s1377_s27 + $0x150] sm:$0xff] %v348_v42  ;;  %351 = vst [vmem:[%s1377_s27 + $0x158] sm:$0xff] %v350_v43  ;;  %v354_v45 = vld [vmem:[%s1369_s26 + $0x2d0] sm:$0xff] }
  0x2b   : > { %353 = vst [vmem:[%s1377_s27 + $0x160] sm:$0xff] %v352_v44  ;;  %v356_v46 = vld [vmem:[%s1369_s26 + $0x2e0] sm:$0xff]  ;;  %v358_v47 = vld [vmem:[%s1369_s26 + $0x2f0] sm:$0xff]  ;;  %355 = vst [vmem:[%s1377_s27 + $0x168] sm:$0xff] %v354_v45 }
  0x2c   : > { %357 = vst [vmem:[%s1377_s27 + $0x170] sm:$0xff] %v356_v46  ;;  %359 = vst [vmem:[%s1377_s27 + $0x178] sm:$0xff] %v358_v47  ;;  %v360_v48 = vld [vmem:[%s1369_s26 + $0x300] sm:$0xff] }
  0x2d   : > { %361 = vst [vmem:[%s1377_s27 + $0x180] sm:$0xff] %v360_v48 }
  0x2e PF: > { %p1250_p7 = scmp.ge.s32.totalorder %s1306_s14, 1  ;;  %p378_p8 = scmp.lt.s32.totalorder %s1306_s14, 3 }
  0x30   : > { %p379_p9 = pnand %p1250_p7, %p378_p8 }
  0x32   : > { %382 = sbr.rel (%p379_p9) target bundleno = 382 (0x17e), region = 66 }
  0x39   : > { %s385_s28 = sand.u32 1, %s1298_s12   ;;  %p413_p10 = scmp.lt.s32.totalorder %s1344_s15, 1 }
  0x3a   : > { %s1474_s29 = smul.u32 392, %s385_s28  ;;  %s1253_s12 = sshll.u32 (%p1359_p5), %s1344_s15, 3 }
  0x3b   : > { %s414_s4 = scalar_select %p413_p10, %s1344_s15, 1 }
  0x3c   : > { %s1477_s30 = scalar_lea.vmem [#allocation2], %s1474_s29  ;;  %s1930_s11 = scalar_lea.vmem [#allocation3], %s1474_s29 }
  0x3d   : > { %v1480_v49 = vld [vmem:[%s1477_s30] sm:$0xff]  ;;  %v1483_v50 = vld [vmem:[%s1477_s30 + $0x8] sm:$0xff]  ;;  %v1486_v51 = vld [vmem:[%s1477_s30 + $0x10] sm:$0xff]  ;;  %s415_s7 = scalar_lea.vmem %s2262_s1, %s414_s4  ;;  %s418_s10 = scalar_lea.vmem %s2263_s2, %s414_s4 }
  0x3e   : > { %v468_v52 = vadd.f32 %v1483_v50, %v1480_v49  ;;  %v1491_v53 = vld [vmem:[%s1477_s30 + $0x18] sm:$0xff]  ;;  %v1495_v55 = vld [vmem:[%s1477_s30 + $0x20] sm:$0xff]  ;;  %v1499_v57 = vld [vmem:[%s1477_s30 + $0x28] sm:$0xff]  ;;  %s2154_s18 = scalar_lea.vmem (%p1359_p5), %s2264_s3, %s1253_s12 }
  0x3f   : > { %v1503_v59 = vld [vmem:[%s1477_s30 + $0x30] sm:$0xff]  ;;  %v1507_v61 = vld [vmem:[%s1477_s30 + $0x38] sm:$0xff]  ;;  %v1511_v63 = vld [vmem:[%s1477_s30 + $0x40] sm:$0xff] }
  0x40   : > { %v469_v54 = vadd.f32 %v468_v52, %v1486_v51  ;;  %v1515_v1 = vld [vmem:[%s1477_s30 + $0x48] sm:$0xff]  ;;  %v1519_v3 = vld [vmem:[%s1477_s30 + $0x50] sm:$0xff]  ;;  %v1523_v5 = vld [vmem:[%s1477_s30 + $0x58] sm:$0xff] }
  0x41   : > { %v1527_v7 = vld [vmem:[%s1477_s30 + $0x60] sm:$0xff]  ;;  %v1531_v9 = vld [vmem:[%s1477_s30 + $0x68] sm:$0xff]  ;;  %v1535_v11 = vld [vmem:[%s1477_s30 + $0x70] sm:$0xff] }
  0x42   : > { %v470_v56 = vadd.f32 %v469_v54, %v1491_v53  ;;  %v1539_v13 = vld [vmem:[%s1477_s30 + $0x78] sm:$0xff]  ;;  %v1543_v15 = vld [vmem:[%s1477_s30 + $0x80] sm:$0xff]  ;;  %v1547_v17 = vld [vmem:[%s1477_s30 + $0x88] sm:$0xff] }
  0x43   : > { %v1551_v19 = vld [vmem:[%s1477_s30 + $0x90] sm:$0xff]  ;;  %v1555_v21 = vld [vmem:[%s1477_s30 + $0x98] sm:$0xff]  ;;  %v1559_v23 = vld [vmem:[%s1477_s30 + $0xa0] sm:$0xff] }
  0x44   : > { %v471_v58 = vadd.f32 %v470_v56, %v1495_v55  ;;  %v1563_v25 = vld [vmem:[%s1477_s30 + $0xa8] sm:$0xff]  ;;  %v1567_v27 = vld [vmem:[%s1477_s30 + $0xb0] sm:$0xff]  ;;  %v1571_v29 = vld [vmem:[%s1477_s30 + $0xb8] sm:$0xff] }
  0x45   : > { %v1575_v31 = vld [vmem:[%s1477_s30 + $0xc0] sm:$0xff]  ;;  %v1579_v33 = vld [vmem:[%s1477_s30 + $0xc8] sm:$0xff]  ;;  %v1583_v35 = vld [vmem:[%s1477_s30 + $0xd0] sm:$0xff] }
  0x46   : > { %v472_v60 = vadd.f32 %v471_v58, %v1499_v57  ;;  %v446_v37 = vld [vmem:[%s1477_s30 + $0xd8] sm:$0xff]  ;;  %v447_v39 = vld [vmem:[%s1477_s30 + $0xe0] sm:$0xff]  ;;  %v448_v41 = vld [vmem:[%s1477_s30 + $0xe8] sm:$0xff] }
  0x47   : > { %v449_v43 = vld [vmem:[%s1477_s30 + $0xf0] sm:$0xff]  ;;  %v450_v45 = vld [vmem:[%s1477_s30 + $0xf8] sm:$0xff]  ;;  %v451_v47 = vld [vmem:[%s1477_s30 + $0x100] sm:$0xff] }
  0x48   : > { %v473_v62 = vadd.f32 %v472_v60, %v1503_v59  ;;  %v452_v52 = vld [vmem:[%s1477_s30 + $0x108] sm:$0xff]  ;;  %v453_v56 = vld [vmem:[%s1477_s30 + $0x110] sm:$0xff]  ;;  %v454_v60 = vld [vmem:[%s1477_s30 + $0x118] sm:$0xff] }
  0x4a   : > { %v474_v0 = vadd.f32 %v473_v62, %v1507_v61 }
  0x4c   : > { %v475_v2 = vadd.f32 %v474_v0, %v1511_v63  ;;  %v455_v0 = vld [vmem:[%s1477_s30 + $0x120] sm:$0xff] }
  0x4e   : > { %v476_v4 = vadd.f32 %v475_v2, %v1515_v1 }
  0x50   : > { %v477_v6 = vadd.f32 %v476_v4, %v1519_v3  ;;  %v456_v4 = vld [vmem:[%s1477_s30 + $0x128] sm:$0xff] }
  0x52   : > { %v478_v8 = vadd.f32 %v477_v6, %v1523_v5 }
  0x54   : > { %v479_v10 = vadd.f32 %v478_v8, %v1527_v7  ;;  %v457_v8 = vld [vmem:[%s1477_s30 + $0x130] sm:$0xff] }
  0x56   : > { %v480_v12 = vadd.f32 %v479_v10, %v1531_v9 }
  0x58   : > { %v481_v14 = vadd.f32 %v480_v12, %v1535_v11  ;;  %v458_v12 = vld [vmem:[%s1477_s30 + $0x138] sm:$0xff] }
  0x5a   : > { %v482_v16 = vadd.f32 %v481_v14, %v1539_v13 }
  0x5c   : > { %v483_v18 = vadd.f32 %v482_v16, %v1543_v15  ;;  %v459_v16 = vld [vmem:[%s1477_s30 + $0x140] sm:$0xff] }
  0x5e   : > { %v484_v20 = vadd.f32 %v483_v18, %v1547_v17 }
  0x60   : > { %v485_v22 = vadd.f32 %v484_v20, %v1551_v19  ;;  %v460_v20 = vld [vmem:[%s1477_s30 + $0x148] sm:$0xff] }
  0x62   : > { %v486_v24 = vadd.f32 %v485_v22, %v1555_v21 }
  0x64   : > { %v487_v26 = vadd.f32 %v486_v24, %v1559_v23  ;;  %v461_v24 = vld [vmem:[%s1477_s30 + $0x150] sm:$0xff] }
  0x66   : > { %v488_v28 = vadd.f32 %v487_v26, %v1563_v25 }
  0x68   : > { %v489_v30 = vadd.f32 %v488_v28, %v1567_v27  ;;  %v462_v28 = vld [vmem:[%s1477_s30 + $0x158] sm:$0xff] }
  0x6a   : > { %v490_v32 = vadd.f32 %v489_v30, %v1571_v29 }
  0x6c   : > { %v491_v34 = vadd.f32 %v490_v32, %v1575_v31  ;;  %v463_v32 = vld [vmem:[%s1477_s30 + $0x160] sm:$0xff] }
  0x6e   : > { %v492_v36 = vadd.f32 %v491_v34, %v1579_v33 }
  0x70   : > { %v493_v38 = vadd.f32 %v492_v36, %v1583_v35  ;;  %v464_v36 = vld [vmem:[%s1477_s30 + $0x168] sm:$0xff] }
  0x72   : > { %v494_v40 = vadd.f32 %v493_v38, %v446_v37 }
  0x74   : > { %v495_v42 = vadd.f32 %v494_v40, %v447_v39  ;;  %v465_v40 = vld [vmem:[%s1477_s30 + $0x170] sm:$0xff] }
  0x76   : > { %v496_v44 = vadd.f32 %v495_v42, %v448_v41 }
  0x78   : > { %v497_v46 = vadd.f32 %v496_v44, %v449_v43  ;;  %v466_v44 = vld [vmem:[%s1477_s30 + $0x178] sm:$0xff] }
  0x7a   : > { %v498_v48 = vadd.f32 %v497_v46, %v450_v45 }
  0x7c   : > { %v499_v54 = vadd.f32 %v498_v48, %v451_v47  ;;  %v467_v48 = vld [vmem:[%s1477_s30 + $0x180] sm:$0xff] }
  0x7e   : > { %v500_v58 = vadd.f32 %v499_v54, %v452_v52 }
  0x80   : > { %v501_v62 = vadd.f32 %v500_v58, %v453_v56 }
  0x82   : > { %v502_v2 = vadd.f32 %v501_v62, %v454_v60 }
  0x84   : > { %v503_v6 = vadd.f32 %v502_v2, %v455_v0 }
  0x86   : > { %v504_v10 = vadd.f32 %v503_v6, %v456_v4 }
  0x88   : > { %v505_v14 = vadd.f32 %v504_v10, %v457_v8 }
  0x8a   : > { %v506_v18 = vadd.f32 %v505_v14, %v458_v12 }
  0x8c   : > { %v507_v22 = vadd.f32 %v506_v18, %v459_v16 }
  0x8e   : > { %v508_v26 = vadd.f32 %v507_v22, %v460_v20 }
  0x90   : > { %v509_v30 = vadd.f32 %v508_v26, %v461_v24 }
  0x92   : > { %v510_v34 = vadd.f32 %v509_v30, %v462_v28 }
  0x94   : > { %v511_v38 = vadd.f32 %v510_v34, %v463_v32 }
  0x96   : > { %v512_v42 = vadd.f32 %v511_v38, %v464_v36 }
  0x98   : > { %v513_v46 = vadd.f32 %v512_v42, %v465_v40 }
  0x9a   : > { %v514_v54 = vadd.f32 %v513_v46, %v466_v44 }
  0x9c   : > { %v515_v58 = vadd.f32 %v514_v54, %v467_v48 }
  0x9e   : > { %v516_v62 = vrot.slane %v515_v58, 4 }
  0xa0   : > { %v517_v2 = vadd.f32 %v516_v62, %v515_v58 }
  0xa2   : > { %v518_v6 = vrot.slane %v517_v2, 2 }
  0xa4   : > { %v519_v10 = vadd.f32 %v518_v6, %v517_v2 }
  0xa6   : > { %v520_v14 = vrot.slane %v519_v10, 1 }
  0xa8   : > { %v521_v18 = vadd.f32 %v520_v14, %v519_v10 }
  0xaa   : > { %v1609_v22 = vmul.f32 0.0025510204, %v521_v18 }
  0xac   : > { %v1612_v26 = vsub.f32 %v446_v37, %v1609_v22  ;;  %v1615_v30 = vsub.f32 %v447_v39, %v1609_v22  ;;  %v1618_v34 = vsub.f32 %v448_v41, %v1609_v22  ;;  %v1621_v38 = vsub.f32 %v449_v43, %v1609_v22 }
  0xad   : > { %v1624_v42 = vsub.f32 %v450_v45, %v1609_v22  ;;  %v1627_v46 = vsub.f32 %v451_v47, %v1609_v22  ;;  %v1630_v54 = vsub.f32 %v452_v52, %v1609_v22  ;;  %v1633_v37 = vsub.f32 %v453_v56, %v1609_v22 }
  0xae   : > { %v1636_v39 = vsub.f32 %v454_v60, %v1609_v22  ;;  %v1639_v41 = vsub.f32 %v455_v0, %v1609_v22  ;;  %v1642_v43 = vsub.f32 %v456_v4, %v1609_v22  ;;  %v1645_v45 = vsub.f32 %v457_v8, %v1609_v22 }
  0xaf   : > { %v1648_v47 = vsub.f32 %v458_v12, %v1609_v22  ;;  %v1651_v52 = vsub.f32 %v459_v16, %v1609_v22  ;;  %v1654_v56 = vsub.f32 %v460_v20, %v1609_v22  ;;  %v1657_v60 = vsub.f32 %v461_v24, %v1609_v22 }
  0xb0   : > { %v1660_v0 = vsub.f32 %v462_v28, %v1609_v22  ;;  %v1663_v4 = vsub.f32 %v463_v32, %v1609_v22  ;;  %v1666_v8 = vsub.f32 %v464_v36, %v1609_v22  ;;  %v1669_v12 = vsub.f32 %v465_v40, %v1609_v22 }
  0xb1   : > { %v1672_v16 = vsub.f32 %v466_v44, %v1609_v22  ;;  %v1675_v20 = vsub.f32 %v467_v48, %v1609_v22  ;;  %v1679_v24 = vsub.f32 %v1480_v49, %v1609_v22  ;;  %v1683_v28 = vsub.f32 %v1483_v50, %v1609_v22 }
  0xb2   : > { %2270 = vst [vmem:[#allocation4_spill] sm:$0xff] %v1660_v0  ;;  %2271 = vst [vmem:[#allocation5_spill] sm:$0xff] %v1663_v4  ;;  %v1687_v32 = vsub.f32 %v1486_v51, %v1609_v22  ;;  %v1691_v36 = vsub.f32 %v1491_v53, %v1609_v22  ;;  %v1699_v49 = vsub.f32 %v1495_v55, %v1609_v22 }
  0xb3   : > { %2272 = vst [vmem:[#allocation6_spill] sm:$0xff] %v1666_v8  ;;  %2273 = vst [vmem:[#allocation7_spill] sm:$0xff] %v1669_v12  ;;  %v573_v40 = vmul.f32 %v1679_v24, %v1679_v24  ;;  %v574_v44 = vmul.f32 %v1683_v28, %v1683_v28  ;;  %v1705_v51 = vsub.f32 %v1499_v57, %v1609_v22 }
  0xb4   : > { %v575_v50 = vmul.f32 %v1687_v32, %v1687_v32  ;;  %v576_v53 = vmul.f32 %v1691_v36, %v1691_v36  ;;  %v1711_v58 = vsub.f32 %v1503_v59, %v1609_v22  ;;  %v577_v62 = vmul.f32 %v1699_v49, %v1699_v49 }
  0xb5   : > { %v622_v48 = vadd.f32 %v574_v44, %v573_v40  ;;  %v1717_v2 = vsub.f32 %v1507_v61, %v1609_v22  ;;  %v578_v57 = vmul.f32 %v1705_v51, %v1705_v51  ;;  %v1723_v10 = vsub.f32 %v1511_v63, %v1609_v22 }
  0xb6   : > { %v579_v59 = vmul.f32 %v1711_v58, %v1711_v58  ;;  %v1729_v18 = vsub.f32 %v1515_v1, %v1609_v22  ;;  %v1735_v44 = vsub.f32 %v1519_v3, %v1609_v22 }
  0xb7   : > { %v623_v55 = vadd.f32 %v622_v48, %v575_v50  ;;  %v580_v61 = vmul.f32 %v1717_v2, %v1717_v2  ;;  %v581_v63 = vmul.f32 %v1723_v10, %v1723_v10 }
  0xb8   : > { %v582_v1 = vmul.f32 %v1729_v18, %v1729_v18  ;;  %v583_v3 = vmul.f32 %v1735_v44, %v1735_v44 }
  0xb9   : > { %v624_v6 = vadd.f32 %v623_v55, %v576_v53  ;;  %v1741_v53 = vsub.f32 %v1523_v5, %v1609_v22 }
  0xbb   : > { %v625_v14 = vadd.f32 %v624_v6, %v577_v62  ;;  %v1747_v62 = vsub.f32 %v1527_v7, %v1609_v22  ;;  %v584_v5 = vmul.f32 %v1741_v53, %v1741_v53 }
  0xbd   : > { %v626_v40 = vadd.f32 %v625_v14, %v578_v57  ;;  %v1753_v57 = vsub.f32 %v1531_v9, %v1609_v22  ;;  %v585_v7 = vmul.f32 %v1747_v62, %v1747_v62 }
  0xbf   : > { %v627_v50 = vadd.f32 %v626_v40, %v579_v59  ;;  %v1759_v59 = vsub.f32 %v1535_v11, %v1609_v22  ;;  %v586_v9 = vmul.f32 %v1753_v57, %v1753_v57 }
  0xc1   : > { %v628_v48 = vadd.f32 %v627_v50, %v580_v61  ;;  %v1765_v61 = vsub.f32 %v1539_v13, %v1609_v22  ;;  %v587_v11 = vmul.f32 %v1759_v59, %v1759_v59 }
  0xc3   : > { %v629_v55 = vadd.f32 %v628_v48, %v581_v63  ;;  %v1771_v63 = vsub.f32 %v1543_v15, %v1609_v22  ;;  %v588_v13 = vmul.f32 %v1765_v61, %v1765_v61 }
  0xc5   : > { %v630_v6 = vadd.f32 %v629_v55, %v582_v1  ;;  %v1777_v1 = vsub.f32 %v1547_v17, %v1609_v22  ;;  %v589_v15 = vmul.f32 %v1771_v63, %v1771_v63 }
  0xc7   : > { %v631_v14 = vadd.f32 %v630_v6, %v583_v3  ;;  %v1783_v3 = vsub.f32 %v1551_v19, %v1609_v22  ;;  %v590_v17 = vmul.f32 %v1777_v1, %v1777_v1 }
  0xc9   : > { %v632_v40 = vadd.f32 %v631_v14, %v584_v5  ;;  %v1789_v5 = vsub.f32 %v1555_v21, %v1609_v22  ;;  %v591_v19 = vmul.f32 %v1783_v3, %v1783_v3 }
  0xcb   : > { %v633_v50 = vadd.f32 %v632_v40, %v585_v7  ;;  %v1795_v7 = vsub.f32 %v1559_v23, %v1609_v22  ;;  %v592_v21 = vmul.f32 %v1789_v5, %v1789_v5 }
  0xcd   : > { %v634_v48 = vadd.f32 %v633_v50, %v586_v9  ;;  %v1801_v9 = vsub.f32 %v1563_v25, %v1609_v22  ;;  %v593_v23 = vmul.f32 %v1795_v7, %v1795_v7 }
  0xcf   : > { %v635_v55 = vadd.f32 %v634_v48, %v587_v11  ;;  %v1807_v11 = vsub.f32 %v1567_v27, %v1609_v22  ;;  %v594_v25 = vmul.f32 %v1801_v9, %v1801_v9 }
  0xd1   : > { %v636_v6 = vadd.f32 %v635_v55, %v588_v13  ;;  %v1813_v13 = vsub.f32 %v1571_v29, %v1609_v22  ;;  %v595_v27 = vmul.f32 %v1807_v11, %v1807_v11 }
  0xd3   : > { %v637_v14 = vadd.f32 %v636_v6, %v589_v15  ;;  %v1819_v15 = vsub.f32 %v1575_v31, %v1609_v22  ;;  %v596_v29 = vmul.f32 %v1813_v13, %v1813_v13 }
  0xd5   : > { %v638_v40 = vadd.f32 %v637_v14, %v590_v17  ;;  %v1825_v17 = vsub.f32 %v1579_v33, %v1609_v22  ;;  %v597_v31 = vmul.f32 %v1819_v15, %v1819_v15 }
  0xd7   : > { %v639_v50 = vadd.f32 %v638_v40, %v591_v19  ;;  %v1831_v19 = vsub.f32 %v1583_v35, %v1609_v22  ;;  %v601_v35 = vmul.f32 %v1615_v30, %v1615_v30 }
  0xd9   : > { %v640_v48 = vadd.f32 %v639_v50, %v592_v21  ;;  %v598_v21 = vmul.f32 %v1825_v17, %v1825_v17  ;;  %v599_v33 = vmul.f32 %v1831_v19, %v1831_v19  ;;  %v600_v50 = vmul.f32 %v1612_v26, %v1612_v26 }
  0xdb   : > { %v641_v55 = vadd.f32 %v640_v48, %v593_v23  ;;  %v602_v48 = vmul.f32 %v1618_v34, %v1618_v34 }
  0xdd   : > { %v642_v6 = vadd.f32 %v641_v55, %v594_v25  ;;  %v603_v55 = vmul.f32 %v1621_v38, %v1621_v38 }
  0xdf   : > { %v643_v14 = vadd.f32 %v642_v6, %v595_v27  ;;  %v604_v6 = vmul.f32 %v1624_v42, %v1624_v42 }
  0xe1   : > { %v644_v40 = vadd.f32 %v643_v14, %v596_v29  ;;  %v605_v14 = vmul.f32 %v1627_v46, %v1627_v46 }
  0xe3   : > { %v645_v23 = vadd.f32 %v644_v40, %v597_v31  ;;  %v606_v40 = vmul.f32 %v1630_v54, %v1630_v54 }
  0xe5   : > { %v646_v25 = vadd.f32 %v645_v23, %v598_v21  ;;  %v607_v23 = vmul.f32 %v1633_v37, %v1633_v37 }
  0xe7   : > { %v647_v22 = vadd.f32 %v646_v25, %v599_v33  ;;  %v608_v25 = vmul.f32 %v1636_v39, %v1636_v39 }
  0xe9   : > { %v648_v27 = vadd.f32 %v647_v22, %v600_v50  ;;  %v609_v22 = vmul.f32 %v1639_v41, %v1639_v41 }
  0xeb   : > { %v649_v29 = vadd.f32 %v648_v27, %v601_v35  ;;  %v610_v27 = vmul.f32 %v1642_v43, %v1642_v43 }
  0xed   : > { %v650_v31 = vadd.f32 %v649_v29, %v602_v48  ;;  %v611_v29 = vmul.f32 %v1645_v45, %v1645_v45 }
  0xef   : > { %v651_v21 = vadd.f32 %v650_v31, %v603_v55  ;;  %v612_v31 = vmul.f32 %v1648_v47, %v1648_v47 }
  0xf1   : > { %v652_v33 = vadd.f32 %v651_v21, %v604_v6  ;;  %v613_v21 = vmul.f32 %v1651_v52, %v1651_v52 }
  0xf3   : > { %v653_v50 = vadd.f32 %v652_v33, %v605_v14  ;;  %v614_v33 = vmul.f32 %v1654_v56, %v1654_v56 }
  0xf5   : > { %v654_v35 = vadd.f32 %v653_v50, %v606_v40  ;;  %v615_v50 = vmul.f32 %v1657_v60, %v1657_v60 }
  0xf7   : > { %v655_v48 = vadd.f32 %v654_v35, %v607_v23  ;;  %v616_v35 = vmul.f32 %v1660_v0, %v1660_v0 }
  0xf9   : > { %v656_v55 = vadd.f32 %v655_v48, %v608_v25  ;;  %v617_v48 = vmul.f32 %v1663_v4, %v1663_v4 }
  0xfb   : > { %v657_v6 = vadd.f32 %v656_v55, %v609_v22  ;;  %v618_v55 = vmul.f32 %v1666_v8, %v1666_v8 }
  0xfd   : > { %v658_v14 = vadd.f32 %v657_v6, %v610_v27  ;;  %v619_v6 = vmul.f32 %v1669_v12, %v1669_v12 }
  0xff   : > { %v659_v40 = vadd.f32 %v658_v14, %v611_v29  ;;  %v620_v14 = vmul.f32 %v1672_v16, %v1672_v16 }
 0x101   : > { %v660_v23 = vadd.f32 %v659_v40, %v612_v31  ;;  %v621_v40 = vmul.f32 %v1675_v20, %v1675_v20 }
 0x103   : > { %v661_v25 = vadd.f32 %v660_v23, %v613_v21 }
 0x105   : > { %v662_v22 = vadd.f32 %v661_v25, %v614_v33 }
 0x107   : > { %v663_v27 = vadd.f32 %v662_v22, %v615_v50 }
 0x109   : > { %v664_v29 = vadd.f32 %v663_v27, %v616_v35 }
 0x10b   : > { %v665_v31 = vadd.f32 %v664_v29, %v617_v48  ;;  %v1903_v29 = vld [vmem:[%s418_s10] ss:$0 sm:$0xff] }
 0x10d   : > { %v666_v21 = vadd.f32 %v665_v31, %v618_v55  ;;  %v1893_v55 = vld [vmem:[%s415_s7] ss:$0 sm:$0xff] }
 0x10f   : > { %v667_v33 = vadd.f32 %v666_v21, %v619_v6 }
 0x111   : > { %v668_v23 = vadd.f32 %v667_v33, %v620_v14 }
 0x113   : > { %v669_v50 = vadd.f32 %v668_v23, %v621_v40 }
 0x115   : > { %v670_v25 = vrot.slane %v669_v50, 4 }
 0x117   : > { %v671_v22 = vadd.f32 %v670_v25, %v669_v50 }
 0x119   : > { %v672_v8 = vrot.slane %v671_v22, 2 }
 0x11b   : > { %v673_v35 = vadd.f32 %v672_v8, %v671_v22 }
 0x11d   : > { %v674_v27 = vrot.slane %v673_v35, 1 }
 0x11f   : > { %v675_v4 = vadd.f32 %v674_v27, %v673_v35 }
 0x121   : > { %v676_v12 = vmul.f32 0.0025510204, %v675_v4 }
 0x123   : > { %v677_v0 = vadd.f32 1e-05, %v676_v12 }
 0x125   : > { %1282 = vrsqrt.f32 %v677_v0 }
 0x12f   : > { %v1891_v48 = vpop.eup %1282 }
 0x130   : > { %v679_v8 = vmul.f32 %v1891_v48, %v1679_v24  ;;  %v680_v4 = vmul.f32 %v1891_v48, %v1683_v28  ;;  %v681_v0 = vmul.f32 %v1891_v48, %v1687_v32  ;;  %v682_v12 = vmul.f32 %v1891_v48, %v1691_v36 }
 0x131   : > { %v683_v6 = vmul.f32 %v1891_v48, %v1699_v49  ;;  %v684_v31 = vmul.f32 %v1891_v48, %v1705_v51  ;;  %v685_v24 = vmul.f32 %v1891_v48, %v1711_v58  ;;  %v686_v28 = vmul.f32 %v1891_v48, %v1717_v2 }
 0x132   : > { %v735_v14 = vmul.f32 %v1893_v55, %v679_v8  ;;  %v736_v32 = vmul.f32 %v1893_v55, %v680_v4  ;;  %v737_v36 = vmul.f32 %v1893_v55, %v681_v0  ;;  %v738_v21 = vmul.f32 %v1893_v55, %v682_v12 }
 0x133   : > { %v739_v40 = vmul.f32 %v1893_v55, %v683_v6  ;;  %v740_v49 = vmul.f32 %v1893_v55, %v684_v31  ;;  %v741_v51 = vmul.f32 %v1893_v55, %v685_v24  ;;  %v742_v33 = vmul.f32 %v1893_v55, %v686_v28 }
 0x134   : > { %v791_v58 = vadd.f32 %v1903_v29, %v735_v14  ;;  %v792_v2 = vadd.f32 %v1903_v29, %v736_v32  ;;  %v793_v23 = vadd.f32 %v1903_v29, %v737_v36  ;;  %v794_v50 = vadd.f32 %v1903_v29, %v738_v21 }
 0x135   : > { %v795_v25 = vadd.f32 %v1903_v29, %v739_v40  ;;  %v796_v22 = vadd.f32 %v1903_v29, %v740_v49  ;;  %v797_v35 = vadd.f32 %v1903_v29, %v741_v51  ;;  %v798_v27 = vadd.f32 %v1903_v29, %v742_v33 }
 0x136   : > { %v840_v8 = vmax.f32 %v791_v58, 0.0  ;;  %v841_v4 = vmax.f32 %v792_v2, 0.0  ;;  %v842_v0 = vmax.f32 %v793_v23, 0.0  ;;  %v843_v12 = vmax.f32 %v794_v50, 0.0 }
 0x137   : > { %v844_v6 = vmax.f32 %v795_v25, 0.0  ;;  %v845_v31 = vmax.f32 %v796_v22, 0.0  ;;  %v846_v24 = vmax.f32 %v797_v35, 0.0  ;;  %v847_v28 = vmax.f32 %v798_v27, 0.0 }
 0x138   : > { %889 = vst [vmem:[%s1930_s11] sm:$0xff] %v840_v8  ;;  %890 = vst [vmem:[%s1930_s11 + $0x8] sm:$0xff] %v841_v4  ;;  %v687_v14 = vmul.f32 %v1891_v48, %v1723_v10  ;;  %v688_v32 = vmul.f32 %v1891_v48, %v1729_v18  ;;  %v689_v36 = vmul.f32 %v1891_v48, %v1735_v44 }
 0x139   : > { %891 = vst [vmem:[%s1930_s11 + $0x10] sm:$0xff] %v842_v0  ;;  %892 = vst [vmem:[%s1930_s11 + $0x18] sm:$0xff] %v843_v12  ;;  %v690_v21 = vmul.f32 %v1891_v48, %v1741_v53  ;;  %v691_v40 = vmul.f32 %v1891_v48, %v1747_v62  ;;  %v692_v49 = vmul.f32 %v1891_v48, %v1753_v57 }
 0x13a   : > { %893 = vst [vmem:[%s1930_s11 + $0x20] sm:$0xff] %v844_v6  ;;  %894 = vst [vmem:[%s1930_s11 + $0x28] sm:$0xff] %v845_v31  ;;  %v693_v10 = vmul.f32 %v1891_v48, %v1759_v59  ;;  %v694_v18 = vmul.f32 %v1891_v48, %v1765_v61  ;;  %v743_v44 = vmul.f32 %v1893_v55, %v687_v14 }
 0x13b   : > { %895 = vst [vmem:[%s1930_s11 + $0x30] sm:$0xff] %v846_v24  ;;  %896 = vst [vmem:[%s1930_s11 + $0x38] sm:$0xff] %v847_v28  ;;  %v744_v53 = vmul.f32 %v1893_v55, %v688_v32  ;;  %v745_v51 = vmul.f32 %v1893_v55, %v689_v36  ;;  %v746_v33 = vmul.f32 %v1893_v55, %v690_v21 }
 0x13c   : > { %v747_v58 = vmul.f32 %v1893_v55, %v691_v40  ;;  %v748_v62 = vmul.f32 %v1893_v55, %v692_v49  ;;  %v749_v57 = vmul.f32 %v1893_v55, %v693_v10  ;;  %v750_v2 = vmul.f32 %v1893_v55, %v694_v18 }
 0x13d   : > { %v799_v59 = vadd.f32 %v1903_v29, %v743_v44  ;;  %v800_v61 = vadd.f32 %v1903_v29, %v744_v53  ;;  %v801_v23 = vadd.f32 %v1903_v29, %v745_v51  ;;  %v802_v50 = vadd.f32 %v1903_v29, %v746_v33 }
 0x13e   : > { %v803_v25 = vadd.f32 %v1903_v29, %v747_v58  ;;  %v804_v22 = vadd.f32 %v1903_v29, %v748_v62  ;;  %v805_v35 = vadd.f32 %v1903_v29, %v749_v57  ;;  %v806_v27 = vadd.f32 %v1903_v29, %v750_v2 }
 0x13f   : > { %v848_v8 = vmax.f32 %v799_v59, 0.0  ;;  %v849_v4 = vmax.f32 %v800_v61, 0.0  ;;  %v850_v0 = vmax.f32 %v801_v23, 0.0  ;;  %v851_v12 = vmax.f32 %v802_v50, 0.0 }
 0x140   : > { %v852_v6 = vmax.f32 %v803_v25, 0.0  ;;  %v853_v31 = vmax.f32 %v804_v22, 0.0  ;;  %v854_v24 = vmax.f32 %v805_v35, 0.0  ;;  %v855_v28 = vmax.f32 %v806_v27, 0.0 }
 0x141   : > { %897 = vst [vmem:[%s1930_s11 + $0x40] sm:$0xff] %v848_v8  ;;  %898 = vst [vmem:[%s1930_s11 + $0x48] sm:$0xff] %v849_v4  ;;  %v695_v14 = vmul.f32 %v1891_v48, %v1771_v63  ;;  %v696_v32 = vmul.f32 %v1891_v48, %v1777_v1  ;;  %v697_v36 = vmul.f32 %v1891_v48, %v1783_v3 }
 0x142   : > { %899 = vst [vmem:[%s1930_s11 + $0x50] sm:$0xff] %v850_v0  ;;  %900 = vst [vmem:[%s1930_s11 + $0x58] sm:$0xff] %v851_v12  ;;  %v698_v21 = vmul.f32 %v1891_v48, %v1789_v5  ;;  %v699_v40 = vmul.f32 %v1891_v48, %v1795_v7  ;;  %v700_v49 = vmul.f32 %v1891_v48, %v1801_v9 }
 0x143   : > { %901 = vst [vmem:[%s1930_s11 + $0x60] sm:$0xff] %v852_v6  ;;  %902 = vst [vmem:[%s1930_s11 + $0x68] sm:$0xff] %v853_v31  ;;  %v701_v63 = vmul.f32 %v1891_v48, %v1807_v11  ;;  %v702_v1 = vmul.f32 %v1891_v48, %v1813_v13  ;;  %v751_v3 = vmul.f32 %v1893_v55, %v695_v14 }
 0x144   : > { %903 = vst [vmem:[%s1930_s11 + $0x70] sm:$0xff] %v854_v24  ;;  %904 = vst [vmem:[%s1930_s11 + $0x78] sm:$0xff] %v855_v28  ;;  %v752_v5 = vmul.f32 %v1893_v55, %v696_v32  ;;  %v753_v10 = vmul.f32 %v1893_v55, %v697_v36  ;;  %v754_v18 = vmul.f32 %v1893_v55, %v698_v21 }
 0x145   : > { %v755_v44 = vmul.f32 %v1893_v55, %v699_v40  ;;  %v756_v7 = vmul.f32 %v1893_v55, %v700_v49  ;;  %v757_v9 = vmul.f32 %v1893_v55, %v701_v63  ;;  %v758_v53 = vmul.f32 %v1893_v55, %v702_v1 }
 0x146   : > { %v807_v11 = vadd.f32 %v1903_v29, %v751_v3  ;;  %v808_v13 = vadd.f32 %v1903_v29, %v752_v5  ;;  %v809_v51 = vadd.f32 %v1903_v29, %v753_v10  ;;  %v810_v33 = vadd.f32 %v1903_v29, %v754_v18 }
 0x147   : > { %v811_v58 = vadd.f32 %v1903_v29, %v755_v44  ;;  %v812_v62 = vadd.f32 %v1903_v29, %v756_v7  ;;  %v813_v57 = vadd.f32 %v1903_v29, %v757_v9  ;;  %v814_v2 = vadd.f32 %v1903_v29, %v758_v53 }
 0x148   : > { %v856_v59 = vmax.f32 %v807_v11, 0.0  ;;  %v857_v61 = vmax.f32 %v808_v13, 0.0  ;;  %v858_v23 = vmax.f32 %v809_v51, 0.0  ;;  %v859_v50 = vmax.f32 %v810_v33, 0.0 }
 0x149   : > { %v860_v25 = vmax.f32 %v811_v58, 0.0  ;;  %v861_v22 = vmax.f32 %v812_v62, 0.0  ;;  %v862_v35 = vmax.f32 %v813_v57, 0.0  ;;  %v863_v27 = vmax.f32 %v814_v2, 0.0 }
 0x14a   : > { %905 = vst [vmem:[%s1930_s11 + $0x80] sm:$0xff] %v856_v59  ;;  %906 = vst [vmem:[%s1930_s11 + $0x88] sm:$0xff] %v857_v61  ;;  %v703_v8 = vmul.f32 %v1891_v48, %v1819_v15  ;;  %v704_v4 = vmul.f32 %v1891_v48, %v1825_v17  ;;  %v705_v0 = vmul.f32 %v1891_v48, %v1831_v19 }
 0x14b   : > { %907 = vst [vmem:[%s1930_s11 + $0x90] sm:$0xff] %v858_v23  ;;  %908 = vst [vmem:[%s1930_s11 + $0x98] sm:$0xff] %v859_v50  ;;  %v706_v12 = vmul.f32 %v1891_v48, %v1612_v26  ;;  %v707_v6 = vmul.f32 %v1891_v48, %v1615_v30  ;;  %v708_v31 = vmul.f32 %v1891_v48, %v1618_v34 }
 0x14c   : > { %909 = vst [vmem:[%s1930_s11 + $0xa0] sm:$0xff] %v860_v25  ;;  %910 = vst [vmem:[%s1930_s11 + $0xa8] sm:$0xff] %v861_v22  ;;  %v709_v15 = vmul.f32 %v1891_v48, %v1621_v38  ;;  %v710_v17 = vmul.f32 %v1891_v48, %v1624_v42  ;;  %v759_v19 = vmul.f32 %v1893_v55, %v703_v8 }
 0x14d   : > { %911 = vst [vmem:[%s1930_s11 + $0xb0] sm:$0xff] %v862_v35  ;;  %912 = vst [vmem:[%s1930_s11 + $0xb8] sm:$0xff] %v863_v27  ;;  %v760_v26 = vmul.f32 %v1893_v55, %v704_v4  ;;  %v761_v24 = vmul.f32 %v1893_v55, %v705_v0  ;;  %v762_v28 = vmul.f32 %v1893_v55, %v706_v12 }
 0x14e   : > { %v763_v14 = vmul.f32 %v1893_v55, %v707_v6  ;;  %v764_v30 = vmul.f32 %v1893_v55, %v708_v31  ;;  %v765_v34 = vmul.f32 %v1893_v55, %v709_v15  ;;  %v766_v32 = vmul.f32 %v1893_v55, %v710_v17 }
 0x14f   : > { %v815_v38 = vadd.f32 %v1903_v29, %v759_v19  ;;  %v816_v42 = vadd.f32 %v1903_v29, %v760_v26  ;;  %v817_v36 = vadd.f32 %v1903_v29, %v761_v24  ;;  %v818_v21 = vadd.f32 %v1903_v29, %v762_v28  ;;  %v2274_v28 = vld [vmem:[#allocation4_spill] sm:$0xff] }
 0x150   : > { %v819_v40 = vadd.f32 %v1903_v29, %v763_v14  ;;  %v820_v49 = vadd.f32 %v1903_v29, %v764_v30  ;;  %v821_v63 = vadd.f32 %v1903_v29, %v765_v34  ;;  %v822_v1 = vadd.f32 %v1903_v29, %v766_v32  ;;  %v2275_v30 = vld [vmem:[#allocation5_spill] sm:$0xff]  ;;  %v2276_v32 = vld [vmem:[#allocation6_spill] sm:$0xff] }
 0x151   : > { %v864_v3 = vmax.f32 %v815_v38, 0.0  ;;  %v865_v5 = vmax.f32 %v816_v42, 0.0  ;;  %v866_v10 = vmax.f32 %v817_v36, 0.0  ;;  %v867_v18 = vmax.f32 %v818_v21, 0.0 }
 0x152   : > { %v868_v44 = vmax.f32 %v819_v40, 0.0  ;;  %v869_v7 = vmax.f32 %v820_v49, 0.0  ;;  %v870_v9 = vmax.f32 %v821_v63, 0.0  ;;  %v871_v53 = vmax.f32 %v822_v1, 0.0 }
 0x153   : > { %913 = vst [vmem:[%s1930_s11 + $0xc0] sm:$0xff] %v864_v3  ;;  %914 = vst [vmem:[%s1930_s11 + $0xc8] sm:$0xff] %v865_v5  ;;  %v711_v11 = vmul.f32 %v1891_v48, %v1627_v46  ;;  %v712_v13 = vmul.f32 %v1891_v48, %v1630_v54  ;;  %v713_v51 = vmul.f32 %v1891_v48, %v1633_v37 }
 0x154   : > { %915 = vst [vmem:[%s1930_s11 + $0xd0] sm:$0xff] %v866_v10  ;;  %916 = vst [vmem:[%s1930_s11 + $0xd8] sm:$0xff] %v867_v18  ;;  %v714_v33 = vmul.f32 %v1891_v48, %v1636_v39  ;;  %v715_v58 = vmul.f32 %v1891_v48, %v1639_v41  ;;  %v716_v62 = vmul.f32 %v1891_v48, %v1642_v43 }
 0x155   : > { %917 = vst [vmem:[%s1930_s11 + $0xe0] sm:$0xff] %v868_v44  ;;  %918 = vst [vmem:[%s1930_s11 + $0xe8] sm:$0xff] %v869_v7  ;;  %v717_v46 = vmul.f32 %v1891_v48, %v1645_v45  ;;  %v718_v54 = vmul.f32 %v1891_v48, %v1648_v47  ;;  %v767_v37 = vmul.f32 %v1893_v55, %v711_v11 }
 0x156   : > { %919 = vst [vmem:[%s1930_s11 + $0xf0] sm:$0xff] %v870_v9  ;;  %920 = vst [vmem:[%s1930_s11 + $0xf8] sm:$0xff] %v871_v53  ;;  %v768_v39 = vmul.f32 %v1893_v55, %v712_v13  ;;  %v769_v57 = vmul.f32 %v1893_v55, %v713_v51  ;;  %v770_v2 = vmul.f32 %v1893_v55, %v714_v33 }
 0x157   : > { %v771_v59 = vmul.f32 %v1893_v55, %v715_v58  ;;  %v772_v41 = vmul.f32 %v1893_v55, %v716_v62  ;;  %v773_v43 = vmul.f32 %v1893_v55, %v717_v46  ;;  %v774_v61 = vmul.f32 %v1893_v55, %v718_v54 }
 0x158   : > { %v823_v45 = vadd.f32 %v1903_v29, %v767_v37  ;;  %v824_v47 = vadd.f32 %v1903_v29, %v768_v39  ;;  %v825_v23 = vadd.f32 %v1903_v29, %v769_v57  ;;  %v826_v50 = vadd.f32 %v1903_v29, %v770_v2 }
 0x159   : > { %v827_v25 = vadd.f32 %v1903_v29, %v771_v59  ;;  %v828_v22 = vadd.f32 %v1903_v29, %v772_v41  ;;  %v829_v35 = vadd.f32 %v1903_v29, %v773_v43  ;;  %v830_v27 = vadd.f32 %v1903_v29, %v774_v61  ;;  %v1078_v59 = vld [vmem:[%s1930_s11 + $0x20] sm:$0xff] (%p1359_p5)  ;;  %v1080_v41 = vld [vmem:[%s1930_s11 + $0x28] sm:$0xff] (%p1359_p5)  ;;  %v1082_v43 = vld [vmem:[%s1930_s11 + $0x30] sm:$0xff] (%p1359_p5) }
 0x15a   : > { %v872_v8 = vmax.f32 %v823_v45, 0.0  ;;  %v873_v4 = vmax.f32 %v824_v47, 0.0  ;;  %v874_v0 = vmax.f32 %v825_v23, 0.0  ;;  %v875_v12 = vmax.f32 %v826_v50, 0.0  ;;  %1079 = vst [vmem:[%s2154_s18 + $0x40] sm:$0xff] (%p1359_p5), %v1078_v59  ;;  %1081 = vst [vmem:[%s2154_s18 + $0x50] sm:$0xff] (%p1359_p5), %v1080_v41 }
 0x15b   : > { %v876_v6 = vmax.f32 %v827_v25, 0.0  ;;  %v877_v31 = vmax.f32 %v828_v22, 0.0  ;;  %v878_v15 = vmax.f32 %v829_v35, 0.0  ;;  %v879_v17 = vmax.f32 %v830_v27, 0.0  ;;  %v1084_v61 = vld [vmem:[%s1930_s11 + $0x38] sm:$0xff] (%p1359_p5)  ;;  %v1086_v45 = vld [vmem:[%s1930_s11 + $0x40] sm:$0xff] (%p1359_p5) }
 0x15c   : > { %921 = vst [vmem:[%s1930_s11 + $0x100] sm:$0xff] %v872_v8  ;;  %922 = vst [vmem:[%s1930_s11 + $0x108] sm:$0xff] %v873_v4  ;;  %v719_v19 = vmul.f32 %v1891_v48, %v1651_v52  ;;  %v720_v26 = vmul.f32 %v1891_v48, %v1654_v56  ;;  %v721_v24 = vmul.f32 %v1891_v48, %v1657_v60  ;;  %v2277_v52 = vld [vmem:[#allocation7_spill] sm:$0xff]  ;;  %v1090_v23 = vld [vmem:[%s1930_s11 + $0x50] sm:$0xff] (%p1359_p5) }
 0x15d   : > { %923 = vst [vmem:[%s1930_s11 + $0x110] sm:$0xff] %v874_v0  ;;  %924 = vst [vmem:[%s1930_s11 + $0x118] sm:$0xff] %v875_v12  ;;  %v722_v14 = vmul.f32 %v1891_v48, %v2274_v28  ;;  %v723_v34 = vmul.f32 %v1891_v48, %v2275_v30  ;;  %v724_v38 = vmul.f32 %v1891_v48, %v2276_v32  ;;  %v1088_v47 = vld [vmem:[%s1930_s11 + $0x48] sm:$0xff] (%p1359_p5)  ;;  %v1092_v50 = vld [vmem:[%s1930_s11 + $0x58] sm:$0xff] (%p1359_p5) }
 0x15e   : > { %925 = vst [vmem:[%s1930_s11 + $0x120] sm:$0xff] %v876_v6  ;;  %926 = vst [vmem:[%s1930_s11 + $0x128] sm:$0xff] %v877_v31  ;;  %v725_v42 = vmul.f32 %v1891_v48, %v2277_v52  ;;  %v726_v56 = vmul.f32 %v1891_v48, %v1672_v16  ;;  %v775_v60 = vmul.f32 %v1893_v55, %v719_v19  ;;  %v1094_v25 = vld [vmem:[%s1930_s11 + $0x60] sm:$0xff] (%p1359_p5)  ;;  %v1096_v22 = vld [vmem:[%s1930_s11 + $0x68] sm:$0xff] (%p1359_p5) }
 0x15f   : > { %927 = vst [vmem:[%s1930_s11 + $0x130] sm:$0xff] %v878_v15  ;;  %928 = vst [vmem:[%s1930_s11 + $0x138] sm:$0xff] %v879_v17  ;;  %v776_v36 = vmul.f32 %v1893_v55, %v720_v26  ;;  %v777_v21 = vmul.f32 %v1893_v55, %v721_v24  ;;  %v778_v40 = vmul.f32 %v1893_v55, %v722_v14  ;;  %v1098_v35 = vld [vmem:[%s1930_s11 + $0x70] sm:$0xff] (%p1359_p5)  ;;  %v1100_v27 = vld [vmem:[%s1930_s11 + $0x78] sm:$0xff] (%p1359_p5) }
 0x160   : > { %v779_v49 = vmul.f32 %v1893_v55, %v723_v34  ;;  %v780_v63 = vmul.f32 %v1893_v55, %v724_v38  ;;  %v781_v1 = vmul.f32 %v1893_v55, %v725_v42  ;;  %v782_v3 = vmul.f32 %v1893_v55, %v726_v56  ;;  %1083 = vst [vmem:[%s2154_s18 + $0x60] sm:$0xff] (%p1359_p5), %v1082_v43  ;;  %v1102_v8 = vld [vmem:[%s1930_s11 + $0x80] sm:$0xff] (%p1359_p5)  ;;  %v1104_v4 = vld [vmem:[%s1930_s11 + $0x88] sm:$0xff] (%p1359_p5)  ;;  %v1106_v0 = vld [vmem:[%s1930_s11 + $0x90] sm:$0xff] (%p1359_p5) }
 0x161   : > { %v831_v5 = vadd.f32 %v1903_v29, %v775_v60  ;;  %v832_v16 = vadd.f32 %v1903_v29, %v776_v36  ;;  %v833_v10 = vadd.f32 %v1903_v29, %v777_v21  ;;  %v834_v18 = vadd.f32 %v1903_v29, %v778_v40  ;;  %1085 = vst [vmem:[%s2154_s18 + $0x70] sm:$0xff] (%p1359_p5), %v1084_v61  ;;  %v1108_v12 = vld [vmem:[%s1930_s11 + $0x98] sm:$0xff] (%p1359_p5)  ;;  %v1110_v6 = vld [vmem:[%s1930_s11 + $0xa0] sm:$0xff] (%p1359_p5)  ;;  %v1112_v31 = vld [vmem:[%s1930_s11 + $0xa8] sm:$0xff] (%p1359_p5) }
 0x162   : > { %v835_v44 = vadd.f32 %v1903_v29, %v779_v49  ;;  %v836_v7 = vadd.f32 %v1903_v29, %v780_v63  ;;  %v837_v9 = vadd.f32 %v1903_v29, %v781_v1  ;;  %v838_v53 = vadd.f32 %v1903_v29, %v782_v3  ;;  %1087 = vst [vmem:[%s2154_s18 + $0x80] sm:$0xff] (%p1359_p5), %v1086_v45  ;;  %v1114_v15 = vld [vmem:[%s1930_s11 + $0xb0] sm:$0xff] (%p1359_p5)  ;;  %v1116_v17 = vld [vmem:[%s1930_s11 + $0xb8] sm:$0xff] (%p1359_p5)  ;;  %v1118_v19 = vld [vmem:[%s1930_s11 + $0xc0] sm:$0xff] (%p1359_p5) }
 0x163   : > { %v880_v11 = vmax.f32 %v831_v5, 0.0  ;;  %v881_v13 = vmax.f32 %v832_v16, 0.0  ;;  %v882_v51 = vmax.f32 %v833_v10, 0.0  ;;  %v883_v33 = vmax.f32 %v834_v18, 0.0  ;;  %1089 = vst [vmem:[%s2154_s18 + $0x90] sm:$0xff] (%p1359_p5), %v1088_v47  ;;  %1091 = vst [vmem:[%s2154_s18 + $0xa0] sm:$0xff] (%p1359_p5), %v1090_v23 }
 0x164   : > { %v884_v58 = vmax.f32 %v835_v44, 0.0  ;;  %v885_v62 = vmax.f32 %v836_v7, 0.0  ;;  %v886_v46 = vmax.f32 %v837_v9, 0.0  ;;  %v887_v54 = vmax.f32 %v838_v53, 0.0  ;;  %1093 = vst [vmem:[%s2154_s18 + $0xb0] sm:$0xff] (%p1359_p5), %v1092_v50  ;;  %1095 = vst [vmem:[%s2154_s18 + $0xc0] sm:$0xff] (%p1359_p5), %v1094_v25 }
 0x165   : > { %929 = vst [vmem:[%s1930_s11 + $0x140] sm:$0xff] %v880_v11  ;;  %930 = vst [vmem:[%s1930_s11 + $0x148] sm:$0xff] %v881_v13  ;;  %v727_v37 = vmul.f32 %v1891_v48, %v1675_v20  ;;  %v1070_v20 = vld [vmem:[%s1930_s11] sm:$0xff] (%p1359_p5)  ;;  %v1072_v48 = vld [vmem:[%s1930_s11 + $0x8] sm:$0xff] (%p1359_p5) }
 0x166   : > { %931 = vst [vmem:[%s1930_s11 + $0x150] sm:$0xff] %v882_v51  ;;  %932 = vst [vmem:[%s1930_s11 + $0x158] sm:$0xff] %v883_v33  ;;  %v1120_v26 = vld [vmem:[%s1930_s11 + $0xc8] sm:$0xff] (%p1359_p5)  ;;  %v1122_v24 = vld [vmem:[%s1930_s11 + $0xd0] sm:$0xff] (%p1359_p5) }
 0x167   : > { %933 = vst [vmem:[%s1930_s11 + $0x160] sm:$0xff] %v884_v58  ;;  %934 = vst [vmem:[%s1930_s11 + $0x168] sm:$0xff] %v885_v62  ;;  %v783_v39 = vmul.f32 %v1893_v55, %v727_v37  ;;  %944 = sbr.rel (!%p1359_p5) target bundleno = 382 (0x17e), region = 74  ;;  %v1074_v55 = vld [vmem:[%s1930_s11 + $0x10] sm:$0xff] (%p1359_p5)  ;;  %v1124_v28 = vld [vmem:[%s1930_s11 + $0xd8] sm:$0xff] (%p1359_p5) }
 0x168   : > { %935 = vst [vmem:[%s1930_s11 + $0x170] sm:$0xff] %v886_v46  ;;  %936 = vst [vmem:[%s1930_s11 + $0x178] sm:$0xff] %v887_v54  ;;  %v1126_v14 = vld [vmem:[%s1930_s11 + $0xe0] sm:$0xff] (%p1359_p5)  ;;  %v1128_v30 = vld [vmem:[%s1930_s11 + $0xe8] sm:$0xff] (%p1359_p5) }
 0x169   : > { %v839_v57 = vadd.f32 %v1903_v29, %v783_v39  ;;  %v1076_v29 = vld [vmem:[%s1930_s11 + $0x18] sm:$0xff] (%p1359_p5)  ;;  %1071 = vst [vmem:[%s2154_s18] sm:$0xff] (%p1359_p5), %v1070_v20  ;;  %1073 = vst [vmem:[%s2154_s18 + $0x10] sm:$0xff] (%p1359_p5), %v1072_v48  ;;  %v1130_v34 = vld [vmem:[%s1930_s11 + $0xf0] sm:$0xff] (%p1359_p5) }
 0x16a   : > { %1075 = vst [vmem:[%s2154_s18 + $0x20] sm:$0xff] (%p1359_p5), %v1074_v55  ;;  %1077 = vst [vmem:[%s2154_s18 + $0x30] sm:$0xff] (%p1359_p5), %v1076_v29  ;;  %v1132_v32 = vld [vmem:[%s1930_s11 + $0xf8] sm:$0xff] (%p1359_p5)  ;;  %v1134_v38 = vld [vmem:[%s1930_s11 + $0x100] sm:$0xff] (%p1359_p5) }
 0x16b   : > { %v888_v2 = vmax.f32 %v839_v57, 0.0  ;;  %1097 = vst [vmem:[%s2154_s18 + $0xd0] sm:$0xff] (%p1359_p5), %v1096_v22  ;;  %1099 = vst [vmem:[%s2154_s18 + $0xe0] sm:$0xff] (%p1359_p5), %v1098_v35  ;;  %v1136_v52 = vld [vmem:[%s1930_s11 + $0x108] sm:$0xff] (%p1359_p5)  ;;  %v1138_v42 = vld [vmem:[%s1930_s11 + $0x110] sm:$0xff] (%p1359_p5) }
 0x16c   : > { %1101 = vst [vmem:[%s2154_s18 + $0xf0] sm:$0xff] (%p1359_p5), %v1100_v27  ;;  %1103 = vst [vmem:[%s2154_s18 + $0x100] sm:$0xff] (%p1359_p5), %v1102_v8  ;;  %v1140_v56 = vld [vmem:[%s1930_s11 + $0x118] sm:$0xff] (%p1359_p5)  ;;  %v1142_v60 = vld [vmem:[%s1930_s11 + $0x120] sm:$0xff] (%p1359_p5) }
 0x16d   : > { %937 = vst [vmem:[%s1930_s11 + $0x180] sm:$0xff] %v888_v2  ;;  %1105 = vst [vmem:[%s2154_s18 + $0x110] sm:$0xff] (%p1359_p5), %v1104_v4  ;;  %v1144_v36 = vld [vmem:[%s1930_s11 + $0x128] sm:$0xff] (%p1359_p5)  ;;  %v1146_v21 = vld [vmem:[%s1930_s11 + $0x130] sm:$0xff] (%p1359_p5) }
 0x16e   : > { %1107 = vst [vmem:[%s2154_s18 + $0x120] sm:$0xff] %v1106_v0  ;;  %1109 = vst [vmem:[%s2154_s18 + $0x130] sm:$0xff] %v1108_v12  ;;  %v1148_v40 = vld [vmem:[%s1930_s11 + $0x138] sm:$0xff]  ;;  %v1150_v49 = vld [vmem:[%s1930_s11 + $0x140] sm:$0xff] }
 0x16f   : > { %1111 = vst [vmem:[%s2154_s18 + $0x140] sm:$0xff] %v1110_v6  ;;  %1113 = vst [vmem:[%s2154_s18 + $0x150] sm:$0xff] %v1112_v31  ;;  %v1152_v63 = vld [vmem:[%s1930_s11 + $0x148] sm:$0xff]  ;;  %v1154_v1 = vld [vmem:[%s1930_s11 + $0x150] sm:$0xff] }
 0x170   : > { %1115 = vst [vmem:[%s2154_s18 + $0x160] sm:$0xff] %v1114_v15  ;;  %1117 = vst [vmem:[%s2154_s18 + $0x170] sm:$0xff] %v1116_v17  ;;  %v1156_v3 = vld [vmem:[%s1930_s11 + $0x158] sm:$0xff]  ;;  %v1158_v5 = vld [vmem:[%s1930_s11 + $0x160] sm:$0xff] }
 0x171   : > { %1119 = vst [vmem:[%s2154_s18 + $0x180] sm:$0xff] %v1118_v19  ;;  %1121 = vst [vmem:[%s2154_s18 + $0x190] sm:$0xff] %v1120_v26  ;;  %v1160_v16 = vld [vmem:[%s1930_s11 + $0x168] sm:$0xff]  ;;  %v1162_v10 = vld [vmem:[%s1930_s11 + $0x170] sm:$0xff] }
 0x172   : > { %1123 = vst [vmem:[%s2154_s18 + $0x1a0] sm:$0xff] %v1122_v24  ;;  %1125 = vst [vmem:[%s2154_s18 + $0x1b0] sm:$0xff] %v1124_v28  ;;  %v1164_v18 = vld [vmem:[%s1930_s11 + $0x178] sm:$0xff] }
 0x173   : > { %1127 = vst [vmem:[%s2154_s18 + $0x1c0] sm:$0xff] %v1126_v14  ;;  %1129 = vst [vmem:[%s2154_s18 + $0x1d0] sm:$0xff] %v1128_v30 }
 0x174   : > { %1131 = vst [vmem:[%s2154_s18 + $0x1e0] sm:$0xff] %v1130_v34  ;;  %1133 = vst [vmem:[%s2154_s18 + $0x1f0] sm:$0xff] %v1132_v32  ;;  %v1166_v44 = vld [vmem:[%s1930_s11 + $0x180] sm:$0xff] }
 0x175   : > { %1135 = vst [vmem:[%s2154_s18 + $0x200] sm:$0xff] %v1134_v38  ;;  %1137 = vst [vmem:[%s2154_s18 + $0x210] sm:$0xff] %v1136_v52 }
 0x176   : > { %1139 = vst [vmem:[%s2154_s18 + $0x220] sm:$0xff] %v1138_v42  ;;  %1141 = vst [vmem:[%s2154_s18 + $0x230] sm:$0xff] %v1140_v56 }
 0x177   : > { %1143 = vst [vmem:[%s2154_s18 + $0x240] sm:$0xff] %v1142_v60  ;;  %1145 = vst [vmem:[%s2154_s18 + $0x250] sm:$0xff] %v1144_v36 }
 0x178   : > { %1147 = vst [vmem:[%s2154_s18 + $0x260] sm:$0xff] %v1146_v21  ;;  %1149 = vst [vmem:[%s2154_s18 + $0x270] sm:$0xff] %v1148_v40 }
 0x179   : > { %1151 = vst [vmem:[%s2154_s18 + $0x280] sm:$0xff] %v1150_v49  ;;  %1153 = vst [vmem:[%s2154_s18 + $0x290] sm:$0xff] %v1152_v63 }
 0x17a   : > { %1155 = vst [vmem:[%s2154_s18 + $0x2a0] sm:$0xff] %v1154_v1  ;;  %1157 = vst [vmem:[%s2154_s18 + $0x2b0] sm:$0xff] %v1156_v3 }
 0x17b   : > { %1159 = vst [vmem:[%s2154_s18 + $0x2c0] sm:$0xff] %v1158_v5  ;;  %1161 = vst [vmem:[%s2154_s18 + $0x2d0] sm:$0xff] %v1160_v16 }
 0x17c   : > { %1163 = vst [vmem:[%s2154_s18 + $0x2e0] sm:$0xff] %v1162_v10  ;;  %1165 = vst [vmem:[%s2154_s18 + $0x2f0] sm:$0xff] %v1164_v18 }
 0x17d   : > { %1167 = vst [vmem:[%s2154_s18 + $0x300] sm:$0xff] %v1166_v44 }
 0x17e PF: > { %p10_p11 = scmp.ge.s32.totalorder %s1347_s16, 4   ;;  %s2278_s12 = smov %s1302_s13 }
 0x17f   : > { %s2279_s13 = smov %s1357_s19  ;;  %s2280_s14 = smov %s1347_s16 }
 0x180   :  { %12 = sbr.rel (!%p10_p11) target bundleno = 2 (0x2), region = 149 }

// kernel: squeeze.16
= control target key start
LH: loop header
LB: loop body
LE: loop exit
PB: predicated region body
PF: predicated region fallthrough
CT: control target
= control target key end

     0   :  { %s464_s0 = inlined_call_operand.vmem [shape: f32[98,256], index: 0, kind: input, shape index: {}]   ;;  %s465_s1 = inlined_call_operand.vmem [shape: f32[2,7,7,256], index: 1, kind: output, shape index: {}]  }
   0x1   :  { %v2_v0 = vld [vmem:[%s464_s0] sm:$0xff]   ;;  %v153_v1 = vld [vmem:[%s464_s0 + $0x8] sm:$0xff]   ;;  %v156_v2 = vld [vmem:[%s464_s0 + $0x10] sm:$0xff]  }
   0x2   :  { %3 = vst [vmem:[%s465_s1] sm:$0x7f] %v2_v0   ;;  %152 = vst [vmem:[%s465_s1 + $0x9] sm:$0x80] %v2_v0   ;;  %v159_v3 = vld [vmem:[%s464_s0 + $0x18] sm:$0xff]   ;;  %v162_v4 = vld [vmem:[%s464_s0 + $0x20] sm:$0xff]  }
   0x3   :  { %154 = vst [vmem:[%s465_s1 + $0x8] sm:$0x7f] %v153_v1   ;;  %155 = vst [vmem:[%s465_s1 + $0x11] sm:$0x80] %v153_v1   ;;  %v165_v5 = vld [vmem:[%s464_s0 + $0x28] sm:$0xff]   ;;  %v168_v6 = vld [vmem:[%s464_s0 + $0x30] sm:$0xff]  }
   0x4   :  { %157 = vst [vmem:[%s465_s1 + $0x11] sm:$0x3f] %v156_v2   ;;  %158 = vst [vmem:[%s465_s1 + $0x1a] sm:$0xc0] %v156_v2   ;;  %v171_v7 = vld [vmem:[%s464_s0 + $0x38] sm:$0xff]   ;;  %v174_v8 = vld [vmem:[%s464_s0 + $0x40] sm:$0xff]  }
   0x5   :  { %160 = vst [vmem:[%s465_s1 + $0x19] sm:$0x3f] %v159_v3   ;;  %161 = vst [vmem:[%s465_s1 + $0x22] sm:$0xc0] %v159_v3   ;;  %v177_v9 = vld [vmem:[%s464_s0 + $0x48] sm:$0xff]   ;;  %v180_v10 = vld [vmem:[%s464_s0 + $0x50] sm:$0xff]  }
   0x6   :  { %163 = vst [vmem:[%s465_s1 + $0x22] sm:$0x1f] %v162_v4   ;;  %164 = vst [vmem:[%s465_s1 + $0x2b] sm:$0xe0] %v162_v4   ;;  %v183_v11 = vld [vmem:[%s464_s0 + $0x58] sm:$0xff]   ;;  %v186_v12 = vld [vmem:[%s464_s0 + $0x60] sm:$0xff]  }
   0x7   :  { %166 = vst [vmem:[%s465_s1 + $0x2a] sm:$0x1f] %v165_v5   ;;  %167 = vst [vmem:[%s465_s1 + $0x33] sm:$0xe0] %v165_v5   ;;  %v189_v13 = vld [vmem:[%s464_s0 + $0x68] sm:$0xff]   ;;  %v192_v14 = vld [vmem:[%s464_s0 + $0x70] sm:$0xff]  }
   0x8   :  { %169 = vst [vmem:[%s465_s1 + $0x33] sm:$0xf] %v168_v6   ;;  %170 = vst [vmem:[%s465_s1 + $0x3c] sm:$0xf0] %v168_v6   ;;  %v195_v15 = vld [vmem:[%s464_s0 + $0x78] sm:$0xff]   ;;  %v198_v16 = vld [vmem:[%s464_s0 + $0x80] sm:$0xff]  }
   0x9   :  { %172 = vst [vmem:[%s465_s1 + $0x3b] sm:$0xf] %v171_v7   ;;  %173 = vst [vmem:[%s465_s1 + $0x44] sm:$0xf0] %v171_v7   ;;  %v201_v17 = vld [vmem:[%s464_s0 + $0x88] sm:$0xff]   ;;  %v204_v18 = vld [vmem:[%s464_s0 + $0x90] sm:$0xff]  }
   0xa   :  { %175 = vst [vmem:[%s465_s1 + $0x44] sm:$0x7] %v174_v8   ;;  %176 = vst [vmem:[%s465_s1 + $0x4d] sm:$0xf8] %v174_v8   ;;  %v207_v19 = vld [vmem:[%s464_s0 + $0x98] sm:$0xff]   ;;  %v210_v20 = vld [vmem:[%s464_s0 + $0xa0] sm:$0xff]  }
   0xb   :  { %178 = vst [vmem:[%s465_s1 + $0x4c] sm:$0x7] %v177_v9   ;;  %179 = vst [vmem:[%s465_s1 + $0x55] sm:$0xf8] %v177_v9   ;;  %v213_v21 = vld [vmem:[%s464_s0 + $0xa8] sm:$0xff]   ;;  %v216_v22 = vld [vmem:[%s464_s0 + $0xb0] sm:$0xff]  }
   0xc   :  { %181 = vst [vmem:[%s465_s1 + $0x55] sm:$0x3] %v180_v10   ;;  %182 = vst [vmem:[%s465_s1 + $0x5e] sm:$0xfc] %v180_v10   ;;  %v219_v23 = vld [vmem:[%s464_s0 + $0xb8] sm:$0xff]  }
   0xd   :  { %184 = vst [vmem:[%s465_s1 + $0x5d] sm:$0x3] %v183_v11   ;;  %185 = vst [vmem:[%s465_s1 + $0x66] sm:$0xfc] %v183_v11   ;;  %v222_v24 = vld [vmem:[%s464_s0 + $0xc0] sm:$0x3]  }
   0xe   :  { %187 = vst [vmem:[%s465_s1 + $0x66] ss:$10 sm:$0x3] %v186_v12   ;;  %188 = vst [vmem:[%s465_s1 + $0x6f] sm:$0xfc] %v186_v12  }
   0xf   :  { %190 = vst [vmem:[%s465_s1 + $0x6e] ss:$10 sm:$0x3] %v189_v13   ;;  %191 = vst [vmem:[%s465_s1 + $0x77] sm:$0xfc] %v189_v13  }
  0x10   :  { %193 = vst [vmem:[%s465_s1 + $0x80] sm:$0x7f] %v192_v14   ;;  %194 = vst [vmem:[%s465_s1 + $0x89] sm:$0x80] %v192_v14   ;;  %v224_v25 = vld [vmem:[%s464_s0 + $0xc8] sm:$0x3]  }
  0x11   :  { %196 = vst [vmem:[%s465_s1 + $0x88] sm:$0x7f] %v195_v15   ;;  %197 = vst [vmem:[%s465_s1 + $0x91] sm:$0x80] %v195_v15  }
  0x12   :  { %199 = vst [vmem:[%s465_s1 + $0x91] sm:$0x3f] %v198_v16   ;;  %200 = vst [vmem:[%s465_s1 + $0x9a] sm:$0xc0] %v198_v16  }
  0x13   :  { %202 = vst [vmem:[%s465_s1 + $0x99] sm:$0x3f] %v201_v17   ;;  %203 = vst [vmem:[%s465_s1 + $0xa2] sm:$0xc0] %v201_v17  }
  0x14   :  { %205 = vst [vmem:[%s465_s1 + $0xa2] sm:$0x1f] %v204_v18   ;;  %206 = vst [vmem:[%s465_s1 + $0xab] sm:$0xe0] %v204_v18  }
  0x15   :  { %208 = vst [vmem:[%s465_s1 + $0xaa] sm:$0x1f] %v207_v19   ;;  %209 = vst [vmem:[%s465_s1 + $0xb3] sm:$0xe0] %v207_v19  }
  0x16   :  { %211 = vst [vmem:[%s465_s1 + $0xb3] sm:$0xf] %v210_v20   ;;  %212 = vst [vmem:[%s465_s1 + $0xbc] sm:$0xf0] %v210_v20  }
  0x17   :  { %214 = vst [vmem:[%s465_s1 + $0xbb] sm:$0xf] %v213_v21   ;;  %215 = vst [vmem:[%s465_s1 + $0xc4] sm:$0xf0] %v213_v21  }
  0x18   :  { %217 = vst [vmem:[%s465_s1 + $0xc4] sm:$0x7] %v216_v22   ;;  %218 = vst [vmem:[%s465_s1 + $0xcd] sm:$0xf8] %v216_v22  }
  0x19   :  { %220 = vst [vmem:[%s465_s1 + $0xcc] sm:$0x7] %v219_v23   ;;  %221 = vst [vmem:[%s465_s1 + $0xd5] sm:$0xf8] %v219_v23  }
  0x1a   :  { %223 = vst [vmem:[%s465_s1 + $0xd5] sm:$0x3] %v222_v24   ;;  %225 = vst [vmem:[%s465_s1 + $0xdd] sm:$0x3] %v224_v25  }

// kernel: generator_28_forward.13
= control target key start
LH: loop header
LB: loop body
LE: loop exit
PB: predicated region body
PF: predicated region fallthrough
CT: control target
= control target key end

     0   :  { %s2482_s12 = smov 0   ;;  %s2484_s13 = smov 0   ;;  %s2990_s0 = inlined_call_operand.vmem [shape: bf16[4,8,1024], index: 0, kind: input, shape index: {}]   ;;  %s2991_s1 = inlined_call_operand.vmem [shape: bf16[4,1024,512], index: 1, kind: input, shape index: {}]   ;;  %s2992_s2 = inlined_call_operand.vmem [shape: f32[8,1], index: 2, kind: input, shape index: {}]   ;;  %s2993_s3 = inlined_call_operand.vmem [shape: f32[4,8,512], index: 3, kind: output, shape index: {}]  }
   0x1   :  { %s2486_s14 = smov 0   ;;  %s2488_s15 = smov 0  }
   0x2   :  { %s2490_s16 = smov 0   ;;  %s2492_s17 = smov 0  }
   0x3   :  { %s2494_s18 = smov 0  }
   0x4 LB: > { %s31_s19 = sadd.s32 1, %s2451_s16  ;;  %s39_s20 = sadd.s32 1, %s2455_s17  ;;  %s2459_s18 = sphi %s2494_s18, %s13_s18   ;;  %s2455_s17 = sphi %s2492_s17, %s2999_s17   ;;  %s2451_s16 = sphi %s2490_s16, %s2998_s16   ;;  %s2447_s15 = sphi %s2488_s15, %s2997_s15   ;;  %s2443_s14 = sphi %s2486_s14, %s2996_s14   ;;  %s2439_s13 = sphi %s2484_s13, %s2995_s13   ;;  %s2435_s12 = sphi %s2482_s12, %s2994_s12  }
   0x5   : > { %p33_p0 = scmp.ge.s32.totalorder %s31_s19, 2  ;;  %p87_p1 = scmp.ne.s32.totalorder %s2439_s13, %s2435_s12 }
   0x6   : > { %p88_p2 = scmp.eq.s32.totalorder %s2459_s18, 0  ;;  %s80_s24 = sadd.s32 1, %s2439_s13 }
   0x7   : > { %s3001_s19 = smov (%p33_p0, %s31_s19), 0  ;;  %s3003_s20 = smov (!%p33_p0, %s39_s20), %s2455_s17 }
   0x8   : > { %p89_p3 = por %p88_p2, %p87_p1  ;;  %p41_p4 = scmp.ge.s32.totalorder %s3003_s20, 4 }
   0x9   : > { %s76_s21 = ssub.s32 %s2451_s16, %s3001_s19  ;;  %p1992_p6 = scmp.ge.s32.totalorder %s2459_s18, 8 }
   0xa   : > { %s3005_s20 = smov (%p41_p4, %s3003_s20), 0 }
   0xb   : > { %s73_s22 = ssub.s32 %s2455_s17, %s3005_s20  ;;  %176 = sbr.rel (%p1992_p6) target bundleno = 89 (0x59), region = 20 }
   0xc   : > { %s77_s23 = sor.u32 %s76_s21, %s73_s22 }
   0xd   : > { %p78_p5 = scmp.eq.s32.totalorder %s77_s23, 0 }
   0xf   : > { %s2533_s25 = scalar_select %p78_p5, %s2439_s13, %s80_s24  }
  0x12   : > { %196 = sbr.rel (!%p89_p3) target bundleno = 89 (0x59), region = 28  ;;  %s198_s26 = sand.u32 (%p89_p3), 1, %s2439_s13  }
  0x13   : > { %s1994_s27 = sshll.u32 (%p89_p3), %s2451_s16, 1  ;;  %s1993_s28 = sshll.u32 (%p89_p3), %s198_s26, 10 }
  0x14   : > { %s1995_s29 = sshll.u32 (%p89_p3), %s2455_s17, 9  ;;  %s2547_s8 = scalar_lea.vmem (%p89_p3), [#allocation3], %s1993_s28 }
  0x15   : > { %s206_s30 = sadd.s32 (%p89_p3), %s1995_s29, %s1994_s27 }
  0x16   : > { %s1996_s4 = sshll.u32 (%p89_p3), %s206_s30, 2 }
  0x17   : > { %s2542_s7 = scalar_lea.vmem (%p89_p3), %s2991_s1, %s1996_s4 }
  0x18   : > { %v490_v0 = vld [vmem:[%s2542_s7] sm:$0xff] (%p89_p3)  ;;  %v492_v1 = vld [vmem:[%s2542_s7 + $0x10] sm:$0xff] (%p89_p3) }
  0x19   : > { %v494_v2 = vld [vmem:[%s2542_s7 + $0x20] sm:$0xff]  ;;  %491 = vst [vmem:[%s2547_s8] sm:$0xff] %v490_v0  ;;  %493 = vst [vmem:[%s2547_s8 + $0x8] sm:$0xff] %v492_v1  ;;  %v496_v3 = vld [vmem:[%s2542_s7 + $0x30] sm:$0xff] }
  0x1a   : > { %495 = vst [vmem:[%s2547_s8 + $0x10] sm:$0xff] %v494_v2  ;;  %v498_v4 = vld [vmem:[%s2542_s7 + $0x40] sm:$0xff]  ;;  %v500_v5 = vld [vmem:[%s2542_s7 + $0x50] sm:$0xff]  ;;  %497 = vst [vmem:[%s2547_s8 + $0x18] sm:$0xff] %v496_v3 }
  0x1b   : > { %499 = vst [vmem:[%s2547_s8 + $0x20] sm:$0xff] %v498_v4  ;;  %501 = vst [vmem:[%s2547_s8 + $0x28] sm:$0xff] %v500_v5  ;;  %v502_v6 = vld [vmem:[%s2542_s7 + $0x60] sm:$0xff]  ;;  %v504_v7 = vld [vmem:[%s2542_s7 + $0x70] sm:$0xff] }
  0x1c   : > { %v506_v8 = vld [vmem:[%s2542_s7 + $0x80] sm:$0xff]  ;;  %503 = vst [vmem:[%s2547_s8 + $0x30] sm:$0xff] %v502_v6  ;;  %505 = vst [vmem:[%s2547_s8 + $0x38] sm:$0xff] %v504_v7  ;;  %v508_v9 = vld [vmem:[%s2542_s7 + $0x90] sm:$0xff] }
  0x1d   : > { %507 = vst [vmem:[%s2547_s8 + $0x40] sm:$0xff] %v506_v8  ;;  %v510_v10 = vld [vmem:[%s2542_s7 + $0xa0] sm:$0xff]  ;;  %v512_v11 = vld [vmem:[%s2542_s7 + $0xb0] sm:$0xff]  ;;  %509 = vst [vmem:[%s2547_s8 + $0x48] sm:$0xff] %v508_v9 }
  0x1e   : > { %511 = vst [vmem:[%s2547_s8 + $0x50] sm:$0xff] %v510_v10  ;;  %513 = vst [vmem:[%s2547_s8 + $0x58] sm:$0xff] %v512_v11  ;;  %v514_v12 = vld [vmem:[%s2542_s7 + $0xc0] sm:$0xff]  ;;  %v516_v13 = vld [vmem:[%s2542_s7 + $0xd0] sm:$0xff] }
  0x1f   : > { %v518_v14 = vld [vmem:[%s2542_s7 + $0xe0] sm:$0xff]  ;;  %515 = vst [vmem:[%s2547_s8 + $0x60] sm:$0xff] %v514_v12  ;;  %517 = vst [vmem:[%s2547_s8 + $0x68] sm:$0xff] %v516_v13  ;;  %v520_v15 = vld [vmem:[%s2542_s7 + $0xf0] sm:$0xff] }
  0x20   : > { %519 = vst [vmem:[%s2547_s8 + $0x70] sm:$0xff] %v518_v14  ;;  %v522_v16 = vld [vmem:[%s2542_s7 + $0x100] sm:$0xff]  ;;  %v524_v17 = vld [vmem:[%s2542_s7 + $0x110] sm:$0xff]  ;;  %521 = vst [vmem:[%s2547_s8 + $0x78] sm:$0xff] %v520_v15 }
  0x21   : > { %523 = vst [vmem:[%s2547_s8 + $0x80] sm:$0xff] %v522_v16  ;;  %525 = vst [vmem:[%s2547_s8 + $0x88] sm:$0xff] %v524_v17  ;;  %v526_v18 = vld [vmem:[%s2542_s7 + $0x120] sm:$0xff]  ;;  %v528_v19 = vld [vmem:[%s2542_s7 + $0x130] sm:$0xff] }
  0x22   : > { %v530_v20 = vld [vmem:[%s2542_s7 + $0x140] sm:$0xff]  ;;  %527 = vst [vmem:[%s2547_s8 + $0x90] sm:$0xff] %v526_v18  ;;  %529 = vst [vmem:[%s2547_s8 + $0x98] sm:$0xff] %v528_v19  ;;  %v532_v21 = vld [vmem:[%s2542_s7 + $0x150] sm:$0xff] }
  0x23   : > { %531 = vst [vmem:[%s2547_s8 + $0xa0] sm:$0xff] %v530_v20  ;;  %v534_v22 = vld [vmem:[%s2542_s7 + $0x160] sm:$0xff]  ;;  %v536_v23 = vld [vmem:[%s2542_s7 + $0x170] sm:$0xff]  ;;  %533 = vst [vmem:[%s2547_s8 + $0xa8] sm:$0xff] %v532_v21 }
  0x24   : > { %535 = vst [vmem:[%s2547_s8 + $0xb0] sm:$0xff] %v534_v22  ;;  %537 = vst [vmem:[%s2547_s8 + $0xb8] sm:$0xff] %v536_v23  ;;  %v538_v24 = vld [vmem:[%s2542_s7 + $0x180] sm:$0xff]  ;;  %v540_v25 = vld [vmem:[%s2542_s7 + $0x190] sm:$0xff] }
  0x25   : > { %v542_v26 = vld [vmem:[%s2542_s7 + $0x1a0] sm:$0xff]  ;;  %539 = vst [vmem:[%s2547_s8 + $0xc0] sm:$0xff] %v538_v24  ;;  %541 = vst [vmem:[%s2547_s8 + $0xc8] sm:$0xff] %v540_v25  ;;  %v544_v27 = vld [vmem:[%s2542_s7 + $0x1b0] sm:$0xff] }
  0x26   : > { %543 = vst [vmem:[%s2547_s8 + $0xd0] sm:$0xff] %v542_v26  ;;  %v546_v28 = vld [vmem:[%s2542_s7 + $0x1c0] sm:$0xff]  ;;  %v548_v29 = vld [vmem:[%s2542_s7 + $0x1d0] sm:$0xff]  ;;  %545 = vst [vmem:[%s2547_s8 + $0xd8] sm:$0xff] %v544_v27 }
  0x27   : > { %547 = vst [vmem:[%s2547_s8 + $0xe0] sm:$0xff] %v546_v28  ;;  %549 = vst [vmem:[%s2547_s8 + $0xe8] sm:$0xff] %v548_v29  ;;  %v550_v30 = vld [vmem:[%s2542_s7 + $0x1e0] sm:$0xff]  ;;  %v552_v31 = vld [vmem:[%s2542_s7 + $0x1f0] sm:$0xff] }
  0x28   : > { %v554_v32 = vld [vmem:[%s2542_s7 + $0x200] sm:$0xff]  ;;  %551 = vst [vmem:[%s2547_s8 + $0xf0] sm:$0xff] %v550_v30  ;;  %553 = vst [vmem:[%s2547_s8 + $0xf8] sm:$0xff] %v552_v31  ;;  %v556_v33 = vld [vmem:[%s2542_s7 + $0x210] sm:$0xff] }
  0x29   : > { %555 = vst [vmem:[%s2547_s8 + $0x100] sm:$0xff] %v554_v32  ;;  %v558_v34 = vld [vmem:[%s2542_s7 + $0x220] sm:$0xff]  ;;  %v560_v35 = vld [vmem:[%s2542_s7 + $0x230] sm:$0xff]  ;;  %557 = vst [vmem:[%s2547_s8 + $0x108] sm:$0xff] %v556_v33 }
  0x2a   : > { %559 = vst [vmem:[%s2547_s8 + $0x110] sm:$0xff] %v558_v34  ;;  %561 = vst [vmem:[%s2547_s8 + $0x118] sm:$0xff] %v560_v35  ;;  %v562_v36 = vld [vmem:[%s2542_s7 + $0x240] sm:$0xff]  ;;  %v564_v37 = vld [vmem:[%s2542_s7 + $0x250] sm:$0xff] }
  0x2b   : > { %v566_v38 = vld [vmem:[%s2542_s7 + $0x260] sm:$0xff]  ;;  %563 = vst [vmem:[%s2547_s8 + $0x120] sm:$0xff] %v562_v36  ;;  %565 = vst [vmem:[%s2547_s8 + $0x128] sm:$0xff] %v564_v37  ;;  %v568_v39 = vld [vmem:[%s2542_s7 + $0x270] sm:$0xff] }
  0x2c   : > { %567 = vst [vmem:[%s2547_s8 + $0x130] sm:$0xff] %v566_v38  ;;  %v570_v40 = vld [vmem:[%s2542_s7 + $0x280] sm:$0xff]  ;;  %v572_v41 = vld [vmem:[%s2542_s7 + $0x290] sm:$0xff]  ;;  %569 = vst [vmem:[%s2547_s8 + $0x138] sm:$0xff] %v568_v39 }
  0x2d   : > { %571 = vst [vmem:[%s2547_s8 + $0x140] sm:$0xff] %v570_v40  ;;  %573 = vst [vmem:[%s2547_s8 + $0x148] sm:$0xff] %v572_v41  ;;  %v574_v42 = vld [vmem:[%s2542_s7 + $0x2a0] sm:$0xff]  ;;  %v576_v43 = vld [vmem:[%s2542_s7 + $0x2b0] sm:$0xff] }
  0x2e   : > { %v578_v44 = vld [vmem:[%s2542_s7 + $0x2c0] sm:$0xff]  ;;  %575 = vst [vmem:[%s2547_s8 + $0x150] sm:$0xff] %v574_v42  ;;  %577 = vst [vmem:[%s2547_s8 + $0x158] sm:$0xff] %v576_v43  ;;  %v580_v45 = vld [vmem:[%s2542_s7 + $0x2d0] sm:$0xff] }
  0x2f   : > { %579 = vst [vmem:[%s2547_s8 + $0x160] sm:$0xff] %v578_v44  ;;  %v582_v46 = vld [vmem:[%s2542_s7 + $0x2e0] sm:$0xff]  ;;  %v584_v47 = vld [vmem:[%s2542_s7 + $0x2f0] sm:$0xff]  ;;  %581 = vst [vmem:[%s2547_s8 + $0x168] sm:$0xff] %v580_v45 }
  0x30   : > { %583 = vst [vmem:[%s2547_s8 + $0x170] sm:$0xff] %v582_v46  ;;  %585 = vst [vmem:[%s2547_s8 + $0x178] sm:$0xff] %v584_v47  ;;  %v586_v48 = vld [vmem:[%s2542_s7 + $0x300] sm:$0xff]  ;;  %v588_v49 = vld [vmem:[%s2542_s7 + $0x310] sm:$0xff] }
  0x31   : > { %v590_v50 = vld [vmem:[%s2542_s7 + $0x320] sm:$0xff]  ;;  %587 = vst [vmem:[%s2547_s8 + $0x180] sm:$0xff] %v586_v48  ;;  %589 = vst [vmem:[%s2547_s8 + $0x188] sm:$0xff] %v588_v49  ;;  %v592_v51 = vld [vmem:[%s2542_s7 + $0x330] sm:$0xff] }
  0x32   : > { %591 = vst [vmem:[%s2547_s8 + $0x190] sm:$0xff] %v590_v50  ;;  %v594_v52 = vld [vmem:[%s2542_s7 + $0x340] sm:$0xff]  ;;  %v596_v53 = vld [vmem:[%s2542_s7 + $0x350] sm:$0xff]  ;;  %593 = vst [vmem:[%s2547_s8 + $0x198] sm:$0xff] %v592_v51 }
  0x33   : > { %595 = vst [vmem:[%s2547_s8 + $0x1a0] sm:$0xff] %v594_v52  ;;  %597 = vst [vmem:[%s2547_s8 + $0x1a8] sm:$0xff] %v596_v53  ;;  %v598_v54 = vld [vmem:[%s2542_s7 + $0x360] sm:$0xff]  ;;  %v600_v55 = vld [vmem:[%s2542_s7 + $0x370] sm:$0xff] }
  0x34   : > { %v602_v56 = vld [vmem:[%s2542_s7 + $0x380] sm:$0xff]  ;;  %599 = vst [vmem:[%s2547_s8 + $0x1b0] sm:$0xff] %v598_v54  ;;  %601 = vst [vmem:[%s2547_s8 + $0x1b8] sm:$0xff] %v600_v55  ;;  %v604_v57 = vld [vmem:[%s2542_s7 + $0x390] sm:$0xff] }
  0x35   : > { %603 = vst [vmem:[%s2547_s8 + $0x1c0] sm:$0xff] %v602_v56  ;;  %v606_v58 = vld [vmem:[%s2542_s7 + $0x3a0] sm:$0xff]  ;;  %v608_v59 = vld [vmem:[%s2542_s7 + $0x3b0] sm:$0xff]  ;;  %605 = vst [vmem:[%s2547_s8 + $0x1c8] sm:$0xff] %v604_v57 }
  0x36   : > { %607 = vst [vmem:[%s2547_s8 + $0x1d0] sm:$0xff] %v606_v58  ;;  %609 = vst [vmem:[%s2547_s8 + $0x1d8] sm:$0xff] %v608_v59  ;;  %v610_v60 = vld [vmem:[%s2542_s7 + $0x3c0] sm:$0xff]  ;;  %v612_v61 = vld [vmem:[%s2542_s7 + $0x3d0] sm:$0xff] }
  0x37   : > { %v614_v62 = vld [vmem:[%s2542_s7 + $0x3e0] sm:$0xff]  ;;  %611 = vst [vmem:[%s2547_s8 + $0x1e0] sm:$0xff] %v610_v60  ;;  %613 = vst [vmem:[%s2547_s8 + $0x1e8] sm:$0xff] %v612_v61  ;;  %v616_v63 = vld [vmem:[%s2542_s7 + $0x3f0] sm:$0xff] }
  0x38   : > { %615 = vst [vmem:[%s2547_s8 + $0x1f0] sm:$0xff] %v614_v62  ;;  %v618_v0 = vld [vmem:[%s2542_s7 + $0x400] sm:$0xff]  ;;  %v620_v1 = vld [vmem:[%s2542_s7 + $0x410] sm:$0xff]  ;;  %617 = vst [vmem:[%s2547_s8 + $0x1f8] sm:$0xff] %v616_v63 }
  0x39   : > { %619 = vst [vmem:[%s2547_s8 + $0x200] sm:$0xff] %v618_v0  ;;  %621 = vst [vmem:[%s2547_s8 + $0x208] sm:$0xff] %v620_v1  ;;  %v622_v2 = vld [vmem:[%s2542_s7 + $0x420] sm:$0xff]  ;;  %v624_v3 = vld [vmem:[%s2542_s7 + $0x430] sm:$0xff] }
  0x3a   : > { %v626_v4 = vld [vmem:[%s2542_s7 + $0x440] sm:$0xff]  ;;  %623 = vst [vmem:[%s2547_s8 + $0x210] sm:$0xff] %v622_v2  ;;  %625 = vst [vmem:[%s2547_s8 + $0x218] sm:$0xff] %v624_v3  ;;  %v628_v5 = vld [vmem:[%s2542_s7 + $0x450] sm:$0xff] }
  0x3b   : > { %627 = vst [vmem:[%s2547_s8 + $0x220] sm:$0xff] %v626_v4  ;;  %v630_v6 = vld [vmem:[%s2542_s7 + $0x460] sm:$0xff]  ;;  %v632_v7 = vld [vmem:[%s2542_s7 + $0x470] sm:$0xff]  ;;  %629 = vst [vmem:[%s2547_s8 + $0x228] sm:$0xff] %v628_v5 }
  0x3c   : > { %631 = vst [vmem:[%s2547_s8 + $0x230] sm:$0xff] %v630_v6  ;;  %633 = vst [vmem:[%s2547_s8 + $0x238] sm:$0xff] %v632_v7  ;;  %v634_v8 = vld [vmem:[%s2542_s7 + $0x480] sm:$0xff]  ;;  %v636_v9 = vld [vmem:[%s2542_s7 + $0x490] sm:$0xff] }
  0x3d   : > { %v638_v10 = vld [vmem:[%s2542_s7 + $0x4a0] sm:$0xff]  ;;  %635 = vst [vmem:[%s2547_s8 + $0x240] sm:$0xff] %v634_v8  ;;  %637 = vst [vmem:[%s2547_s8 + $0x248] sm:$0xff] %v636_v9  ;;  %v640_v11 = vld [vmem:[%s2542_s7 + $0x4b0] sm:$0xff] }
  0x3e   : > { %639 = vst [vmem:[%s2547_s8 + $0x250] sm:$0xff] %v638_v10  ;;  %v642_v12 = vld [vmem:[%s2542_s7 + $0x4c0] sm:$0xff]  ;;  %v644_v13 = vld [vmem:[%s2542_s7 + $0x4d0] sm:$0xff]  ;;  %641 = vst [vmem:[%s2547_s8 + $0x258] sm:$0xff] %v640_v11 }
  0x3f   : > { %643 = vst [vmem:[%s2547_s8 + $0x260] sm:$0xff] %v642_v12  ;;  %645 = vst [vmem:[%s2547_s8 + $0x268] sm:$0xff] %v644_v13  ;;  %v646_v14 = vld [vmem:[%s2542_s7 + $0x4e0] sm:$0xff]  ;;  %v648_v15 = vld [vmem:[%s2542_s7 + $0x4f0] sm:$0xff] }
  0x40   : > { %v650_v16 = vld [vmem:[%s2542_s7 + $0x500] sm:$0xff]  ;;  %647 = vst [vmem:[%s2547_s8 + $0x270] sm:$0xff] %v646_v14  ;;  %649 = vst [vmem:[%s2547_s8 + $0x278] sm:$0xff] %v648_v15  ;;  %v652_v17 = vld [vmem:[%s2542_s7 + $0x510] sm:$0xff] }
  0x41   : > { %651 = vst [vmem:[%s2547_s8 + $0x280] sm:$0xff] %v650_v16  ;;  %v654_v18 = vld [vmem:[%s2542_s7 + $0x520] sm:$0xff]  ;;  %v656_v19 = vld [vmem:[%s2542_s7 + $0x530] sm:$0xff]  ;;  %653 = vst [vmem:[%s2547_s8 + $0x288] sm:$0xff] %v652_v17 }
  0x42   : > { %655 = vst [vmem:[%s2547_s8 + $0x290] sm:$0xff] %v654_v18  ;;  %657 = vst [vmem:[%s2547_s8 + $0x298] sm:$0xff] %v656_v19  ;;  %v658_v20 = vld [vmem:[%s2542_s7 + $0x540] sm:$0xff]  ;;  %v660_v21 = vld [vmem:[%s2542_s7 + $0x550] sm:$0xff] }
  0x43   : > { %v662_v22 = vld [vmem:[%s2542_s7 + $0x560] sm:$0xff]  ;;  %659 = vst [vmem:[%s2547_s8 + $0x2a0] sm:$0xff] %v658_v20  ;;  %661 = vst [vmem:[%s2547_s8 + $0x2a8] sm:$0xff] %v660_v21  ;;  %v664_v23 = vld [vmem:[%s2542_s7 + $0x570] sm:$0xff] }
  0x44   : > { %663 = vst [vmem:[%s2547_s8 + $0x2b0] sm:$0xff] %v662_v22  ;;  %v666_v24 = vld [vmem:[%s2542_s7 + $0x580] sm:$0xff]  ;;  %v668_v25 = vld [vmem:[%s2542_s7 + $0x590] sm:$0xff]  ;;  %665 = vst [vmem:[%s2547_s8 + $0x2b8] sm:$0xff] %v664_v23 }
  0x45   : > { %667 = vst [vmem:[%s2547_s8 + $0x2c0] sm:$0xff] %v666_v24  ;;  %669 = vst [vmem:[%s2547_s8 + $0x2c8] sm:$0xff] %v668_v25  ;;  %v670_v26 = vld [vmem:[%s2542_s7 + $0x5a0] sm:$0xff]  ;;  %v672_v27 = vld [vmem:[%s2542_s7 + $0x5b0] sm:$0xff] }
  0x46   : > { %v674_v28 = vld [vmem:[%s2542_s7 + $0x5c0] sm:$0xff]  ;;  %671 = vst [vmem:[%s2547_s8 + $0x2d0] sm:$0xff] %v670_v26  ;;  %673 = vst [vmem:[%s2547_s8 + $0x2d8] sm:$0xff] %v672_v27  ;;  %v676_v29 = vld [vmem:[%s2542_s7 + $0x5d0] sm:$0xff] }
  0x47   : > { %675 = vst [vmem:[%s2547_s8 + $0x2e0] sm:$0xff] %v674_v28  ;;  %v678_v30 = vld [vmem:[%s2542_s7 + $0x5e0] sm:$0xff]  ;;  %v680_v31 = vld [vmem:[%s2542_s7 + $0x5f0] sm:$0xff]  ;;  %677 = vst [vmem:[%s2547_s8 + $0x2e8] sm:$0xff] %v676_v29 }
  0x48   : > { %679 = vst [vmem:[%s2547_s8 + $0x2f0] sm:$0xff] %v678_v30  ;;  %681 = vst [vmem:[%s2547_s8 + $0x2f8] sm:$0xff] %v680_v31  ;;  %v682_v32 = vld [vmem:[%s2542_s7 + $0x600] sm:$0xff]  ;;  %v684_v33 = vld [vmem:[%s2542_s7 + $0x610] sm:$0xff] }
  0x49   : > { %v686_v34 = vld [vmem:[%s2542_s7 + $0x620] sm:$0xff]  ;;  %683 = vst [vmem:[%s2547_s8 + $0x300] sm:$0xff] %v682_v32  ;;  %685 = vst [vmem:[%s2547_s8 + $0x308] sm:$0xff] %v684_v33  ;;  %v688_v35 = vld [vmem:[%s2542_s7 + $0x630] sm:$0xff] }
  0x4a   : > { %687 = vst [vmem:[%s2547_s8 + $0x310] sm:$0xff] %v686_v34  ;;  %v690_v36 = vld [vmem:[%s2542_s7 + $0x640] sm:$0xff]  ;;  %v692_v37 = vld [vmem:[%s2542_s7 + $0x650] sm:$0xff]  ;;  %689 = vst [vmem:[%s2547_s8 + $0x318] sm:$0xff] %v688_v35 }
  0x4b   : > { %691 = vst [vmem:[%s2547_s8 + $0x320] sm:$0xff] %v690_v36  ;;  %693 = vst [vmem:[%s2547_s8 + $0x328] sm:$0xff] %v692_v37  ;;  %v694_v38 = vld [vmem:[%s2542_s7 + $0x660] sm:$0xff]  ;;  %v696_v39 = vld [vmem:[%s2542_s7 + $0x670] sm:$0xff] }
  0x4c   : > { %v698_v40 = vld [vmem:[%s2542_s7 + $0x680] sm:$0xff]  ;;  %695 = vst [vmem:[%s2547_s8 + $0x330] sm:$0xff] %v694_v38  ;;  %697 = vst [vmem:[%s2547_s8 + $0x338] sm:$0xff] %v696_v39  ;;  %v700_v41 = vld [vmem:[%s2542_s7 + $0x690] sm:$0xff] }
  0x4d   : > { %699 = vst [vmem:[%s2547_s8 + $0x340] sm:$0xff] %v698_v40  ;;  %v702_v42 = vld [vmem:[%s2542_s7 + $0x6a0] sm:$0xff]  ;;  %v704_v43 = vld [vmem:[%s2542_s7 + $0x6b0] sm:$0xff]  ;;  %701 = vst [vmem:[%s2547_s8 + $0x348] sm:$0xff] %v700_v41 }
  0x4e   : > { %703 = vst [vmem:[%s2547_s8 + $0x350] sm:$0xff] %v702_v42  ;;  %705 = vst [vmem:[%s2547_s8 + $0x358] sm:$0xff] %v704_v43  ;;  %v706_v44 = vld [vmem:[%s2542_s7 + $0x6c0] sm:$0xff]  ;;  %v708_v45 = vld [vmem:[%s2542_s7 + $0x6d0] sm:$0xff] }
  0x4f   : > { %v710_v46 = vld [vmem:[%s2542_s7 + $0x6e0] sm:$0xff]  ;;  %707 = vst [vmem:[%s2547_s8 + $0x360] sm:$0xff] %v706_v44  ;;  %709 = vst [vmem:[%s2547_s8 + $0x368] sm:$0xff] %v708_v45  ;;  %v712_v47 = vld [vmem:[%s2542_s7 + $0x6f0] sm:$0xff] }
  0x50   : > { %711 = vst [vmem:[%s2547_s8 + $0x370] sm:$0xff] %v710_v46  ;;  %v714_v48 = vld [vmem:[%s2542_s7 + $0x700] sm:$0xff]  ;;  %v716_v49 = vld [vmem:[%s2542_s7 + $0x710] sm:$0xff]  ;;  %713 = vst [vmem:[%s2547_s8 + $0x378] sm:$0xff] %v712_v47 }
  0x51   : > { %715 = vst [vmem:[%s2547_s8 + $0x380] sm:$0xff] %v714_v48  ;;  %717 = vst [vmem:[%s2547_s8 + $0x388] sm:$0xff] %v716_v49  ;;  %v718_v50 = vld [vmem:[%s2542_s7 + $0x720] sm:$0xff]  ;;  %v720_v51 = vld [vmem:[%s2542_s7 + $0x730] sm:$0xff] }
  0x52   : > { %v722_v52 = vld [vmem:[%s2542_s7 + $0x740] sm:$0xff]  ;;  %719 = vst [vmem:[%s2547_s8 + $0x390] sm:$0xff] %v718_v50  ;;  %721 = vst [vmem:[%s2547_s8 + $0x398] sm:$0xff] %v720_v51  ;;  %v724_v53 = vld [vmem:[%s2542_s7 + $0x750] sm:$0xff] }
  0x53   : > { %723 = vst [vmem:[%s2547_s8 + $0x3a0] sm:$0xff] %v722_v52  ;;  %v726_v54 = vld [vmem:[%s2542_s7 + $0x760] sm:$0xff]  ;;  %v728_v55 = vld [vmem:[%s2542_s7 + $0x770] sm:$0xff]  ;;  %725 = vst [vmem:[%s2547_s8 + $0x3a8] sm:$0xff] %v724_v53 }
  0x54   : > { %727 = vst [vmem:[%s2547_s8 + $0x3b0] sm:$0xff] %v726_v54  ;;  %729 = vst [vmem:[%s2547_s8 + $0x3b8] sm:$0xff] %v728_v55  ;;  %v730_v56 = vld [vmem:[%s2542_s7 + $0x780] sm:$0xff]  ;;  %v732_v57 = vld [vmem:[%s2542_s7 + $0x790] sm:$0xff] }
  0x55   : > { %v734_v58 = vld [vmem:[%s2542_s7 + $0x7a0] sm:$0xff]  ;;  %731 = vst [vmem:[%s2547_s8 + $0x3c0] sm:$0xff] %v730_v56  ;;  %733 = vst [vmem:[%s2547_s8 + $0x3c8] sm:$0xff] %v732_v57  ;;  %v736_v59 = vld [vmem:[%s2542_s7 + $0x7b0] sm:$0xff] }
  0x56   : > { %735 = vst [vmem:[%s2547_s8 + $0x3d0] sm:$0xff] %v734_v58  ;;  %v738_v60 = vld [vmem:[%s2542_s7 + $0x7c0] sm:$0xff]  ;;  %v740_v61 = vld [vmem:[%s2542_s7 + $0x7d0] sm:$0xff]  ;;  %737 = vst [vmem:[%s2547_s8 + $0x3d8] sm:$0xff] %v736_v59 }
  0x57   : > { %739 = vst [vmem:[%s2547_s8 + $0x3e0] sm:$0xff] %v738_v60  ;;  %741 = vst [vmem:[%s2547_s8 + $0x3e8] sm:$0xff] %v740_v61  ;;  %v742_v62 = vld [vmem:[%s2542_s7 + $0x7e0] sm:$0xff]  ;;  %v744_v63 = vld [vmem:[%s2542_s7 + $0x7f0] sm:$0xff] }
  0x58   : > { %743 = vst [vmem:[%s2547_s8 + $0x3f0] sm:$0xff] %v742_v62  ;;  %745 = vst [vmem:[%s2547_s8 + $0x3f8] sm:$0xff] %v744_v63 }
  0x59 PF: > { %p1997_p7 = scmp.ge.s32.totalorder %s2459_s18, 1  ;;  %p750_p8 = scmp.lt.s32.totalorder %s2459_s18, 9 }
  0x5b   : > { %p751_p9 = pnand %p1997_p7, %p750_p8 }
  0x5c   : > { %s757_s9 = sand.u32 (!%p751_p9), 1, %s2435_s12   ;;  %v2461_v8 = vmov (!%p751_p9), 0   ;;  %p806_p10 = scmp.lt.s32.totalorder (!%p751_p9), %s2447_s15, 3 }
  0x5d   : > { %754 = sbr.rel (%p751_p9) target bundleno = 455 (0x1c7), region = 66  ;;  %s1998_s10 = sshll.u32 (!%p751_p9), %s757_s9, 10  ;;  %2200 = vset.pattern.permute.xlu0 (!%p751_p9), %v2461_v8 }
  0x5e   : > { %s2805_s11 = scalar_lea.vmem (!%p751_p9), [#allocation3], %s1998_s10  ;;  %s2001_s27 = sshll.u32 (!%p751_p9), %s2443_s14, 1 }
  0x5f   : > { %v2201_v0 = vld [vmem:[%s2805_s11 + $0x4] ss:$8 sps:$4 sm:$0xff] (!%p751_p9)   ;;  %v2205_v2 = vld [vmem:[%s2805_s11] ss:$8 sps:$4 sm:$0xff] (!%p751_p9)   ;;  %v2207_v4 = vld [vmem:[%s2805_s11 + $0x14] ss:$8 sps:$4 sm:$0xff] (!%p751_p9)  }
  0x60   : > { %v2203_v1 = vld [vmem:[%s2805_s11 + $0x104] ss:$8 sps:$4 sm:$0xff] (!%p751_p9)   ;;  %1647 = vmatprep.subr.bf16.mxu0 (!%p751_p9), %v2201_v0  ;;  %v2206_v3 = vld [vmem:[%s2805_s11 + $0x100] ss:$8 sps:$4 sm:$0xff] (!%p751_p9)   ;;  %v2209_v5 = vld [vmem:[%s2805_s11 + $0x114] ss:$8 sps:$4 sm:$0xff] (!%p751_p9)  }
  0x61   : > { %1688 = vmatprep.subr.bf16.mxu1 (!%p751_p9), %v2203_v1  ;;  %1648 = vmatpush1.bf16.msra.mxu0 (!%p751_p9), %v2205_v2  ;;  %v2211_v6 = vld [vmem:[%s2805_s11 + $0x10] ss:$8 sps:$4 sm:$0xff] (!%p751_p9)   ;;  %v2213_v9 = vld [vmem:[%s2805_s11 + $0x24] ss:$8 sps:$4 sm:$0xff] (!%p751_p9)   ;;  %v2217_v11 = vld [vmem:[%s2805_s11 + $0x20] ss:$8 sps:$4 sm:$0xff] (!%p751_p9)  }
  0x62   : > { %1689 = vmatpush1.bf16.msra.mxu1 (!%p751_p9), %v2206_v3  ;;  %1649 = vmatprep.subr.bf16.mxu0 (!%p751_p9), %v2207_v4  ;;  %v2212_v7 = vld [vmem:[%s2805_s11 + $0x110] ss:$8 sps:$4 sm:$0xff] (!%p751_p9)   ;;  %v2215_v10 = vld [vmem:[%s2805_s11 + $0x124] ss:$8 sps:$4 sm:$0xff] (!%p751_p9)   ;;  %v2218_v12 = vld [vmem:[%s2805_s11 + $0x120] ss:$8 sps:$4 sm:$0xff] (!%p751_p9)  }
  0x63   : > { %1690 = vmatprep.subr.bf16.mxu1 (!%p751_p9), %v2209_v5  ;;  %v2219_v13 = vld [vmem:[%s2805_s11 + $0x34] ss:$8 sps:$4 sm:$0xff] (!%p751_p9)   ;;  %v2223_v15 = vld [vmem:[%s2805_s11 + $0x30] ss:$8 sps:$4 sm:$0xff] (!%p751_p9)   ;;  %v2225_v17 = vld [vmem:[%s2805_s11 + $0x44] ss:$8 sps:$4 sm:$0xff] (!%p751_p9)  }
  0x64   : > { %v2221_v14 = vld [vmem:[%s2805_s11 + $0x134] ss:$8 sps:$4 sm:$0xff]   ;;  %v2224_v16 = vld [vmem:[%s2805_s11 + $0x130] ss:$8 sps:$4 sm:$0xff]   ;;  %v2227_v18 = vld [vmem:[%s2805_s11 + $0x144] ss:$8 sps:$4 sm:$0xff]  }
  0x65   : > { %1650 = vmatpush1.bf16.msra.mxu0 %v2211_v6  ;;  %v2229_v19 = vld [vmem:[%s2805_s11 + $0x40] ss:$8 sps:$4 sm:$0xff]   ;;  %v2231_v21 = vld [vmem:[%s2805_s11 + $0x54] ss:$8 sps:$4 sm:$0xff]   ;;  %v2235_v23 = vld [vmem:[%s2805_s11 + $0x50] ss:$8 sps:$4 sm:$0xff]  }
  0x66   : > { %1691 = vmatpush1.bf16.msra.mxu1 %v2212_v7  ;;  %1651 = vmatprep.subr.bf16.mxu0 %v2213_v9  ;;  %v2230_v20 = vld [vmem:[%s2805_s11 + $0x140] ss:$8 sps:$4 sm:$0xff]   ;;  %v2233_v22 = vld [vmem:[%s2805_s11 + $0x154] ss:$8 sps:$4 sm:$0xff]   ;;  %v2236_v24 = vld [vmem:[%s2805_s11 + $0x150] ss:$8 sps:$4 sm:$0xff]  }
  0x67   : > { %1692 = vmatprep.subr.bf16.mxu1 %v2215_v10  ;;  %v2237_v25 = vld [vmem:[%s2805_s11 + $0x64] ss:$8 sps:$4 sm:$0xff]   ;;  %v2241_v27 = vld [vmem:[%s2805_s11 + $0x60] ss:$8 sps:$4 sm:$0xff]   ;;  %v2243_v29 = vld [vmem:[%s2805_s11 + $0x74] ss:$8 sps:$4 sm:$0xff]  }
  0x68   : > { %v2239_v26 = vld [vmem:[%s2805_s11 + $0x164] ss:$8 sps:$4 sm:$0xff]   ;;  %v2242_v28 = vld [vmem:[%s2805_s11 + $0x160] ss:$8 sps:$4 sm:$0xff]   ;;  %v2245_v30 = vld [vmem:[%s2805_s11 + $0x174] ss:$8 sps:$4 sm:$0xff]  }
  0x69   : > { %1652 = vmatpush1.bf16.msra.mxu0 %v2217_v11  ;;  %v2247_v31 = vld [vmem:[%s2805_s11 + $0x70] ss:$8 sps:$4 sm:$0xff]   ;;  %v2249_v33 = vld [vmem:[%s2805_s11 + $0x84] ss:$8 sps:$4 sm:$0xff]   ;;  %v2253_v35 = vld [vmem:[%s2805_s11 + $0x80] ss:$8 sps:$4 sm:$0xff]  }
  0x6a   : > { %1693 = vmatpush1.bf16.msra.mxu1 %v2218_v12  ;;  %1653 = vmatprep.subr.bf16.mxu0 %v2219_v13  ;;  %v2248_v32 = vld [vmem:[%s2805_s11 + $0x170] ss:$8 sps:$4 sm:$0xff]   ;;  %v2251_v34 = vld [vmem:[%s2805_s11 + $0x184] ss:$8 sps:$4 sm:$0xff]   ;;  %v2254_v36 = vld [vmem:[%s2805_s11 + $0x180] ss:$8 sps:$4 sm:$0xff]  }
  0x6b   : > { %1694 = vmatprep.subr.bf16.mxu1 %v2221_v14  ;;  %v2255_v37 = vld [vmem:[%s2805_s11 + $0x94] ss:$8 sps:$4 sm:$0xff]   ;;  %s3007_s15 = smov (!%p806_p10, %s2447_s15), 3  ;;  %v2259_v39 = vld [vmem:[%s2805_s11 + $0x90] ss:$8 sps:$4 sm:$0xff]   ;;  %p830_p11 = scmp.lt.s32.totalorder %s2001_s27, 3 }
  0x6c   : > { %v2257_v38 = vld [vmem:[%s2805_s11 + $0x194] ss:$8 sps:$4 sm:$0xff]   ;;  %v2260_v40 = vld [vmem:[%s2805_s11 + $0x190] ss:$8 sps:$4 sm:$0xff]   ;;  %v2261_v41 = vld [vmem:[%s2805_s11 + $0xa4] ss:$8 sps:$4 sm:$0xff]  }
  0x6d   : > { %1654 = vmatpush1.bf16.msra.mxu0 %v2223_v15  ;;  %s2142_s12 = sshll.u32 %s3007_s15, 5  ;;  %v2263_v42 = vld [vmem:[%s2805_s11 + $0x1a4] ss:$8 sps:$4 sm:$0xff]   ;;  %v2265_v43 = vld [vmem:[%s2805_s11 + $0xa0] ss:$8 sps:$4 sm:$0xff]   ;;  %s3009_s27 = smov (!%p830_p11, %s2001_s27), 3 }
  0x6e   : > { %1695 = vmatpush1.bf16.msra.mxu1 %v2224_v16  ;;  %1655 = vmatprep.subr.bf16.mxu0 %v2225_v17  ;;  %v2266_v44 = vld [vmem:[%s2805_s11 + $0x1a0] ss:$8 sps:$4 sm:$0xff]   ;;  %s2859_s23 = scalar_lea.vmem %s2990_s0, %s2142_s12  ;;  %v2267_v45 = vld [vmem:[%s2805_s11 + $0xb4] ss:$8 sps:$4 sm:$0xff]   ;;  %v2271_v50 = vld [vmem:[%s2805_s11 + $0xb0] ss:$8 sps:$4 sm:$0xff]  }
  0x6f   : > { %1696 = vmatprep.subr.bf16.mxu1 %v2227_v18  ;;  %v2269_v46 = vld [vmem:[%s2805_s11 + $0x1b4] ss:$8 sps:$4 sm:$0xff]   ;;  %v847_v47 = vld [vmem:[%s2859_s23] sm:$0xff]  ;;  %v848_v49 = vld [vmem:[%s2859_s23 + $0x8] sm:$0xff]  ;;  %s2002_s28 = sshll.u32 %s3007_s15, 2 }
  0x70   : > { %v2005_v48 = vcombine.high %v847_v47, %v847_v47  ;;  %v2272_v51 = vld [vmem:[%s2805_s11 + $0x1b0] ss:$8 sps:$4 sm:$0xff]   ;;  %v2007_v52 = vcombine.high %v848_v49, %v848_v49  ;;  %v2273_v53 = vld [vmem:[%s2805_s11 + $0xc4] ss:$8 sps:$4 sm:$0xff]   ;;  %v2277_v55 = vld [vmem:[%s2805_s11 + $0xc0] ss:$8 sps:$4 sm:$0xff]   ;;  %v2004_v7 = vcombine.low %v847_v47, %v847_v47  ;;  %v2006_v8 = vcombine.low %v848_v49, %v848_v49  ;;  %s835_s14 = sadd.s32 %s2002_s28, %s3009_s27 }
  0x71   : > { %1656 = vmatpush1.bf16.msra.mxu0 %v2229_v19  ;;  %v2275_v54 = vld [vmem:[%s2805_s11 + $0x1c4] ss:$8 sps:$4 sm:$0xff]   ;;  %v2278_v56 = vld [vmem:[%s2805_s11 + $0x1c0] ss:$8 sps:$4 sm:$0xff]   ;;  %v2279_v57 = vld [vmem:[%s2805_s11 + $0xd4] ss:$8 sps:$4 sm:$0xff]  }
  0x72   : > { %1697 = vmatpush1.bf16.msra.mxu1 %v2230_v20  ;;  %1657 = vmatprep.subr.bf16.mxu0 %v2231_v21  ;;  %v2281_v58 = vld [vmem:[%s2805_s11 + $0x1d4] ss:$8 sps:$4 sm:$0xff]   ;;  %v2283_v59 = vld [vmem:[%s2805_s11 + $0xd0] ss:$8 sps:$4 sm:$0xff]   ;;  %v2285_v61 = vld [vmem:[%s2805_s11 + $0xe4] ss:$8 sps:$4 sm:$0xff]  }
  0x73   : > { %1698 = vmatprep.subr.bf16.mxu1 %v2233_v22  ;;  %1679 = vmatprep.mubr.bf16.mxu0 %v2005_v48  ;;  %v2284_v60 = vld [vmem:[%s2805_s11 + $0x1d0] ss:$8 sps:$4 sm:$0xff]   ;;  %v2287_v62 = vld [vmem:[%s2805_s11 + $0x1e4] ss:$8 sps:$4 sm:$0xff]   ;;  %v2289_v63 = vld [vmem:[%s2805_s11 + $0xe0] ss:$8 sps:$4 sm:$0xff]  }
  0x74   : > { %1720 = vmatprep.mubr.bf16.mxu1 %v2007_v52  ;;  %v2290_v0 = vld [vmem:[%s2805_s11 + $0x1e0] ss:$8 sps:$4 sm:$0xff]   ;;  %v2291_v1 = vld [vmem:[%s2805_s11 + $0xf4] ss:$8 sps:$4 sm:$0xff]   ;;  %v2295_v3 = vld [vmem:[%s2805_s11 + $0xf0] ss:$8 sps:$4 sm:$0xff]  }
  0x75   : > { %1658 = vmatpush1.bf16.msra.mxu0 %v2235_v23  ;;  %v2293_v2 = vld [vmem:[%s2805_s11 + $0x1f4] ss:$8 sps:$4 sm:$0xff]   ;;  %v2296_v4 = vld [vmem:[%s2805_s11 + $0x1f0] ss:$8 sps:$4 sm:$0xff]   ;;  %v2303_v5 = vld [vmem:[%s2805_s11 + $0x204] ss:$8 sps:$4 sm:$0xff]  }
  0x76   : > { %1699 = vmatpush1.bf16.msra.mxu1 %v2236_v24  ;;  %1659 = vmatprep.subr.bf16.mxu0 %v2237_v25  ;;  %v2306_v6 = vld [vmem:[%s2805_s11 + $0x304] ss:$8 sps:$4 sm:$0xff]   ;;  %v2301_v9 = vld [vmem:[%s2805_s11 + $0x200] ss:$8 sps:$4 sm:$0xff]   ;;  %v2309_v11 = vld [vmem:[%s2805_s11 + $0x214] ss:$8 sps:$4 sm:$0xff]  }
  0x77   : > { %1700 = vmatprep.subr.bf16.mxu1 %v2239_v26  ;;  %v2304_v10 = vld [vmem:[%s2805_s11 + $0x300] ss:$8 sps:$4 sm:$0xff]   ;;  %v2312_v12 = vld [vmem:[%s2805_s11 + $0x314] ss:$8 sps:$4 sm:$0xff]   ;;  %v2307_v13 = vld [vmem:[%s2805_s11 + $0x210] ss:$8 sps:$4 sm:$0xff]  }
  0x78   : > { %v2310_v14 = vld [vmem:[%s2805_s11 + $0x310] ss:$8 sps:$4 sm:$0xff]   ;;  %v2315_v15 = vld [vmem:[%s2805_s11 + $0x224] ss:$8 sps:$4 sm:$0xff]   ;;  %v2313_v17 = vld [vmem:[%s2805_s11 + $0x220] ss:$8 sps:$4 sm:$0xff]  }
  0x79   : > { %1660 = vmatpush1.bf16.msra.mxu0 %v2241_v27  ;;  %v2318_v16 = vld [vmem:[%s2805_s11 + $0x324] ss:$8 sps:$4 sm:$0xff]   ;;  %v2316_v18 = vld [vmem:[%s2805_s11 + $0x320] ss:$8 sps:$4 sm:$0xff]   ;;  %v2321_v19 = vld [vmem:[%s2805_s11 + $0x234] ss:$8 sps:$4 sm:$0xff]  }
  0x7a   : > { %1701 = vmatpush1.bf16.msra.mxu1 %v2242_v28  ;;  %1661 = vmatprep.subr.bf16.mxu0 %v2243_v29  ;;  %v2324_v20 = vld [vmem:[%s2805_s11 + $0x334] ss:$8 sps:$4 sm:$0xff]   ;;  %v2319_v21 = vld [vmem:[%s2805_s11 + $0x230] ss:$8 sps:$4 sm:$0xff]   ;;  %v2327_v23 = vld [vmem:[%s2805_s11 + $0x244] ss:$8 sps:$4 sm:$0xff]  }
  0x7b   : > { %1702 = vmatprep.subr.bf16.mxu1 %v2245_v30  ;;  %v2322_v22 = vld [vmem:[%s2805_s11 + $0x330] ss:$8 sps:$4 sm:$0xff]   ;;  %v2330_v24 = vld [vmem:[%s2805_s11 + $0x344] ss:$8 sps:$4 sm:$0xff]   ;;  %v2325_v25 = vld [vmem:[%s2805_s11 + $0x240] ss:$8 sps:$4 sm:$0xff]  }
  0x7c   : > { %v2328_v26 = vld [vmem:[%s2805_s11 + $0x340] ss:$8 sps:$4 sm:$0xff]   ;;  %v2333_v27 = vld [vmem:[%s2805_s11 + $0x254] ss:$8 sps:$4 sm:$0xff]   ;;  %v2331_v29 = vld [vmem:[%s2805_s11 + $0x250] ss:$8 sps:$4 sm:$0xff]  }
  0x7d   : > { %1662 = vmatpush1.bf16.msra.mxu0 %v2247_v31  ;;  %v2336_v28 = vld [vmem:[%s2805_s11 + $0x354] ss:$8 sps:$4 sm:$0xff]   ;;  %v2334_v30 = vld [vmem:[%s2805_s11 + $0x350] ss:$8 sps:$4 sm:$0xff]   ;;  %v2339_v31 = vld [vmem:[%s2805_s11 + $0x264] ss:$8 sps:$4 sm:$0xff]  }
  0x7e   : > { %1703 = vmatpush1.bf16.msra.mxu1 %v2248_v32  ;;  %1663 = vmatprep.subr.bf16.mxu0 %v2249_v33  ;;  %v2342_v32 = vld [vmem:[%s2805_s11 + $0x364] ss:$8 sps:$4 sm:$0xff]   ;;  %v2910_v33 = vld [vmem:[%s2859_s23 + $0x10] sm:$0xff]  ;;  %v2352_v47 = vld [vmem:[%s2805_s11 + $0x380] ss:$8 sps:$4 sm:$0xff]   ;;  %s2003_s29 = sshll.u32 %s835_s14, 3 }
  0x7f   : > { %1704 = vmatprep.subr.bf16.mxu1 %v2251_v34  ;;  %v2913_v34 = vld [vmem:[%s2859_s23 + $0x18] sm:$0xff]  ;;  %v2363_v52 = vld [vmem:[%s2805_s11 + $0x2a4] ss:$8 sps:$4 sm:$0xff]   ;;  %s837_s5 = scalar_lea.vmem %s2993_s3, %s2003_s29 }
  0x80   : > { %v2357_v48 = vld [vmem:[%s2805_s11 + $0x294] ss:$8 sps:$4 sm:$0xff]  }
  0x81   : > { %1664 = vmatpush1.bf16.msra.mxu0 %v2253_v35  ;;  %v1820_v35 = vld [vmem:[%s2992_s2] sm:$0xff]  ;;  %v2360_v49 = vld [vmem:[%s2805_s11 + $0x394] ss:$8 sps:$4 sm:$0xff]  }
  0x82   : > { %1705 = vmatpush1.bf16.msra.mxu1 %v2254_v36  ;;  %1665 = vmatprep.subr.bf16.mxu0 %v2255_v37  ;;  %v2009_v36 = vcombine.high %v2910_v33, %v2910_v33  ;;  %v2011_v37 = vcombine.high %v2913_v34, %v2913_v34 }
  0x83   : > { %1706 = vmatprep.subr.bf16.mxu1 %v2257_v38  ;;  %1823 = vperm.xlu0 %2200, %v1820_v35   ;;  %v2337_v38 = vld [vmem:[%s2805_s11 + $0x260] ss:$8 sps:$4 sm:$0xff]  }
  0x85   : > { %1666 = vmatpush1.bf16.msra.mxu0 %v2259_v39  ;;  %v2340_v39 = vld [vmem:[%s2805_s11 + $0x360] ss:$8 sps:$4 sm:$0xff]  }
  0x86   : > { %1707 = vmatpush1.bf16.msra.mxu1 %v2260_v40  ;;  %1667 = vmatprep.subr.bf16.mxu0 %v2261_v41  ;;  %v2345_v40 = vld [vmem:[%s2805_s11 + $0x274] ss:$8 sps:$4 sm:$0xff]  }
  0x87   : > { %1708 = vmatprep.subr.bf16.mxu1 %v2263_v42  ;;  %v2348_v41 = vld [vmem:[%s2805_s11 + $0x374] ss:$8 sps:$4 sm:$0xff]   ;;  %v2343_v42 = vld [vmem:[%s2805_s11 + $0x270] ss:$8 sps:$4 sm:$0xff]  }
  0x89   : > { %1668 = vmatpush1.bf16.msra.mxu0 %v2265_v43  ;;  %v2346_v43 = vld [vmem:[%s2805_s11 + $0x370] ss:$8 sps:$4 sm:$0xff]  }
  0x8a   : > { %1709 = vmatpush1.bf16.msra.mxu1 %v2266_v44  ;;  %1669 = vmatprep.subr.bf16.mxu0 %v2267_v45  ;;  %v2351_v44 = vld [vmem:[%s2805_s11 + $0x284] ss:$8 sps:$4 sm:$0xff]  }
  0x8b   : > { %1710 = vmatprep.subr.bf16.mxu1 %v2269_v46  ;;  %v2354_v45 = vld [vmem:[%s2805_s11 + $0x384] ss:$8 sps:$4 sm:$0xff]   ;;  %v2349_v46 = vld [vmem:[%s2805_s11 + $0x280] ss:$8 sps:$4 sm:$0xff]  }
  0x8d   : > { %1670 = vmatpush1.bf16.msra.mxu0 %v2271_v50  ;;  %v2355_v50 = vld [vmem:[%s2805_s11 + $0x290] ss:$8 sps:$4 sm:$0xff]  }
  0x8e   : > { %1711 = vmatpush1.bf16.msra.mxu1 %v2272_v51  ;;  %1671 = vmatprep.subr.bf16.mxu0 %v2273_v53  ;;  %v2358_v51 = vld [vmem:[%s2805_s11 + $0x390] ss:$8 sps:$4 sm:$0xff]   ;;  %v2366_v53 = vld [vmem:[%s2805_s11 + $0x3a4] ss:$8 sps:$4 sm:$0xff]  }
  0x8f   : > { %1712 = vmatprep.subr.bf16.mxu1 %v2275_v54  ;;  %v2361_v54 = vld [vmem:[%s2805_s11 + $0x2a0] ss:$8 sps:$4 sm:$0xff]  }
  0x91   : > { %1672 = vmatpush1.bf16.msra.mxu0 %v2277_v55  ;;  %v2364_v55 = vld [vmem:[%s2805_s11 + $0x3a0] ss:$8 sps:$4 sm:$0xff]  }
  0x92   : > { %1713 = vmatpush1.bf16.msra.mxu1 %v2278_v56  ;;  %1673 = vmatprep.subr.bf16.mxu0 %v2279_v57  ;;  %v2369_v56 = vld [vmem:[%s2805_s11 + $0x2b4] ss:$8 sps:$4 sm:$0xff]  }
  0x93   : > { %1714 = vmatprep.subr.bf16.mxu1 %v2281_v58  ;;  %v2372_v57 = vld [vmem:[%s2805_s11 + $0x3b4] ss:$8 sps:$4 sm:$0xff]   ;;  %v2367_v58 = vld [vmem:[%s2805_s11 + $0x2b0] ss:$8 sps:$4 sm:$0xff]  }
  0x95   : > { %1674 = vmatpush1.bf16.msra.mxu0 %v2283_v59  ;;  %v2370_v59 = vld [vmem:[%s2805_s11 + $0x3b0] ss:$8 sps:$4 sm:$0xff]  }
  0x96   : > { %1715 = vmatpush1.bf16.msra.mxu1 %v2284_v60  ;;  %1675 = vmatprep.subr.bf16.mxu0 %v2285_v61  ;;  %v2375_v60 = vld [vmem:[%s2805_s11 + $0x2c4] ss:$8 sps:$4 sm:$0xff]  }
  0x97   : > { %1716 = vmatprep.subr.bf16.mxu1 %v2287_v62  ;;  %v2378_v61 = vld [vmem:[%s2805_s11 + $0x3c4] ss:$8 sps:$4 sm:$0xff]   ;;  %v2373_v62 = vld [vmem:[%s2805_s11 + $0x2c0] ss:$8 sps:$4 sm:$0xff]  }
  0x99   : > { %1676 = vmatpush1.bf16.msra.mxu0 %v2289_v63  ;;  %v2376_v63 = vld [vmem:[%s2805_s11 + $0x3c0] ss:$8 sps:$4 sm:$0xff]  }
  0x9a   : > { %1717 = vmatpush1.bf16.msra.mxu1 %v2290_v0  ;;  %1677 = vmatprep.subr.bf16.mxu0 %v2291_v1  ;;  %v2381_v0 = vld [vmem:[%s2805_s11 + $0x2d4] ss:$8 sps:$4 sm:$0xff]  }
  0x9b   : > { %1718 = vmatprep.subr.bf16.mxu1 %v2293_v2  ;;  %v2384_v1 = vld [vmem:[%s2805_s11 + $0x3d4] ss:$8 sps:$4 sm:$0xff]   ;;  %v2379_v2 = vld [vmem:[%s2805_s11 + $0x2d0] ss:$8 sps:$4 sm:$0xff]  }
  0x9d   : > { %1678 = vmatpush1.bf16.msra.mxu0 %v2295_v3  ;;  %v2382_v3 = vld [vmem:[%s2805_s11 + $0x3d0] ss:$8 sps:$4 sm:$0xff]  }
  0x9e   : > { %1719 = vmatpush1.bf16.msra.mxu1 %v2296_v4  ;;  %1729 = vmatprep.subr.bf16.mxu0 %v2303_v5  ;;  %v2387_v4 = vld [vmem:[%s2805_s11 + $0x2e4] ss:$8 sps:$4 sm:$0xff]  }
  0x9f   : > { %1770 = vmatprep.subr.bf16.mxu1 %v2306_v6  ;;  %v2390_v5 = vld [vmem:[%s2805_s11 + $0x3e4] ss:$8 sps:$4 sm:$0xff]   ;;  %v2385_v6 = vld [vmem:[%s2805_s11 + $0x2e0] ss:$8 sps:$4 sm:$0xff]  }
  0xa0   : > { %1680 = vmatmul.mubr.bf16.vlgmr.msra.gmra.mrb[0].mxu0 %v2004_v7  ;;  %v2388_v7 = vld [vmem:[%s2805_s11 + $0x3e0] ss:$8 sps:$4 sm:$0xff]  }
  0xa1   : > { %1721 = vmatmul.mubr.bf16.vlgmr.msra.gmra.mrb[0].mxu1 %v2006_v8  ;;  %1730 = vmatpush1.bf16.msra.mxu0 %v2301_v9  ;;  %v2393_v8 = vld [vmem:[%s2805_s11 + $0x2f4] ss:$8 sps:$4 sm:$0xff]  }
  0xa2   : > { %1771 = vmatpush1.bf16.msra.mxu1 %v2304_v10  ;;  %1731 = vmatprep.subr.bf16.mxu0 %v2309_v11  ;;  %v2396_v9 = vld [vmem:[%s2805_s11 + $0x3f4] ss:$8 sps:$4 sm:$0xff]   ;;  %v2391_v10 = vld [vmem:[%s2805_s11 + $0x2f0] ss:$8 sps:$4 sm:$0xff]  }
  0xa3   : > { %1772 = vmatprep.subr.bf16.mxu1 %v2312_v12  ;;  %1761 = vmatprep.mubr.bf16.mxu0 %v2009_v36  ;;  %v2394_v11 = vld [vmem:[%s2805_s11 + $0x3f0] ss:$8 sps:$4 sm:$0xff]   ;;  %v2008_v12 = vcombine.low %v2910_v33, %v2910_v33 }
  0xa4   : > { %1802 = vmatprep.mubr.bf16.mxu1 %v2011_v37 }
  0xa5   : > { %1732 = vmatpush1.bf16.msra.mxu0 %v2307_v13  ;;  %v2010_v13 = vcombine.low %v2913_v34, %v2913_v34 }
  0xa6   : > { %1773 = vmatpush1.bf16.msra.mxu1 %v2310_v14  ;;  %1733 = vmatprep.subr.bf16.mxu0 %v2315_v15 }
  0xa7   : > { %1774 = vmatprep.subr.bf16.mxu1 %v2318_v16 }
  0xa9   : > { %1734 = vmatpush1.bf16.msra.mxu0 %v2313_v17 }
  0xaa   : > { %1775 = vmatpush1.bf16.msra.mxu1 %v2316_v18  ;;  %1735 = vmatprep.subr.bf16.mxu0 %v2321_v19 }
  0xab   : > { %1776 = vmatprep.subr.bf16.mxu1 %v2324_v20 }
  0xad   : > { %1736 = vmatpush1.bf16.msra.mxu0 %v2319_v21 }
  0xae   : > { %1777 = vmatpush1.bf16.msra.mxu1 %v2322_v22  ;;  %1737 = vmatprep.subr.bf16.mxu0 %v2327_v23 }
  0xaf   : > { %1778 = vmatprep.subr.bf16.mxu1 %v2330_v24 }
  0xb1   : > { %1738 = vmatpush1.bf16.msra.mxu0 %v2325_v25 }
  0xb2   : > { %1779 = vmatpush1.bf16.msra.mxu1 %v2328_v26  ;;  %1739 = vmatprep.subr.bf16.mxu0 %v2333_v27 }
  0xb3   : > { %1780 = vmatprep.subr.bf16.mxu1 %v2336_v28 }
  0xb5   : > { %1740 = vmatpush1.bf16.msra.mxu0 %v2331_v29 }
  0xb6   : > { %1781 = vmatpush1.bf16.msra.mxu1 %v2334_v30  ;;  %1741 = vmatprep.subr.bf16.mxu0 %v2339_v31 }
  0xb7   : > { %1782 = vmatprep.subr.bf16.mxu1 %v2342_v32 }
  0xb9   : > { %1742 = vmatpush1.bf16.msra.mxu0 %v2337_v38 }
  0xba   : > { %1783 = vmatpush1.bf16.msra.mxu1 %v2340_v39  ;;  %1743 = vmatprep.subr.bf16.mxu0 %v2345_v40 }
  0xbb   : > { %1784 = vmatprep.subr.bf16.mxu1 %v2348_v41 }
  0xbd   : > { %1744 = vmatpush1.bf16.msra.mxu0 %v2343_v42 }
  0xbe   : > { %1785 = vmatpush1.bf16.msra.mxu1 %v2346_v43  ;;  %1745 = vmatprep.subr.bf16.mxu0 %v2351_v44 }
  0xbf   : > { %1786 = vmatprep.subr.bf16.mxu1 %v2354_v45 }
  0xc1   : > { %1746 = vmatpush1.bf16.msra.mxu0 %v2349_v46 }
  0xc2   : > { %1787 = vmatpush1.bf16.msra.mxu1 %v2352_v47  ;;  %1747 = vmatprep.subr.bf16.mxu0 %v2357_v48 }
  0xc3   : > { %1788 = vmatprep.subr.bf16.mxu1 %v2360_v49 }
  0xc5   : > { %1748 = vmatpush1.bf16.msra.mxu0 %v2355_v50 }
  0xc6   : > { %1789 = vmatpush1.bf16.msra.mxu1 %v2358_v51  ;;  %1749 = vmatprep.subr.bf16.mxu0 %v2363_v52 }
  0xc7   : > { %1790 = vmatprep.subr.bf16.mxu1 %v2366_v53 }
  0xc9   : > { %1750 = vmatpush1.bf16.msra.mxu0 %v2361_v54 }
  0xca   : > { %1791 = vmatpush1.bf16.msra.mxu1 %v2364_v55  ;;  %1751 = vmatprep.subr.bf16.mxu0 %v2369_v56 }
  0xcb   : > { %1792 = vmatprep.subr.bf16.mxu1 %v2372_v57 }
  0xcd   : > { %1752 = vmatpush1.bf16.msra.mxu0 %v2367_v58 }
  0xce   : > { %1793 = vmatpush1.bf16.msra.mxu1 %v2370_v59  ;;  %1753 = vmatprep.subr.bf16.mxu0 %v2375_v60 }
  0xcf   : > { %1794 = vmatprep.subr.bf16.mxu1 %v2378_v61 }
  0xd1   : > { %1754 = vmatpush1.bf16.msra.mxu0 %v2373_v62 }
  0xd2   : > { %1795 = vmatpush1.bf16.msra.mxu1 %v2376_v63  ;;  %1755 = vmatprep.subr.bf16.mxu0 %v2381_v0 }
  0xd3   : > { %1796 = vmatprep.subr.bf16.mxu1 %v2384_v1 }
  0xd5   : > { %1756 = vmatpush1.bf16.msra.mxu0 %v2379_v2 }
  0xd6   : > { %1797 = vmatpush1.bf16.msra.mxu1 %v2382_v3  ;;  %1757 = vmatprep.subr.bf16.mxu0 %v2387_v4 }
  0xd7   : > { %1798 = vmatprep.subr.bf16.mxu1 %v2390_v5 }
  0xd9   : > { %1758 = vmatpush1.bf16.msra.mxu0 %v2385_v6 }
  0xda   : > { %1799 = vmatpush1.bf16.msra.mxu1 %v2388_v7  ;;  %1759 = vmatprep.subr.bf16.mxu0 %v2393_v8 }
  0xdb   : > { %1800 = vmatprep.subr.bf16.mxu1 %v2396_v9 }
  0xdd   : > { %1760 = vmatpush1.bf16.msra.mxu0 %v2391_v10 }
  0xde   : > { %1801 = vmatpush1.bf16.msra.mxu1 %v2394_v11 }
  0xe0   : > { %1762 = vmatmul.mubr.bf16.vlgmr.msra.gmra.mrb[4].mxu0 %v2008_v12 }
  0xe1   : > { %1803 = vmatmul.mubr.bf16.vlgmr.msra.gmra.mrb[4].mxu1 %v2010_v13 }
 0x102   : > { %v1824_v24 = vpop.permute.xlu0 %1823 }
 0x173   : > { %v1681_v14 = vpop.f32.mrb[0].mxu0 }
 0x174   : > { %v1722_v15 = vpop.f32.mrb[0].mxu1  ;;  %v1683_v17 = vpop.f32.mrb[1].mxu0 }
 0x175   : > { %v1723_v16 = vadd.f32 %v1722_v15, %v1681_v14  ;;  %v1724_v18 = vpop.f32.mrb[1].mxu1  ;;  %v1685_v20 = vpop.f32.mrb[2].mxu0 }
 0x176   : > { %v1725_v19 = vadd.f32 %v1724_v18, %v1683_v17  ;;  %v1726_v21 = vpop.f32.mrb[2].mxu1  ;;  %v1686_v22 = vpop.f32.mrb[3].mxu0 }
 0x177   : > { %v1727_v23 = vpop.f32.mrb[3].mxu1 }
 0x1b3   : > { %v1763_v25 = vpop.f32.mrb[4].mxu0 }
 0x1b4   : > { %v1804_v26 = vpop.f32.mrb[4].mxu1  ;;  %v1764_v27 = vadd.f32 %v1763_v25, %v1723_v16  ;;  %v1765_v28 = vpop.f32.mrb[5].mxu0 }
 0x1b5   : > { %v1806_v29 = vpop.f32.mrb[5].mxu1  ;;  %v1766_v30 = vadd.f32 %v1765_v28, %v1725_v19  ;;  %v1767_v31 = vpop.f32.mrb[6].mxu0 }
 0x1b6   : > { %v1808_v32 = vpop.f32.mrb[6].mxu1  ;;  %v1805_v33 = vadd.f32 %v1804_v26, %v1764_v27  ;;  %v1768_v34 = vpop.f32.mrb[7].mxu0 }
 0x1b7   : > { %v1809_v35 = vpop.f32.mrb[7].mxu1  ;;  %v1807_v36 = vadd.f32 %v1806_v29, %v1766_v30 }
 0x1b8   : > { %v1826_v37 = vadd.f32 %v1824_v24, %v1805_v33 }
 0x1b9   : > { %v1827_v38 = vadd.f32 %v1824_v24, %v1807_v36 }
 0x1ba   : > { %2401 = vtanh.f32 %v1826_v37 }
 0x1bb   : > { %2403 = vtanh.f32 %v1827_v38 }
 0x1c4   : > { %v2402_v39 = vpop.eup %2401 }
 0x1c5   : > { %v2404_v40 = vpop.eup %2403  ;;  %1830 = vst [vmem:[%s837_s5] sm:$0xff] %v2402_v39 }
 0x1c6   : > { %1831 = vst [vmem:[%s837_s5 + $0x8] sm:$0xff] %v2404_v40 }
 0x1c7 PF: > { %s13_s18 = sadd.s32 1, %s2459_s18   ;;  %s2994_s12 = smov %s2439_s13 }
 0x1c8   : > { %p10_p12 = scmp.ge.s32.totalorder %s13_s18, 10   ;;  %s2995_s13 = smov %s2533_s25 }
 0x1c9   : > { %s2996_s14 = smov %s2451_s16  ;;  %s2997_s15 = smov %s2455_s17 }
 0x1ca   : > { %s2998_s16 = smov %s3001_s19  ;;  %s2999_s17 = smov %s3005_s20 }
 0x1cb   :  { %12 = sbr.rel (!%p10_p12) target bundleno = 4 (0x4), region = 119 }

</bundles_post_ra>
